<compile_context>
chip_gen: v5e
topology: v5e:2x2
jax: 0.10.0
libtpu: 0.0.40
codegen_flags: <defaults>
</compile_context>

<pallas_src>
import jax
import jax.numpy as jnp
from jax import lax
from jax.experimental import pallas as pl
from jax.experimental.pallas import tpu as pltpu


# SRCNN1 architecture constants.
C_IN, C1, C2, C_OUT = 3, 64, 32, 3
K1, K3 = 9, 5
PAD = 2                       # every conv: padding=2, padding_mode='replicate'
KD1 = K1 * K1 * C_IN          # 243 = conv1 im2col depth
KD3 = K3 * K3 * C2            # 800 = conv3 im2col depth
MAX_IMGS_PER_STEP = 8         # ~1.2 MiB of in-kernel temporaries per image


def _edge_pad_hw(a, pad_h, pad_w_lo, pad_w_hi):
    """Replicate ('edge') pad a (B, H, W, C) value along H (ax 1) / W (ax 2).

    H is a non-tiled dim, so repeating the 1-wide edge slice in a concat is
    just vreg copies.  W is the sublane axis, so the edge slabs are built with
    one pad-wide sublane broadcast instead of 2*pad one-wide concats.
    """
    b, h, w, c = a.shape
    a = jnp.concatenate([a[:, :1]] * pad_h + [a] + [a[:, h - 1:h]] * pad_h,
                        axis=1)
    hp = a.shape[1]
    left = jnp.broadcast_to(a[:, :, :1, :], (b, hp, pad_w_lo, c))
    right = jnp.broadcast_to(a[:, :, w - 1:w, :], (b, hp, pad_w_hi, c))
    return jnp.concatenate([left, a, right], axis=2)


def _im2col_concat(xpad, kh, kw, ho, wo):
    """(B, Hp, Wp, C) -> (B, ho, wo, kh*kw*C), tap-major / channel-minor.

    Used for conv1 only (C = 3: the 243-wide patch axis has no 128-aligned
    tap grouping, so a concat build is as good as scratch stores here)."""
    rows = []
    for i in range(kh):
        rows.append(jnp.concatenate(
            [xpad[:, i:i + ho, j:j + wo, :] for j in range(kw)], axis=-1))
    return jnp.concatenate(rows, axis=-1)


def _srcnn1_kernel(x_ref, w1_ref, b1_ref, w2_ref, b2_ref, w3_ref, b3_ref,
                   o_ref, l3_ref):
    """Fused SRCNN1 forward for a block of B images.

    x_ref : (B, H, W, 3)    raw input (replicate padding done in-kernel)
    w1_ref: (243, 64)       conv1 weight, HWIO-flattened
    b1_ref: (1, 64)
    w2_ref: (64, 32)        conv2 (1x1) weight as (Cin, Cout)
    b2_ref: (1, 32)
    w3_ref: (3, 800)        conv3 weight, transposed for an NT (x.y^T) dot
    b3_ref: (3, 1)
    o_ref : (3, B*H*W)      lane-dense output block
    l3_ref: (B, H, W, 800)  VMEM scratch: conv3 im2col patches
    """
    bsz, h, w, _ = x_ref.shape
    ho1 = h + 2 * PAD - K1 + 1            # true conv1/conv2 grid (12 for 16)
    wo1 = w + 2 * PAD - K1 + 1
    wo1e = (wo1 + 7) // 8 * 8             # W-extended grid (16): keeps every
                                          # reshape sublane-tile aligned.

    # ---- conv1 (9x9, 3 -> 64) + ReLU : one 2-D matmul, M = B*ho1*wo1e ----
    # Asymmetric W pad (left=2, right=2+(wo1e-wo1)) so VALID conv columns
    # 0..wo1-1 are exactly the true outputs; columns wo1..wo1e-1 are garbage
    # that is discarded before conv3.
    xp = _edge_pad_hw(x_ref[...], PAD, PAD, PAD + (wo1e - wo1))
    l1 = _im2col_concat(xp, K1, K1, ho1, wo1e)            # (B, 12, 16, 243)
    l1f = l1.reshape(bsz * ho1 * wo1e, KD1)               # aligned collapse
    a1 = jnp.dot(l1f, w1_ref[...], preferred_element_type=jnp.float32)
    a1 = jnp.maximum(a1 + b1_ref[...], 0.0)               # (B*192, 64)

    # ---- conv2 (1x1, 64 -> 32) + ReLU : one 2-D matmul ----
    a2 = jnp.dot(a1, w2_ref[...], preferred_element_type=jnp.float32)
    a2 = jnp.maximum(a2 + b2_ref[...], 0.0)               # (B*192, 32)

    # ---- conv3 (5x5, 32 -> 3) : one 2-D NT matmul, K = 800 ----
    # conv2's replicate pad commutes past the pointwise conv2+ReLU; merged
    # with conv3's own pad it is a single edge-pad(4) of the 32-ch activation.
    a2 = a2.reshape(bsz, ho1, wo1e, C2)[:, :, :wo1, :]    # drop garbage cols
    a2p = _edge_pad_hw(a2, 2 * PAD, 2 * PAD, 2 * PAD)     # (B, 20, 20, 32)

    # Build the 800-wide patch tensor in VMEM scratch, 4 taps (= 128 lanes)
    # per store: every store except the 32-wide tail is aligned & unmasked.
    taps = [(t // K3, t % K3) for t in range(K3 * K3)]
    group = 128 // C2                                     # 4 taps
    for t0 in range(0, K3 * K3, group):
        g = taps[t0:t0 + group]
        pieces = [a2p[:, i:i + h, j:j + w, :] for (i, j) in g]
        slab = pieces[0] if len(pieces) == 1 else jnp.concatenate(pieces, axis=-1)
        l3_ref[:, :, :, t0 * C2:(t0 + len(g)) * C2] = slab

    # W = 16 is a multiple of the 8-row sublane tile -> layout-preserving.
    l3f = l3_ref[...].reshape(bsz * h * w, KD3)           # (B*256, 800)
    # (3, 800) x (B*256, 800)^T -> (3, B*256): Cout on sublanes, B*H*W on
    # lanes => unmasked lane-dense output stores.
    y = lax.dot_general(w3_ref[...], l3f, (((1,), (1,)), ((), ())),
                        preferred_element_type=jnp.float32)
    o_ref[...] = (y + b3_ref[...]).astype(o_ref.dtype)    # (3, B*H*W)


def _batch_tile(n):
    """Images per grid step: >= 2 steps when N >= 2 (keeps both v7x
    TensorCores busy; harmless on 1-TC v5e/v6e), capped so VMEM temporaries
    stay small, always dividing N evenly."""
    b = n // 2 if (n >= 2 and n % 2 == 0) else n
    b = max(b, 1)
    while b > 1 and (b > MAX_IMGS_PER_STEP or n % b != 0):
        b -= 1
    return b


@jax.jit
def srcnn1_forward(params, x):
    """x: (N, 3, H, W) float32 -> (N, 3, H, W); matches SRCNN1.forward."""
    n, cin, h, w = x.shape
    assert cin == C_IN
    assert h + 2 * PAD >= K1 and w + 2 * PAD >= K1, "input too small for 9x9"
    w1, b1 = params["conv1"]
    w2, b2 = params["conv2"]
    w3, b3 = params["conv3"]

    # Weight / bias prep (tiny; OIHW -> flattened im2col layouts).
    w1m = jnp.transpose(w1, (2, 3, 1, 0)).reshape(KD1, C1)        # (243, 64)
    b1m = b1.reshape(1, C1)
    w2m = jnp.transpose(w2, (2, 3, 1, 0)).reshape(C1, C2)         # (64, 32)
    b2m = b2.reshape(1, C2)
    w3m = jnp.transpose(w3, (2, 3, 1, 0)).reshape(KD3, C_OUT).T   # (3, 800)
    b3m = b3.reshape(C_OUT, 1)

    # Only activation glue outside the kernel: NCHW -> NHWC of the tiny
    # 3-channel input and the matching relayout of the 3-channel output.
    x_nhwc = jnp.transpose(x, (0, 2, 3, 1))

    bt = _batch_tile(n)
    steps = n // bt
    hw = h * w

    out = pl.pallas_call(
        _srcnn1_kernel,
        out_shape=jax.ShapeDtypeStruct((C_OUT, n * hw), jnp.float32),
        grid_spec=pltpu.PrefetchScalarGridSpec(
            num_scalar_prefetch=0,
            grid=(steps,),
            in_specs=[
                pl.BlockSpec((bt, h, w, C_IN), lambda i: (i, 0, 0, 0)),
                pl.BlockSpec((KD1, C1), lambda i: (0, 0)),
                pl.BlockSpec((1, C1), lambda i: (0, 0)),
                pl.BlockSpec((C1, C2), lambda i: (0, 0)),
                pl.BlockSpec((1, C2), lambda i: (0, 0)),
                pl.BlockSpec((C_OUT, KD3), lambda i: (0, 0)),
                pl.BlockSpec((C_OUT, 1), lambda i: (0, 0)),
            ],
            out_specs=pl.BlockSpec((C_OUT, bt * hw), lambda i: (0, i)),
            scratch_shapes=[pltpu.VMEM((bt, h, w, KD3), jnp.float32)],
        ),
        compiler_params=pltpu.CompilerParams(
            dimension_semantics=("parallel",),       # batch across TCs on v7x
            vmem_limit_bytes=32 * 1024 * 1024,
        ),
    )(x_nhwc, w1m, b1m, w2m, b2m, w3m, b3m)

    # (3, N*H*W) -> (N, 3, H, W): free reshape + a tiny 3-channel transpose.
    return jnp.transpose(out.reshape(C_OUT, n, h, w), (1, 0, 2, 3))


def init_params(key):
    """Deterministic PyTorch-style (uniform +-1/sqrt(fan_in)) init."""
    def conv_init(k, cout, cin, ksz):
        kw_, kb_ = jax.random.split(k)
        bound = 1.0 / jnp.sqrt(cin * ksz * ksz)
        wgt = jax.random.uniform(kw_, (cout, cin, ksz, ksz),
                                 minval=-bound, maxval=bound, dtype=jnp.float32)
        b = jax.random.uniform(kb_, (cout,),
                               minval=-bound, maxval=bound, dtype=jnp.float32)
        return wgt, b

    k1, k2, k3 = jax.random.split(key, 3)
    return {
        "conv1": conv_init(k1, C1, C_IN, K1),
        "conv2": conv_init(k2, C2, C1, 1),
        "conv3": conv_init(k3, C_OUT, C2, K3),
    }


def _reference_conv(x_nchw, w_oihw, b, padding, relu):
    xp = jnp.pad(x_nchw, ((0, 0), (0, 0), (padding, padding), (padding, padding)),
                 mode="edge")
    y = lax.conv_general_dilated(
        xp, w_oihw, window_strides=(1, 1), padding="VALID",
        dimension_numbers=("NCHW", "OIHW", "NCHW"))
    y = y + b[None, :, None, None]
    return jnp.maximum(y, 0.0) if relu else y


def _reference_forward(params, x):
    w1, b1 = params["conv1"]
    w2, b2 = params["conv2"]
    w3, b3 = params["conv3"]
    x = _reference_conv(x, w1, b1, PAD, True)
    x = _reference_conv(x, w2, b2, PAD, True)
    x = _reference_conv(x, w3, b3, PAD, False)
    return x


if __name__ == "__main__":
    key = jax.random.PRNGKey(0)
    kp, kx = jax.random.split(key)
    params = init_params(kp)
    x = jax.random.normal(kx, (2, 3, 16, 16), dtype=jnp.float32)

    out = jax.block_until_ready(srcnn1_forward(params, x))
    assert out.shape == (2, 3, 16, 16), out.shape
    assert bool(jnp.all(jnp.isfinite(out)))

    ref = jax.block_until_ready(_reference_forward(params, x))
    err = float(jnp.max(jnp.abs(out - ref)))
    assert err < 5e-4, err

    print("KERNEL_OK")
</pallas_src>

<mosaic_0001>
module attributes {stable_mosaic.version = 11 : i64} {
  func.func @_srcnn1_kernel(%arg0: i32, %arg1: memref<1x16x16x3xf32, #tpu.memory_space<vmem>>, %arg2: memref<243x64xf32, #tpu.memory_space<vmem>>, %arg3: memref<1x64xf32, #tpu.memory_space<vmem>>, %arg4: memref<64x32xf32, #tpu.memory_space<vmem>>, %arg5: memref<1x32xf32, #tpu.memory_space<vmem>>, %arg6: memref<3x800xf32, #tpu.memory_space<vmem>>, %arg7: memref<3x1xf32, #tpu.memory_space<vmem>>, %arg8: memref<3x256xf32, #tpu.memory_space<vmem>>, %arg9: memref<1x16x16x800xf32, #tpu.memory_space<vmem>>) attributes {dimension_semantics = [#tpu.dimension_semantics<parallel>], iteration_bounds = array<i64: 2>, scalar_prefetch = 0 : i64, scratch_operands = 1 : i64, tpu.core_type = #tpu.core_type<tc>, window_params = [{transform_indices = @transform_0, window_bounds = array<i64: 1, 16, 16, 3>}, {pipeline_mode = #tpu.pipeline_mode<synchronous>, transform_indices = @transform_1, window_bounds = array<i64: 243, 64>}, {pipeline_mode = #tpu.pipeline_mode<synchronous>, transform_indices = @transform_2, window_bounds = array<i64: 1, 64>}, {pipeline_mode = #tpu.pipeline_mode<synchronous>, transform_indices = @transform_3, window_bounds = array<i64: 64, 32>}, {pipeline_mode = #tpu.pipeline_mode<synchronous>, transform_indices = @transform_4, window_bounds = array<i64: 1, 32>}, {pipeline_mode = #tpu.pipeline_mode<synchronous>, transform_indices = @transform_5, window_bounds = array<i64: 3, 800>}, {pipeline_mode = #tpu.pipeline_mode<synchronous>, transform_indices = @transform_6, window_bounds = array<i64: 3, 1>}, {transform_indices = @transform_7, window_bounds = array<i64: 3, 256>}]} {
    %c0 = arith.constant 0 : index
    %c0_0 = arith.constant 0 : index
    %c0_1 = arith.constant 0 : index
    %c0_2 = arith.constant 0 : index
    %0 = vector.load %arg1[%c0, %c0_0, %c0_1, %c0_2] : memref<1x16x16x3xf32, #tpu.memory_space<vmem>>, vector<1x16x16x3xf32>
    %1 = vector.extract_strided_slice %0 {offsets = [0, 0, 0, 0], sizes = [1, 1, 16, 3], strides = [1, 1, 1, 1]} : vector<1x16x16x3xf32> to vector<1x1x16x3xf32>
    %2 = vector.extract_strided_slice %0 {offsets = [0, 15, 0, 0], sizes = [1, 1, 16, 3], strides = [1, 1, 1, 1]} : vector<1x16x16x3xf32> to vector<1x1x16x3xf32>
    %3 = tpu.concatenate %1, %1, %0, %2, %2 in 1 : vector<1x1x16x3xf32>, vector<1x1x16x3xf32>, vector<1x16x16x3xf32>, vector<1x1x16x3xf32>, vector<1x1x16x3xf32> -> vector<1x20x16x3xf32>
    %4 = vector.extract_strided_slice %3 {offsets = [0, 0, 0, 0], sizes = [1, 20, 1, 3], strides = [1, 1, 1, 1]} : vector<1x20x16x3xf32> to vector<1x20x1x3xf32>
    %5 = vector.shape_cast %4 : vector<1x20x1x3xf32> to vector<1x20x1x3xf32>
    %6 = vector.broadcast %5 : vector<1x20x1x3xf32> to vector<1x20x2x3xf32>
    %7 = vector.extract_strided_slice %3 {offsets = [0, 0, 15, 0], sizes = [1, 20, 1, 3], strides = [1, 1, 1, 1]} : vector<1x20x16x3xf32> to vector<1x20x1x3xf32>
    %8 = vector.shape_cast %7 : vector<1x20x1x3xf32> to vector<1x20x1x3xf32>
    %9 = vector.broadcast %8 : vector<1x20x1x3xf32> to vector<1x20x6x3xf32>
    %10 = tpu.concatenate %6, %3, %9 in 2 : vector<1x20x2x3xf32>, vector<1x20x16x3xf32>, vector<1x20x6x3xf32> -> vector<1x20x24x3xf32>
    %11 = vector.extract_strided_slice %10 {offsets = [0, 0, 0, 0], sizes = [1, 12, 16, 3], strides = [1, 1, 1, 1]} : vector<1x20x24x3xf32> to vector<1x12x16x3xf32>
    %12 = vector.extract_strided_slice %10 {offsets = [0, 0, 1, 0], sizes = [1, 12, 16, 3], strides = [1, 1, 1, 1]} : vector<1x20x24x3xf32> to vector<1x12x16x3xf32>
    %13 = vector.extract_strided_slice %10 {offsets = [0, 0, 2, 0], sizes = [1, 12, 16, 3], strides = [1, 1, 1, 1]} : vector<1x20x24x3xf32> to vector<1x12x16x3xf32>
    %14 = vector.extract_strided_slice %10 {offsets = [0, 0, 3, 0], sizes = [1, 12, 16, 3], strides = [1, 1, 1, 1]} : vector<1x20x24x3xf32> to vector<1x12x16x3xf32>
    %15 = vector.extract_strided_slice %10 {offsets = [0, 0, 4, 0], sizes = [1, 12, 16, 3], strides = [1, 1, 1, 1]} : vector<1x20x24x3xf32> to vector<1x12x16x3xf32>
    %16 = vector.extract_strided_slice %10 {offsets = [0, 0, 5, 0], sizes = [1, 12, 16, 3], strides = [1, 1, 1, 1]} : vector<1x20x24x3xf32> to vector<1x12x16x3xf32>
    %17 = vector.extract_strided_slice %10 {offsets = [0, 0, 6, 0], sizes = [1, 12, 16, 3], strides = [1, 1, 1, 1]} : vector<1x20x24x3xf32> to vector<1x12x16x3xf32>
    %18 = vector.extract_strided_slice %10 {offsets = [0, 0, 7, 0], sizes = [1, 12, 16, 3], strides = [1, 1, 1, 1]} : vector<1x20x24x3xf32> to vector<1x12x16x3xf32>
    %19 = vector.extract_strided_slice %10 {offsets = [0, 0, 8, 0], sizes = [1, 12, 16, 3], strides = [1, 1, 1, 1]} : vector<1x20x24x3xf32> to vector<1x12x16x3xf32>
    %20 = tpu.concatenate %11, %12, %13, %14, %15, %16, %17, %18, %19 in 3 : vector<1x12x16x3xf32>, vector<1x12x16x3xf32>, vector<1x12x16x3xf32>, vector<1x12x16x3xf32>, vector<1x12x16x3xf32>, vector<1x12x16x3xf32>, vector<1x12x16x3xf32>, vector<1x12x16x3xf32>, vector<1x12x16x3xf32> -> vector<1x12x16x27xf32>
    %21 = vector.extract_strided_slice %10 {offsets = [0, 1, 0, 0], sizes = [1, 12, 16, 3], strides = [1, 1, 1, 1]} : vector<1x20x24x3xf32> to vector<1x12x16x3xf32>
    %22 = vector.extract_strided_slice %10 {offsets = [0, 1, 1, 0], sizes = [1, 12, 16, 3], strides = [1, 1, 1, 1]} : vector<1x20x24x3xf32> to vector<1x12x16x3xf32>
    %23 = vector.extract_strided_slice %10 {offsets = [0, 1, 2, 0], sizes = [1, 12, 16, 3], strides = [1, 1, 1, 1]} : vector<1x20x24x3xf32> to vector<1x12x16x3xf32>
    %24 = vector.extract_strided_slice %10 {offsets = [0, 1, 3, 0], sizes = [1, 12, 16, 3], strides = [1, 1, 1, 1]} : vector<1x20x24x3xf32> to vector<1x12x16x3xf32>
    %25 = vector.extract_strided_slice %10 {offsets = [0, 1, 4, 0], sizes = [1, 12, 16, 3], strides = [1, 1, 1, 1]} : vector<1x20x24x3xf32> to vector<1x12x16x3xf32>
    %26 = vector.extract_strided_slice %10 {offsets = [0, 1, 5, 0], sizes = [1, 12, 16, 3], strides = [1, 1, 1, 1]} : vector<1x20x24x3xf32> to vector<1x12x16x3xf32>
    %27 = vector.extract_strided_slice %10 {offsets = [0, 1, 6, 0], sizes = [1, 12, 16, 3], strides = [1, 1, 1, 1]} : vector<1x20x24x3xf32> to vector<1x12x16x3xf32>
    %28 = vector.extract_strided_slice %10 {offsets = [0, 1, 7, 0], sizes = [1, 12, 16, 3], strides = [1, 1, 1, 1]} : vector<1x20x24x3xf32> to vector<1x12x16x3xf32>
    %29 = vector.extract_strided_slice %10 {offsets = [0, 1, 8, 0], sizes = [1, 12, 16, 3], strides = [1, 1, 1, 1]} : vector<1x20x24x3xf32> to vector<1x12x16x3xf32>
    %30 = tpu.concatenate %21, %22, %23, %24, %25, %26, %27, %28, %29 in 3 : vector<1x12x16x3xf32>, vector<1x12x16x3xf32>, vector<1x12x16x3xf32>, vector<1x12x16x3xf32>, vector<1x12x16x3xf32>, vector<1x12x16x3xf32>, vector<1x12x16x3xf32>, vector<1x12x16x3xf32>, vector<1x12x16x3xf32> -> vector<1x12x16x27xf32>
    %31 = vector.extract_strided_slice %10 {offsets = [0, 2, 0, 0], sizes = [1, 12, 16, 3], strides = [1, 1, 1, 1]} : vector<1x20x24x3xf32> to vector<1x12x16x3xf32>
    %32 = vector.extract_strided_slice %10 {offsets = [0, 2, 1, 0], sizes = [1, 12, 16, 3], strides = [1, 1, 1, 1]} : vector<1x20x24x3xf32> to vector<1x12x16x3xf32>
    %33 = vector.extract_strided_slice %10 {offsets = [0, 2, 2, 0], sizes = [1, 12, 16, 3], strides = [1, 1, 1, 1]} : vector<1x20x24x3xf32> to vector<1x12x16x3xf32>
    %34 = vector.extract_strided_slice %10 {offsets = [0, 2, 3, 0], sizes = [1, 12, 16, 3], strides = [1, 1, 1, 1]} : vector<1x20x24x3xf32> to vector<1x12x16x3xf32>
    %35 = vector.extract_strided_slice %10 {offsets = [0, 2, 4, 0], sizes = [1, 12, 16, 3], strides = [1, 1, 1, 1]} : vector<1x20x24x3xf32> to vector<1x12x16x3xf32>
    %36 = vector.extract_strided_slice %10 {offsets = [0, 2, 5, 0], sizes = [1, 12, 16, 3], strides = [1, 1, 1, 1]} : vector<1x20x24x3xf32> to vector<1x12x16x3xf32>
    %37 = vector.extract_strided_slice %10 {offsets = [0, 2, 6, 0], sizes = [1, 12, 16, 3], strides = [1, 1, 1, 1]} : vector<1x20x24x3xf32> to vector<1x12x16x3xf32>
    %38 = vector.extract_strided_slice %10 {offsets = [0, 2, 7, 0], sizes = [1, 12, 16, 3], strides = [1, 1, 1, 1]} : vector<1x20x24x3xf32> to vector<1x12x16x3xf32>
    %39 = vector.extract_strided_slice %10 {offsets = [0, 2, 8, 0], sizes = [1, 12, 16, 3], strides = [1, 1, 1, 1]} : vector<1x20x24x3xf32> to vector<1x12x16x3xf32>
    %40 = tpu.concatenate %31, %32, %33, %34, %35, %36, %37, %38, %39 in 3 : vector<1x12x16x3xf32>, vector<1x12x16x3xf32>, vector<1x12x16x3xf32>, vector<1x12x16x3xf32>, vector<1x12x16x3xf32>, vector<1x12x16x3xf32>, vector<1x12x16x3xf32>, vector<1x12x16x3xf32>, vector<1x12x16x3xf32> -> vector<1x12x16x27xf32>
    %41 = vector.extract_strided_slice %10 {offsets = [0, 3, 0, 0], sizes = [1, 12, 16, 3], strides = [1, 1, 1, 1]} : vector<1x20x24x3xf32> to vector<1x12x16x3xf32>
    %42 = vector.extract_strided_slice %10 {offsets = [0, 3, 1, 0], sizes = [1, 12, 16, 3], strides = [1, 1, 1, 1]} : vector<1x20x24x3xf32> to vector<1x12x16x3xf32>
    %43 = vector.extract_strided_slice %10 {offsets = [0, 3, 2, 0], sizes = [1, 12, 16, 3], strides = [1, 1, 1, 1]} : vector<1x20x24x3xf32> to vector<1x12x16x3xf32>
    %44 = vector.extract_strided_slice %10 {offsets = [0, 3, 3, 0], sizes = [1, 12, 16, 3], strides = [1, 1, 1, 1]} : vector<1x20x24x3xf32> to vector<1x12x16x3xf32>
    %45 = vector.extract_strided_slice %10 {offsets = [0, 3, 4, 0], sizes = [1, 12, 16, 3], strides = [1, 1, 1, 1]} : vector<1x20x24x3xf32> to vector<1x12x16x3xf32>
    %46 = vector.extract_strided_slice %10 {offsets = [0, 3, 5, 0], sizes = [1, 12, 16, 3], strides = [1, 1, 1, 1]} : vector<1x20x24x3xf32> to vector<1x12x16x3xf32>
    %47 = vector.extract_strided_slice %10 {offsets = [0, 3, 6, 0], sizes = [1, 12, 16, 3], strides = [1, 1, 1, 1]} : vector<1x20x24x3xf32> to vector<1x12x16x3xf32>
    %48 = vector.extract_strided_slice %10 {offsets = [0, 3, 7, 0], sizes = [1, 12, 16, 3], strides = [1, 1, 1, 1]} : vector<1x20x24x3xf32> to vector<1x12x16x3xf32>
    %49 = vector.extract_strided_slice %10 {offsets = [0, 3, 8, 0], sizes = [1, 12, 16, 3], strides = [1, 1, 1, 1]} : vector<1x20x24x3xf32> to vector<1x12x16x3xf32>
    %50 = tpu.concatenate %41, %42, %43, %44, %45, %46, %47, %48, %49 in 3 : vector<1x12x16x3xf32>, vector<1x12x16x3xf32>, vector<1x12x16x3xf32>, vector<1x12x16x3xf32>, vector<1x12x16x3xf32>, vector<1x12x16x3xf32>, vector<1x12x16x3xf32>, vector<1x12x16x3xf32>, vector<1x12x16x3xf32> -> vector<1x12x16x27xf32>
    %51 = vector.extract_strided_slice %10 {offsets = [0, 4, 0, 0], sizes = [1, 12, 16, 3], strides = [1, 1, 1, 1]} : vector<1x20x24x3xf32> to vector<1x12x16x3xf32>
    %52 = vector.extract_strided_slice %10 {offsets = [0, 4, 1, 0], sizes = [1, 12, 16, 3], strides = [1, 1, 1, 1]} : vector<1x20x24x3xf32> to vector<1x12x16x3xf32>
    %53 = vector.extract_strided_slice %10 {offsets = [0, 4, 2, 0], sizes = [1, 12, 16, 3], strides = [1, 1, 1, 1]} : vector<1x20x24x3xf32> to vector<1x12x16x3xf32>
    %54 = vector.extract_strided_slice %10 {offsets = [0, 4, 3, 0], sizes = [1, 12, 16, 3], strides = [1, 1, 1, 1]} : vector<1x20x24x3xf32> to vector<1x12x16x3xf32>
    %55 = vector.extract_strided_slice %10 {offsets = [0, 4, 4, 0], sizes = [1, 12, 16, 3], strides = [1, 1, 1, 1]} : vector<1x20x24x3xf32> to vector<1x12x16x3xf32>
    %56 = vector.extract_strided_slice %10 {offsets = [0, 4, 5, 0], sizes = [1, 12, 16, 3], strides = [1, 1, 1, 1]} : vector<1x20x24x3xf32> to vector<1x12x16x3xf32>
    %57 = vector.extract_strided_slice %10 {offsets = [0, 4, 6, 0], sizes = [1, 12, 16, 3], strides = [1, 1, 1, 1]} : vector<1x20x24x3xf32> to vector<1x12x16x3xf32>
    %58 = vector.extract_strided_slice %10 {offsets = [0, 4, 7, 0], sizes = [1, 12, 16, 3], strides = [1, 1, 1, 1]} : vector<1x20x24x3xf32> to vector<1x12x16x3xf32>
    %59 = vector.extract_strided_slice %10 {offsets = [0, 4, 8, 0], sizes = [1, 12, 16, 3], strides = [1, 1, 1, 1]} : vector<1x20x24x3xf32> to vector<1x12x16x3xf32>
    %60 = tpu.concatenate %51, %52, %53, %54, %55, %56, %57, %58, %59 in 3 : vector<1x12x16x3xf32>, vector<1x12x16x3xf32>, vector<1x12x16x3xf32>, vector<1x12x16x3xf32>, vector<1x12x16x3xf32>, vector<1x12x16x3xf32>, vector<1x12x16x3xf32>, vector<1x12x16x3xf32>, vector<1x12x16x3xf32> -> vector<1x12x16x27xf32>
    %61 = vector.extract_strided_slice %10 {offsets = [0, 5, 0, 0], sizes = [1, 12, 16, 3], strides = [1, 1, 1, 1]} : vector<1x20x24x3xf32> to vector<1x12x16x3xf32>
    %62 = vector.extract_strided_slice %10 {offsets = [0, 5, 1, 0], sizes = [1, 12, 16, 3], strides = [1, 1, 1, 1]} : vector<1x20x24x3xf32> to vector<1x12x16x3xf32>
    %63 = vector.extract_strided_slice %10 {offsets = [0, 5, 2, 0], sizes = [1, 12, 16, 3], strides = [1, 1, 1, 1]} : vector<1x20x24x3xf32> to vector<1x12x16x3xf32>
    %64 = vector.extract_strided_slice %10 {offsets = [0, 5, 3, 0], sizes = [1, 12, 16, 3], strides = [1, 1, 1, 1]} : vector<1x20x24x3xf32> to vector<1x12x16x3xf32>
    %65 = vector.extract_strided_slice %10 {offsets = [0, 5, 4, 0], sizes = [1, 12, 16, 3], strides = [1, 1, 1, 1]} : vector<1x20x24x3xf32> to vector<1x12x16x3xf32>
    %66 = vector.extract_strided_slice %10 {offsets = [0, 5, 5, 0], sizes = [1, 12, 16, 3], strides = [1, 1, 1, 1]} : vector<1x20x24x3xf32> to vector<1x12x16x3xf32>
    %67 = vector.extract_strided_slice %10 {offsets = [0, 5, 6, 0], sizes = [1, 12, 16, 3], strides = [1, 1, 1, 1]} : vector<1x20x24x3xf32> to vector<1x12x16x3xf32>
    %68 = vector.extract_strided_slice %10 {offsets = [0, 5, 7, 0], sizes = [1, 12, 16, 3], strides = [1, 1, 1, 1]} : vector<1x20x24x3xf32> to vector<1x12x16x3xf32>
    %69 = vector.extract_strided_slice %10 {offsets = [0, 5, 8, 0], sizes = [1, 12, 16, 3], strides = [1, 1, 1, 1]} : vector<1x20x24x3xf32> to vector<1x12x16x3xf32>
    %70 = tpu.concatenate %61, %62, %63, %64, %65, %66, %67, %68, %69 in 3 : vector<1x12x16x3xf32>, vector<1x12x16x3xf32>, vector<1x12x16x3xf32>, vector<1x12x16x3xf32>, vector<1x12x16x3xf32>, vector<1x12x16x3xf32>, vector<1x12x16x3xf32>, vector<1x12x16x3xf32>, vector<1x12x16x3xf32> -> vector<1x12x16x27xf32>
    %71 = vector.extract_strided_slice %10 {offsets = [0, 6, 0, 0], sizes = [1, 12, 16, 3], strides = [1, 1, 1, 1]} : vector<1x20x24x3xf32> to vector<1x12x16x3xf32>
    %72 = vector.extract_strided_slice %10 {offsets = [0, 6, 1, 0], sizes = [1, 12, 16, 3], strides = [1, 1, 1, 1]} : vector<1x20x24x3xf32> to vector<1x12x16x3xf32>
    %73 = vector.extract_strided_slice %10 {offsets = [0, 6, 2, 0], sizes = [1, 12, 16, 3], strides = [1, 1, 1, 1]} : vector<1x20x24x3xf32> to vector<1x12x16x3xf32>
    %74 = vector.extract_strided_slice %10 {offsets = [0, 6, 3, 0], sizes = [1, 12, 16, 3], strides = [1, 1, 1, 1]} : vector<1x20x24x3xf32> to vector<1x12x16x3xf32>
    %75 = vector.extract_strided_slice %10 {offsets = [0, 6, 4, 0], sizes = [1, 12, 16, 3], strides = [1, 1, 1, 1]} : vector<1x20x24x3xf32> to vector<1x12x16x3xf32>
    %76 = vector.extract_strided_slice %10 {offsets = [0, 6, 5, 0], sizes = [1, 12, 16, 3], strides = [1, 1, 1, 1]} : vector<1x20x24x3xf32> to vector<1x12x16x3xf32>
    %77 = vector.extract_strided_slice %10 {offsets = [0, 6, 6, 0], sizes = [1, 12, 16, 3], strides = [1, 1, 1, 1]} : vector<1x20x24x3xf32> to vector<1x12x16x3xf32>
    %78 = vector.extract_strided_slice %10 {offsets = [0, 6, 7, 0], sizes = [1, 12, 16, 3], strides = [1, 1, 1, 1]} : vector<1x20x24x3xf32> to vector<1x12x16x3xf32>
    %79 = vector.extract_strided_slice %10 {offsets = [0, 6, 8, 0], sizes = [1, 12, 16, 3], strides = [1, 1, 1, 1]} : vector<1x20x24x3xf32> to vector<1x12x16x3xf32>
    %80 = tpu.concatenate %71, %72, %73, %74, %75, %76, %77, %78, %79 in 3 : vector<1x12x16x3xf32>, vector<1x12x16x3xf32>, vector<1x12x16x3xf32>, vector<1x12x16x3xf32>, vector<1x12x16x3xf32>, vector<1x12x16x3xf32>, vector<1x12x16x3xf32>, vector<1x12x16x3xf32>, vector<1x12x16x3xf32> -> vector<1x12x16x27xf32>
    %81 = vector.extract_strided_slice %10 {offsets = [0, 7, 0, 0], sizes = [1, 12, 16, 3], strides = [1, 1, 1, 1]} : vector<1x20x24x3xf32> to vector<1x12x16x3xf32>
    %82 = vector.extract_strided_slice %10 {offsets = [0, 7, 1, 0], sizes = [1, 12, 16, 3], strides = [1, 1, 1, 1]} : vector<1x20x24x3xf32> to vector<1x12x16x3xf32>
    %83 = vector.extract_strided_slice %10 {offsets = [0, 7, 2, 0], sizes = [1, 12, 16, 3], strides = [1, 1, 1, 1]} : vector<1x20x24x3xf32> to vector<1x12x16x3xf32>
    %84 = vector.extract_strided_slice %10 {offsets = [0, 7, 3, 0], sizes = [1, 12, 16, 3], strides = [1, 1, 1, 1]} : vector<1x20x24x3xf32> to vector<1x12x16x3xf32>
    %85 = vector.extract_strided_slice %10 {offsets = [0, 7, 4, 0], sizes = [1, 12, 16, 3], strides = [1, 1, 1, 1]} : vector<1x20x24x3xf32> to vector<1x12x16x3xf32>
    %86 = vector.extract_strided_slice %10 {offsets = [0, 7, 5, 0], sizes = [1, 12, 16, 3], strides = [1, 1, 1, 1]} : vector<1x20x24x3xf32> to vector<1x12x16x3xf32>
    %87 = vector.extract_strided_slice %10 {offsets = [0, 7, 6, 0], sizes = [1, 12, 16, 3], strides = [1, 1, 1, 1]} : vector<1x20x24x3xf32> to vector<1x12x16x3xf32>
    %88 = vector.extract_strided_slice %10 {offsets = [0, 7, 7, 0], sizes = [1, 12, 16, 3], strides = [1, 1, 1, 1]} : vector<1x20x24x3xf32> to vector<1x12x16x3xf32>
    %89 = vector.extract_strided_slice %10 {offsets = [0, 7, 8, 0], sizes = [1, 12, 16, 3], strides = [1, 1, 1, 1]} : vector<1x20x24x3xf32> to vector<1x12x16x3xf32>
    %90 = tpu.concatenate %81, %82, %83, %84, %85, %86, %87, %88, %89 in 3 : vector<1x12x16x3xf32>, vector<1x12x16x3xf32>, vector<1x12x16x3xf32>, vector<1x12x16x3xf32>, vector<1x12x16x3xf32>, vector<1x12x16x3xf32>, vector<1x12x16x3xf32>, vector<1x12x16x3xf32>, vector<1x12x16x3xf32> -> vector<1x12x16x27xf32>
    %91 = vector.extract_strided_slice %10 {offsets = [0, 8, 0, 0], sizes = [1, 12, 16, 3], strides = [1, 1, 1, 1]} : vector<1x20x24x3xf32> to vector<1x12x16x3xf32>
    %92 = vector.extract_strided_slice %10 {offsets = [0, 8, 1, 0], sizes = [1, 12, 16, 3], strides = [1, 1, 1, 1]} : vector<1x20x24x3xf32> to vector<1x12x16x3xf32>
    %93 = vector.extract_strided_slice %10 {offsets = [0, 8, 2, 0], sizes = [1, 12, 16, 3], strides = [1, 1, 1, 1]} : vector<1x20x24x3xf32> to vector<1x12x16x3xf32>
    %94 = vector.extract_strided_slice %10 {offsets = [0, 8, 3, 0], sizes = [1, 12, 16, 3], strides = [1, 1, 1, 1]} : vector<1x20x24x3xf32> to vector<1x12x16x3xf32>
    %95 = vector.extract_strided_slice %10 {offsets = [0, 8, 4, 0], sizes = [1, 12, 16, 3], strides = [1, 1, 1, 1]} : vector<1x20x24x3xf32> to vector<1x12x16x3xf32>
    %96 = vector.extract_strided_slice %10 {offsets = [0, 8, 5, 0], sizes = [1, 12, 16, 3], strides = [1, 1, 1, 1]} : vector<1x20x24x3xf32> to vector<1x12x16x3xf32>
    %97 = vector.extract_strided_slice %10 {offsets = [0, 8, 6, 0], sizes = [1, 12, 16, 3], strides = [1, 1, 1, 1]} : vector<1x20x24x3xf32> to vector<1x12x16x3xf32>
    %98 = vector.extract_strided_slice %10 {offsets = [0, 8, 7, 0], sizes = [1, 12, 16, 3], strides = [1, 1, 1, 1]} : vector<1x20x24x3xf32> to vector<1x12x16x3xf32>
    %99 = vector.extract_strided_slice %10 {offsets = [0, 8, 8, 0], sizes = [1, 12, 16, 3], strides = [1, 1, 1, 1]} : vector<1x20x24x3xf32> to vector<1x12x16x3xf32>
    %100 = tpu.concatenate %91, %92, %93, %94, %95, %96, %97, %98, %99 in 3 : vector<1x12x16x3xf32>, vector<1x12x16x3xf32>, vector<1x12x16x3xf32>, vector<1x12x16x3xf32>, vector<1x12x16x3xf32>, vector<1x12x16x3xf32>, vector<1x12x16x3xf32>, vector<1x12x16x3xf32>, vector<1x12x16x3xf32> -> vector<1x12x16x27xf32>
    %101 = tpu.concatenate %20, %30, %40, %50, %60, %70, %80, %90, %100 in 3 : vector<1x12x16x27xf32>, vector<1x12x16x27xf32>, vector<1x12x16x27xf32>, vector<1x12x16x27xf32>, vector<1x12x16x27xf32>, vector<1x12x16x27xf32>, vector<1x12x16x27xf32>, vector<1x12x16x27xf32>, vector<1x12x16x27xf32> -> vector<1x12x16x243xf32>
    %102 = vector.shape_cast %101 : vector<1x12x16x243xf32> to vector<192x243xf32>
    %c0_3 = arith.constant 0 : index
    %c0_4 = arith.constant 0 : index
    %103 = vector.load %arg2[%c0_3, %c0_4] : memref<243x64xf32, #tpu.memory_space<vmem>>, vector<243x64xf32>
    %cst = arith.constant dense<0.000000e+00> : vector<192x64xf32>
    %104 = tpu.matmul %102, %103, %cst {dimension_numbers = #tpu.dot_dimension_numbers<[1], [0], [0], [1], [0, 0, 1, 1], [], []>} : vector<192x243xf32>, vector<243x64xf32>, vector<192x64xf32> -> vector<192x64xf32>
    %c0_5 = arith.constant 0 : index
    %c0_6 = arith.constant 0 : index
    %105 = vector.load %arg3[%c0_5, %c0_6] : memref<1x64xf32, #tpu.memory_space<vmem>>, vector<1x64xf32>
    %106 = vector.broadcast %105 : vector<1x64xf32> to vector<192x64xf32>
    %107 = arith.addf %104, %106 : vector<192x64xf32>
    %cst_7 = arith.constant 0.000000e+00 : f32
    %108 = vector.broadcast %cst_7 : f32 to vector<192x64xf32>
    %109 = arith.maximumf %107, %108 : vector<192x64xf32>
    %c0_8 = arith.constant 0 : index
    %c0_9 = arith.constant 0 : index
    %110 = vector.load %arg4[%c0_8, %c0_9] : memref<64x32xf32, #tpu.memory_space<vmem>>, vector<64x32xf32>
    %cst_10 = arith.constant dense<0.000000e+00> : vector<192x32xf32>
    %111 = tpu.matmul %109, %110, %cst_10 {dimension_numbers = #tpu.dot_dimension_numbers<[1], [0], [0], [1], [0, 0, 1, 1], [], []>} : vector<192x64xf32>, vector<64x32xf32>, vector<192x32xf32> -> vector<192x32xf32>
    %c0_11 = arith.constant 0 : index
    %c0_12 = arith.constant 0 : index
    %112 = vector.load %arg5[%c0_11, %c0_12] : memref<1x32xf32, #tpu.memory_space<vmem>>, vector<1x32xf32>
    %113 = vector.broadcast %112 : vector<1x32xf32> to vector<192x32xf32>
    %114 = arith.addf %111, %113 : vector<192x32xf32>
    %cst_13 = arith.constant 0.000000e+00 : f32
    %115 = vector.broadcast %cst_13 : f32 to vector<192x32xf32>
    %116 = arith.maximumf %114, %115 : vector<192x32xf32>
    %117 = vector.shape_cast %116 : vector<192x32xf32> to vector<1x12x16x32xf32>
    %118 = vector.extract_strided_slice %117 {offsets = [0, 0, 0, 0], sizes = [1, 12, 12, 32], strides = [1, 1, 1, 1]} : vector<1x12x16x32xf32> to vector<1x12x12x32xf32>
    %119 = vector.extract_strided_slice %118 {offsets = [0, 0, 0, 0], sizes = [1, 1, 12, 32], strides = [1, 1, 1, 1]} : vector<1x12x12x32xf32> to vector<1x1x12x32xf32>
    %120 = vector.extract_strided_slice %118 {offsets = [0, 11, 0, 0], sizes = [1, 1, 12, 32], strides = [1, 1, 1, 1]} : vector<1x12x12x32xf32> to vector<1x1x12x32xf32>
    %121 = tpu.concatenate %119, %119, %119, %119, %118, %120, %120, %120, %120 in 1 : vector<1x1x12x32xf32>, vector<1x1x12x32xf32>, vector<1x1x12x32xf32>, vector<1x1x12x32xf32>, vector<1x12x12x32xf32>, vector<1x1x12x32xf32>, vector<1x1x12x32xf32>, vector<1x1x12x32xf32>, vector<1x1x12x32xf32> -> vector<1x20x12x32xf32>
    %122 = vector.extract_strided_slice %121 {offsets = [0, 0, 0, 0], sizes = [1, 20, 1, 32], strides = [1, 1, 1, 1]} : vector<1x20x12x32xf32> to vector<1x20x1x32xf32>
    %123 = vector.shape_cast %122 : vector<1x20x1x32xf32> to vector<1x20x1x32xf32>
    %124 = vector.broadcast %123 : vector<1x20x1x32xf32> to vector<1x20x4x32xf32>
    %125 = vector.extract_strided_slice %121 {offsets = [0, 0, 11, 0], sizes = [1, 20, 1, 32], strides = [1, 1, 1, 1]} : vector<1x20x12x32xf32> to vector<1x20x1x32xf32>
    %126 = vector.shape_cast %125 : vector<1x20x1x32xf32> to vector<1x20x1x32xf32>
    %127 = vector.broadcast %126 : vector<1x20x1x32xf32> to vector<1x20x4x32xf32>
    %128 = tpu.concatenate %124, %121, %127 in 2 : vector<1x20x4x32xf32>, vector<1x20x12x32xf32>, vector<1x20x4x32xf32> -> vector<1x20x20x32xf32>
    %129 = vector.extract_strided_slice %128 {offsets = [0, 0, 0, 0], sizes = [1, 16, 16, 32], strides = [1, 1, 1, 1]} : vector<1x20x20x32xf32> to vector<1x16x16x32xf32>
    %130 = vector.extract_strided_slice %128 {offsets = [0, 0, 1, 0], sizes = [1, 16, 16, 32], strides = [1, 1, 1, 1]} : vector<1x20x20x32xf32> to vector<1x16x16x32xf32>
    %131 = vector.extract_strided_slice %128 {offsets = [0, 0, 2, 0], sizes = [1, 16, 16, 32], strides = [1, 1, 1, 1]} : vector<1x20x20x32xf32> to vector<1x16x16x32xf32>
    %132 = vector.extract_strided_slice %128 {offsets = [0, 0, 3, 0], sizes = [1, 16, 16, 32], strides = [1, 1, 1, 1]} : vector<1x20x20x32xf32> to vector<1x16x16x32xf32>
    %133 = tpu.concatenate %129, %130, %131, %132 in 3 : vector<1x16x16x32xf32>, vector<1x16x16x32xf32>, vector<1x16x16x32xf32>, vector<1x16x16x32xf32> -> vector<1x16x16x128xf32>
    %c0_14 = arith.constant 0 : index
    %c0_15 = arith.constant 0 : index
    %c0_16 = arith.constant 0 : index
    %c0_17 = arith.constant 0 : index
    %134 = vector.load %arg9[%c0_14, %c0_15, %c0_16, %c0_17] : memref<1x16x16x800xf32, #tpu.memory_space<vmem>>, vector<1x16x16x128xf32>
    tpu.vector_store %arg9[%c0_14, %c0_15, %c0_16, %c0_17], %133 {strides = array<i32>} : memref<1x16x16x800xf32, #tpu.memory_space<vmem>>, vector<1x16x16x128xf32>,
    %135 = vector.extract_strided_slice %128 {offsets = [0, 0, 4, 0], sizes = [1, 16, 16, 32], strides = [1, 1, 1, 1]} : vector<1x20x20x32xf32> to vector<1x16x16x32xf32>
    %136 = vector.extract_strided_slice %128 {offsets = [0, 1, 0, 0], sizes = [1, 16, 16, 32], strides = [1, 1, 1, 1]} : vector<1x20x20x32xf32> to vector<1x16x16x32xf32>
    %137 = vector.extract_strided_slice %128 {offsets = [0, 1, 1, 0], sizes = [1, 16, 16, 32], strides = [1, 1, 1, 1]} : vector<1x20x20x32xf32> to vector<1x16x16x32xf32>
    %138 = vector.extract_strided_slice %128 {offsets = [0, 1, 2, 0], sizes = [1, 16, 16, 32], strides = [1, 1, 1, 1]} : vector<1x20x20x32xf32> to vector<1x16x16x32xf32>
    %139 = tpu.concatenate %135, %136, %137, %138 in 3 : vector<1x16x16x32xf32>, vector<1x16x16x32xf32>, vector<1x16x16x32xf32>, vector<1x16x16x32xf32> -> vector<1x16x16x128xf32>
    %c0_18 = arith.constant 0 : index
    %c0_19 = arith.constant 0 : index
    %c0_20 = arith.constant 0 : index
    %c128 = arith.constant 128 : index
    %140 = vector.load %arg9[%c0_18, %c0_19, %c0_20, %c128] : memref<1x16x16x800xf32, #tpu.memory_space<vmem>>, vector<1x16x16x128xf32>
    tpu.vector_store %arg9[%c0_18, %c0_19, %c0_20, %c128], %139 {strides = array<i32>} : memref<1x16x16x800xf32, #tpu.memory_space<vmem>>, vector<1x16x16x128xf32>,
    %141 = vector.extract_strided_slice %128 {offsets = [0, 1, 3, 0], sizes = [1, 16, 16, 32], strides = [1, 1, 1, 1]} : vector<1x20x20x32xf32> to vector<1x16x16x32xf32>
    %142 = vector.extract_strided_slice %128 {offsets = [0, 1, 4, 0], sizes = [1, 16, 16, 32], strides = [1, 1, 1, 1]} : vector<1x20x20x32xf32> to vector<1x16x16x32xf32>
    %143 = vector.extract_strided_slice %128 {offsets = [0, 2, 0, 0], sizes = [1, 16, 16, 32], strides = [1, 1, 1, 1]} : vector<1x20x20x32xf32> to vector<1x16x16x32xf32>
    %144 = vector.extract_strided_slice %128 {offsets = [0, 2, 1, 0], sizes = [1, 16, 16, 32], strides = [1, 1, 1, 1]} : vector<1x20x20x32xf32> to vector<1x16x16x32xf32>
    %145 = tpu.concatenate %141, %142, %143, %144 in 3 : vector<1x16x16x32xf32>, vector<1x16x16x32xf32>, vector<1x16x16x32xf32>, vector<1x16x16x32xf32> -> vector<1x16x16x128xf32>
    %c0_21 = arith.constant 0 : index
    %c0_22 = arith.constant 0 : index
    %c0_23 = arith.constant 0 : index
    %c256 = arith.constant 256 : index
    %146 = vector.load %arg9[%c0_21, %c0_22, %c0_23, %c256] : memref<1x16x16x800xf32, #tpu.memory_space<vmem>>, vector<1x16x16x128xf32>
    tpu.vector_store %arg9[%c0_21, %c0_22, %c0_23, %c256], %145 {strides = array<i32>} : memref<1x16x16x800xf32, #tpu.memory_space<vmem>>, vector<1x16x16x128xf32>,
    %147 = vector.extract_strided_slice %128 {offsets = [0, 2, 2, 0], sizes = [1, 16, 16, 32], strides = [1, 1, 1, 1]} : vector<1x20x20x32xf32> to vector<1x16x16x32xf32>
    %148 = vector.extract_strided_slice %128 {offsets = [0, 2, 3, 0], sizes = [1, 16, 16, 32], strides = [1, 1, 1, 1]} : vector<1x20x20x32xf32> to vector<1x16x16x32xf32>
    %149 = vector.extract_strided_slice %128 {offsets = [0, 2, 4, 0], sizes = [1, 16, 16, 32], strides = [1, 1, 1, 1]} : vector<1x20x20x32xf32> to vector<1x16x16x32xf32>
    %150 = vector.extract_strided_slice %128 {offsets = [0, 3, 0, 0], sizes = [1, 16, 16, 32], strides = [1, 1, 1, 1]} : vector<1x20x20x32xf32> to vector<1x16x16x32xf32>
    %151 = tpu.concatenate %147, %148, %149, %150 in 3 : vector<1x16x16x32xf32>, vector<1x16x16x32xf32>, vector<1x16x16x32xf32>, vector<1x16x16x32xf32> -> vector<1x16x16x128xf32>
    %c0_24 = arith.constant 0 : index
    %c0_25 = arith.constant 0 : index
    %c0_26 = arith.constant 0 : index
    %c384 = arith.constant 384 : index
    %152 = vector.load %arg9[%c0_24, %c0_25, %c0_26, %c384] : memref<1x16x16x800xf32, #tpu.memory_space<vmem>>, vector<1x16x16x128xf32>
    tpu.vector_store %arg9[%c0_24, %c0_25, %c0_26, %c384], %151 {strides = array<i32>} : memref<1x16x16x800xf32, #tpu.memory_space<vmem>>, vector<1x16x16x128xf32>,
    %153 = vector.extract_strided_slice %128 {offsets = [0, 3, 1, 0], sizes = [1, 16, 16, 32], strides = [1, 1, 1, 1]} : vector<1x20x20x32xf32> to vector<1x16x16x32xf32>
    %154 = vector.extract_strided_slice %128 {offsets = [0, 3, 2, 0], sizes = [1, 16, 16, 32], strides = [1, 1, 1, 1]} : vector<1x20x20x32xf32> to vector<1x16x16x32xf32>
    %155 = vector.extract_strided_slice %128 {offsets = [0, 3, 3, 0], sizes = [1, 16, 16, 32], strides = [1, 1, 1, 1]} : vector<1x20x20x32xf32> to vector<1x16x16x32xf32>
    %156 = vector.extract_strided_slice %128 {offsets = [0, 3, 4, 0], sizes = [1, 16, 16, 32], strides = [1, 1, 1, 1]} : vector<1x20x20x32xf32> to vector<1x16x16x32xf32>
    %157 = tpu.concatenate %153, %154, %155, %156 in 3 : vector<1x16x16x32xf32>, vector<1x16x16x32xf32>, vector<1x16x16x32xf32>, vector<1x16x16x32xf32> -> vector<1x16x16x128xf32>
    %c0_27 = arith.constant 0 : index
    %c0_28 = arith.constant 0 : index
    %c0_29 = arith.constant 0 : index
    %c512 = arith.constant 512 : index
    %158 = vector.load %arg9[%c0_27, %c0_28, %c0_29, %c512] : memref<1x16x16x800xf32, #tpu.memory_space<vmem>>, vector<1x16x16x128xf32>
    tpu.vector_store %arg9[%c0_27, %c0_28, %c0_29, %c512], %157 {strides = array<i32>} : memref<1x16x16x800xf32, #tpu.memory_space<vmem>>, vector<1x16x16x128xf32>,
    %159 = vector.extract_strided_slice %128 {offsets = [0, 4, 0, 0], sizes = [1, 16, 16, 32], strides = [1, 1, 1, 1]} : vector<1x20x20x32xf32> to vector<1x16x16x32xf32>
    %160 = vector.extract_strided_slice %128 {offsets = [0, 4, 1, 0], sizes = [1, 16, 16, 32], strides = [1, 1, 1, 1]} : vector<1x20x20x32xf32> to vector<1x16x16x32xf32>
    %161 = vector.extract_strided_slice %128 {offsets = [0, 4, 2, 0], sizes = [1, 16, 16, 32], strides = [1, 1, 1, 1]} : vector<1x20x20x32xf32> to vector<1x16x16x32xf32>
    %162 = vector.extract_strided_slice %128 {offsets = [0, 4, 3, 0], sizes = [1, 16, 16, 32], strides = [1, 1, 1, 1]} : vector<1x20x20x32xf32> to vector<1x16x16x32xf32>
    %163 = tpu.concatenate %159, %160, %161, %162 in 3 : vector<1x16x16x32xf32>, vector<1x16x16x32xf32>, vector<1x16x16x32xf32>, vector<1x16x16x32xf32> -> vector<1x16x16x128xf32>
    %c0_30 = arith.constant 0 : index
    %c0_31 = arith.constant 0 : index
    %c0_32 = arith.constant 0 : index
    %c640 = arith.constant 640 : index
    %164 = vector.load %arg9[%c0_30, %c0_31, %c0_32, %c640] : memref<1x16x16x800xf32, #tpu.memory_space<vmem>>, vector<1x16x16x128xf32>
    tpu.vector_store %arg9[%c0_30, %c0_31, %c0_32, %c640], %163 {strides = array<i32>} : memref<1x16x16x800xf32, #tpu.memory_space<vmem>>, vector<1x16x16x128xf32>,
    %165 = vector.extract_strided_slice %128 {offsets = [0, 4, 4, 0], sizes = [1, 16, 16, 32], strides = [1, 1, 1, 1]} : vector<1x20x20x32xf32> to vector<1x16x16x32xf32>
    %c0_33 = arith.constant 0 : index
    %c0_34 = arith.constant 0 : index
    %c0_35 = arith.constant 0 : index
    %c768 = arith.constant 768 : index
    %166 = vector.load %arg9[%c0_33, %c0_34, %c0_35, %c768] : memref<1x16x16x800xf32, #tpu.memory_space<vmem>>, vector<1x16x16x32xf32>
    tpu.vector_store %arg9[%c0_33, %c0_34, %c0_35, %c768], %165 {strides = array<i32>} : memref<1x16x16x800xf32, #tpu.memory_space<vmem>>, vector<1x16x16x32xf32>,
    %c0_36 = arith.constant 0 : index
    %c0_37 = arith.constant 0 : index
    %c0_38 = arith.constant 0 : index
    %c0_39 = arith.constant 0 : index
    %167 = vector.load %arg9[%c0_36, %c0_37, %c0_38, %c0_39] : memref<1x16x16x800xf32, #tpu.memory_space<vmem>>, vector<1x16x16x800xf32>
    %168 = vector.shape_cast %167 : vector<1x16x16x800xf32> to vector<256x800xf32>
    %c0_40 = arith.constant 0 : index
    %c0_41 = arith.constant 0 : index
    %169 = vector.load %arg6[%c0_40, %c0_41] : memref<3x800xf32, #tpu.memory_space<vmem>>, vector<3x800xf32>
    %cst_42 = arith.constant dense<0.000000e+00> : vector<3x256xf32>
    %170 = tpu.matmul %169, %168, %cst_42 {dimension_numbers = #tpu.dot_dimension_numbers<[1], [1], [0], [0], [0, 0, 1, 0], [], []>} : vector<3x800xf32>, vector<256x800xf32>, vector<3x256xf32> -> vector<3x256xf32>
    %c0_43 = arith.constant 0 : index
    %c0_44 = arith.constant 0 : index
    %171 = vector.load %arg7[%c0_43, %c0_44] : memref<3x1xf32, #tpu.memory_space<vmem>>, vector<3x1xf32>
    %172 = vector.broadcast %171 : vector<3x1xf32> to vector<3x256xf32>
    %173 = arith.addf %170, %172 : vector<3x256xf32>
    %c0_45 = arith.constant 0 : index
    %c0_46 = arith.constant 0 : index
    %174 = vector.load %arg8[%c0_45, %c0_46] : memref<3x256xf32, #tpu.memory_space<vmem>>, vector<3x256xf32>
    tpu.vector_store %arg8[%c0_45, %c0_46], %173 {strides = array<i32>} : memref<3x256xf32, #tpu.memory_space<vmem>>, vector<3x256xf32>,
    return
  }
  func.func @transform_0(%arg0: i32) -> (i32, i32, i32, i32) {
    %c0_i32 = arith.constant 0 : i32
    %c0_i32_0 = arith.constant 0 : i32
    %c0_i32_1 = arith.constant 0 : i32
    %c0_i32_2 = arith.constant 0 : i32
    return %arg0, %c0_i32, %c0_i32_0, %c0_i32_1 : i32, i32, i32, i32
  }
  func.func @transform_1(%arg0: i32) -> (i32, i32) {
    %c0_i32 = arith.constant 0 : i32
    %c0_i32_0 = arith.constant 0 : i32
    %c0_i32_1 = arith.constant 0 : i32
    return %c0_i32, %c0_i32_0 : i32, i32
  }
  func.func @transform_2(%arg0: i32) -> (i32, i32) {
    %c0_i32 = arith.constant 0 : i32
    %c0_i32_0 = arith.constant 0 : i32
    %c0_i32_1 = arith.constant 0 : i32
    return %c0_i32, %c0_i32_0 : i32, i32
  }
  func.func @transform_3(%arg0: i32) -> (i32, i32) {
    %c0_i32 = arith.constant 0 : i32
    %c0_i32_0 = arith.constant 0 : i32
    %c0_i32_1 = arith.constant 0 : i32
    return %c0_i32, %c0_i32_0 : i32, i32
  }
  func.func @transform_4(%arg0: i32) -> (i32, i32) {
    %c0_i32 = arith.constant 0 : i32
    %c0_i32_0 = arith.constant 0 : i32
    %c0_i32_1 = arith.constant 0 : i32
    return %c0_i32, %c0_i32_0 : i32, i32
  }
  func.func @transform_5(%arg0: i32) -> (i32, i32) {
    %c0_i32 = arith.constant 0 : i32
    %c0_i32_0 = arith.constant 0 : i32
    %c0_i32_1 = arith.constant 0 : i32
    return %c0_i32, %c0_i32_0 : i32, i32
  }
  func.func @transform_6(%arg0: i32) -> (i32, i32) {
    %c0_i32 = arith.constant 0 : i32
    %c0_i32_0 = arith.constant 0 : i32
    %c0_i32_1 = arith.constant 0 : i32
    return %c0_i32, %c0_i32_0 : i32, i32
  }
  func.func @transform_7(%arg0: i32) -> (i32, i32) {
    %c0_i32 = arith.constant 0 : i32
    %c0_i32_0 = arith.constant 0 : i32
    return %c0_i32, %arg0 : i32, i32
  }
}

</mosaic_0001>

<bundles_post_ra>
// kernel: srcnn1_forward.1
= control target key start
LH: loop header
LB: loop body
LE: loop exit
PB: predicated region body
PF: predicated region fallthrough
CT: control target
= control target key end

     0   :  { %s6904_s24 = smov 0   ;;  %s13288_s0 = inlined_call_operand.vmem [shape: f32[2,16,16,3], index: 0, kind: input, shape index: {}]   ;;  %s13289_s1 = inlined_call_operand.vmem [shape: f32[243,64], index: 1, kind: input, shape index: {}]   ;;  %s13290_s2 = inlined_call_operand.vmem [shape: f32[1,64], index: 2, kind: input, shape index: {}]   ;;  %s13291_s3 = inlined_call_operand.vmem [shape: f32[64,32], index: 3, kind: input, shape index: {}]   ;;  %s13292_s4 = inlined_call_operand.vmem [shape: f32[1,32], index: 4, kind: input, shape index: {}]   ;;  %s13293_s5 = inlined_call_operand.vmem [shape: f32[3,800], index: 5, kind: input, shape index: {}]   ;;  %s13294_s6 = inlined_call_operand.vmem [shape: f32[3,1], index: 6, kind: input, shape index: {}]   ;;  %s13295_s7 = inlined_call_operand.vmem [shape: f32[3,512], index: 7, kind: output, shape index: {}]  }
   0x1 LB: > { %s6910_s25 = sadd.s32 4294967295, %s6842_s24   ;;  %p6456_p0 = scmp.ge.s32.totalorder %s6842_s24, 1  ;;  %s6842_s24 = sphi %s6904_s24, %s17_s24  }
   0x2   : > { %p237_p1 = scmp.lt.s32.totalorder %s6842_s24, 3 }
   0x4   : > { %p238_p2 = pnand %p6456_p0, %p237_p1 }
   0x6   : > { %241 = sbr.rel (%p238_p2) target bundleno = 2497 (0x9c1), region = 48 }
   0xb   : > { %p269_p3 = scmp.lt.s32.totalorder %s6910_s25, 1  ;;  %vm13318_vm0 = vcmask 1041408   ;;  %vm525_vm1 = vcmask 1046528   ;;  %s6844_s8 = smov 3   ;;  %vm636_vm2 = vcmask 1045504   ;;  %vm13319_vm3 = vcmask 1044480  }
   0xc   : > { %s6845_s9 = smov 6   ;;  %s6846_s10 = smov 9   ;;  %vm858_vm4 = vcmask 1043456   ;;  %vm969_vm5 = vcmask 1042432   ;;  %vm1190_vm6 = vcmask 1040384   ;;  %vm1361_vm7 = vcmask 23552  }
   0xd   : > { %s270_s26 = scalar_select %p269_p3, %s6910_s25, 1  ;;  %vm1382_vm8 = vcmask 48128   ;;  %vm1403_vm9 = vcmask 72704   ;;  %vm1424_vm10 = vcmask 97280   ;;  %vm1445_vm11 = vcmask 121856  }
   0xe   : > { %s6847_s11 = smov 12   ;;  %s6848_s12 = smov 15   ;;  %vm1466_vm12 = vcmask 146432   ;;  %vm1487_vm13 = vcmask 171008   ;;  %vm1508_vm14 = vcmask 195584   ;;  %vm2719_vm15 = vcmask 220160  }
   0xf   : > { %s6546_s27 = sshll.u32 %s270_s26, 8  ;;  %s6849_s13 = smov 18  }
  0x10   : > { %s6919_s30 = scalar_lea.vmem %s13288_s0, %s6546_s27  ;;  %s6850_s14 = smov 21  }
  0x11   : > { %v286_v0 = vld [vmem:[%s6919_s30 + $0x30] sm:$0xff]  ;;  %v287_v1 = vld [vmem:[%s6919_s30 + $0x38] sm:$0xff]  ;;  %v284_v2 = vld [vmem:[%s6919_s30 + $0x20] sm:$0xff]  ;;  %s6851_s15 = smov 24   ;;  %s6852_s16 = smov 27  }
  0x12   : > { %v315_v3 = vperm.slane %v286_v0, 0  ;;  %v386_v4 = vrot.slane %v286_v0, 6  ;;  %v387_v5 = vrot.slane %v287_v1, 6  ;;  %v285_v6 = vld [vmem:[%s6919_s30 + $0x28] sm:$0xff]  ;;  %v314_v7 = vperm.slane %v284_v2, 0  ;;  %v280_v8 = vld [vmem:[%s6919_s30] sm:$0xff] }
  0x13   : > { %v383_v9 = vrot.slane %v284_v2, 6  ;;  %v384_v10 = vrot.slane %v285_v6, 6  ;;  %v281_v11 = vld [vmem:[%s6919_s30 + $0x8] sm:$0xff]  ;;  %v312_v12 = vperm.slane %v280_v8, 0  ;;  %v377_v13 = vrot.slane %v280_v8, 6  ;;  %v282_v26 = vld [vmem:[%s6919_s30 + $0x10] sm:$0xff] }
  0x14   : > { %v6928_v14 = vsel %vm13318_vm0, %v386_v4, %v387_v5  ;;  %v6931_v15 = vsel %vm13318_vm0, %v315_v3, %v386_v4  ;;  %v328_v16 = vperm.slane %v281_v11, 7  ;;  %v378_v17 = vrot.slane %v281_v11, 6  ;;  %v283_v27 = vld [vmem:[%s6919_s30 + $0x18] sm:$0xff]  ;;  %v290_v40 = vld [vmem:[%s6919_s30 + $0x50] sm:$0xff]  ;;  %v288_v50 = vld [vmem:[%s6919_s30 + $0x40] sm:$0xff]  ;;  %s6853_s17 = smov 54  }
  0x15   : > { %v541_v18 = vrot.slane %v6931_v15, 1  ;;  %v542_v19 = vrot.slane %v6928_v14, 1  ;;  %v6936_v20 = vsel %vm13318_vm0, %v383_v9, %v384_v10  ;;  %v6939_v21 = vsel %vm13318_vm0, %v314_v7, %v383_v9  ;;  %v291_v49 = vld [vmem:[%s6919_s30 + $0x58] sm:$0xff]  ;;  %v289_v51 = vld [vmem:[%s6919_s30 + $0x48] sm:$0xff]  ;;  %s6854_s18 = smov 81   ;;  %s6855_s19 = smov 108  }
  0x16   : > { %v536_v22 = vrot.slane %v6939_v21, 1  ;;  %v537_v23 = vrot.slane %v6936_v20, 1  ;;  %v6944_v24 = vsel %vm13318_vm0, %v377_v13, %v378_v17  ;;  %v6947_v25 = vsel %vm13318_vm0, %v312_v12, %v377_v13  ;;  %v293_v60 = vld [vmem:[%s6919_s30 + $0x68] sm:$0xff]  ;;  %s6860_s23 = smov 32   ;;  %s6861_s26 = smov 64  }
  0x17   : > { %v543_v28 = vsel %vm525_vm1, %v541_v18, %v542_v19  ;;  %v6953_v29 = vsel %vm13318_vm0, %v378_v17, %v328_v16  ;;  %v526_v30 = vrot.slane %v6947_v25, 1  ;;  %v527_v31 = vrot.slane %v6944_v24, 1  ;;  %s6862_s27 = smov 96  }
  0x18   : > { %588 = vrot.lane.b32.xlu2 %v543_v28, %s6844_s8  ;;  %v538_v32 = vsel %vm525_vm1, %v536_v22, %v537_v23  ;;  %v529_v33 = vrot.slane %v6953_v29, 1  ;;  %v331_v34 = vperm.slane %v287_v1, 7  ;;  %v330_v35 = vperm.slane %v285_v6, 7 }
  0x19   : > { %584 = vrot.lane.b32.xlu1 %v538_v32, %s6844_s8  ;;  %v528_v36 = vsel %vm525_vm1, %v526_v30, %v527_v31  ;;  %v313_v37 = vperm.slane %v282_v26, 0  ;;  %v329_v38 = vperm.slane %v283_v27, 7  ;;  %v380_v39 = vrot.slane %v282_v26, 6 }
  0x1a   : > { %v530_v41 = vsel %vm525_vm1, %v527_v31, %v529_v33  ;;  %v6965_v42 = vsel %vm13318_vm0, %v387_v5, %v331_v34  ;;  %v6968_v43 = vsel %vm13318_vm0, %v384_v10, %v330_v35  ;;  %v381_v44 = vrot.slane %v283_v27, 6  ;;  %v292_v5 = vld [vmem:[%s6919_s30 + $0x60] sm:$0xff]  ;;  %v297_v35 = vld [vmem:[%s6919_s30 + $0x88] sm:$0xff] }
  0x1b   : > { %v6575_v45 = vpack.i.bf16 %v530_v41, %v528_v36  ;;  %v544_v46 = vrot.slane %v6965_v42, 1  ;;  %v539_v47 = vrot.slane %v6968_v43, 1  ;;  %v6973_v48 = vsel %vm13318_vm0, %v313_v37, %v380_v39  ;;  %v296_v33 = vld [vmem:[%s6919_s30 + $0x80] sm:$0xff]  ;;  %v294_v36 = vld [vmem:[%s6919_s30 + $0x70] sm:$0xff]  ;;  %v295_v37 = vld [vmem:[%s6919_s30 + $0x78] sm:$0xff] }
  0x1c   : > { %v6979_v52 = vsel %vm13318_vm0, %v380_v39, %v381_v44  ;;  %v6982_v53 = vsel %vm13318_vm0, %v381_v44, %v329_v38  ;;  %v531_v54 = vrot.slane %v6973_v48, 1  ;;  %v317_v55 = vperm.slane %v290_v40, 0 }
  0x1d   : > { %6576 = vrot.lane.b32.xlu0 %v6575_v45, %s6844_s8  ;;  %v545_v56 = vsel %vm525_vm1, %v542_v19, %v544_v46  ;;  %v540_v57 = vsel %vm525_vm1, %v537_v23, %v539_v47  ;;  %v532_v58 = vrot.slane %v6979_v52, 1  ;;  %v534_v59 = vrot.slane %v6982_v53, 1 }
  0x1e   : > { %v392_v61 = vrot.slane %v290_v40, 6  ;;  %v393_v62 = vrot.slane %v291_v49, 6  ;;  %v332_v63 = vperm.slane %v289_v51, 7  ;;  %v389_v0 = vrot.slane %v288_v50, 6 }
  0x1f   : > { %v533_v1 = vsel %vm525_vm1, %v531_v54, %v532_v58  ;;  %v535_v2 = vsel %vm525_vm1, %v532_v58, %v534_v59  ;;  %v390_v3 = vrot.slane %v289_v51, 6  ;;  %v316_v4 = vperm.slane %v288_v50, 0 }
  0x20   : > { %590 = vrot.lane.b32.xlu2 %v545_v56, %s6844_s8  ;;  %v6580_v6 = vpack.i.bf16 %v535_v2, %v533_v1  ;;  %v6996_v7 = vsel %vm13318_vm0, %v392_v61, %v393_v62  ;;  %v6999_v8 = vsel %vm13318_vm0, %v317_v55, %v392_v61  ;;  %v334_v9 = vperm.slane %v293_v60, 7  ;;  %v299_v61 = vld [vmem:[%s6919_s30 + $0x98] sm:$0xff] }
  0x21   : > { %586 = vrot.lane.b32.xlu1 %v540_v57, %s6844_s8  ;;  %v551_v10 = vrot.slane %v6999_v8, 1  ;;  %v552_v11 = vrot.slane %v6996_v7, 1  ;;  %v7005_v12 = vsel %vm13318_vm0, %v389_v0, %v390_v3  ;;  %v7008_v13 = vsel %vm13318_vm0, %v390_v3, %v332_v63 }
  0x22   : > { %v547_v16 = vrot.slane %v7005_v12, 1  ;;  %v549_v17 = vrot.slane %v7008_v13, 1  ;;  %v7013_v18 = vsel %vm13318_vm0, %v316_v4, %v389_v0  ;;  %v395_v19 = vrot.slane %v292_v5, 6 }
  0x23   : > { %v396_v22 = vrot.slane %v293_v60, 6  ;;  %v318_v23 = vperm.slane %v292_v5, 0  ;;  %v553_v26 = vsel %vm525_vm1, %v551_v10, %v552_v11  ;;  %v546_v27 = vrot.slane %v7013_v18, 1  ;;  %v298_v60 = vld [vmem:[%s6919_s30 + $0x90] sm:$0xff] }
  0x24   : > { %v550_v28 = vsel %vm525_vm1, %v547_v16, %v549_v17  ;;  %v333_v32 = vperm.slane %v291_v49, 7  ;;  %v320_v40 = vperm.slane %v296_v33, 0  ;;  %v401_v41 = vrot.slane %v296_v33, 6 }
  0x25   : > { %6581 = vrot.lane.b32.xlu0 %v6580_v6, %s6844_s8  ;;  %v7020_v30 = vsel %vm13318_vm0, %v395_v19, %v396_v22  ;;  %v7023_v31 = vsel %vm13318_vm0, %v396_v22, %v334_v9  ;;  %v7027_v34 = vsel %vm13318_vm0, %v318_v23, %v395_v19  ;;  %v548_v44 = vsel %vm525_vm1, %v546_v27, %v547_v16 }
  0x26   : > { %v557_v38 = vrot.slane %v7020_v30, 1  ;;  %v559_v39 = vrot.slane %v7023_v31, 1  ;;  %v556_v45 = vrot.slane %v7027_v34, 1  ;;  %v7039_v46 = vsel %vm13318_vm0, %v393_v62, %v333_v32 }
  0x27   : > { %v402_v47 = vrot.slane %v297_v35, 6  ;;  %v335_v49 = vperm.slane %v295_v37, 7  ;;  %v398_v50 = vrot.slane %v294_v36, 6  ;;  %v399_v51 = vrot.slane %v295_v37, 6 }
  0x28   : > { %596 = vrot.lane.b32.xlu2 %v553_v26, %s6844_s8  ;;  %v560_v54 = vsel %vm525_vm1, %v557_v38, %v559_v39  ;;  %v554_v55 = vrot.slane %v7039_v46, 1  ;;  %v7045_v56 = vsel %vm13318_vm0, %v320_v40, %v401_v41  ;;  %v558_v57 = vsel %vm525_vm1, %v556_v45, %v557_v38 }
  0x29   : > { %594 = vrot.lane.b32.xlu1 %v550_v28, %s6844_s8  ;;  %v7049_v58 = vsel %vm13318_vm0, %v401_v41, %v402_v47  ;;  %v319_v59 = vperm.slane %v294_v36, 0  ;;  %v7054_v62 = vsel %vm13318_vm0, %v398_v50, %v399_v51  ;;  %v7057_v63 = vsel %vm13318_vm0, %v399_v51, %v335_v49 }
  0x2a   : > { %v566_v0 = vrot.slane %v7045_v56, 1  ;;  %v555_v1 = vsel %vm525_vm1, %v552_v11, %v554_v55  ;;  %v567_v2 = vrot.slane %v7049_v58, 1  ;;  %v337_v3 = vperm.slane %v299_v61, 7 }
  0x2b   : > { %v404_v4 = vrot.slane %v298_v60, 6  ;;  %v562_v5 = vrot.slane %v7054_v62, 1  ;;  %v564_v6 = vrot.slane %v7057_v63, 1  ;;  %v7067_v9 = vsel %vm13318_vm0, %v319_v59, %v398_v50 }
  0x2c   : > { %v405_v10 = vrot.slane %v299_v61, 6  ;;  %v321_v16 = vperm.slane %v298_v60, 0  ;;  %v568_v17 = vsel %vm525_vm1, %v566_v0, %v567_v2  ;;  %v561_v19 = vrot.slane %v7067_v9, 1 }
  0x2d   : > { %592 = vrot.lane.b32.xlu0 %v548_v44, %s6844_s8  ;;  %v565_v11 = vsel %vm525_vm1, %v562_v5, %v564_v6  ;;  %v336_v26 = vperm.slane %v297_v35, 7  ;;  %v642_v40 = vrot.slane %v6973_v48, 2  ;;  %v643_v41 = vrot.slane %v6979_v52, 2 }
  0x2e   : > { %v7074_v22 = vsel %vm13318_vm0, %v404_v4, %v405_v10  ;;  %v7077_v23 = vsel %vm13318_vm0, %v405_v10, %v337_v3  ;;  %v7080_v27 = vsel %vm13318_vm0, %v321_v16, %v404_v4  ;;  %v563_v33 = vsel %vm525_vm1, %v561_v19, %v562_v5 }
  0x2f   : > { %13552 = vst [vmem:[#allocation3_spill] sm:$0xff] %v7074_v22  ;;  %v572_v28 = vrot.slane %v7074_v22, 1  ;;  %v574_v32 = vrot.slane %v7077_v23, 1  ;;  %v571_v36 = vrot.slane %v7080_v27, 1  ;;  %v7089_v37 = vsel %vm13318_vm0, %v402_v47, %v336_v26 }
  0x30   : > { %602 = vrot.lane.b32.xlu2 %v560_v54, %s6844_s8  ;;  %13553 = vst [vmem:[#allocation4_spill] sm:$0xff] %v7080_v27  ;;  %v569_v38 = vrot.slane %v7089_v37, 1  ;;  %v645_v44 = vrot.slane %v6982_v53, 2  ;;  %v647_v47 = vrot.slane %v6939_v21, 2  ;;  %v648_v49 = vrot.slane %v6936_v20, 2 }
  0x31   : > { %600 = vrot.lane.b32.xlu1 %v558_v57, %s6844_s8  ;;  %v575_v35 = vsel %vm525_vm1, %v572_v28, %v574_v32  ;;  %v573_v39 = vsel %vm525_vm1, %v571_v36, %v572_v28  ;;  %v637_v50 = vrot.slane %v6947_v25, 2  ;;  %v644_v51 = vsel %vm636_vm2, %v642_v40, %v643_v41 }
  0x32   : > { %v570_v45 = vsel %vm525_vm1, %v567_v2, %v569_v38  ;;  %v646_v54 = vsel %vm636_vm2, %v643_v41, %v645_v44  ;;  %v638_v55 = vrot.slane %v6944_v24, 2  ;;  %v640_v57 = vrot.slane %v6953_v29, 2 }
  0x33   : > { %v649_v59 = vsel %vm636_vm2, %v647_v47, %v648_v49  ;;  %v6590_v60 = vpack.i.bf16 %v646_v54, %v644_v51  ;;  %v653_v2 = vrot.slane %v6928_v14, 2  ;;  %v655_v3 = vrot.slane %v6965_v42, 2 }
  0x34   : > { %v639_v61 = vsel %vm636_vm2, %v637_v50, %v638_v55  ;;  %v641_v0 = vsel %vm636_vm2, %v638_v55, %v640_v57  ;;  %v652_v4 = vrot.slane %v6931_v15, 2  ;;  %v650_v10 = vrot.slane %v6968_v43, 2 }
  0x35   : > { %598 = vrot.lane.b32.xlu0 %v555_v1, %s6844_s8  ;;  %v6585_v1 = vpack.i.bf16 %v641_v0, %v639_v61  ;;  %v656_v5 = vsel %vm636_vm2, %v653_v2, %v655_v3  ;;  %v662_v16 = vrot.slane %v6999_v8, 2  ;;  %v660_v26 = vrot.slane %v7008_v13, 2 }
  0x36   : > { %v654_v6 = vsel %vm636_vm2, %v652_v4, %v653_v2  ;;  %v651_v19 = vsel %vm636_vm2, %v648_v49, %v650_v10  ;;  %v668_v36 = vrot.slane %v7020_v30, 2  ;;  %v665_v44 = vrot.slane %v7039_v46, 2 }
  0x37   : > { %v678_v47 = vrot.slane %v7049_v58, 2  ;;  %v673_v50 = vrot.slane %v7054_v62, 2  ;;  %v675_v51 = vrot.slane %v7057_v63, 2  ;;  %v672_v57 = vrot.slane %v7067_v9, 2 }
  0x38   : > { %608 = vrot.lane.b32.xlu2 %v568_v17, %s6844_s8  ;;  %v663_v17 = vrot.slane %v6996_v7, 2  ;;  %v682_v0 = vrot.slane %v7080_v27, 2  ;;  %v680_v2 = vrot.slane %v7089_v37, 2  ;;  %v753_v3 = vrot.slane %v6973_v48, 3 }
  0x39   : > { %606 = vrot.lane.b32.xlu1 %v565_v11, %s6844_s8  ;;  %v658_v11 = vrot.slane %v7005_v12, 2  ;;  %v676_v55 = vsel %vm636_vm2, %v673_v50, %v675_v51  ;;  %v674_v61 = vsel %vm636_vm2, %v672_v57, %v673_v50  ;;  %v754_v4 = vrot.slane %v6979_v52, 3 }
  0x3a   : > { %v664_v28 = vsel %vm636_vm2, %v662_v16, %v663_v17  ;;  %v666_v49 = vsel %vm636_vm2, %v663_v17, %v665_v44  ;;  %v681_v10 = vsel %vm636_vm2, %v678_v47, %v680_v2  ;;  %v758_v16 = vrot.slane %v6939_v21, 3 }
  0x3b   : > { %v661_v32 = vsel %vm636_vm2, %v658_v11, %v660_v26  ;;  %v759_v17 = vrot.slane %v6936_v20, 3  ;;  %v766_v44 = vrot.slane %v6965_v42, 3  ;;  %v761_v51 = vrot.slane %v6968_v43, 3 }
  0x3c   : > { %v768_v2 = vrot.slane %v7013_v18, 3 }
  0x3d   : > { %604 = vrot.lane.b32.xlu0 %v563_v33, %s6844_s8  ;;  %v657_v33 = vrot.slane %v7013_v18, 2 }
  0x3f   : > { %v659_v38 = vsel %vm636_vm2, %v657_v33, %v658_v11  ;;  %v751_v33 = vrot.slane %v6953_v29, 3 }
  0x40   : > { %614 = vrot.lane.b32.xlu2 %v575_v35, %s6844_s8  ;;  %v670_v35 = vrot.slane %v7023_v31, 2 }
  0x41   : > { %612 = vrot.lane.b32.xlu1 %v573_v39, %s6844_s8  ;;  %v667_v39 = vrot.slane %v7027_v34, 2 }
  0x42   : > { %v671_v40 = vsel %vm636_vm2, %v668_v36, %v670_v35 }
  0x43   : > { %v669_v41 = vsel %vm636_vm2, %v667_v39, %v668_v36  ;;  %v760_v36 = vsel %vm13319_vm3, %v758_v16, %v759_v17 }
  0x45   : > { %610 = vrot.lane.b32.xlu0 %v570_v45, %s6844_s8  ;;  %v677_v45 = vrot.slane %v7045_v56, 2 }
  0x47   : > { %v679_v54 = vsel %vm636_vm2, %v677_v45, %v678_v47  ;;  %v763_v47 = vrot.slane %v6931_v15, 3 }
  0x48   : > { %695 = vrot.lane.b32.xlu2 %v649_v59, %s6845_s9  ;;  %v683_v59 = vrot.slane %v7074_v22, 2 }
  0x49   : > { %6591 = vrot.lane.b32.xlu1 %v6590_v60, %s6845_s9  ;;  %v685_v60 = vrot.slane %v7077_v23, 2 }
  0x4d   : > { %6586 = vrot.lane.b32.xlu0 %v6585_v1, %s6845_s9  ;;  %v686_v1 = vsel %vm636_vm2, %v683_v59, %v685_v60  ;;  %v769_v60 = vrot.slane %v7005_v12, 3 }
  0x50   : > { %701 = vrot.lane.b32.xlu2 %v656_v5, %s6845_s9  ;;  %v684_v5 = vsel %vm636_vm2, %v682_v0, %v683_v59  ;;  %v762_v59 = vsel %vm13319_vm3, %v759_v17, %v761_v51  ;;  %v796_v51 = vrot.slane %v7077_v23, 3 }
  0x51   : > { %699 = vrot.lane.b32.xlu1 %v654_v6, %s6845_s9  ;;  %v756_v6 = vrot.slane %v6982_v53, 3 }
  0x53   : > { %v757_v26 = vsel %vm13319_vm3, %v754_v4, %v756_v6  ;;  %v770_v6 = vsel %vm13319_vm3, %v768_v2, %v769_v60  ;;  %v865_v2 = vrot.slane %v6979_v52, 4 }
  0x55   : > { %697 = vrot.lane.b32.xlu0 %v651_v19, %s6845_s9  ;;  %v755_v19 = vsel %vm13319_vm3, %v753_v3, %v754_v4  ;;  %v779_v3 = vrot.slane %v7020_v30, 3  ;;  %v781_v4 = vrot.slane %v7023_v31, 3 }
  0x56   : > { %v6600_v35 = vpack.i.bf16 %v757_v26, %v755_v19  ;;  %v776_v26 = vrot.slane %v7039_v46, 3 }
  0x57   : > { %v782_v17 = vsel %vm13319_vm3, %v779_v3, %v781_v4  ;;  %v867_v4 = vrot.slane %v6982_v53, 4 }
  0x58   : > { %707 = vrot.lane.b32.xlu2 %v664_v28, %s6845_s9  ;;  %v748_v28 = vrot.slane %v6947_v25, 3 }
  0x59   : > { %705 = vrot.lane.b32.xlu1 %v661_v32, %s6845_s9  ;;  %v749_v32 = vrot.slane %v6944_v24, 3 }
  0x5b   : > { %v752_v39 = vsel %vm13319_vm3, %v749_v32, %v751_v33  ;;  %v789_v33 = vrot.slane %v7049_v58, 3 }
  0x5d   : > { %703 = vrot.lane.b32.xlu0 %v659_v38, %s6845_s9  ;;  %v750_v38 = vsel %vm13319_vm3, %v748_v28, %v749_v32  ;;  %v788_v32 = vrot.slane %v7045_v56, 3 }
  0x60   : > { %713 = vrot.lane.b32.xlu2 %v671_v40, %s6845_s9  ;;  %v6595_v40 = vpack.i.bf16 %v752_v39, %v750_v38  ;;  %v784_v38 = vrot.slane %v7054_v62, 3  ;;  %v786_v39 = vrot.slane %v7057_v63, 3 }
  0x61   : > { %711 = vrot.lane.b32.xlu1 %v669_v41, %s6845_s9  ;;  %v764_v41 = vrot.slane %v6928_v14, 3 }
  0x63   : > { %v765_v50 = vsel %vm13319_vm3, %v763_v47, %v764_v41  ;;  %v783_v47 = vrot.slane %v7067_v9, 3 }
  0x65   : > { %709 = vrot.lane.b32.xlu0 %v666_v49, %s6845_s9  ;;  %v767_v49 = vsel %vm13319_vm3, %v764_v41, %v766_v44  ;;  %v790_v41 = vsel %vm13319_vm3, %v788_v32, %v789_v33  ;;  %v787_v44 = vsel %vm13319_vm3, %v784_v38, %v786_v39  ;;  %v860_v39 = vrot.slane %v6944_v24, 4 }
  0x68   : > { %719 = vrot.lane.b32.xlu2 %v679_v54, %s6845_s9  ;;  %v773_v54 = vrot.slane %v6999_v8, 3 }
  0x69   : > { %717 = vrot.lane.b32.xlu1 %v676_v55, %s6845_s9  ;;  %v774_v55 = vrot.slane %v6996_v7, 3 }
  0x6b   : > { %v775_v0 = vsel %vm13319_vm3, %v773_v54, %v774_v55 }
  0x6d   : > { %715 = vrot.lane.b32.xlu0 %v674_v61, %s6845_s9  ;;  %v771_v61 = vrot.slane %v7008_v13, 3 }
  0x70   : > { %725 = vrot.lane.b32.xlu2 %v686_v1, %s6845_s9  ;;  %v772_v1 = vsel %vm13319_vm3, %v769_v60, %v771_v61 }
  0x71   : > { %723 = vrot.lane.b32.xlu1 %v684_v5, %s6845_s9 }
  0x72   : > { %v7172_v11 = vpop.permute.xlu2 %588 }
  0x75   : > { %721 = vrot.lane.b32.xlu0 %v681_v10, %s6845_s9  ;;  %v778_v10 = vrot.slane %v7027_v34, 3 }
  0x77   : > { %v780_v19 = vsel %vm13319_vm3, %v778_v10, %v779_v3 }
  0x78   : > { %806 = vrot.lane.b32.xlu2 %v760_v36, %s6846_s10 }
  0x79   : > { %6601 = vrot.lane.b32.xlu1 %v6600_v35, %s6846_s10  ;;  %v777_v35 = vsel %vm13319_vm3, %v774_v55, %v776_v26  ;;  %v785_v55 = vsel %vm13319_vm3, %v783_v47, %v784_v38  ;;  %v859_v38 = vrot.slane %v6947_v25, 4 }
  0x7a   : > { %v7186_v45 = vpop.permute.xlu2 %590 }
  0x7d   : > { %6596 = vrot.lane.b32.xlu0 %v6595_v40, %s6846_s10 }
  0x80   : > { %812 = vrot.lane.b32.xlu2 %v767_v49, %s6846_s10 }
  0x81   : > { %810 = vrot.lane.b32.xlu1 %v765_v50, %s6846_s10  ;;  %v794_v50 = vrot.slane %v7074_v22, 3 }
  0x82   : > { %v7197_v57 = vpop.permute.xlu2 %596 }
  0x83   : > { %v797_v61 = vsel %vm13319_vm3, %v794_v50, %v796_v51 }
  0x85   : > { %808 = vrot.lane.b32.xlu0 %v762_v59, %s6846_s10  ;;  %v793_v59 = vrot.slane %v7080_v27, 3 }
  0x87   : > { %v795_v3 = vsel %vm13319_vm3, %v793_v59, %v794_v50  ;;  %v861_v50 = vsel %vm858_vm4, %v859_v38, %v860_v39  ;;  %v885_v38 = vrot.slane %v6996_v7, 4 }
  0x88   : > { %818 = vrot.lane.b32.xlu2 %v775_v0, %s6846_s10  ;;  %v791_v0 = vrot.slane %v7089_v37, 3 }
  0x89   : > { %816 = vrot.lane.b32.xlu1 %v772_v1, %s6846_s10  ;;  %v864_v1 = vrot.slane %v6973_v48, 4 }
  0x8a   : > { %v7210_v5 = vpop.permute.xlu2 %602  ;;  %v792_v10 = vsel %vm13319_vm3, %v789_v33, %v791_v0  ;;  %v877_v0 = vrot.slane %v6965_v42, 4 }
  0x8b   : > { %v7214_v16 = vpop.permute.xlu1 %584  ;;  %v866_v26 = vsel %vm858_vm4, %v864_v1, %v865_v2 }
  0x8d   : > { %814 = vrot.lane.b32.xlu0 %v770_v6, %s6846_s10 }
  0x8f   : > { %v7220_v28 = vpop.permute.xlu0 %6576 }
  0x90   : > { %824 = vrot.lane.b32.xlu2 %v782_v17, %s6846_s10  ;;  %v869_v17 = vrot.slane %v6939_v21, 4 }
  0x91   : > { %822 = vrot.lane.b32.xlu1 %v780_v19, %s6846_s10  ;;  %v870_v19 = vrot.slane %v6936_v20, 4 }
  0x92   : > { %v7226_v36 = vpop.permute.xlu2 %608 }
  0x93   : > { %v7231_v40 = vpop.permute.xlu1 %586  ;;  %v871_v33 = vsel %vm858_vm4, %v869_v17, %v870_v19  ;;  %v872_v17 = vrot.slane %v6968_v43, 4 }
  0x95   : > { %820 = vrot.lane.b32.xlu0 %v777_v35, %s6846_s10  ;;  %v868_v35 = vsel %vm858_vm4, %v865_v2, %v867_v4  ;;  %v874_v2 = vrot.slane %v6931_v15, 4 }
  0x96   : > { %v6610_v47 = vpack.i.bf16 %v868_v35, %v866_v26  ;;  %v884_v35 = vrot.slane %v6999_v8, 4 }
  0x97   : > { %v7237_v49 = vpop.permute.xlu0 %6581 }
  0x98   : > { %830 = vrot.lane.b32.xlu2 %v790_v41, %s6846_s10  ;;  %v862_v41 = vrot.slane %v6953_v29, 4 }
  0x99   : > { %828 = vrot.lane.b32.xlu1 %v787_v44, %s6846_s10 }
  0x9a   : > { %v7243_v54 = vpop.permute.xlu2 %614  ;;  %v863_v51 = vsel %vm858_vm4, %v860_v39, %v862_v41  ;;  %v873_v41 = vsel %vm858_vm4, %v870_v19, %v872_v17  ;;  %v890_v19 = vrot.slane %v7020_v30, 4  ;;  %v889_v17 = vrot.slane %v7027_v34, 4 }
  0x9b   : > { %13554 = vst [vmem:[#allocation5_spill] sm:$0xff] %v7243_v54  ;;  %v7247_v60 = vpop.permute.xlu1 %594  ;;  %v6605_v59 = vpack.i.bf16 %v863_v51, %v861_v50  ;;  %v886_v51 = vsel %vm858_vm4, %v884_v35, %v885_v38  ;;  %v894_v54 = vrot.slane %v7067_v9, 4 }
  0x9d   : > { %826 = vrot.lane.b32.xlu0 %v785_v55, %s6846_s10 }
  0x9f   : > { %v7256_v6 = vpop.permute.xlu0 %592 }
  0xa0   : > { %836 = vrot.lane.b32.xlu2 %v797_v61, %s6846_s10  ;;  %v875_v61 = vrot.slane %v6928_v14, 4 }
  0xa1   : > { %834 = vrot.lane.b32.xlu1 %v795_v3, %s6846_s10 }
  0xa2   : > { %v7264_v32 = vpop.permute.xlu2 %695  ;;  %v878_v4 = vsel %vm858_vm4, %v875_v61, %v877_v0 }
  0xa3   : > { %v7270_v44 = vpop.permute.xlu1 %600 }
  0xa5   : > { %832 = vrot.lane.b32.xlu0 %v792_v10, %s6846_s10  ;;  %v876_v10 = vsel %vm858_vm4, %v874_v2, %v875_v61  ;;  %v879_v61 = vrot.slane %v7013_v18, 4  ;;  %v892_v2 = vrot.slane %v7023_v31, 4 }
  0xa7   : > { %v7276_v55 = vpop.permute.xlu0 %598 }
  0xa8   : > { %917 = vrot.lane.b32.xlu2 %v871_v33, %s6847_s11  ;;  %v880_v33 = vrot.slane %v7005_v12, 4 }
  0xa9   : > { %6611 = vrot.lane.b32.xlu1 %v6610_v47, %s6847_s11  ;;  %v882_v47 = vrot.slane %v7008_v13, 4 }
  0xaa   : > { %v7282_v1 = vpop.permute.xlu2 %701 }
  0xab   : > { %v7285_v3 = vpop.permute.xlu1 %606 }
  0xad   : > { %6606 = vrot.lane.b32.xlu0 %v6605_v59, %s6847_s11  ;;  %v883_v59 = vsel %vm858_vm4, %v880_v33, %v882_v47  ;;  %v891_v47 = vsel %vm858_vm4, %v889_v17, %v890_v19 }
  0xaf   : > { %v7291_v26 = vpop.permute.xlu0 %604 }
  0xb0   : > { %13555 = vst [vmem:[#allocation6_spill] sm:$0xff] %v7291_v26  ;;  %923 = vrot.lane.b32.xlu2 %v878_v4, %s6847_s11 }
  0xb1   : > { %921 = vrot.lane.b32.xlu1 %v876_v10, %s6847_s11  ;;  %v881_v10 = vsel %vm858_vm4, %v879_v61, %v880_v33  ;;  %v899_v33 = vrot.slane %v7045_v56, 4  ;;  %v900_v61 = vrot.slane %v7049_v58, 4 }
  0xb2   : > { %v7297_v39 = vpop.permute.xlu2 %707 }
  0xb3   : > { %13556 = vst [vmem:[#allocation7_spill] sm:$0xff] %v7297_v39  ;;  %v7302_v50 = vpop.permute.xlu1 %612 }
  0xb4   : > { %13557 = vst [vmem:[#allocation8_spill] sm:$0xff] %v7302_v50 }
  0xb5   : > { %919 = vrot.lane.b32.xlu0 %v873_v41, %s6847_s11  ;;  %v893_v41 = vsel %vm858_vm4, %v890_v19, %v892_v2  ;;  %v895_v2 = vrot.slane %v7054_v62, 4  ;;  %v897_v19 = vrot.slane %v7057_v63, 4 }
  0xb7   : > { %v7308_v0 = vpop.permute.xlu0 %610 }
  0xb8   : > { %13558 = vst [vmem:[#allocation9_spill] sm:$0xff] %v7308_v0  ;;  %929 = vrot.lane.b32.xlu2 %v886_v51, %s6847_s11  ;;  %v887_v51 = vrot.slane %v7039_v46, 4 }
  0xb9   : > { %927 = vrot.lane.b32.xlu1 %v883_v59, %s6847_s11 }
  0xba   : > { %v7314_v4 = vpop.permute.xlu2 %713 }
  0xbb   : > { %13559 = vst [vmem:[#allocation10_spill] sm:$0xff] %v7314_v4  ;;  %v7318_v35 = vpop.permute.xlu1 %6591 }
  0xbd   : > { %925 = vrot.lane.b32.xlu0 %v881_v10, %s6847_s11  ;;  %v888_v10 = vsel %vm858_vm4, %v885_v38, %v887_v51  ;;  %v905_v38 = vrot.slane %v7074_v22, 4  ;;  %v907_v51 = vrot.slane %v7077_v23, 4 }
  0xbf   : > { %v7324_v59 = vpop.permute.xlu0 %6586 }
  0xc0   : > { %935 = vrot.lane.b32.xlu2 %v893_v41, %s6847_s11  ;;  %v901_v41 = vsel %vm858_vm4, %v899_v33, %v900_v61  ;;  %v904_v33 = vrot.slane %v7080_v27, 4 }
  0xc1   : > { %933 = vrot.lane.b32.xlu1 %v891_v47, %s6847_s11  ;;  %v898_v47 = vsel %vm858_vm4, %v895_v2, %v897_v19  ;;  %v908_v19 = vsel %vm858_vm4, %v905_v38, %v907_v51  ;;  %v980_v51 = vrot.slane %v6939_v21, 5 }
  0xc2   : > { %v7330_v50 = vpop.permute.xlu2 %719  ;;  %v906_v0 = vsel %vm858_vm4, %v904_v33, %v905_v38  ;;  %v970_v33 = vrot.slane %v6947_v25, 5 }
  0xc3   : > { %13560 = vst [vmem:[#allocation11_spill] sm:$0xff] %v7330_v50  ;;  %v7335_v17 = vpop.permute.xlu1 %699 }
  0xc4   : > { %13561 = vst [vmem:[#allocation12_spill] sm:$0xff] %v7335_v17 }
  0xc5   : > { %931 = vrot.lane.b32.xlu0 %v888_v10, %s6847_s11  ;;  %v896_v10 = vsel %vm858_vm4, %v894_v54, %v895_v2 }
  0xc7   : > { %v7341_v4 = vpop.permute.xlu0 %697 }
  0xc8   : > { %13562 = vst [vmem:[#allocation13_spill] sm:$0xff] %v7341_v4  ;;  %941 = vrot.lane.b32.xlu2 %v901_v41, %s6847_s11  ;;  %v902_v41 = vrot.slane %v7089_v37, 4  ;;  %v976_v4 = vrot.slane %v6979_v52, 5 }
  0xc9   : > { %939 = vrot.lane.b32.xlu1 %v898_v47, %s6847_s11  ;;  %v975_v47 = vrot.slane %v6973_v48, 5 }
  0xca   : > { %v7347_v50 = vpop.permute.xlu2 %725  ;;  %v903_v2 = vsel %vm858_vm4, %v900_v61, %v902_v41 }
  0xcb   : > { %13563 = vst [vmem:[#allocation14_spill] sm:$0xff] %v7347_v50  ;;  %v7351_v17 = vpop.permute.xlu1 %705  ;;  %v978_v50 = vrot.slane %v6982_v53, 5 }
  0xcc   : > { %13564 = vst [vmem:[#allocation15_spill] sm:$0xff] %v7351_v17  ;;  %v977_v17 = vsel %vm969_vm5, %v975_v47, %v976_v4 }
  0xcd   : > { %937 = vrot.lane.b32.xlu0 %v896_v10, %s6847_s11  ;;  %v981_v10 = vrot.slane %v6936_v20, 5  ;;  %v979_v38 = vsel %vm969_vm5, %v976_v4, %v978_v50  ;;  %v986_v4 = vrot.slane %v6928_v14, 5 }
  0xce   : > { %v6620_v61 = vpack.i.bf16 %v979_v38, %v977_v17  ;;  %v985_v17 = vrot.slane %v6931_v15, 5 }
  0xcf   : > { %v7360_v54 = vpop.permute.xlu0 %703 }
  0xd0   : > { %13565 = vst [vmem:[#allocation16_spill] sm:$0xff] %v7360_v54  ;;  %947 = vrot.lane.b32.xlu2 %v908_v19, %s6847_s11  ;;  %v971_v54 = vrot.slane %v6944_v24, 5  ;;  %v973_v19 = vrot.slane %v6953_v29, 5  ;;  %v987_v38 = vsel %vm969_vm5, %v985_v17, %v986_v4 }
  0xd1   : > { %945 = vrot.lane.b32.xlu1 %v906_v0, %s6847_s11  ;;  %v982_v0 = vsel %vm969_vm5, %v980_v51, %v981_v10 }
  0xd2   : > { %v7368_v39 = vpop.permute.xlu2 %806  ;;  %v972_v41 = vsel %vm969_vm5, %v970_v33, %v971_v54  ;;  %v974_v47 = vsel %vm969_vm5, %v971_v54, %v973_v19  ;;  %v983_v33 = vrot.slane %v6968_v43, 5 }
  0xd3   : > { %13566 = vst [vmem:[#allocation17_spill] sm:$0xff] %v7368_v39  ;;  %v7374_v26 = vpop.permute.xlu1 %711  ;;  %v6615_v50 = vpack.i.bf16 %v974_v47, %v972_v41 }
  0xd4   : > { %13567 = vst [vmem:[#allocation18_spill] sm:$0xff] %v7374_v26  ;;  %v988_v26 = vrot.slane %v6965_v42, 5  ;;  %v984_v47 = vsel %vm969_vm5, %v981_v10, %v983_v33  ;;  %v1001_v10 = vrot.slane %v7020_v30, 5  ;;  %v1003_v33 = vrot.slane %v7023_v31, 5 }
  0xd5   : > { %943 = vrot.lane.b32.xlu0 %v903_v2, %s6847_s11 }
  0xd6   : > { %v989_v54 = vsel %vm969_vm5, %v986_v4, %v988_v26  ;;  %v991_v26 = vrot.slane %v7005_v12, 5 }
  0xd7   : > { %v7380_v39 = vpop.permute.xlu0 %709 }
  0xd8   : > { %13568 = vst [vmem:[#allocation19_spill] sm:$0xff] %v7380_v39  ;;  %1028 = vrot.lane.b32.xlu2 %v982_v0, %s6848_s12  ;;  %v995_v0 = vrot.slane %v6999_v8, 5 }
  0xd9   : > { %6621 = vrot.lane.b32.xlu1 %v6620_v61, %s6848_s12  ;;  %v996_v61 = vrot.slane %v6996_v7, 5 }
  0xda   : > { %v7386_v2 = vpop.permute.xlu2 %812 }
  0xdb   : > { %13569 = vst [vmem:[#allocation20_spill] sm:$0xff] %v7386_v2  ;;  %v7389_v51 = vpop.permute.xlu1 %717  ;;  %v997_v17 = vsel %vm969_vm5, %v995_v0, %v996_v61  ;;  %v1000_v0 = vrot.slane %v7027_v34, 5 }
  0xdc   : > { %13570 = vst [vmem:[#allocation21_spill] sm:$0xff] %v7389_v51  ;;  %v1005_v51 = vrot.slane %v7067_v9, 5 }
  0xdd   : > { %6616 = vrot.lane.b32.xlu0 %v6615_v50, %s6848_s12  ;;  %v993_v50 = vrot.slane %v7008_v13, 5 }
  0xdf   : > { %v7395_v19 = vpop.permute.xlu0 %715 }
  0xe0   : > { %13571 = vst [vmem:[#allocation22_spill] sm:$0xff] %v7395_v19  ;;  %1034 = vrot.lane.b32.xlu2 %v989_v54, %s6848_s12  ;;  %v994_v54 = vsel %vm969_vm5, %v991_v26, %v993_v50  ;;  %v1004_v50 = vsel %vm969_vm5, %v1001_v10, %v1003_v33  ;;  %v1006_v33 = vrot.slane %v7054_v62, 5 }
  0xe1   : > { %1032 = vrot.lane.b32.xlu1 %v987_v38, %s6848_s12  ;;  %v990_v38 = vrot.slane %v7013_v18, 5 }
  0xe2   : > { %v7401_v41 = vpop.permute.xlu2 %818 }
  0xe3   : > { %13572 = vst [vmem:[#allocation23_spill] sm:$0xff] %v7401_v41  ;;  %v7406_v4 = vpop.permute.xlu1 %723 }
  0xe4   : > { %13573 = vst [vmem:[#allocation24_spill] sm:$0xff] %v7406_v4 }
  0xe5   : > { %1030 = vrot.lane.b32.xlu0 %v984_v47, %s6848_s12  ;;  %v992_v47 = vsel %vm969_vm5, %v990_v38, %v991_v26  ;;  %v1010_v26 = vrot.slane %v7045_v56, 5  ;;  %v1011_v38 = vrot.slane %v7049_v58, 5 }
  0xe7   : > { %v7412_v19 = vpop.permute.xlu0 %721 }
  0xe8   : > { %13574 = vst [vmem:[#allocation25_spill] sm:$0xff] %v7412_v19  ;;  %1040 = vrot.lane.b32.xlu2 %v997_v17, %s6848_s12  ;;  %v1002_v17 = vsel %vm969_vm5, %v1000_v0, %v1001_v10  ;;  %v1008_v10 = vrot.slane %v7057_v63, 5 }
  0xe9   : > { %1038 = vrot.lane.b32.xlu1 %v994_v54, %s6848_s12  ;;  %v998_v54 = vrot.slane %v7039_v46, 5 }
  0xea   : > { %v7418_v41 = vpop.permute.xlu2 %824 }
  0xeb   : > { %13575 = vst [vmem:[#allocation26_spill] sm:$0xff] %v7418_v41  ;;  %v7422_v4 = vpop.permute.xlu1 %6601 }
  0xec   : > { %13576 = vst [vmem:[#allocation27_spill] sm:$0xff] %v7422_v4 }
  0xed   : > { %1036 = vrot.lane.b32.xlu0 %v992_v47, %s6848_s12  ;;  %v999_v47 = vsel %vm969_vm5, %v996_v61, %v998_v54  ;;  %v1016_v61 = vrot.slane %v7074_v22, 5  ;;  %v1018_v54 = vrot.slane %v7077_v23, 5 }
  0xef   : > { %v7428_v19 = vpop.permute.xlu0 %6596 }
  0xf0   : > { %13577 = vst [vmem:[#allocation28_spill] sm:$0xff] %v7428_v19  ;;  %1046 = vrot.lane.b32.xlu2 %v1004_v50, %s6848_s12  ;;  %v1012_v50 = vsel %vm969_vm5, %v1010_v26, %v1011_v38  ;;  %v1015_v26 = vrot.slane %v7080_v27, 5 }
  0xf1   : > { %1044 = vrot.lane.b32.xlu1 %v1002_v17, %s6848_s12  ;;  %v1009_v17 = vsel %vm969_vm5, %v1006_v33, %v1008_v10  ;;  %v1019_v10 = vsel %vm969_vm5, %v1016_v61, %v1018_v54  ;;  %v1091_v54 = vrot.slane %v6936_v20, 6 }
  0xf2   : > { %v7434_v41 = vpop.permute.xlu2 %830  ;;  %v1017_v19 = vsel %vm969_vm5, %v1015_v26, %v1016_v61  ;;  %v1080_v26 = vrot.slane %v6947_v25, 6 }
  0xf3   : > { %13578 = vst [vmem:[#allocation29_spill] sm:$0xff] %v7434_v41  ;;  %v7439_v0 = vpop.permute.xlu1 %810 }
  0xf4   : > { %13579 = vst [vmem:[#allocation30_spill] sm:$0xff] %v7439_v0 }
  0xf5   : > { %1042 = vrot.lane.b32.xlu0 %v999_v47, %s6848_s12  ;;  %v1007_v47 = vsel %vm969_vm5, %v1005_v51, %v1006_v33  ;;  %v1090_v33 = vrot.slane %v6939_v21, 6 }
  0xf7   : > { %v7445_v2 = vpop.permute.xlu0 %808 }
  0xf8   : > { %13580 = vst [vmem:[#allocation31_spill] sm:$0xff] %v7445_v2  ;;  %1052 = vrot.lane.b32.xlu2 %v1012_v50, %s6848_s12  ;;  %v1013_v50 = vrot.slane %v7089_v37, 5  ;;  %v1086_v2 = vrot.slane %v6979_v52, 6 }
  0xf9   : > { %1050 = vrot.lane.b32.xlu1 %v1009_v17, %s6848_s12  ;;  %v1085_v17 = vrot.slane %v6973_v48, 6 }
  0xfa   : > { %v7451_v41 = vpop.permute.xlu2 %836  ;;  %v1014_v51 = vsel %vm969_vm5, %v1011_v38, %v1013_v50 }
  0xfb   : > { %13581 = vst [vmem:[#allocation32_spill] sm:$0xff] %v7451_v41  ;;  %v7455_v0 = vpop.permute.xlu1 %816  ;;  %v1088_v41 = vrot.slane %v6982_v53, 6 }
  0xfc   : > { %13582 = vst [vmem:[#allocation33_spill] sm:$0xff] %v7455_v0 }
  0xfd   : > { %1048 = vrot.lane.b32.xlu0 %v1007_v47, %s6848_s12  ;;  %v1087_v47 = vsel %vm13318_vm0, %v1085_v17, %v1086_v2  ;;  %v1089_v61 = vsel %vm13318_vm0, %v1086_v2, %v1088_v41  ;;  %v1096_v41 = vrot.slane %v6928_v14, 6 }
  0xfe   : > { %v6630_v38 = vpack.i.bf16 %v1089_v61, %v1087_v47 }
  0xff   : > { %v7464_v4 = vpop.permute.xlu0 %814 }
 0x100   : > { %13583 = vst [vmem:[#allocation34_spill] sm:$0xff] %v7464_v4  ;;  %1058 = vrot.lane.b32.xlu2 %v1019_v10, %s6848_s12  ;;  %v1081_v4 = vrot.slane %v6944_v24, 6  ;;  %v1083_v10 = vrot.slane %v6953_v29, 6 }
 0x101   : > { %1056 = vrot.lane.b32.xlu1 %v1017_v19, %s6848_s12  ;;  %v1092_v19 = vsel %vm13318_vm0, %v1090_v33, %v1091_v54  ;;  %v1095_v33 = vrot.slane %v6931_v15, 6 }
 0x102   : > { %v7472_v0 = vpop.permute.xlu2 %917  ;;  %v1082_v50 = vsel %vm13318_vm0, %v1080_v26, %v1081_v4  ;;  %v1084_v17 = vsel %vm13318_vm0, %v1081_v4, %v1083_v10  ;;  %v1093_v26 = vrot.slane %v6968_v43, 6 }
 0x103   : > { %13584 = vst [vmem:[#allocation35_spill] sm:$0xff] %v7472_v0  ;;  %v7478_v39 = vpop.permute.xlu1 %822  ;;  %v6625_v2 = vpack.i.bf16 %v1084_v17, %v1082_v50  ;;  %v1097_v61 = vsel %vm13318_vm0, %v1095_v33, %v1096_v41 }
 0x104   : > { %13585 = vst [vmem:[#allocation36_spill] sm:$0xff] %v7478_v39  ;;  %v1098_v39 = vrot.slane %v6965_v42, 6  ;;  %v1094_v17 = vsel %vm13318_vm0, %v1091_v54, %v1093_v26  ;;  %v1111_v54 = vrot.slane %v7020_v30, 6  ;;  %v1113_v26 = vrot.slane %v7023_v31, 6 }
 0x105   : > { %1054 = vrot.lane.b32.xlu0 %v1014_v51, %s6848_s12 }
 0x106   : > { %v1099_v4 = vsel %vm13318_vm0, %v1096_v41, %v1098_v39  ;;  %v1101_v39 = vrot.slane %v7005_v12, 6 }
 0x107   : > { %v7484_v0 = vpop.permute.xlu0 %820 }
 0x108   : > { %13586 = vst [vmem:[#allocation37_spill] sm:$0xff] %v7484_v0  ;;  %1138 = vrot.lane.b32.xlu2 %v1092_v19, %s6849_s13  ;;  %v1105_v19 = vrot.slane %v6999_v8, 6 }
 0x109   : > { %6631 = vrot.lane.b32.xlu1 %v6630_v38, %s6849_s13  ;;  %v1106_v38 = vrot.slane %v6996_v7, 6 }
 0x10a   : > { %v7490_v51 = vpop.permute.xlu2 %923 }
 0x10b   : > { %13587 = vst [vmem:[#allocation38_spill] sm:$0xff] %v7490_v51  ;;  %v7493_v47 = vpop.permute.xlu1 %828  ;;  %v1107_v33 = vsel %vm13318_vm0, %v1105_v19, %v1106_v38  ;;  %v1110_v19 = vrot.slane %v7027_v34, 6 }
 0x10c   : > { %13588 = vst [vmem:[#allocation39_spill] sm:$0xff] %v7493_v47  ;;  %v1115_v47 = vrot.slane %v7067_v9, 6 }
 0x10d   : > { %6626 = vrot.lane.b32.xlu0 %v6625_v2, %s6849_s13  ;;  %v1103_v2 = vrot.slane %v7008_v13, 6 }
 0x10f   : > { %v7499_v10 = vpop.permute.xlu0 %826 }
 0x110   : > { %13589 = vst [vmem:[#allocation40_spill] sm:$0xff] %v7499_v10  ;;  %1144 = vrot.lane.b32.xlu2 %v1099_v4, %s6849_s13  ;;  %v1104_v4 = vsel %vm13318_vm0, %v1101_v39, %v1103_v2  ;;  %v1114_v2 = vsel %vm13318_vm0, %v1111_v54, %v1113_v26  ;;  %v1116_v26 = vrot.slane %v7054_v62, 6 }
 0x111   : > { %1142 = vrot.lane.b32.xlu1 %v1097_v61, %s6849_s13  ;;  %v1100_v61 = vrot.slane %v7013_v18, 6 }
 0x112   : > { %v7505_v50 = vpop.permute.xlu2 %929 }
 0x113   : > { %13590 = vst [vmem:[#allocation41_spill] sm:$0xff] %v7505_v50  ;;  %v7510_v41 = vpop.permute.xlu1 %834 }
 0x114   : > { %13591 = vst [vmem:[#allocation42_spill] sm:$0xff] %v7510_v41 }
 0x115   : > { %1140 = vrot.lane.b32.xlu0 %v1094_v17, %s6849_s13  ;;  %v1102_v17 = vsel %vm13318_vm0, %v1100_v61, %v1101_v39  ;;  %v1120_v39 = vrot.slane %v7045_v56, 6  ;;  %v1121_v61 = vrot.slane %v7049_v58, 6 }
 0x117   : > { %v7516_v10 = vpop.permute.xlu0 %832 }
 0x118   : > { %13592 = vst [vmem:[#allocation43_spill] sm:$0xff] %v7516_v10  ;;  %1150 = vrot.lane.b32.xlu2 %v1107_v33, %s6849_s13  ;;  %v1112_v33 = vsel %vm13318_vm0, %v1110_v19, %v1111_v54  ;;  %v1118_v54 = vrot.slane %v7057_v63, 6 }
 0x119   : > { %1148 = vrot.lane.b32.xlu1 %v1104_v4, %s6849_s13  ;;  %v1108_v4 = vrot.slane %v7039_v46, 6 }
 0x11a   : > { %v7522_v50 = vpop.permute.xlu2 %935 }
 0x11b   : > { %13593 = vst [vmem:[#allocation44_spill] sm:$0xff] %v7522_v50  ;;  %v7526_v41 = vpop.permute.xlu1 %6611 }
 0x11c   : > { %13594 = vst [vmem:[#allocation45_spill] sm:$0xff] %v7526_v41 }
 0x11d   : > { %1146 = vrot.lane.b32.xlu0 %v1102_v17, %s6849_s13  ;;  %v1109_v17 = vsel %vm13318_vm0, %v1106_v38, %v1108_v4  ;;  %v1126_v38 = vrot.slane %v7074_v22, 6  ;;  %v1128_v4 = vrot.slane %v7077_v23, 6 }
 0x11f   : > { %v7532_v10 = vpop.permute.xlu0 %6606 }
 0x120   : > { %13595 = vst [vmem:[#allocation46_spill] sm:$0xff] %v7532_v10  ;;  %1156 = vrot.lane.b32.xlu2 %v1114_v2, %s6849_s13  ;;  %v1122_v2 = vsel %vm13318_vm0, %v1120_v39, %v1121_v61  ;;  %v1125_v39 = vrot.slane %v7080_v27, 6 }
 0x121   : > { %1154 = vrot.lane.b32.xlu1 %v1112_v33, %s6849_s13  ;;  %v1119_v33 = vsel %vm13318_vm0, %v1116_v26, %v1118_v54  ;;  %v1129_v54 = vsel %vm13318_vm0, %v1126_v38, %v1128_v4  ;;  %v1201_v4 = vrot.slane %v6939_v21, 7 }
 0x122   : > { %v7538_v50 = vpop.permute.xlu2 %941  ;;  %v1127_v10 = vsel %vm13318_vm0, %v1125_v39, %v1126_v38  ;;  %v1191_v39 = vrot.slane %v6947_v25, 7 }
 0x123   : > { %13596 = vst [vmem:[#allocation47_spill] sm:$0xff] %v7538_v50  ;;  %v7543_v19 = vpop.permute.xlu1 %921 }
 0x124   : > { %13597 = vst [vmem:[#allocation48_spill] sm:$0xff] %v7543_v19 }
 0x125   : > { %1152 = vrot.lane.b32.xlu0 %v1109_v17, %s6849_s13  ;;  %v1117_v17 = vsel %vm13318_vm0, %v1115_v47, %v1116_v26 }
 0x127   : > { %v7549_v51 = vpop.permute.xlu0 %919 }
 0x128   : > { %13598 = vst [vmem:[#allocation49_spill] sm:$0xff] %v7549_v51  ;;  %1162 = vrot.lane.b32.xlu2 %v1122_v2, %s6849_s13  ;;  %v1123_v2 = vrot.slane %v7089_v37, 6  ;;  %v1197_v51 = vrot.slane %v6979_v52, 7 }
 0x129   : > { %1160 = vrot.lane.b32.xlu1 %v1119_v33, %s6849_s13  ;;  %v1196_v33 = vrot.slane %v6973_v48, 7 }
 0x12a   : > { %v7555_v50 = vpop.permute.xlu2 %947  ;;  %v1124_v26 = vsel %vm13318_vm0, %v1121_v61, %v1123_v2 }
 0x12b   : > { %13599 = vst [vmem:[#allocation50_spill] sm:$0xff] %v7555_v50  ;;  %v7559_v19 = vpop.permute.xlu1 %927  ;;  %v1199_v50 = vrot.slane %v6982_v53, 7 }
 0x12c   : > { %13600 = vst [vmem:[#allocation51_spill] sm:$0xff] %v7559_v19  ;;  %v1198_v19 = vsel %vm1190_vm6, %v1196_v33, %v1197_v51 }
 0x12d   : > { %1158 = vrot.lane.b32.xlu0 %v1117_v17, %s6849_s13  ;;  %v1202_v17 = vrot.slane %v6936_v20, 7  ;;  %v1200_v38 = vsel %vm1190_vm6, %v1197_v51, %v1199_v50  ;;  %v1207_v50 = vrot.slane %v6928_v14, 7 }
 0x12e   : > { %v6640_v61 = vpack.i.bf16 %v1200_v38, %v1198_v19  ;;  %v1206_v19 = vrot.slane %v6931_v15, 7 }
 0x12f   : > { %v7568_v47 = vpop.permute.xlu0 %925 }
 0x130   : > { %13601 = vst [vmem:[#allocation52_spill] sm:$0xff] %v7568_v47  ;;  %1168 = vrot.lane.b32.xlu2 %v1129_v54, %s6849_s13  ;;  %v1192_v47 = vrot.slane %v6944_v24, 7  ;;  %v1194_v54 = vrot.slane %v6953_v29, 7  ;;  %v1208_v38 = vsel %vm1190_vm6, %v1206_v19, %v1207_v50 }
 0x131   : > { %1166 = vrot.lane.b32.xlu1 %v1127_v10, %s6849_s13  ;;  %v1203_v10 = vsel %vm1190_vm6, %v1201_v4, %v1202_v17 }
 0x132   : > { %v7576_v0 = vpop.permute.xlu2 %1028  ;;  %v1193_v2 = vsel %vm1190_vm6, %v1191_v39, %v1192_v47  ;;  %v1195_v33 = vsel %vm1190_vm6, %v1192_v47, %v1194_v54  ;;  %v1204_v39 = vrot.slane %v6968_v43, 7 }
 0x133   : > { %13602 = vst [vmem:[#allocation53_spill] sm:$0xff] %v7576_v0  ;;  %v7582_v41 = vpop.permute.xlu1 %933  ;;  %v6635_v51 = vpack.i.bf16 %v1195_v33, %v1193_v2 }
 0x134   : > { %13603 = vst [vmem:[#allocation54_spill] sm:$0xff] %v7582_v41  ;;  %v1209_v41 = vrot.slane %v6965_v42, 7  ;;  %v1205_v33 = vsel %vm1190_vm6, %v1202_v17, %v1204_v39  ;;  %v1222_v17 = vrot.slane %v7020_v30, 7  ;;  %v1224_v39 = vrot.slane %v7023_v31, 7 }
 0x135   : > { %1164 = vrot.lane.b32.xlu0 %v1124_v26, %s6849_s13 }
 0x136   : > { %v1210_v47 = vsel %vm1190_vm6, %v1207_v50, %v1209_v41  ;;  %v1212_v41 = vrot.slane %v7005_v12, 7 }
 0x137   : > { %v7588_v0 = vpop.permute.xlu0 %931 }
 0x138   : > { %13604 = vst [vmem:[#allocation55_spill] sm:$0xff] %v7588_v0  ;;  %1249 = vrot.lane.b32.xlu2 %v1203_v10, %s6850_s14  ;;  %v1216_v10 = vrot.slane %v6999_v8, 7 }
 0x139   : > { %6641 = vrot.lane.b32.xlu1 %v6640_v61, %s6850_s14  ;;  %v1217_v61 = vrot.slane %v6996_v7, 7 }
 0x13a   : > { %v7594_v26 = vpop.permute.xlu2 %1034 }
 0x13b   : > { %13605 = vst [vmem:[#allocation56_spill] sm:$0xff] %v7594_v26  ;;  %v7597_v4 = vpop.permute.xlu1 %939  ;;  %v1218_v19 = vsel %vm1190_vm6, %v1216_v10, %v1217_v61  ;;  %v1221_v10 = vrot.slane %v7027_v34, 7 }
 0x13c   : > { %13606 = vst [vmem:[#allocation57_spill] sm:$0xff] %v7597_v4  ;;  %v1226_v4 = vrot.slane %v7067_v9, 7 }
 0x13d   : > { %6636 = vrot.lane.b32.xlu0 %v6635_v51, %s6850_s14  ;;  %v1214_v51 = vrot.slane %v7008_v13, 7 }
 0x13f   : > { %v7603_v54 = vpop.permute.xlu0 %937 }
 0x140   : > { %13607 = vst [vmem:[#allocation58_spill] sm:$0xff] %v7603_v54  ;;  %1255 = vrot.lane.b32.xlu2 %v1210_v47, %s6850_s14  ;;  %v1215_v47 = vsel %vm1190_vm6, %v1212_v41, %v1214_v51  ;;  %v1225_v51 = vsel %vm1190_vm6, %v1222_v17, %v1224_v39  ;;  %v1227_v39 = vrot.slane %v7054_v62, 7 }
 0x141   : > { %1253 = vrot.lane.b32.xlu1 %v1208_v38, %s6850_s14  ;;  %v1211_v38 = vrot.slane %v7013_v18, 7 }
 0x142   : > { %v7609_v2 = vpop.permute.xlu2 %1040 }
 0x143   : > { %13608 = vst [vmem:[#allocation59_spill] sm:$0xff] %v7609_v2  ;;  %v7614_v50 = vpop.permute.xlu1 %945 }
 0x144   : > { %13609 = vst [vmem:[#allocation60_spill] sm:$0xff] %v7614_v50 }
 0x145   : > { %1251 = vrot.lane.b32.xlu0 %v1205_v33, %s6850_s14  ;;  %v1213_v33 = vsel %vm1190_vm6, %v1211_v38, %v1212_v41  ;;  %v1231_v41 = vrot.slane %v7045_v56, 7  ;;  %v1232_v38 = vrot.slane %v7049_v58, 7 }
 0x147   : > { %v7620_v54 = vpop.permute.xlu0 %943 }
 0x148   : > { %13610 = vst [vmem:[#allocation61_spill] sm:$0xff] %v7620_v54  ;;  %1261 = vrot.lane.b32.xlu2 %v1218_v19, %s6850_s14  ;;  %v1223_v19 = vsel %vm1190_vm6, %v1221_v10, %v1222_v17  ;;  %v1229_v17 = vrot.slane %v7057_v63, 7 }
 0x149   : > { %1259 = vrot.lane.b32.xlu1 %v1215_v47, %s6850_s14  ;;  %v1219_v47 = vrot.slane %v7039_v46, 7 }
 0x14a   : > { %v7626_v2 = vpop.permute.xlu2 %1046 }
 0x14b   : > { %13611 = vst [vmem:[#allocation62_spill] sm:$0xff] %v7626_v2  ;;  %v7630_v50 = vpop.permute.xlu1 %6621 }
 0x14d   : > { %1257 = vrot.lane.b32.xlu0 %v1213_v33, %s6850_s14  ;;  %v1220_v33 = vsel %vm1190_vm6, %v1217_v61, %v1219_v47  ;;  %v1237_v61 = vrot.slane %v7074_v22, 7  ;;  %v1239_v47 = vrot.slane %v7077_v23, 7 }
 0x14f   : > { %v7636_v54 = vpop.permute.xlu0 %6616 }
 0x150   : > { %1267 = vrot.lane.b32.xlu2 %v1225_v51, %s6850_s14  ;;  %v1233_v51 = vsel %vm1190_vm6, %v1231_v41, %v1232_v38  ;;  %v1236_v41 = vrot.slane %v7080_v27, 7 }
 0x151   : > { %1265 = vrot.lane.b32.xlu1 %v1223_v19, %s6850_s14  ;;  %v1230_v19 = vsel %vm1190_vm6, %v1227_v39, %v1229_v17  ;;  %v1240_v17 = vsel %vm1190_vm6, %v1237_v61, %v1239_v47  ;;  %v6650_v47 = vpack.i.bf16 %v6982_v53, %v6979_v52 }
 0x152   : > { %v7642_v2 = vpop.permute.xlu2 %1052 }
 0x153   : > { %13612 = vst [vmem:[#allocation63_spill] sm:$0xff] %v7642_v2  ;;  %v7647_v10 = vpop.permute.xlu1 %1032 }
 0x154   : > { %13613 = vst [vmem:[#allocation64_spill] sm:$0xff] %v7647_v10 }
 0x155   : > { %1263 = vrot.lane.b32.xlu0 %v1220_v33, %s6850_s14  ;;  %v1228_v33 = vsel %vm1190_vm6, %v1226_v4, %v1227_v39 }
 0x157   : > { %v7653_v26 = vpop.permute.xlu0 %1030 }
 0x158   : > { %1273 = vrot.lane.b32.xlu2 %v1233_v51, %s6850_s14  ;;  %v1238_v51 = vsel %vm1190_vm6, %v1236_v41, %v1237_v61 }
 0x159   : > { %1271 = vrot.lane.b32.xlu1 %v1230_v19, %s6850_s14  ;;  %v1234_v19 = vrot.slane %v7089_v37, 7 }
 0x15a   : > { %v7659_v2 = vpop.permute.xlu2 %1058 }
 0x15b   : > { %13614 = vst [vmem:[#allocation65_spill] sm:$0xff] %v7659_v2  ;;  %v7663_v10 = vpop.permute.xlu1 %1038  ;;  %v1235_v4 = vsel %vm1190_vm6, %v1232_v38, %v1234_v19 }
 0x15c   : > { %13615 = vst [vmem:[#allocation66_spill] sm:$0xff] %v7663_v10  ;;  %v302_v10 = vld [vmem:[%s6919_s30 + $0xb0] sm:$0xff] }
 0x15d   : > { %1269 = vrot.lane.b32.xlu0 %v1228_v33, %s6850_s14  ;;  %v6645_v33 = vpack.i.bf16 %v6953_v29, %v6944_v24 }
 0x15f   : > { %v7669_v0 = vpop.permute.xlu0 %1036 }
 0x160   : > { %13616 = vst [vmem:[#allocation67_spill] sm:$0xff] %v7669_v0  ;;  %1279 = vrot.lane.b32.xlu2 %v1240_v17, %s6850_s14  ;;  %v410_v0 = vrot.slane %v302_v10, 6 }
 0x161   : > { %1277 = vrot.lane.b32.xlu1 %v1238_v51, %s6850_s14 }
 0x162   : > { %v7673_v2 = vpop.permute.xlu2 %1138 }
 0x163   : > { %v7676_v39 = vpop.permute.xlu1 %1044 }
 0x164   : > { %13617 = vst [vmem:[#allocation68_spill] sm:$0xff] %v7676_v39 }
 0x165   : > { %1275 = vrot.lane.b32.xlu0 %v1235_v4, %s6850_s14 }
 0x167   : > { %v7681_v61 = vpop.permute.xlu0 %1042 }
 0x168   : > { %13618 = vst [vmem:[#allocation69_spill] sm:$0xff] %v7681_v61  ;;  %1309 = vrot.lane.b32.xlu2 %v6936_v20, %s6851_s15 }
 0x169   : > { %6651 = vrot.lane.b32.xlu1 %v6650_v47, %s6851_s15 }
 0x16a   : > { %v7688_v41 = vpop.permute.xlu2 %1144 }
 0x16b   : > { %13619 = vst [vmem:[#allocation70_spill] sm:$0xff] %v7688_v41  ;;  %v7690_v38 = vpop.permute.xlu1 %1050 }
 0x16c   : > { %13620 = vst [vmem:[#allocation71_spill] sm:$0xff] %v7690_v38 }
 0x16d   : > { %6646 = vrot.lane.b32.xlu0 %v6645_v33, %s6851_s15  ;;  %v300_v33 = vld [vmem:[%s6919_s30 + $0xa0] sm:$0xff] }
 0x16e   : > { %v322_v27 = vperm.slane %v300_v33, 0 }
 0x16f   : > { %v7693_v17 = vpop.permute.xlu0 %1048 }
 0x170   : > { %13621 = vst [vmem:[#allocation72_spill] sm:$0xff] %v7693_v17  ;;  %1315 = vrot.lane.b32.xlu2 %v6965_v42, %s6851_s15 }
 0x171   : > { %1313 = vrot.lane.b32.xlu1 %v6928_v14, %s6851_s15 }
 0x172   : > { %v7699_v53 = vpop.permute.xlu2 %1150 }
 0x173   : > { %13622 = vst [vmem:[#allocation73_spill] sm:$0xff] %v7699_v53  ;;  %v7701_v51 = vpop.permute.xlu1 %1056 }
 0x174   : > { %13623 = vst [vmem:[#allocation74_spill] sm:$0xff] %v7701_v51  ;;  %v301_v51 = vld [vmem:[%s6919_s30 + $0xa8] sm:$0xff] }
 0x175   : > { %1311 = vrot.lane.b32.xlu0 %v6968_v43, %s6851_s15  ;;  %v338_v17 = vperm.slane %v301_v51, 7 }
 0x177   : > { %v7705_v29 = vpop.permute.xlu0 %1054 }
 0x178   : > { %13624 = vst [vmem:[#allocation75_spill] sm:$0xff] %v7705_v29  ;;  %1321 = vrot.lane.b32.xlu2 %v6996_v7, %s6851_s15 }
 0x179   : > { %1319 = vrot.lane.b32.xlu1 %v7008_v13, %s6851_s15 }
 0x17a   : > { %v7711_v42 = vpop.permute.xlu2 %1156 }
 0x17b   : > { %13625 = vst [vmem:[#allocation76_spill] sm:$0xff] %v7711_v42  ;;  %v7713_v19 = vpop.permute.xlu1 %6631  ;;  %v407_v42 = vrot.slane %v300_v33, 6 }
 0x17d   : > { %1317 = vrot.lane.b32.xlu0 %v7005_v12, %s6851_s15  ;;  %v7747_v38 = vsel %vm13318_vm0, %v322_v27, %v407_v42 }
 0x17e   : > { %13631 = vst [vmem:[#allocation82_spill] sm:$0xff] %v7747_v38 }
 0x17f   : > { %v7717_v4 = vpop.permute.xlu0 %6626 }
 0x180   : > { %1327 = vrot.lane.b32.xlu2 %v7023_v31, %s6851_s15 }
 0x181   : > { %1325 = vrot.lane.b32.xlu1 %v7020_v30, %s6851_s15 }
 0x182   : > { %v7723_v43 = vpop.permute.xlu2 %1162 }
 0x183   : > { %13626 = vst [vmem:[#allocation77_spill] sm:$0xff] %v7723_v43  ;;  %v7725_v47 = vpop.permute.xlu1 %1142  ;;  %v408_v43 = vrot.slane %v301_v51, 6  ;;  %v1542_v51 = vrot.slane %v7747_v38, 2 }
 0x184   : > { %13627 = vst [vmem:[#allocation78_spill] sm:$0xff] %v7725_v47 }
 0x185   : > { %1323 = vrot.lane.b32.xlu0 %v7039_v46, %s6851_s15  ;;  %v7744_v46 = vsel %vm13318_vm0, %v407_v42, %v408_v43 }
 0x186   : > { %13630 = vst [vmem:[#allocation81_spill] sm:$0xff] %v7744_v46  ;;  %v1543_v33 = vrot.slane %v7744_v46, 2  ;;  %v1532_v27 = vrot.slane %v7744_v46, 1  ;;  %v1554_v39 = vrot.slane %v7744_v46, 3 }
 0x187   : > { %v7729_v13 = vpop.permute.xlu0 %1140 }
 0x188   : > { %1333 = vrot.lane.b32.xlu2 %v7049_v58, %s6851_s15 }
 0x189   : > { %1331 = vrot.lane.b32.xlu1 %v7057_v63, %s6851_s15  ;;  %v7752_v63 = vsel %vm13318_vm0, %v408_v43, %v338_v17  ;;  %v1531_v43 = vrot.slane %v7747_v38, 1 }
 0x18a   : > { %v7737_v31 = vpop.permute.xlu2 %1168  ;;  %v1534_v42 = vrot.slane %v7752_v63, 1 }
 0x18b   : > { %13628 = vst [vmem:[#allocation79_spill] sm:$0xff] %v7737_v31  ;;  %v7739_v29 = vpop.permute.xlu1 %1148 }
 0x18c   : > { %13629 = vst [vmem:[#allocation80_spill] sm:$0xff] %v7739_v29  ;;  %v1535_v17 = vsel %vm525_vm1, %v1532_v27, %v1534_v42  ;;  %v1556_v29 = vrot.slane %v7752_v63, 3 }
 0x18d   : > { %1329 = vrot.lane.b32.xlu0 %v7054_v62, %s6851_s15 }
 0x18e   : > { %v1557_v42 = vsel %vm13319_vm3, %v1554_v39, %v1556_v29  ;;  %v1565_v29 = vrot.slane %v7744_v46, 4 }
 0x18f   : > { %v7749_v41 = vpop.permute.xlu0 %1146 }
 0x190   : > { %13632 = vst [vmem:[#allocation83_spill] sm:$0xff] %v7749_v41  ;;  %1339 = vrot.lane.b32.xlu2 %v7077_v23, %s6851_s15  ;;  %v1544_v23 = vsel %vm636_vm2, %v1542_v51, %v1543_v33  ;;  %v1553_v51 = vrot.slane %v7747_v38, 3 }
 0x191   : > { %1337 = vrot.lane.b32.xlu1 %v7074_v22, %s6851_s15 }
 0x192   : > { %v7760_v31 = vpop.permute.xlu2 %1249 }
 0x193   : > { %13633 = vst [vmem:[#allocation84_spill] sm:$0xff] %v7760_v31  ;;  %v7764_v47 = vpop.permute.xlu1 %1154 }
 0x194   : > { %13634 = vst [vmem:[#allocation85_spill] sm:$0xff] %v7764_v47 }
 0x195   : > { %1335 = vrot.lane.b32.xlu0 %v7089_v37, %s6851_s15  ;;  %v1533_v37 = vsel %vm525_vm1, %v1531_v43, %v1532_v27  ;;  %v1575_v27 = vrot.slane %v7747_v38, 5  ;;  %v1576_v43 = vrot.slane %v7744_v46, 5 }
 0x197   : > { %v7771_v22 = vpop.permute.xlu0 %1152 }
 0x198   : > { %13635 = vst [vmem:[#allocation86_spill] sm:$0xff] %v7771_v22  ;;  %1547 = vrot.lane.b32.xlu2 %v1544_v23, %s6845_s9  ;;  %v1555_v23 = vsel %vm13319_vm3, %v1553_v51, %v1554_v39  ;;  %v1567_v39 = vrot.slane %v7752_v63, 4  ;;  %v303_v22 = vld [vmem:[%s6919_s30 + $0xb8] sm:$0xff] }
 0x199   : > { %1538 = vrot.lane.b32.xlu1 %v1535_v17, %s6844_s8  ;;  %v1545_v17 = vrot.slane %v7752_v63, 2  ;;  %v411_v61 = vrot.slane %v303_v22, 6 }
 0x19a   : > { %v7777_v47 = vpop.permute.xlu2 %1255 }
 0x19b   : > { %13636 = vst [vmem:[#allocation87_spill] sm:$0xff] %v7777_v47  ;;  %v7781_v53 = vpop.permute.xlu1 %1160 }
 0x19c   : > { %13637 = vst [vmem:[#allocation88_spill] sm:$0xff] %v7781_v53  ;;  %v1564_v53 = vrot.slane %v7747_v38, 4 }
 0x19d   : > { %1536 = vrot.lane.b32.xlu0 %v1533_v37, %s6844_s8  ;;  %v1546_v37 = vsel %vm636_vm2, %v1543_v33, %v1545_v17  ;;  %v1587_v33 = vrot.slane %v7744_v46, 6  ;;  %v1589_v17 = vrot.slane %v7752_v63, 6 }
 0x19f   : > { %v7787_v41 = vpop.permute.xlu0 %1158 }
 0x1a0   : > { %13638 = vst [vmem:[#allocation89_spill] sm:$0xff] %v7787_v41  ;;  %1560 = vrot.lane.b32.xlu2 %v1557_v42, %s6846_s10  ;;  %v1577_v42 = vsel %vm969_vm5, %v1575_v27, %v1576_v43  ;;  %v1566_v27 = vsel %vm858_vm4, %v1564_v53, %v1565_v29 }
 0x1a1   : > { %1558 = vrot.lane.b32.xlu1 %v1555_v23, %s6846_s10  ;;  %v1568_v23 = vsel %vm858_vm4, %v1565_v29, %v1567_v39  ;;  %v1598_v29 = vrot.slane %v7744_v46, 7 }
 0x1a2   : > { %v7793_v47 = vpop.permute.xlu2 %1261 }
 0x1a3   : > { %13639 = vst [vmem:[#allocation90_spill] sm:$0xff] %v7793_v47  ;;  %v7798_v51 = vpop.permute.xlu1 %1166 }
 0x1a4   : > { %13640 = vst [vmem:[#allocation91_spill] sm:$0xff] %v7798_v51 }
 0x1a5   : > { %1549 = vrot.lane.b32.xlu0 %v1546_v37, %s6845_s9  ;;  %v1586_v37 = vrot.slane %v7747_v38, 6 }
 0x1a7   : > { %v7804_v41 = vpop.permute.xlu0 %1164 }
 0x1a8   : > { %13641 = vst [vmem:[#allocation92_spill] sm:$0xff] %v7804_v41  ;;  %1580 = vrot.lane.b32.xlu2 %v1577_v42, %s6848_s12  ;;  %v1590_v41 = vsel %vm13318_vm0, %v1587_v33, %v1589_v17  ;;  %v1578_v42 = vrot.slane %v7752_v63, 5  ;;  %v1600_v17 = vrot.slane %v7752_v63, 7 }
 0x1a9   : > { %1571 = vrot.lane.b32.xlu1 %v1568_v23, %s6847_s11  ;;  %v1588_v23 = vsel %vm13318_vm0, %v1586_v37, %v1587_v33  ;;  %v323_v37 = vperm.slane %v302_v10, 0 }
 0x1aa   : > { %v7810_v51 = vpop.permute.xlu2 %1267  ;;  %v1579_v53 = vsel %vm969_vm5, %v1576_v43, %v1578_v42  ;;  %v7837_v43 = vsel %vm13318_vm0, %v410_v0, %v411_v61 }
 0x1ab   : > { %13642 = vst [vmem:[#allocation93_spill] sm:$0xff] %v7810_v51  ;;  %v7814_v39 = vpop.permute.xlu1 %6641 }
 0x1ac   : > { %13646 = vst [vmem:[#allocation97_spill] sm:$0xff] %v7837_v43 }
 0x1ad   : > { %1569 = vrot.lane.b32.xlu0 %v1566_v27, %s6847_s11  ;;  %v339_v27 = vperm.slane %v303_v22, 7  ;;  %v1633_v22 = vrot.slane %v7837_v43, 1 }
 0x1af   : > { %v7820_v47 = vpop.permute.xlu0 %6636  ;;  %v7840_v42 = vsel %vm13318_vm0, %v411_v61, %v339_v27 }
 0x1b0   : > { %13643 = vst [vmem:[#allocation94_spill] sm:$0xff] %v7820_v47  ;;  %1593 = vrot.lane.b32.xlu2 %v1590_v41, %s6849_s13  ;;  %v1601_v41 = vsel %vm1190_vm6, %v1598_v29, %v1600_v17  ;;  %v7845_v47 = vsel %vm13318_vm0, %v323_v37, %v410_v0  ;;  %v1635_v10 = vrot.slane %v7840_v42, 1 }
 0x1b1   : > { %1591 = vrot.lane.b32.xlu1 %v1588_v23, %s6849_s13  ;;  %v1597_v23 = vrot.slane %v7747_v38, 7  ;;  %13648 = vst [vmem:[#allocation99_spill] sm:$0xff] %v7845_v47  ;;  %v1632_v61 = vrot.slane %v7845_v47, 1 }
 0x1b2   : > { %v7828_v51 = vpop.permute.xlu2 %1273  ;;  %v1636_v0 = vsel %vm525_vm1, %v1633_v22, %v1635_v10 }
 0x1b3   : > { %13644 = vst [vmem:[#allocation95_spill] sm:$0xff] %v7828_v51  ;;  %v7831_v33 = vpop.permute.xlu1 %1253  ;;  %v1599_v17 = vsel %vm1190_vm6, %v1597_v23, %v1598_v29  ;;  %v1634_v37 = vsel %vm525_vm1, %v1632_v61, %v1633_v22  ;;  %v1655_v29 = vrot.slane %v7837_v43, 3  ;;  %v1643_v61 = vrot.slane %v7845_v47, 2 }
 0x1b4   : > { %13645 = vst [vmem:[#allocation96_spill] sm:$0xff] %v7831_v33  ;;  %v1668_v33 = vrot.slane %v7840_v42, 4 }
 0x1b5   : > { %1582 = vrot.lane.b32.xlu0 %v1579_v53, %s6848_s12 }
 0x1b7   : > { %v7842_v51 = vpop.permute.xlu0 %1251 }
 0x1b8   : > { %13647 = vst [vmem:[#allocation98_spill] sm:$0xff] %v7842_v51  ;;  %1608 = vrot.lane.b32.xlu2 %v7744_v46, %s6851_s15 }
 0x1b9   : > { %1604 = vrot.lane.b32.xlu1 %v1601_v41, %s6850_s14  ;;  %v1654_v41 = vrot.slane %v7845_v47, 3 }
 0x1ba   : > { %v7852_v53 = vpop.permute.xlu2 %1279 }
 0x1bb   : > { %13649 = vst [vmem:[#allocation100_spill] sm:$0xff] %v7852_v53  ;;  %v7856_v27 = vpop.permute.xlu1 %1259  ;;  %v1644_v53 = vrot.slane %v7837_v43, 2  ;;  %v1656_v22 = vsel %vm13319_vm3, %v1654_v41, %v1655_v29  ;;  %v1665_v41 = vrot.slane %v7845_v47, 4 }
 0x1bc   : > { %13650 = vst [vmem:[#allocation101_spill] sm:$0xff] %v7856_v27 }
 0x1bd   : > { %1602 = vrot.lane.b32.xlu0 %v1599_v17, %s6850_s14  ;;  %v1646_v17 = vrot.slane %v7840_v42, 2 }
 0x1bf   : > { %v7861_v38 = vpop.permute.xlu0 %1257  ;;  %v1647_v10 = vsel %vm636_vm2, %v1644_v53, %v1646_v17 }
 0x1c0   : > { %13651 = vst [vmem:[#allocation102_spill] sm:$0xff] %v7861_v38  ;;  %1639 = vrot.lane.b32.xlu2 %v1636_v0, %s6844_s8 }
 0x1c1   : > { %1637 = vrot.lane.b32.xlu1 %v1634_v37, %s6844_s8  ;;  %v1666_v37 = vrot.slane %v7837_v43, 4 }
 0x1c2   : > { %v7867_v23 = vpop.permute.xlu2 %1309 }
 0x1c3   : > { %13652 = vst [vmem:[#allocation103_spill] sm:$0xff] %v7867_v23  ;;  %v7871_v46 = vpop.permute.xlu1 %1265  ;;  %v1669_v17 = vsel %vm858_vm4, %v1666_v37, %v1668_v33 }
 0x1c4   : > { %13653 = vst [vmem:[#allocation104_spill] sm:$0xff] %v7871_v46 }
 0x1c5   : > { %1610 = vrot.lane.b32.xlu0 %v7752_v63, %s6851_s15  ;;  %v1645_v63 = vsel %vm636_vm2, %v1643_v61, %v1644_v53  ;;  %v1687_v53 = vrot.slane %v7845_v47, 6  ;;  %v1688_v61 = vrot.slane %v7837_v43, 6 }
 0x1c7   : > { %v7878_v0 = vpop.permute.xlu0 %1263 }
 0x1c8   : > { %13654 = vst [vmem:[#allocation105_spill] sm:$0xff] %v7878_v0  ;;  %1659 = vrot.lane.b32.xlu2 %v1656_v22, %s6846_s10  ;;  %v1667_v22 = vsel %vm858_vm4, %v1665_v41, %v1666_v37  ;;  %v1677_v37 = vrot.slane %v7837_v43, 5  ;;  %v304_v0 = vld [vmem:[%s6919_s30 + $0xc0] sm:$0xff] }
 0x1c9   : > { %1650 = vrot.lane.b32.xlu1 %v1647_v10, %s6845_s9  ;;  %v1657_v10 = vrot.slane %v7840_v42, 3  ;;  %v324_v23 = vperm.slane %v304_v0, 0 }
 0x1ca   : > { %v7884_v46 = vpop.permute.xlu2 %1315 }
 0x1cb   : > { %13655 = vst [vmem:[#allocation106_spill] sm:$0xff] %v7884_v46  ;;  %v7888_v27 = vpop.permute.xlu1 %1271  ;;  %v1658_v33 = vsel %vm13319_vm3, %v1655_v29, %v1657_v10  ;;  %v1699_v10 = vrot.slane %v7837_v43, 7 }
 0x1cc   : > { %13656 = vst [vmem:[#allocation107_spill] sm:$0xff] %v7888_v27 }
 0x1cd   : > { %1648 = vrot.lane.b32.xlu0 %v1645_v63, %s6845_s9  ;;  %v1679_v63 = vrot.slane %v7840_v42, 5 }
 0x1cf   : > { %v7894_v38 = vpop.permute.xlu0 %1269 }
 0x1d0   : > { %13657 = vst [vmem:[#allocation108_spill] sm:$0xff] %v7894_v38  ;;  %1672 = vrot.lane.b32.xlu2 %v1669_v17, %s6847_s11  ;;  %v1689_v17 = vsel %vm13318_vm0, %v1687_v53, %v1688_v61  ;;  %v1680_v38 = vsel %vm969_vm5, %v1677_v37, %v1679_v63  ;;  %v1698_v53 = vrot.slane %v7845_v47, 7  ;;  %v413_v63 = vrot.slane %v304_v0, 6 }
 0x1d1   : > { %1670 = vrot.lane.b32.xlu1 %v1667_v22, %s6847_s11  ;;  %v1676_v22 = vrot.slane %v7845_v47, 5 }
 0x1d2   : > { %v7900_v27 = vpop.permute.xlu2 %1321 }
 0x1d3   : > { %13658 = vst [vmem:[#allocation109_spill] sm:$0xff] %v7900_v27  ;;  %v7905_v41 = vpop.permute.xlu1 %1277  ;;  %v305_v27 = vld [vmem:[%s6919_s30 + $0xc8] sm:$0xff]  ;;  %v1678_v29 = vsel %vm969_vm5, %v1676_v22, %v1677_v37  ;;  %v1690_v37 = vrot.slane %v7840_v42, 6 }
 0x1d4   : > { %13659 = vst [vmem:[#allocation110_spill] sm:$0xff] %v7905_v41  ;;  %v414_v51 = vrot.slane %v305_v27, 6 }
 0x1d5   : > { %1661 = vrot.lane.b32.xlu0 %v1658_v33, %s6846_s10  ;;  %v1701_v33 = vrot.slane %v7840_v42, 7 }
 0x1d6   : > { %v7930_v22 = vsel %vm13318_vm0, %v413_v63, %v414_v51 }
 0x1d7   : > { %v7911_v46 = vpop.permute.xlu0 %1275  ;;  %13662 = vst [vmem:[#allocation113_spill] sm:$0xff] %v7930_v22 }
 0x1d8   : > { %13660 = vst [vmem:[#allocation111_spill] sm:$0xff] %v7911_v46  ;;  %1692 = vrot.lane.b32.xlu2 %v1689_v17, %s6849_s13  ;;  %v1702_v17 = vsel %vm1190_vm6, %v1699_v10, %v1701_v33 }
 0x1d9   : > { %1683 = vrot.lane.b32.xlu1 %v1680_v38, %s6848_s12  ;;  %v1700_v38 = vsel %vm1190_vm6, %v1698_v53, %v1699_v10  ;;  %v1691_v10 = vsel %vm13318_vm0, %v1688_v61, %v1690_v37  ;;  %v340_v53 = vperm.slane %v305_v27, 7 }
 0x1da   : > { %v7920_v41 = vpop.permute.xlu2 %1327 }
 0x1db   : > { %13661 = vst [vmem:[#allocation112_spill] sm:$0xff] %v7920_v41  ;;  %v7923_v46 = vpop.permute.xlu1 %6651  ;;  %v7933_v41 = vsel %vm13318_vm0, %v324_v23, %v413_v63  ;;  %v7949_v63 = vsel %vm13318_vm0, %v414_v51, %v340_v53 }
 0x1dc   : > { %13663 = vst [vmem:[#allocation114_spill] sm:$0xff] %v7933_v41  ;;  %v1733_v0 = vrot.slane %v7933_v41, 1  ;;  %v1747_v27 = vrot.slane %v7949_v63, 2  ;;  %v1744_v37 = vrot.slane %v7933_v41, 2  ;;  %v1736_v53 = vrot.slane %v7949_v63, 1 }
 0x1dd   : > { %1681 = vrot.lane.b32.xlu0 %v1678_v29, %s6848_s12  ;;  %v1734_v29 = vrot.slane %v7930_v22, 1 }
 0x1df   : > { %v7935_v47 = vpop.permute.xlu0 %6646  ;;  %v1735_v23 = vsel %vm525_vm1, %v1733_v0, %v1734_v29 }
 0x1e0   : > { %13664 = vst [vmem:[#allocation115_spill] sm:$0xff] %v7935_v47  ;;  %1705 = vrot.lane.b32.xlu2 %v1702_v17, %s6850_s14 }
 0x1e1   : > { %1703 = vrot.lane.b32.xlu1 %v1700_v38, %s6850_s14  ;;  %v1745_v38 = vrot.slane %v7930_v22, 2 }
 0x1e2   : > { %v7941_v33 = vpop.permute.xlu2 %1333 }
 0x1e3   : > { %13665 = vst [vmem:[#allocation116_spill] sm:$0xff] %v7941_v33  ;;  %v7944_v31 = vpop.permute.xlu1 %1313  ;;  %v1748_v51 = vsel %vm636_vm2, %v1745_v38, %v1747_v27  ;;  %v1746_v0 = vsel %vm636_vm2, %v1744_v37, %v1745_v38  ;;  %v1756_v27 = vrot.slane %v7930_v22, 3  ;;  %v1758_v38 = vrot.slane %v7949_v63, 3 }
 0x1e4   : > { %13666 = vst [vmem:[#allocation117_spill] sm:$0xff] %v7944_v31  ;;  %v1755_v31 = vrot.slane %v7933_v41, 3 }
 0x1e5   : > { %1694 = vrot.lane.b32.xlu0 %v1691_v10, %s6849_s13 }
 0x1e7   : > { %v7951_v17 = vpop.permute.xlu0 %1311 }
 0x1e8   : > { %13667 = vst [vmem:[#allocation118_spill] sm:$0xff] %v7951_v17  ;;  %1738 = vrot.lane.b32.xlu2 %v1735_v23, %s6844_s8  ;;  %v1766_v23 = vrot.slane %v7933_v41, 4 }
 0x1e9   : > { %1711 = vrot.lane.b32.xlu1 %v7840_v42, %s6851_s15 }
 0x1ea   : > { %v7958_v61 = vpop.permute.xlu2 %1339 }
 0x1eb   : > { %13668 = vst [vmem:[#allocation119_spill] sm:$0xff] %v7958_v61  ;;  %v7961_v10 = vpop.permute.xlu1 %1319  ;;  %v1767_v61 = vrot.slane %v7930_v22, 4 }
 0x1ec   : > { %13669 = vst [vmem:[#allocation120_spill] sm:$0xff] %v7961_v10 }
 0x1ed   : > { %1709 = vrot.lane.b32.xlu0 %v7837_v43, %s6851_s15  ;;  %v1737_v43 = vsel %vm525_vm1, %v1734_v29, %v1736_v53  ;;  %v1778_v29 = vrot.slane %v7930_v22, 5  ;;  %v1780_v53 = vrot.slane %v7949_v63, 5 }
 0x1ef   : > { %v7968_v42 = vpop.permute.xlu0 %1317 }
 0x1f0   : > { %13670 = vst [vmem:[#allocation121_spill] sm:$0xff] %v7968_v42  ;;  %1751 = vrot.lane.b32.xlu2 %v1748_v51, %s6845_s9  ;;  %v1768_v51 = vsel %vm858_vm4, %v1766_v23, %v1767_v61  ;;  %v1777_v23 = vrot.slane %v7933_v41, 5 }
 0x1f1   : > { %1749 = vrot.lane.b32.xlu1 %v1746_v0, %s6845_s9  ;;  %v1759_v0 = vsel %vm13319_vm3, %v1756_v27, %v1758_v38  ;;  %v1781_v38 = vsel %vm969_vm5, %v1778_v29, %v1780_v53 }
 0x1f2   : > { %v7974_v33 = vpop.permute.xlu2 %1547 }
 0x1f3   : > { %13671 = vst [vmem:[#allocation122_spill] sm:$0xff] %v7974_v33  ;;  %v7979_v37 = vpop.permute.xlu1 %1325 }
 0x1f4   : > { %13672 = vst [vmem:[#allocation123_spill] sm:$0xff] %v7979_v37 }
 0x1f5   : > { %1740 = vrot.lane.b32.xlu0 %v1737_v43, %s6844_s8  ;;  %v1757_v43 = vsel %vm13319_vm3, %v1755_v31, %v1756_v27  ;;  %v1799_v31 = vrot.slane %v7933_v41, 7  ;;  %v1800_v27 = vrot.slane %v7930_v22, 7 }
 0x1f7   : > { %v7985_v10 = vpop.permute.xlu0 %1323 }
 0x1f8   : > { %13673 = vst [vmem:[#allocation124_spill] sm:$0xff] %v7985_v10  ;;  %1771 = vrot.lane.b32.xlu2 %v1768_v51, %s6847_s11  ;;  %v1779_v51 = vsel %vm969_vm5, %v1777_v23, %v1778_v29  ;;  %v1789_v29 = vrot.slane %v7930_v22, 6  ;;  %v306_v10 = vld [vmem:[%s6919_s30 + $0xd0] sm:$0xff] }
 0x1f9   : > { %1762 = vrot.lane.b32.xlu1 %v1759_v0, %s6846_s10  ;;  %v1769_v0 = vrot.slane %v7949_v63, 4 }
 0x1fa   : > { %v7991_v33 = vpop.permute.xlu2 %1560 }
 0x1fb   : > { %13674 = vst [vmem:[#allocation125_spill] sm:$0xff] %v7991_v33  ;;  %v7995_v37 = vpop.permute.xlu1 %1331  ;;  %v1770_v53 = vsel %vm858_vm4, %v1767_v61, %v1769_v0  ;;  %v1788_v33 = vrot.slane %v7933_v41, 6  ;;  %v1802_v41 = vrot.slane %v7949_v63, 7 }
 0x1fc   : > { %13675 = vst [vmem:[#allocation126_spill] sm:$0xff] %v7995_v37 }
 0x1fd   : > { %1760 = vrot.lane.b32.xlu0 %v1757_v43, %s6846_s10  ;;  %v1791_v43 = vrot.slane %v7949_v63, 6  ;;  %v1790_v0 = vsel %vm13318_vm0, %v1788_v33, %v1789_v29 }
 0x1ff   : > { %v8001_v42 = vpop.permute.xlu0 %1329 }
 0x200   : > { %13676 = vst [vmem:[#allocation127_spill] sm:$0xff] %v8001_v42  ;;  %1784 = vrot.lane.b32.xlu2 %v1781_v38, %s6848_s12  ;;  %v1801_v38 = vsel %vm1190_vm6, %v1799_v31, %v1800_v27 }
 0x201   : > { %1782 = vrot.lane.b32.xlu1 %v1779_v51, %s6848_s12  ;;  %v1792_v51 = vsel %vm13318_vm0, %v1789_v29, %v1791_v43 }
 0x202   : > { %v8007_v37 = vpop.permute.xlu2 %1580 }
 0x203   : > { %13677 = vst [vmem:[#allocation128_spill] sm:$0xff] %v8007_v37  ;;  %v8012_v23 = vpop.permute.xlu1 %1337  ;;  %v307_v37 = vld [vmem:[%s6919_s30 + $0xd8] sm:$0xff] }
 0x204   : > { %13678 = vst [vmem:[#allocation129_spill] sm:$0xff] %v8012_v23  ;;  %v325_v23 = vperm.slane %v306_v10, 0  ;;  %v417_v47 = vrot.slane %v307_v37, 6  ;;  %v341_v43 = vperm.slane %v307_v37, 7 }
 0x205   : > { %1773 = vrot.lane.b32.xlu0 %v1770_v53, %s6847_s11  ;;  %v416_v53 = vrot.slane %v306_v10, 6 }
 0x206   : > { %v8040_v33 = vsel %vm13318_vm0, %v417_v47, %v341_v43 }
 0x207   : > { %v8018_v42 = vpop.permute.xlu0 %1335 }
 0x208   : > { %13679 = vst [vmem:[#allocation130_spill] sm:$0xff] %v8018_v42  ;;  %1804 = vrot.lane.b32.xlu2 %v1801_v38, %s6850_s14  ;;  %v8032_v42 = vsel %vm13318_vm0, %v416_v53, %v417_v47  ;;  %v8035_v38 = vsel %vm13318_vm0, %v325_v23, %v416_v53  ;;  %v1803_v23 = vsel %vm1190_vm6, %v1800_v27, %v1802_v41  ;;  %v1837_v53 = vrot.slane %v8040_v33, 1 }
 0x209   : > { %1795 = vrot.lane.b32.xlu1 %v1792_v51, %s6849_s13  ;;  %13682 = vst [vmem:[#allocation133_spill] sm:$0xff] %v8032_v42  ;;  %v1845_v10 = vrot.slane %v8035_v38, 2  ;;  %v1846_v37 = vrot.slane %v8032_v42, 2  ;;  %v1857_v41 = vrot.slane %v8032_v42, 3  ;;  %v1859_v27 = vrot.slane %v8040_v33, 3 }
 0x20a   : > { %v8024_v61 = vpop.permute.xlu2 %1593  ;;  %13683 = vst [vmem:[#allocation134_spill] sm:$0xff] %v8035_v38 }
 0x20b   : > { %13680 = vst [vmem:[#allocation131_spill] sm:$0xff] %v8024_v61  ;;  %v8027_v31 = vpop.permute.xlu1 %1538 }
 0x20c   : > { %13681 = vst [vmem:[#allocation132_spill] sm:$0xff] %v8027_v31  ;;  %v309_v31 = vld [vmem:[%s6919_s30 + $0xe8] sm:$0xff] }
 0x20d   : > { %1793 = vrot.lane.b32.xlu0 %v1790_v0, %s6849_s13  ;;  %v1835_v0 = vrot.slane %v8032_v42, 1  ;;  %v420_v17 = vrot.slane %v309_v31, 6 }
 0x20f   : > { %v8037_v51 = vpop.permute.xlu0 %1536  ;;  %v1838_v43 = vsel %vm525_vm1, %v1835_v0, %v1837_v53  ;;  %v1860_v53 = vsel %vm13319_vm3, %v1857_v41, %v1859_v27  ;;  %v1868_v27 = vrot.slane %v8032_v42, 4 }
 0x210   : > { %13684 = vst [vmem:[#allocation135_spill] sm:$0xff] %v8037_v51  ;;  %1812 = vrot.lane.b32.xlu2 %v7949_v63, %s6851_s15  ;;  %v1847_v63 = vsel %vm636_vm2, %v1845_v10, %v1846_v37  ;;  %v1856_v10 = vrot.slane %v8035_v38, 3  ;;  %v308_v51 = vld [vmem:[%s6919_s30 + $0xe0] sm:$0xff] }
 0x211   : > { %1810 = vrot.lane.b32.xlu1 %v7930_v22, %s6851_s15  ;;  %v1834_v22 = vrot.slane %v8035_v38, 1 }
 0x212   : > { %v8048_v29 = vpop.permute.xlu2 %1608 }
 0x213   : > { %13685 = vst [vmem:[#allocation136_spill] sm:$0xff] %v8048_v29  ;;  %v8053_v47 = vpop.permute.xlu1 %1558 }
 0x214   : > { %13686 = vst [vmem:[#allocation137_spill] sm:$0xff] %v8053_v47 }
 0x215   : > { %1806 = vrot.lane.b32.xlu0 %v1803_v23, %s6850_s14  ;;  %v1836_v23 = vsel %vm525_vm1, %v1834_v22, %v1835_v0  ;;  %v1878_v22 = vrot.slane %v8035_v38, 5  ;;  %v1879_v0 = vrot.slane %v8032_v42, 5 }
 0x217   : > { %v8059_v61 = vpop.permute.xlu0 %1549 }
 0x218   : > { %13687 = vst [vmem:[#allocation138_spill] sm:$0xff] %v8059_v61  ;;  %1850 = vrot.lane.b32.xlu2 %v1847_v63, %s6845_s9  ;;  %v1858_v63 = vsel %vm13319_vm3, %v1856_v10, %v1857_v41  ;;  %v1870_v41 = vrot.slane %v8040_v33, 4 }
 0x219   : > { %1841 = vrot.lane.b32.xlu1 %v1838_v43, %s6844_s8  ;;  %v1848_v43 = vrot.slane %v8040_v33, 2 }
 0x21a   : > { %v8065_v29 = vpop.permute.xlu2 %1639 }
 0x21b   : > { %13688 = vst [vmem:[#allocation139_spill] sm:$0xff] %v8065_v29  ;;  %v8069_v47 = vpop.permute.xlu1 %1571 }
 0x21c   : > { %13689 = vst [vmem:[#allocation140_spill] sm:$0xff] %v8069_v47 }
 0x21d   : > { %1839 = vrot.lane.b32.xlu0 %v1836_v23, %s6844_s8  ;;  %v1849_v23 = vsel %vm636_vm2, %v1846_v37, %v1848_v43  ;;  %v1890_v37 = vrot.slane %v8032_v42, 6  ;;  %v1892_v43 = vrot.slane %v8040_v33, 6 }
 0x21f   : > { %v8075_v61 = vpop.permute.xlu0 %1569 }
 0x220   : > { %13690 = vst [vmem:[#allocation141_spill] sm:$0xff] %v8075_v61  ;;  %1863 = vrot.lane.b32.xlu2 %v1860_v53, %s6846_s10  ;;  %v1880_v53 = vsel %vm969_vm5, %v1878_v22, %v1879_v0  ;;  %v1867_v61 = vrot.slane %v8035_v38, 4 }
 0x221   : > { %1861 = vrot.lane.b32.xlu1 %v1858_v63, %s6846_s10  ;;  %v1871_v63 = vsel %vm858_vm4, %v1868_v27, %v1870_v41 }
 0x222   : > { %v8081_v29 = vpop.permute.xlu2 %1659  ;;  %v1869_v22 = vsel %vm858_vm4, %v1867_v61, %v1868_v27  ;;  %v1901_v27 = vrot.slane %v8032_v42, 7 }
 0x223   : > { %13691 = vst [vmem:[#allocation142_spill] sm:$0xff] %v8081_v29  ;;  %v8086_v10 = vpop.permute.xlu1 %1591 }
 0x224   : > { %13692 = vst [vmem:[#allocation143_spill] sm:$0xff] %v8086_v10  ;;  %v1893_v10 = vsel %vm13318_vm0, %v1890_v37, %v1892_v43  ;;  %v1903_v43 = vrot.slane %v8040_v33, 7 }
 0x225   : > { %1852 = vrot.lane.b32.xlu0 %v1849_v23, %s6845_s9  ;;  %v1889_v23 = vrot.slane %v8035_v38, 6 }
 0x227   : > { %v8092_v47 = vpop.permute.xlu0 %1582 }
 0x228   : > { %13693 = vst [vmem:[#allocation144_spill] sm:$0xff] %v8092_v47  ;;  %1883 = vrot.lane.b32.xlu2 %v1880_v53, %s6848_s12  ;;  %v1881_v53 = vrot.slane %v8040_v33, 5 }
 0x229   : > { %1874 = vrot.lane.b32.xlu1 %v1871_v63, %s6847_s11  ;;  %v1891_v63 = vsel %vm13318_vm0, %v1889_v23, %v1890_v37  ;;  %v326_v23 = vperm.slane %v308_v51, 0 }
 0x22a   : > { %v8098_v29 = vpop.permute.xlu2 %1672  ;;  %v1882_v61 = vsel %vm969_vm5, %v1879_v0, %v1881_v53 }
 0x22b   : > { %13694 = vst [vmem:[#allocation145_spill] sm:$0xff] %v8098_v29  ;;  %v8102_v41 = vpop.permute.xlu1 %1604 }
 0x22c   : > { %13695 = vst [vmem:[#allocation146_spill] sm:$0xff] %v8102_v41  ;;  %v419_v41 = vrot.slane %v308_v51, 6 }
 0x22d   : > { %1872 = vrot.lane.b32.xlu0 %v1869_v22, %s6847_s11  ;;  %v342_v22 = vperm.slane %v309_v31, 7 }
 0x22e   : > { %v8125_v0 = vsel %vm13318_vm0, %v419_v41, %v420_v17 }
 0x22f   : > { %v8108_v47 = vpop.permute.xlu0 %1602  ;;  %13699 = vst [vmem:[#allocation150_spill] sm:$0xff] %v8125_v0  ;;  %v8128_v53 = vsel %vm13318_vm0, %v420_v17, %v342_v22  ;;  %v1936_v31 = vrot.slane %v8125_v0, 1 }
 0x230   : > { %13696 = vst [vmem:[#allocation147_spill] sm:$0xff] %v8108_v47  ;;  %1896 = vrot.lane.b32.xlu2 %v1893_v10, %s6849_s13  ;;  %v1904_v10 = vsel %vm1190_vm6, %v1901_v27, %v1903_v43  ;;  %v8133_v47 = vsel %vm13318_vm0, %v326_v23, %v419_v41  ;;  %v1938_v51 = vrot.slane %v8128_v53, 1 }
 0x231   : > { %1894 = vrot.lane.b32.xlu1 %v1891_v63, %s6849_s13  ;;  %v1900_v63 = vrot.slane %v8035_v38, 7  ;;  %13701 = vst [vmem:[#allocation152_spill] sm:$0xff] %v8133_v47  ;;  %v1935_v17 = vrot.slane %v8133_v47, 1 }
 0x232   : > { %v8116_v29 = vpop.permute.xlu2 %1692  ;;  %v1939_v41 = vsel %vm525_vm1, %v1936_v31, %v1938_v51 }
 0x233   : > { %13697 = vst [vmem:[#allocation148_spill] sm:$0xff] %v8116_v29  ;;  %v8119_v37 = vpop.permute.xlu1 %1637  ;;  %v1902_v43 = vsel %vm1190_vm6, %v1900_v63, %v1901_v27  ;;  %v1937_v23 = vsel %vm525_vm1, %v1935_v17, %v1936_v31  ;;  %v1958_v27 = vrot.slane %v8125_v0, 3  ;;  %v1946_v17 = vrot.slane %v8133_v47, 2 }
 0x234   : > { %13698 = vst [vmem:[#allocation149_spill] sm:$0xff] %v8119_v37 }
 0x235   : > { %1885 = vrot.lane.b32.xlu0 %v1882_v61, %s6848_s12 }
 0x237   : > { %v8130_v29 = vpop.permute.xlu0 %1610 }
 0x238   : > { %13700 = vst [vmem:[#allocation151_spill] sm:$0xff] %v8130_v29  ;;  %1911 = vrot.lane.b32.xlu2 %v8032_v42, %s6851_s15  ;;  %v1947_v42 = vrot.slane %v8125_v0, 2 }
 0x239   : > { %1907 = vrot.lane.b32.xlu1 %v1904_v10, %s6850_s14  ;;  %v1957_v10 = vrot.slane %v8133_v47, 3 }
 0x23a   : > { %v8140_v61 = vpop.permute.xlu2 %1705 }
 0x23b   : > { %13702 = vst [vmem:[#allocation153_spill] sm:$0xff] %v8140_v61  ;;  %v8144_v22 = vpop.permute.xlu1 %1650  ;;  %v1959_v31 = vsel %vm13319_vm3, %v1957_v10, %v1958_v27  ;;  %v1968_v10 = vrot.slane %v8133_v47, 4 }
 0x23c   : > { %13703 = vst [vmem:[#allocation154_spill] sm:$0xff] %v8144_v22  ;;  %v310_v22 = vld [vmem:[%s6919_s30 + $0xf0] sm:$0xff] }
 0x23d   : > { %1905 = vrot.lane.b32.xlu0 %v1902_v43, %s6850_s14  ;;  %v1949_v43 = vrot.slane %v8128_v53, 2  ;;  %v327_v37 = vperm.slane %v310_v22, 0 }
 0x23f   : > { %v8149_v38 = vpop.permute.xlu0 %1648  ;;  %v1950_v51 = vsel %vm636_vm2, %v1947_v42, %v1949_v43 }
 0x240   : > { %13704 = vst [vmem:[#allocation155_spill] sm:$0xff] %v8149_v38  ;;  %1942 = vrot.lane.b32.xlu2 %v1939_v41, %s6844_s8 }
 0x241   : > { %1940 = vrot.lane.b32.xlu1 %v1937_v23, %s6844_s8  ;;  %v1969_v23 = vrot.slane %v8125_v0, 4 }
 0x242   : > { %v8155_v63 = vpop.permute.xlu2 %1738 }
 0x243   : > { %13705 = vst [vmem:[#allocation156_spill] sm:$0xff] %v8155_v63  ;;  %v8159_v61 = vpop.permute.xlu1 %1670  ;;  %v1971_v63 = vrot.slane %v8128_v53, 4 }
 0x244   : > { %13706 = vst [vmem:[#allocation157_spill] sm:$0xff] %v8159_v61 }
 0x245   : > { %1913 = vrot.lane.b32.xlu0 %v8040_v33, %s6851_s15  ;;  %v1948_v33 = vsel %vm636_vm2, %v1946_v17, %v1947_v42  ;;  %v1972_v43 = vsel %vm858_vm4, %v1969_v23, %v1971_v63  ;;  %v1990_v42 = vrot.slane %v8133_v47, 6  ;;  %v1991_v17 = vrot.slane %v8125_v0, 6 }
 0x247   : > { %v8166_v41 = vpop.permute.xlu0 %1661 }
 0x248   : > { %13707 = vst [vmem:[#allocation158_spill] sm:$0xff] %v8166_v41  ;;  %1962 = vrot.lane.b32.xlu2 %v1959_v31, %s6846_s10  ;;  %v1970_v31 = vsel %vm858_vm4, %v1968_v10, %v1969_v23  ;;  %v1980_v23 = vrot.slane %v8125_v0, 5 }
 0x249   : > { %1953 = vrot.lane.b32.xlu1 %v1950_v51, %s6845_s9  ;;  %v1960_v51 = vrot.slane %v8128_v53, 3 }
 0x24a   : > { %v8172_v61 = vpop.permute.xlu2 %1751 }
 0x24b   : > { %13708 = vst [vmem:[#allocation159_spill] sm:$0xff] %v8172_v61  ;;  %v8176_v38 = vpop.permute.xlu1 %1683  ;;  %v1961_v63 = vsel %vm13319_vm3, %v1958_v27, %v1960_v51  ;;  %v2002_v51 = vrot.slane %v8125_v0, 7 }
 0x24c   : > { %13709 = vst [vmem:[#allocation160_spill] sm:$0xff] %v8176_v38 }
 0x24d   : > { %1951 = vrot.lane.b32.xlu0 %v1948_v33, %s6845_s9  ;;  %v1982_v33 = vrot.slane %v8128_v53, 5 }
 0x24f   : > { %v8182_v41 = vpop.permute.xlu0 %1681  ;;  %v1983_v38 = vsel %vm969_vm5, %v1980_v23, %v1982_v33  ;;  %v422_v33 = vrot.slane %v310_v22, 6 }
 0x250   : > { %13710 = vst [vmem:[#allocation161_spill] sm:$0xff] %v8182_v41  ;;  %1975 = vrot.lane.b32.xlu2 %v1972_v43, %s6847_s11  ;;  %v1992_v43 = vsel %vm13318_vm0, %v1990_v42, %v1991_v17  ;;  %v2001_v42 = vrot.slane %v8133_v47, 7 }
 0x251   : > { %1973 = vrot.lane.b32.xlu1 %v1970_v31, %s6847_s11  ;;  %v1979_v31 = vrot.slane %v8133_v47, 5 }
 0x252   : > { %v8188_v61 = vpop.permute.xlu2 %1771 }
 0x253   : > { %13711 = vst [vmem:[#allocation162_spill] sm:$0xff] %v8188_v61  ;;  %v8193_v10 = vpop.permute.xlu1 %1703  ;;  %v311_v61 = vld [vmem:[%s6919_s30 + $0xf8] sm:$0xff]  ;;  %v1981_v27 = vsel %vm969_vm5, %v1979_v31, %v1980_v23  ;;  %v1993_v23 = vrot.slane %v8128_v53, 6 }
 0x254   : > { %13712 = vst [vmem:[#allocation163_spill] sm:$0xff] %v8193_v10  ;;  %v423_v29 = vrot.slane %v311_v61, 6 }
 0x255   : > { %1964 = vrot.lane.b32.xlu0 %v1961_v63, %s6846_s10  ;;  %v2004_v63 = vrot.slane %v8128_v53, 7 }
 0x256   : > { %v8218_v31 = vsel %vm13318_vm0, %v422_v33, %v423_v29 }
 0x257   : > { %v8199_v41 = vpop.permute.xlu0 %1694  ;;  %13716 = vst [vmem:[#allocation167_spill] sm:$0xff] %v8218_v31 }
 0x258   : > { %13713 = vst [vmem:[#allocation164_spill] sm:$0xff] %v8199_v41  ;;  %1995 = vrot.lane.b32.xlu2 %v1992_v43, %s6849_s13  ;;  %v2005_v43 = vsel %vm1190_vm6, %v2002_v51, %v2004_v63 }
 0x259   : > { %1986 = vrot.lane.b32.xlu1 %v1983_v38, %s6848_s12  ;;  %v2003_v38 = vsel %vm1190_vm6, %v2001_v42, %v2002_v51  ;;  %v1994_v51 = vsel %vm13318_vm0, %v1991_v17, %v1993_v23  ;;  %v343_v42 = vperm.slane %v311_v61, 7 }
 0x25a   : > { %v8208_v10 = vpop.permute.xlu2 %1784 }
 0x25b   : > { %13714 = vst [vmem:[#allocation165_spill] sm:$0xff] %v8208_v10  ;;  %v8211_v41 = vpop.permute.xlu1 %1711  ;;  %v8221_v10 = vsel %vm13318_vm0, %v327_v37, %v422_v33  ;;  %v8237_v33 = vsel %vm13318_vm0, %v423_v29, %v343_v42 }
 0x25c   : > { %13715 = vst [vmem:[#allocation166_spill] sm:$0xff] %v8211_v41  ;;  %v2036_v22 = vrot.slane %v8221_v10, 1  ;;  %v2050_v61 = vrot.slane %v8237_v33, 2  ;;  %v2047_v23 = vrot.slane %v8221_v10, 2  ;;  %v2039_v42 = vrot.slane %v8237_v33, 1 }
 0x25d   : > { %1984 = vrot.lane.b32.xlu0 %v1981_v27, %s6848_s12  ;;  %13717 = vst [vmem:[#allocation168_spill] sm:$0xff] %v8221_v10  ;;  %v2037_v27 = vrot.slane %v8218_v31, 1 }
 0x25f   : > { %v8223_v47 = vpop.permute.xlu0 %1709  ;;  %v2038_v37 = vsel %vm525_vm1, %v2036_v22, %v2037_v27 }
 0x260   : > { %2008 = vrot.lane.b32.xlu2 %v2005_v43, %s6850_s14 }
 0x261   : > { %2006 = vrot.lane.b32.xlu1 %v2003_v38, %s6850_s14  ;;  %v2048_v38 = vrot.slane %v8218_v31, 2 }
 0x262   : > { %v8229_v63 = vpop.permute.xlu2 %1804 }
 0x263   : > { %13718 = vst [vmem:[#allocation169_spill] sm:$0xff] %v8229_v63  ;;  %v8232_v41 = vpop.permute.xlu1 %1749  ;;  %v2051_v29 = vsel %vm636_vm2, %v2048_v38, %v2050_v61  ;;  %v2049_v22 = vsel %vm636_vm2, %v2047_v23, %v2048_v38  ;;  %v6578_v63 = vunpack.i.l.bf16 %v7220_v28  ;;  %v2069_v61 = vrot.slane %v8221_v10, 4 }
 0x264   : > { %v2070_v38 = vrot.slane %v8218_v31, 4  ;;  %v1368_v23 = vsel %vm1361_vm7, %v6931_v15, %v7172_v11  ;;  %v1375_v15 = vsel %vm1361_vm7, %v7020_v30, %v7210_v5  ;;  %v1367_v30 = vsel %vm1361_vm7, %v6936_v20, %v7231_v40 }
 0x265   : > { %1997 = vrot.lane.b32.xlu0 %v1994_v51, %s6849_s13  ;;  %v1370_v20 = vsel %vm1361_vm7, %v7013_v18, %v7256_v6  ;;  %v6594_v5 = vunpack.i.h.bf16 %v7318_v35  ;;  %v1373_v18 = vsel %vm1361_vm7, %v6996_v7, %v7276_v55  ;;  %v6589_v40 = vunpack.i.h.bf16 %v7324_v59  ;;  %v13722_v6 = vld [vmem:[#allocation6_spill] sm:$0xff]  ;;  %v13723_v55 = vld [vmem:[#allocation7_spill] sm:$0xff] }
 0x266   : > { %v2081_v7 = vrot.slane %v8218_v31, 5 }
 0x267   : > { %v8239_v43 = vpop.permute.xlu0 %1740 }
 0x268   : > { %2041 = vrot.lane.b32.xlu2 %v2038_v37, %s6844_s8  ;;  %v6579_v37 = vunpack.i.h.bf16 %v7220_v28  ;;  %v2040_v28 = vsel %vm525_vm1, %v2037_v27, %v2039_v42  ;;  %v1366_v27 = vsel %vm1361_vm7, %v6939_v21, %v7214_v16  ;;  %v6593_v16 = vunpack.i.l.bf16 %v7318_v35 }
 0x269   : > { %2014 = vrot.lane.b32.xlu1 %v8128_v53, %s6851_s15 }
 0x26a   : > { %v8246_v17 = vpop.permute.xlu2 %1812  ;;  %v1363_v42 = vsel %vm1361_vm7, %v6944_v24, %v6579_v37  ;;  %v2071_v24 = vsel %vm858_vm4, %v2069_v61, %v2070_v38 }
 0x26b   : > { %13719 = vst [vmem:[#allocation170_spill] sm:$0xff] %v8246_v17  ;;  %v8249_v51 = vpop.permute.xlu1 %1762  ;;  %v6584_v17 = vunpack.i.h.bf16 %v7237_v49 }
 0x26c   : > { %13720 = vst [vmem:[#allocation171_spill] sm:$0xff] %v8249_v51  ;;  %v6583_v51 = vunpack.i.l.bf16 %v7237_v49  ;;  %v1369_v49 = vsel %vm1361_vm7, %v6928_v14, %v7186_v45  ;;  %v1362_v14 = vsel %vm1361_vm7, %v6947_v25, %v6578_v63  ;;  %v1371_v25 = vsel %vm1361_vm7, %v7005_v12, %v7247_v60  ;;  %v13725_v63 = vld [vmem:[#allocation10_spill] sm:$0xff] }
 0x26d   : > { %2012 = vrot.lane.b32.xlu0 %v8125_v0, %s6851_s15  ;;  %v1365_v45 = vsel %vm1361_vm7, %v6979_v52, %v6584_v17  ;;  %v2058_v52 = vrot.slane %v8221_v10, 3  ;;  %v6588_v60 = vunpack.i.l.bf16 %v7324_v59  ;;  %v1396_v17 = vsel %vm1382_vm8, %v1375_v15, %v13725_v63  ;;  %v13729_v15 = vld [vmem:[#allocation15_spill] sm:$0xff] }
 0x26e   : > { %v1364_v21 = vsel %vm1361_vm7, %v6973_v48, %v6583_v51  ;;  %v1387_v48 = vsel %vm1382_vm8, %v1366_v27, %v7264_v32  ;;  %v1376_v32 = vsel %vm1361_vm7, %v7067_v9, %v13722_v6  ;;  %v13735_v6 = vld [vmem:[#allocation28_spill] sm:$0xff] }
 0x26f   : > { %v8256_v53 = vpop.permute.xlu0 %1760  ;;  %v1385_v51 = vsel %vm1382_vm8, %v1364_v21, %v6593_v16  ;;  %v1383_v61 = vsel %vm1382_vm8, %v1362_v14, %v6588_v60  ;;  %v1392_v21 = vsel %vm1382_vm8, %v1371_v25, %v13729_v15  ;;  %v13733_v16 = vld [vmem:[#allocation19_spill] sm:$0xff]  ;;  %v6599_v63 = vunpack.i.h.bf16 %v13735_v6 }
 0x270   : > { %13721 = vst [vmem:[#allocation172_spill] sm:$0xff] %v8256_v53  ;;  %2054 = vrot.lane.b32.xlu2 %v2051_v29, %s6845_s9  ;;  %v2059_v29 = vrot.slane %v8218_v31, 3  ;;  %v2061_v53 = vrot.slane %v8237_v33, 3  ;;  %v1394_v25 = vsel %vm1382_vm8, %v1373_v18, %v13733_v16  ;;  %v13739_v18 = vld [vmem:[#allocation23_spill] sm:$0xff] }
 0x271   : > { %2052 = vrot.lane.b32.xlu1 %v2049_v22, %s6845_s9  ;;  %v1372_v22 = vsel %vm1361_vm7, %v6999_v8, %v7197_v57  ;;  %v1378_v8 = vsel %vm1361_vm7, %v7045_v56, %v7226_v36  ;;  %v1374_v57 = vsel %vm1361_vm7, %v7027_v34, %v7270_v44  ;;  %v1390_v36 = vsel %vm1382_vm8, %v1369_v49, %v7282_v1 }
 0x272   : > { %v8269_v0 = vpop.permute.xlu2 %1850  ;;  %v2062_v56 = vsel %vm13319_vm3, %v2059_v29, %v2061_v53  ;;  %v1377_v34 = vsel %vm1361_vm7, %v7054_v62, %v7285_v3  ;;  %v2083_v44 = vrot.slane %v8237_v33, 5  ;;  %v1393_v1 = vsel %vm1382_vm8, %v1372_v22, %v13723_v55  ;;  %v13724_v3 = vld [vmem:[#allocation9_spill] sm:$0xff]  ;;  %v13727_v22 = vld [vmem:[#allocation12_spill] sm:$0xff] }
 0x273   : > { %v8283_v11 = vpop.permute.xlu1 %1782  ;;  %v2060_v59 = vsel %vm13319_vm3, %v2058_v52, %v2059_v29  ;;  %v2080_v62 = vrot.slane %v8221_v10, 5  ;;  %v1379_v9 = vsel %vm1361_vm7, %v7049_v58, %v13724_v3  ;;  %v1386_v53 = vsel %vm1382_vm8, %v1365_v45, %v6594_v5  ;;  %v13726_v29 = vld [vmem:[#allocation11_spill] sm:$0xff]  ;;  %v13728_v58 = vld [vmem:[#allocation13_spill] sm:$0xff] }
 0x274   : > { %v1399_v49 = vsel %vm1382_vm8, %v1378_v8, %v13726_v29  ;;  %v1389_v27 = vsel %vm1382_vm8, %v1368_v23, %v13727_v22  ;;  %v2084_v14 = vsel %vm969_vm5, %v2081_v7, %v2083_v44  ;;  %v13732_v8 = vld [vmem:[#allocation18_spill] sm:$0xff]  ;;  %v6598_v55 = vunpack.i.l.bf16 %v13735_v6  ;;  %v13737_v3 = vld [vmem:[#allocation21_spill] sm:$0xff] }
 0x275   : > { %2043 = vrot.lane.b32.xlu0 %v2040_v28, %s6844_s8  ;;  %v1384_v28 = vsel %vm1382_vm8, %v1363_v42, %v6589_v40  ;;  %v13731_v42 = vld [vmem:[#allocation17_spill] sm:$0xff]  ;;  %v1395_v5 = vsel %vm1382_vm8, %v1374_v57, %v13732_v8  ;;  %v2082_v23 = vsel %vm969_vm5, %v2080_v62, %v2081_v7  ;;  %v13734_v40 = vld [vmem:[#allocation27_spill] sm:$0xff]  ;;  %v1398_v57 = vsel %vm1382_vm8, %v1377_v34, %v13737_v3  ;;  %v13738_v7 = vld [vmem:[#allocation22_spill] sm:$0xff] }
 0x276   : > { %v1408_v52 = vsel %vm1403_vm9, %v1387_v48, %v13731_v42  ;;  %v6604_v60 = vunpack.i.h.bf16 %v13734_v40  ;;  %v1397_v62 = vsel %vm1382_vm8, %v1376_v32, %v13738_v7  ;;  %v1414_v29 = vsel %vm1403_vm9, %v1393_v1, %v13739_v18  ;;  %v13742_v6 = vld [vmem:[#allocation29_spill] sm:$0xff]  ;;  %v13744_v3 = vld [vmem:[#allocation31_spill] sm:$0xff] }
 0x277   : > { %v8321_v12 = vpop.permute.xlu0 %1773  ;;  %v2102_v22 = vrot.slane %v8221_v10, 7  ;;  %v2094_v1 = vrot.slane %v8237_v33, 6  ;;  %v1404_v16 = vsel %vm1403_vm9, %v1383_v61, %v6598_v55  ;;  %v13747_v61 = vld [vmem:[#allocation35_spill] sm:$0xff]  ;;  %v13750_v18 = vld [vmem:[#allocation37_spill] sm:$0xff]  ;;  %vm2792_vm3 = vcmask 883712  }
 0x278   : > { %2074 = vrot.lane.b32.xlu2 %v2071_v24, %s6847_s11  ;;  %v1388_v24 = vsel %vm1382_vm8, %v1367_v30, %v13728_v58  ;;  %v2072_v30 = vrot.slane %v8237_v33, 4  ;;  %v13740_v58 = vld [vmem:[#allocation25_spill] sm:$0xff] }
 0x279   : > { %2065 = vrot.lane.b32.xlu1 %v2062_v56, %s6846_s10  ;;  %v13730_v56 = vld [vmem:[#allocation16_spill] sm:$0xff]  ;;  %v1400_v34 = vsel %vm1382_vm8, %v1379_v9, %v13740_v58  ;;  %v1409_v7 = vsel %vm1403_vm9, %v1388_v24, %v13744_v3  ;;  %v13751_v58 = vld [vmem:[#allocation46_spill] sm:$0xff] }
 0x27a   : > { %v8342_v35 = vpop.permute.xlu2 %1863  ;;  %v1391_v45 = vsel %vm1382_vm8, %v1370_v20, %v13730_v56  ;;  %v6603_v20 = vunpack.i.l.bf16 %v13734_v40  ;;  %v2073_v32 = vsel %vm858_vm4, %v2070_v38, %v2072_v30  ;;  %v2092_v56 = vrot.slane %v8218_v31, 6  ;;  %v13743_v30 = vld [vmem:[#allocation30_spill] sm:$0xff] }
 0x27b   : > { %v8353_v37 = vpop.permute.xlu1 %1795  ;;  %v1405_v40 = vsel %vm1403_vm9, %v1384_v28, %v6599_v63  ;;  %v1420_v38 = vsel %vm1403_vm9, %v1399_v49, %v13742_v6  ;;  %v13748_v49 = vld [vmem:[#allocation45_spill] sm:$0xff]  ;;  %v13749_v63 = vld [vmem:[#allocation36_spill] sm:$0xff]  ;;  %v13752_v6 = vld [vmem:[#allocation38_spill] sm:$0xff] }
 0x27c   : > { %v1406_v8 = vsel %vm1403_vm9, %v1385_v51, %v6603_v20  ;;  %v13746_v20 = vld [vmem:[#allocation34_spill] sm:$0xff]  ;;  %v6613_v24 = vunpack.i.l.bf16 %v13748_v49  ;;  %v2095_v55 = vsel %vm13318_vm0, %v2092_v56, %v2094_v1  ;;  %v13753_v1 = vld [vmem:[#allocation39_spill] sm:$0xff] }
 0x27d   : > { %2063 = vrot.lane.b32.xlu0 %v2060_v59, %s6846_s10  ;;  %v13736_v59 = vld [vmem:[#allocation20_spill] sm:$0xff]  ;;  %v8452_v3 = vsel %vm1403_vm9, %v1398_v57, %v13753_v1  ;;  %v6623_v57 = vunpack.i.l.bf16 %v7630_v50  ;;  %v13759_v1 = vld [vmem:[#allocation47_spill] sm:$0xff] }
 0x27e   : > { %v1411_v48 = vsel %vm1403_vm9, %v1390_v36, %v13736_v59  ;;  %v2103_v36 = vrot.slane %v8218_v31, 7  ;;  %v1410_v59 = vsel %vm1403_vm9, %v1389_v27, %v13743_v30  ;;  %v6614_v27 = vunpack.i.h.bf16 %v13748_v49 }
 0x27f   : > { %v8380_v44 = vpop.permute.xlu0 %1793  ;;  %v8448_v30 = vsel %vm1424_vm10, %v1411_v48, %v13752_v6  ;;  %v6624_v48 = vunpack.i.h.bf16 %v7630_v50  ;;  %v8483_v50 = vsel %vm1424_vm10, %v1420_v38, %v13759_v1  ;;  %v13763_v38 = vld [vmem:[#allocation53_spill] sm:$0xff]  ;;  %v13765_v1 = vld [vmem:[#allocation98_spill] sm:$0xff] }
 0x280   : > { %2087 = vrot.lane.b32.xlu2 %v2084_v14, %s6848_s12  ;;  %v13741_v14 = vld [vmem:[#allocation26_spill] sm:$0xff]  ;;  %v2104_v28 = vsel %vm1190_vm6, %v2102_v22, %v2103_v36  ;;  %v6608_v22 = vunpack.i.l.bf16 %v13751_v58 }
 0x281   : > { %2085 = vrot.lane.b32.xlu1 %v2082_v23, %s6848_s12  ;;  %v1417_v42 = vsel %vm1403_vm9, %v1396_v17, %v13741_v14  ;;  %v1407_v23 = vsel %vm1403_vm9, %v1386_v53, %v6604_v60  ;;  %v13745_v17 = vld [vmem:[#allocation33_spill] sm:$0xff]  ;;  %v8422_v53 = vsel %vm1403_vm9, %v1391_v45, %v13746_v20  ;;  %v1429_v60 = vsel %vm1424_vm10, %v1408_v52, %v13747_v61  ;;  %v13756_v61 = vld [vmem:[#allocation43_spill] sm:$0xff]  ;;  %s6858_s12 = smov 61  }
 0x282   : > { %v8397_v15 = vpop.permute.xlu2 %1883  ;;  %v1413_v51 = vsel %vm1403_vm9, %v1392_v21, %v13745_v17  ;;  %v2091_v21 = vrot.slane %v8221_v10, 6  ;;  %v8436_v45 = vsel %vm1403_vm9, %v1395_v5, %v13749_v63  ;;  %v8440_v52 = vsel %vm1403_vm9, %v1394_v25, %v13750_v18  ;;  %v13754_v5 = vld [vmem:[#allocation40_spill] sm:$0xff]  ;;  %v13755_v25 = vld [vmem:[#allocation41_spill] sm:$0xff] }
 0x283   : > { %v8409_v9 = vpop.permute.xlu1 %1810  ;;  %v8456_v17 = vsel %vm1403_vm9, %v1397_v62, %v13754_v5  ;;  %v8461_v20 = vsel %vm1424_vm10, %v1414_v29, %v13755_v25  ;;  %v8465_v49 = vsel %vm1403_vm9, %v1400_v34, %v13756_v61  ;;  %v13757_v63 = vld [vmem:[#allocation44_spill] sm:$0xff]  ;;  %v1428_v18 = vsel %vm1424_vm10, %v1407_v23, %v6614_v27  ;;  %v13762_v27 = vld [vmem:[#allocation51_spill] sm:$0xff]  ;;  %v13842_v10 = vld [vmem:[#allocation93_spill] sm:$0xff] }
 0x284   : > { %v8472_v62 = vsel %vm1424_vm10, %v1417_v42, %v13757_v63  ;;  %v1425_v34 = vsel %vm1424_vm10, %v1404_v16, %v6608_v22  ;;  %v6633_v16 = vunpack.i.l.bf16 %v7713_v19  ;;  %v6618_v22 = vunpack.i.l.bf16 %v7636_v54 }
 0x285   : > { %2076 = vrot.lane.b32.xlu0 %v2073_v32, %s6847_s11  ;;  %v6609_v32 = vunpack.i.h.bf16 %v13751_v58  ;;  %v2093_v58 = vsel %vm13318_vm0, %v2091_v21, %v2092_v56  ;;  %v6634_v56 = vunpack.i.h.bf16 %v7713_v19  ;;  %v1449_v21 = vsel %vm1445_vm11, %v1428_v18, %v6624_v48  ;;  %s6856_s11 = smov 7  }
 0x286   : > { %v2105_v19 = vrot.slane %v8237_v33, 7  ;;  %v6644_v25 = vunpack.i.h.bf16 %v7814_v39  ;;  %v6654_v63 = vunpack.i.h.bf16 %v7923_v46  ;;  %vm2767_vm0 = vcmask 662528  }
 0x287   : > { %v8444_v14 = vpop.permute.xlu0 %1806  ;;  %v1426_v6 = vsel %vm1424_vm10, %v1405_v40, %v6609_v32  ;;  %v8497_v40 = vsel %vm1424_vm10, %v1413_v51, %v13762_v27  ;;  %v6643_v32 = vunpack.i.l.bf16 %v7814_v39  ;;  %v13764_v39 = vld [vmem:[#allocation84_spill] sm:$0xff] }
 0x288   : > { %2107 = vrot.lane.b32.xlu2 %v2104_v28, %s6850_s14  ;;  %v1427_v28 = vsel %vm1424_vm10, %v1406_v8, %v6613_v24  ;;  %v13761_v8 = vld [vmem:[#allocation49_spill] sm:$0xff]  ;;  %v1450_v24 = vsel %vm1445_vm11, %v1429_v60, %v13763_v38 }
 0x289   : > { %2098 = vrot.lane.b32.xlu1 %v2095_v55, %s6849_s13  ;;  %v13760_v55 = vld [vmem:[#allocation48_spill] sm:$0xff]  ;;  %v1430_v23 = vsel %vm1424_vm10, %v1409_v7, %v13761_v8  ;;  %v6619_v7 = vunpack.i.h.bf16 %v7636_v54  ;;  %v1471_v60 = vsel %vm1466_vm12, %v1450_v24, %v7673_v2  ;;  %v6628_v54 = vunpack.i.l.bf16 %v7717_v4 }
 0x28a   : > { %v8476_v29 = vpop.permute.xlu2 %1896  ;;  %v8487_v42 = vsel %vm1424_vm10, %v1410_v59, %v13760_v55  ;;  %v1448_v59 = vsel %vm1445_vm11, %v1427_v28, %v6623_v57  ;;  %v1451_v51 = vsel %vm1445_vm11, %v1430_v23, %v7653_v26  ;;  %v1470_v57 = vsel %vm1466_vm12, %v1449_v21, %v6634_v56  ;;  %v13767_v55 = vld [vmem:[#allocation94_spill] sm:$0xff] }
 0x28b   : > { %13758 = vst [vmem:[#allocation6_spill] sm:$0xff] %v8476_v29  ;;  %v8489_v5 = vpop.permute.xlu1 %1841  ;;  %v1469_v48 = vsel %vm1466_vm12, %v1448_v59, %v6633_v16  ;;  %v6653_v28 = vunpack.i.l.bf16 %v7923_v46  ;;  %v6629_v26 = vunpack.i.h.bf16 %v7717_v4  ;;  %v1472_v2 = vsel %vm1466_vm12, %v1451_v51, %v7729_v13  ;;  %v13768_v56 = vld [vmem:[#allocation118_spill] sm:$0xff]  ;;  %v13769_v59 = vld [vmem:[#allocation115_spill] sm:$0xff] }
 0x28c   : > { %v1492_v18 = vsel %vm1487_vm13, %v1471_v60, %v13764_v39  ;;  %v1493_v46 = vsel %vm1487_vm13, %v1472_v2, %v13765_v1  ;;  %v2106_v4 = vsel %vm1190_vm6, %v2103_v36, %v2105_v19  ;;  %v1491_v13 = vsel %vm1487_vm13, %v1470_v57, %v6644_v25  ;;  %v13771_v25 = vld [vmem:[#allocation103_spill] sm:$0xff]  ;;  %v13772_v57 = vld [vmem:[#allocation54_spill] sm:$0xff] }
 0x28d   : > { %2096 = vrot.lane.b32.xlu0 %v2093_v58, %s6849_s13  ;;  %v1490_v58 = vsel %vm1487_vm13, %v1469_v48, %v6643_v32  ;;  %v6639_v8 = vunpack.i.h.bf16 %v13767_v55  ;;  %v6638_v23 = vunpack.i.l.bf16 %v13767_v55  ;;  %v8542_v16 = vsel %vm1508_vm14, %v1493_v46, %v13768_v56  ;;  %v13770_v32 = vld [vmem:[#allocation52_spill] sm:$0xff]  ;;  %v13777_v46 = vld [vmem:[#allocation57_spill] sm:$0xff]  ;;  %v13779_v55 = vld [vmem:[#allocation67_spill] sm:$0xff]  ;;  %s6859_s13 = smov 88  }
 0x28e   : > { %v8547_v38 = vsel %vm1508_vm14, %v1490_v58, %v6653_v28  ;;  %v8550_v24 = vsel %vm1508_vm14, %v1491_v13, %v6654_v63  ;;  %v6649_v36 = vunpack.i.h.bf16 %v13769_v59  ;;  %v6648_v21 = vunpack.i.l.bf16 %v13769_v59  ;;  %v13778_v13 = vld [vmem:[#allocation58_spill] sm:$0xff]  ;;  %v13781_v59 = vld [vmem:[#allocation59_spill] sm:$0xff] }
 0x28f   : > { %v8513_v61 = vpop.permute.xlu0 %1839  ;;  %v1433_v19 = vsel %vm1424_vm10, %v8422_v53, %v13770_v32  ;;  %v1446_v51 = vsel %vm1445_vm11, %v1425_v34, %v6618_v22  ;;  %v1447_v60 = vsel %vm1445_vm11, %v1426_v6, %v6619_v7  ;;  %v8561_v48 = vsel %vm1508_vm14, %v1492_v18, %v13771_v25  ;;  %v13773_v34 = vld [vmem:[#allocation55_spill] sm:$0xff]  ;;  %v13775_v18 = vld [vmem:[#allocation69_spill] sm:$0xff] }
 0x290   : > { %2115 = vrot.lane.b32.xlu2 %v8237_v33, %s6851_s15  ;;  %v1437_v63 = vsel %vm1424_vm10, %v8436_v45, %v13772_v57  ;;  %v1467_v28 = vsel %vm1466_vm12, %v1446_v51, %v6628_v54  ;;  %v1468_v2 = vsel %vm1466_vm12, %v1447_v60, %v6629_v26  ;;  %v8571_v53 = vpack.i.bf16 %v8542_v16, %v8561_v48  ;;  %v13774_v54 = vld [vmem:[#allocation56_spill] sm:$0xff]  ;;  %v13783_v32 = vld [vmem:[#allocation83_spill] sm:$0xff]  ;;  %v13784_v51 = vld [vmem:[#allocation105_spill] sm:$0xff] }
 0x291   : > { %2113 = vrot.lane.b32.xlu1 %v8218_v31, %s6851_s15  ;;  %v1436_v6 = vsel %vm1424_vm10, %v8440_v52, %v13773_v34  ;;  %v1488_v7 = vsel %vm1487_vm13, %v1467_v28, %v6638_v23  ;;  %v1489_v22 = vsel %vm1487_vm13, %v1468_v2, %v6639_v8  ;;  %v8582_v45 = vpack.i.bf16 %v8550_v24, %v8547_v38  ;;  %v13780_v23 = vld [vmem:[#allocation86_spill] sm:$0xff]  ;;  %v13786_v25 = vld [vmem:[#allocation73_spill] sm:$0xff]  ;;  %v13788_v34 = vld [vmem:[#allocation124_spill] sm:$0xff] }
 0x292   : > { %v8532_v33 = vpop.permute.xlu2 %1911  ;;  %v1453_v26 = vsel %vm1445_vm11, %v8448_v30, %v13774_v54  ;;  %v1457_v58 = vsel %vm1445_vm11, %v1436_v6, %v13775_v18  ;;  %v8590_v1 = vsel %vm1508_vm14, %v1488_v7, %v6648_v21  ;;  %v8593_v52 = vsel %vm1508_vm14, %v1489_v22, %v6649_v36  ;;  %v13782_v21 = vld [vmem:[#allocation66_spill] sm:$0xff]  ;;  %v13789_v7 = vld [vmem:[#allocation61_spill] sm:$0xff]  ;;  %v13790_v54 = vld [vmem:[#allocation80_spill] sm:$0xff] }
 0x293   : > { %13766 = vst [vmem:[#allocation7_spill] sm:$0xff] %v8532_v33  ;;  %v8544_v27 = vpop.permute.xlu1 %1861  ;;  %v1439_v30 = vsel %vm1424_vm10, %v8456_v17, %v13778_v13  ;;  %v1454_v8 = vsel %vm1445_vm11, %v1433_v19, %v13779_v55  ;;  %v1478_v56 = vsel %vm1466_vm12, %v1457_v58, %v13780_v23  ;;  %v1456_v36 = vsel %vm1445_vm11, %v8461_v20, %v13781_v59  ;;  %v13787_v28 = vld [vmem:[#allocation102_spill] sm:$0xff]  ;;  %v13792_v13 = vld [vmem:[#allocation121_spill] sm:$0xff]  ;;  %v13851_v33 = vld [vmem:[#allocation147_spill] sm:$0xff] }
 0x294   : > { %13776 = vst [vmem:[#allocation9_spill] sm:$0xff] %v8590_v1  ;;  %v1475_v17 = vsel %vm1466_vm12, %v1454_v8, %v13783_v32  ;;  %v1499_v19 = vsel %vm1487_vm13, %v1478_v56, %v13784_v51  ;;  %v1477_v57 = vsel %vm1466_vm12, %v1456_v36, %v13786_v25  ;;  %v1442_v22 = vsel %vm1424_vm10, %v8465_v49, %v13789_v7  ;;  %v13791_v58 = vld [vmem:[#allocation90_spill] sm:$0xff]  ;;  %v13793_v8 = vld [vmem:[#allocation63_spill] sm:$0xff]  ;;  %v13794_v56 = vld [vmem:[#allocation64_spill] sm:$0xff] }
 0x295   : > { %2109 = vrot.lane.b32.xlu0 %v2106_v4, %s6850_s14  ;;  %v1440_v4 = vsel %vm1424_vm10, %v8452_v3, %v13777_v46  ;;  %v1455_v3 = vsel %vm1445_vm11, %v8497_v40, %v13782_v21  ;;  %v1496_v2 = vsel %vm1487_vm13, %v1475_v17, %v13787_v28  ;;  %v8627_v20 = vsel %vm1508_vm14, %v1499_v19, %v13788_v34  ;;  %v13795_v36 = vld [vmem:[#allocation101_spill] sm:$0xff]  ;;  %v13797_v32 = vld [vmem:[#allocation68_spill] sm:$0xff]  ;;  %v13798_v51 = vld [vmem:[#allocation78_spill] sm:$0xff]  ;;  %s6459_s14 = sshll.u32 %s6910_s25, 1 }
 0x296   : > { %v8633_v40 = vpack.i.bf16 %v8593_v52, %v8590_v1  ;;  %v1476_v18 = vsel %vm1466_vm12, %v1455_v3, %v13790_v54  ;;  %v1498_v46 = vsel %vm1487_vm13, %v1477_v57, %v13791_v58  ;;  %v8644_v55 = vsel %vm1508_vm14, %v1496_v2, %v13792_v13  ;;  %v13796_v21 = vld [vmem:[#allocation109_spill] sm:$0xff]  ;;  %v13799_v19 = vld [vmem:[#allocation120_spill] sm:$0xff]  ;;  %v13800_v57 = vld [vmem:[#allocation70_spill] sm:$0xff]  ;;  %p275_p4 = scmp.lt.s32.totalorder %s6459_s14, 3 }
 0x297   : > { %v8578_v39 = vpop.permute.xlu0 %1852  ;;  %v1462_v23 = vsel %vm1445_vm11, %v8483_v50, %v13793_v8  ;;  %v1452_v59 = vsel %vm1445_vm11, %v8487_v42, %v13794_v56  ;;  %v1497_v49 = vsel %vm1487_vm13, %v1476_v18, %v13795_v36  ;;  %v8656_v3 = vsel %vm1508_vm14, %v1498_v46, %v13796_v21  ;;  %v13801_v2 = vld [vmem:[#allocation96_spill] sm:$0xff]  ;;  %v13803_v54 = vld [vmem:[#allocation81_spill] sm:$0xff]  ;;  %v13804_v46 = vld [vmem:[#allocation71_spill] sm:$0xff] }
 0x298   : > { %6666 = vrot.lane.b32.xlu2 %v8571_v53, %s6852_s16  ;;  %v1458_v17 = vsel %vm1445_vm11, %v1437_v63, %v13797_v32  ;;  %v1473_v50 = vsel %vm1466_vm12, %v1452_v59, %v13798_v51  ;;  %v8666_v25 = vsel %vm1508_vm14, %v1497_v49, %v13799_v19  ;;  %v8670_v42 = vpack.i.bf16 %v8627_v20, %v8656_v3  ;;  %v13802_v7 = vld [vmem:[#allocation132_spill] sm:$0xff]  ;;  %v13807_v36 = vld [vmem:[#allocation117_spill] sm:$0xff]  ;;  %v13809_v51 = vld [vmem:[#allocation87_spill] sm:$0xff]  ;;  %s14501_s14 = smov (!%p275_p4, %s6459_s14), 3 }
 0x299   : > { %6661 = vrot.lane.b32.xlu1 %v8582_v45, %s6852_s16  ;;  %v1474_v28 = vsel %vm1466_vm12, %v1453_v26, %v13800_v57  ;;  %v1494_v34 = vsel %vm1487_vm13, %v1473_v50, %v13801_v2  ;;  %v1615_v63 = vsel %vm1361_vm7, %v13803_v54, %v13802_v7  ;;  %v8683_v58 = vpack.i.bf16 %v8666_v25, %v8644_v55  ;;  %v13805_v8 = vld [vmem:[#allocation72_spill] sm:$0xff]  ;;  %v13806_v26 = vld [vmem:[#allocation75_spill] sm:$0xff]  ;;  %v13808_v21 = vld [vmem:[#allocation77_spill] sm:$0xff]  ;;  %s6460_s15 = sshll.u32 %s14501_s14, 2 }
 0x29a   : > { %v8619_v60 = vpop.permute.xlu2 %1942  ;;  %v1461_v13 = vsel %vm1445_vm11, %v1440_v4, %v13804_v46  ;;  %v1460_v56 = vsel %vm1445_vm11, %v1439_v30, %v13805_v8  ;;  %v1463_v59 = vsel %vm1445_vm11, %v1442_v22, %v13806_v26  ;;  %v8693_v49 = vsel %vm1508_vm14, %v1494_v34, %v13807_v36  ;;  %v13810_v4 = vld [vmem:[#allocation92_spill] sm:$0xff]  ;;  %v13811_v30 = vld [vmem:[#allocation135_spill] sm:$0xff]  ;;  %v13812_v57 = vld [vmem:[#allocation82_spill] sm:$0xff] }
 0x29b   : > { %13785 = vst [vmem:[#allocation10_spill] sm:$0xff] %v8619_v60  ;;  %v8629_v6 = vpop.permute.xlu1 %1874  ;;  %v1483_v32 = vsel %vm1466_vm12, %v1462_v23, %v13808_v21  ;;  %v1495_v50 = vsel %vm1487_vm13, %v1474_v28, %v13809_v51  ;;  %v1484_v19 = vsel %vm1466_vm12, %v1463_v59, %v13810_v4  ;;  %v1614_v22 = vsel %vm1361_vm7, %v13812_v57, %v13811_v30  ;;  %v13813_v2 = vld [vmem:[#allocation89_spill] sm:$0xff]  ;;  %v13814_v7 = vld [vmem:[#allocation106_spill] sm:$0xff]  ;;  %v13815_v23 = vld [vmem:[#allocation111_spill] sm:$0xff] }
 0x29c   : > { %v1481_v34 = vsel %vm1466_vm12, %v1460_v56, %v13813_v2  ;;  %v8712_v54 = vsel %vm1508_vm14, %v1495_v50, %v13814_v7  ;;  %v1505_v28 = vsel %vm1487_vm13, %v1484_v19, %v13815_v23  ;;  %v13816_v46 = vld [vmem:[#allocation138_spill] sm:$0xff]  ;;  %v13818_v59 = vld [vmem:[#allocation85_spill] sm:$0xff]  ;;  %v13819_v21 = vld [vmem:[#allocation108_spill] sm:$0xff]  ;;  %vm2742_vm6 = vcmask 441344  }
 0x29d   : > { %6656 = vrot.lane.b32.xlu0 %v8633_v40, %s6852_s16  ;;  %v1617_v8 = vsel %vm1382_vm8, %v1615_v63, %v13816_v46  ;;  %v1479_v36 = vsel %vm1466_vm12, %v1458_v17, %v13818_v59  ;;  %v1502_v51 = vsel %vm1487_vm13, %v1481_v34, %v13819_v21  ;;  %v13820_v4 = vld [vmem:[#allocation130_spill] sm:$0xff]  ;;  %v8732_v19 = vpack.i.bf16 %v8712_v54, %v8693_v49  ;;  %v13822_v30 = vld [vmem:[#allocation88_spill] sm:$0xff]  ;;  %v13823_v57 = vld [vmem:[#allocation95_spill] sm:$0xff] }
 0x29e   : > { %v8726_v56 = vsel %vm1508_vm14, %v1505_v28, %v13820_v4  ;;  %v1482_v63 = vsel %vm1466_vm12, %v1461_v13, %v13822_v30  ;;  %v1504_v2 = vsel %vm1487_vm13, %v1483_v32, %v13823_v57  ;;  %v13824_v17 = vld [vmem:[#allocation127_spill] sm:$0xff]  ;;  %v13825_v34 = vld [vmem:[#allocation122_spill] sm:$0xff]  ;;  %v13827_v59 = vld [vmem:[#allocation116_spill] sm:$0xff] }
 0x29f   : > { %v8679_v18 = vpop.permute.xlu0 %1872  ;;  %v8740_v7 = vsel %vm1508_vm14, %v1502_v51, %v13824_v17  ;;  %v1616_v23 = vsel %vm1382_vm8, %v1614_v22, %v13825_v34  ;;  %v13826_v28 = vld [vmem:[#allocation107_spill] sm:$0xff]  ;;  %v8748_v21 = vsel %vm1508_vm14, %v1504_v2, %v13827_v59  ;;  %v13828_v4 = vld [vmem:[#allocation137_spill] sm:$0xff]  ;;  %v13830_v51 = vld [vmem:[#allocation126_spill] sm:$0xff] }
 0x2a0   : > { %6681 = vrot.lane.b32.xlu2 %v8670_v42, %s6852_s16  ;;  %v1503_v46 = vsel %vm1487_vm13, %v1482_v63, %v13826_v28  ;;  %v1618_v13 = vsel %vm1403_vm9, %v1616_v23, %v13828_v4  ;;  %v13829_v30 = vld [vmem:[#allocation125_spill] sm:$0xff]  ;;  %v13831_v22 = vld [vmem:[#allocation140_spill] sm:$0xff]  ;;  %v8766_v34 = vpack.i.bf16 %v8726_v56, %v8748_v21  ;;  %v13833_v23 = vld [vmem:[#allocation62_spill] sm:$0xff] }
 0x2a1   : > { %6676 = vrot.lane.b32.xlu1 %v8683_v58, %s6852_s16  ;;  %v1619_v32 = vsel %vm1403_vm9, %v1617_v8, %v13829_v30  ;;  %v8758_v57 = vsel %vm1508_vm14, %v1503_v46, %v13830_v51  ;;  %v13832_v17 = vld [vmem:[#allocation141_spill] sm:$0xff]  ;;  %v1459_v8 = vsel %vm1445_vm11, %v8472_v62, %v13833_v23  ;;  %v13834_v28 = vld [vmem:[#allocation104_spill] sm:$0xff] }
 0x2a2   : > { %v8718_v26 = vpop.permute.xlu2 %1962  ;;  %v1621_v63 = vsel %vm1424_vm10, %v1619_v32, %v13831_v22  ;;  %v1620_v2 = vsel %vm1424_vm10, %v1618_v13, %v13832_v17  ;;  %v1500_v59 = vsel %vm1487_vm13, %v1479_v36, %v13834_v28  ;;  %v13835_v4 = vld [vmem:[#allocation144_spill] sm:$0xff]  ;;  %v8779_v32 = vpack.i.bf16 %v8758_v57, %v8740_v7  ;;  %v13837_v22 = vld [vmem:[#allocation123_spill] sm:$0xff]  ;;  %v13838_v62 = vld [vmem:[#allocation5_spill] sm:$0xff] }
 0x2a3   : > { %13817 = vst [vmem:[#allocation11_spill] sm:$0xff] %v8718_v26  ;;  %v8728_v50 = vpop.permute.xlu1 %1894  ;;  %v1623_v46 = vsel %vm1445_vm11, %v1621_v63, %v13835_v4  ;;  %v13836_v13 = vld [vmem:[#allocation76_spill] sm:$0xff]  ;;  %v8785_v17 = vsel %vm1508_vm14, %v1500_v59, %v13837_v22  ;;  %v13839_v36 = vld [vmem:[#allocation3_spill] sm:$0xff] }
 0x2a4   : > { %13821 = vst [vmem:[#allocation12_spill] sm:$0xff] %v8728_v50  ;;  %v1480_v51 = vsel %vm1466_vm12, %v1459_v8, %v13836_v13  ;;  %v1381_v63 = vsel %vm1361_vm7, %v13839_v36, %v13838_v62  ;;  %v13840_v23 = vld [vmem:[#allocation8_spill] sm:$0xff]  ;;  %v13846_v62 = vld [vmem:[#allocation143_spill] sm:$0xff]  ;;  %v13884_v50 = vld [vmem:[#allocation157_spill] sm:$0xff] }
 0x2a5   : > { %6671 = vrot.lane.b32.xlu0 %v8732_v19, %s6852_s16  ;;  %v13841_v28 = vld [vmem:[#allocation4_spill] sm:$0xff]  ;;  %v1501_v31 = vsel %vm1487_vm13, %v1480_v51, %v13842_v10  ;;  %v13849_v51 = vld [vmem:[#allocation42_spill] sm:$0xff] }
 0x2a6   : > { %v1380_v4 = vsel %vm1361_vm7, %v13841_v28, %v13840_v23  ;;  %v13843_v26 = vld [vmem:[#allocation128_spill] sm:$0xff]  ;;  %v13847_v23 = vld [vmem:[#allocation131_spill] sm:$0xff] }
 0x2a7   : > { %v8775_v30 = vpop.permute.xlu0 %1885  ;;  %v1622_v8 = vsel %vm1445_vm11, %v1620_v2, %v13843_v26  ;;  %v13844_v59 = vld [vmem:[#allocation24_spill] sm:$0xff]  ;;  %v1625_v28 = vsel %vm1466_vm12, %v1623_v46, %v13847_v23  ;;  %v13850_v2 = vld [vmem:[#allocation146_spill] sm:$0xff]  ;;  %v13855_v23 = vld [vmem:[#allocation151_spill] sm:$0xff] }
 0x2a8   : > { %6696 = vrot.lane.b32.xlu2 %v8766_v34, %s6852_s16  ;;  %v1401_v13 = vsel %vm1382_vm8, %v1380_v4, %v13844_v59  ;;  %v13845_v22 = vld [vmem:[#allocation112_spill] sm:$0xff]  ;;  %v1624_v36 = vsel %vm1466_vm12, %v1622_v8, %v13846_v62  ;;  %v1627_v1 = vsel %vm1487_vm13, %v1625_v28, %v13850_v2  ;;  %v13853_v8 = vld [vmem:[#allocation14_spill] sm:$0xff] }
 0x2a9   : > { %6691 = vrot.lane.b32.xlu1 %v8779_v32, %s6852_s16  ;;  %v8805_v60 = vsel %vm1508_vm14, %v1501_v31, %v13845_v22  ;;  %v1422_v26 = vsel %vm1403_vm9, %v1401_v13, %v13849_v51  ;;  %v1626_v4 = vsel %vm1487_vm13, %v1624_v36, %v13851_v33  ;;  %v1402_v46 = vsel %vm1382_vm8, %v1381_v63, %v13853_v8  ;;  %v13854_v22 = vld [vmem:[#allocation60_spill] sm:$0xff]  ;;  %v13857_v33 = vld [vmem:[#allocation74_spill] sm:$0xff]  ;;  %v13859_v63 = vld [vmem:[#allocation91_spill] sm:$0xff] }
 0x2aa   : > { %v8811_v10 = vpop.permute.xlu2 %1975  ;;  %v8823_v31 = vpack.i.bf16 %v8805_v60, %v8785_v17  ;;  %v1443_v62 = vsel %vm1424_vm10, %v1422_v26, %v13854_v22  ;;  %v8831_v13 = vsel %vm1508_vm14, %v1627_v1, %v13855_v23  ;;  %v13856_v28 = vld [vmem:[#allocation32_spill] sm:$0xff]  ;;  %v13858_v2 = vld [vmem:[#allocation50_spill] sm:$0xff]  ;;  %v13861_v1 = vld [vmem:[#allocation65_spill] sm:$0xff] }
 0x2ab   : > { %13848 = vst [vmem:[#allocation13_spill] sm:$0xff] %v8811_v10  ;;  %v8819_v59 = vpop.permute.xlu1 %1907  ;;  %v1423_v51 = vsel %vm1403_vm9, %v1402_v46, %v13856_v28  ;;  %v1464_v36 = vsel %vm1445_vm11, %v1443_v62, %v13857_v33  ;;  %v13860_v26 = vld [vmem:[#allocation136_spill] sm:$0xff]  ;;  %v13862_v46 = vld [vmem:[#allocation110_spill] sm:$0xff] }
 0x2ac   : > { %13852 = vst [vmem:[#allocation15_spill] sm:$0xff] %v8819_v59  ;;  %v1444_v10 = vsel %vm1424_vm10, %v1423_v51, %v13858_v2  ;;  %v1485_v8 = vsel %vm1466_vm12, %v1464_v36, %v13859_v63  ;;  %v8845_v22 = vsel %vm1508_vm14, %v1626_v4, %v13860_v26  ;;  %v13864_v51 = vld [vmem:[#allocation79_spill] sm:$0xff]  ;;  %v13865_v36 = vld [vmem:[#allocation129_spill] sm:$0xff] }
 0x2ad   : > { %6686 = vrot.lane.b32.xlu0 %v8823_v31, %s6852_s16  ;;  %v1465_v23 = vsel %vm1445_vm11, %v1444_v10, %v13861_v1  ;;  %v1506_v28 = vsel %vm1487_vm13, %v1485_v8, %v13862_v46  ;;  %v8855_v33 = vpack.i.bf16 %v8831_v13, %v8845_v22  ;;  %v13866_v10 = vld [vmem:[#allocation100_spill] sm:$0xff]  ;;  %v13867_v8 = vld [vmem:[#allocation119_spill] sm:$0xff] }
 0x2ae   : > { %v1486_v2 = vsel %vm1466_vm12, %v1465_v23, %v13864_v51  ;;  %v8861_v63 = vsel %vm1508_vm14, %v1506_v28, %v13865_v36  ;;  %v13874_v36 = vld [vmem:[#allocation97_spill] sm:$0xff] }
 0x2af   : > { %v8851_v62 = vpop.permute.xlu0 %1905  ;;  %v1507_v4 = vsel %vm1487_vm13, %v1486_v2, %v13866_v10  ;;  %v13873_v2 = vld [vmem:[#allocation139_spill] sm:$0xff] }
 0x2b0   : > { %13863 = vst [vmem:[#allocation16_spill] sm:$0xff] %v8851_v62  ;;  %6711 = vrot.lane.b32.xlu2 %v8633_v40, %s6853_s17  ;;  %v8871_v26 = vsel %vm1508_vm14, %v1507_v4, %v13867_v8  ;;  %v1716_v10 = vsel %vm1361_vm7, %v13874_v36, %v13873_v2  ;;  %v13875_v4 = vld [vmem:[#allocation149_spill] sm:$0xff]  ;;  %v13876_v8 = vld [vmem:[#allocation99_spill] sm:$0xff]  ;;  %v13882_v36 = vld [vmem:[#allocation142_spill] sm:$0xff] }
 0x2b1   : > { %6706 = vrot.lane.b32.xlu1 %v8855_v33, %s6852_s16  ;;  %v8879_v46 = vpack.i.bf16 %v8871_v26, %v8861_v63 }
 0x2b2   : > { %v8873_v1 = vpop.permute.xlu2 %1995 }
 0x2b3   : > { %13868 = vst [vmem:[#allocation17_spill] sm:$0xff] %v8873_v1  ;;  %v8875_v23 = vpop.permute.xlu1 %1940  ;;  %v1715_v1 = vsel %vm1361_vm7, %v13876_v8, %v13875_v4  ;;  %v13883_v8 = vld [vmem:[#allocation158_spill] sm:$0xff] }
 0x2b4   : > { %13869 = vst [vmem:[#allocation18_spill] sm:$0xff] %v8875_v23 }
 0x2b5   : > { %6701 = vrot.lane.b32.xlu0 %v8879_v46, %s6852_s16 }
 0x2b7   : > { %v8883_v40 = vpop.permute.xlu0 %1913 }
 0x2b8   : > { %13870 = vst [vmem:[#allocation19_spill] sm:$0xff] %v8883_v40  ;;  %6726 = vrot.lane.b32.xlu2 %v8732_v19, %s6853_s17  ;;  %v13879_v40 = vld [vmem:[#allocation155_spill] sm:$0xff] }
 0x2b9   : > { %6721 = vrot.lane.b32.xlu1 %v8571_v53, %s6853_s17  ;;  %v1717_v62 = vsel %vm1382_vm8, %v1715_v1, %v13879_v40  ;;  %v13886_v40 = vld [vmem:[#allocation145_spill] sm:$0xff] }
 0x2ba   : > { %v8889_v28 = vpop.permute.xlu2 %2008  ;;  %v1719_v4 = vsel %vm1403_vm9, %v1717_v62, %v13882_v36  ;;  %v13887_v62 = vld [vmem:[#allocation160_spill] sm:$0xff] }
 0x2bb   : > { %13871 = vst [vmem:[#allocation27_spill] sm:$0xff] %v8889_v28  ;;  %v8891_v51 = vpop.permute.xlu1 %1953  ;;  %v13878_v28 = vld [vmem:[#allocation154_spill] sm:$0xff]  ;;  %v1721_v29 = vsel %vm1424_vm10, %v1719_v4, %v13884_v50  ;;  %v13888_v36 = vld [vmem:[#allocation148_spill] sm:$0xff] }
 0x2bc   : > { %13872 = vst [vmem:[#allocation28_spill] sm:$0xff] %v8891_v51  ;;  %v1718_v51 = vsel %vm1382_vm8, %v1716_v10, %v13878_v28  ;;  %v13885_v28 = vld [vmem:[#allocation161_spill] sm:$0xff]  ;;  %v13889_v4 = vld [vmem:[#allocation164_spill] sm:$0xff] }
 0x2bd   : > { %6716 = vrot.lane.b32.xlu0 %v8582_v45, %s6853_s17  ;;  %v1723_v10 = vsel %vm1445_vm11, %v1721_v29, %v13885_v28  ;;  %v13891_v28 = vld [vmem:[#allocation163_spill] sm:$0xff] }
 0x2be   : > { %v1725_v50 = vsel %vm1466_vm12, %v1723_v10, %v13888_v36  ;;  %v13893_v10 = vld [vmem:[#allocation166_spill] sm:$0xff] }
 0x2bf   : > { %v8901_v23 = vpop.permute.xlu0 %1951 }
 0x2c0   : > { %13877 = vst [vmem:[#allocation20_spill] sm:$0xff] %v8901_v23  ;;  %6741 = vrot.lane.b32.xlu2 %v8823_v31, %s6853_s17  ;;  %v1720_v23 = vsel %vm1403_vm9, %v1718_v51, %v13883_v8 }
 0x2c1   : > { %6736 = vrot.lane.b32.xlu1 %v8670_v42, %s6853_s17 }
 0x2c2   : > { %v8911_v59 = vpop.permute.xlu2 %2041 }
 0x2c3   : > { %13880 = vst [vmem:[#allocation21_spill] sm:$0xff] %v8911_v59  ;;  %v8913_v2 = vpop.permute.xlu1 %1973  ;;  %v1722_v59 = vsel %vm1424_vm10, %v1720_v23, %v13886_v40  ;;  %v1727_v23 = vsel %vm1487_vm13, %v1725_v50, %v13891_v28 }
 0x2c4   : > { %13881 = vst [vmem:[#allocation22_spill] sm:$0xff] %v8913_v2  ;;  %v1724_v51 = vsel %vm1445_vm11, %v1722_v59, %v13887_v62  ;;  %v8947_v2 = vsel %vm1508_vm14, %v1727_v23, %v8223_v47  ;;  %v13892_v59 = vld [vmem:[#allocation153_spill] sm:$0xff]  ;;  %v13896_v23 = vld [vmem:[#allocation156_spill] sm:$0xff] }
 0x2c5   : > { %6731 = vrot.lane.b32.xlu0 %v8683_v58, %s6853_s17  ;;  %v1726_v29 = vsel %vm1466_vm12, %v1724_v51, %v13889_v4 }
 0x2c6   : > { %v1728_v62 = vsel %vm1487_vm13, %v1726_v29, %v13892_v59  ;;  %v13897_v59 = vld [vmem:[#allocation114_spill] sm:$0xff] }
 0x2c7   : > { %v8925_v1 = vpop.permute.xlu0 %1964  ;;  %v8955_v51 = vsel %vm1508_vm14, %v1728_v62, %v13893_v10  ;;  %v1816_v62 = vsel %vm1361_vm7, %v13897_v59, %v13896_v23  ;;  %v13898_v10 = vld [vmem:[#allocation113_spill] sm:$0xff]  ;;  %v13902_v23 = vld [vmem:[#allocation171_spill] sm:$0xff] }
 0x2c8   : > { %6756 = vrot.lane.b32.xlu2 %v8879_v46, %s6853_s17  ;;  %v6765_v50 = vpack.i.bf16 %v8955_v51, %v8947_v2 }
 0x2c9   : > { %6751 = vrot.lane.b32.xlu1 %v8766_v34, %s6853_s17 }
 0x2ca   : > { %v8939_v8 = vpop.permute.xlu2 %2054 }
 0x2cb   : > { %13890 = vst [vmem:[#allocation23_spill] sm:$0xff] %v8939_v8  ;;  %v8943_v40 = vpop.permute.xlu1 %1986 }
 0x2cd   : > { %6746 = vrot.lane.b32.xlu0 %v8779_v32, %s6853_s17 }
 0x2cf   : > { %v8957_v36 = vpop.permute.xlu0 %1984 }
 0x2d0   : > { %6771 = vrot.lane.b32.xlu2 %v8582_v45, %s6854_s18 }
 0x2d1   : > { %6766 = vrot.lane.b32.xlu1 %v6765_v50, %s6853_s17 }
 0x2d2   : > { %v8964_v47 = vpop.permute.xlu2 %2074 }
 0x2d3   : > { %13894 = vst [vmem:[#allocation25_spill] sm:$0xff] %v8964_v47  ;;  %v8966_v4 = vpop.permute.xlu1 %2006  ;;  %v1817_v47 = vsel %vm1361_vm7, %v13898_v10, %v8239_v43 }
 0x2d5   : > { %6761 = vrot.lane.b32.xlu0 %v8855_v33, %s6853_s17 }
 0x2d7   : > { %v8970_v29 = vpop.permute.xlu0 %1997 }
 0x2d8   : > { %6786 = vrot.lane.b32.xlu2 %v8683_v58, %s6854_s18  ;;  %v1818_v58 = vsel %vm1382_vm8, %v1816_v62, %v8232_v41  ;;  %v13905_v41 = vld [vmem:[#allocation165_spill] sm:$0xff]  ;;  %v13907_v62 = vld [vmem:[#allocation162_spill] sm:$0xff] }
 0x2d9   : > { %6781 = vrot.lane.b32.xlu1 %v8732_v19, %s6854_s18 }
 0x2da   : > { %v8976_v28 = vpop.permute.xlu2 %2087 }
 0x2db   : > { %13895 = vst [vmem:[#allocation26_spill] sm:$0xff] %v8976_v28  ;;  %v8978_v45 = vpop.permute.xlu1 %2014 }
 0x2dd   : > { %6776 = vrot.lane.b32.xlu0 %v8571_v53, %s6854_s18  ;;  %v13900_v53 = vld [vmem:[#allocation159_spill] sm:$0xff] }
 0x2de   : > { %v1819_v19 = vsel %vm1382_vm8, %v1817_v47, %v13900_v53 }
 0x2df   : > { %v8988_v8 = vpop.permute.xlu0 %2012  ;;  %v1821_v59 = vsel %vm1403_vm9, %v1819_v19, %v13902_v23 }
 0x2e0   : > { %13899 = vst [vmem:[#allocation29_spill] sm:$0xff] %v8988_v8  ;;  %6801 = vrot.lane.b32.xlu2 %v8779_v32, %s6854_s18  ;;  %v1823_v10 = vsel %vm1424_vm10, %v1821_v59, %v8321_v12  ;;  %v13904_v32 = vld [vmem:[#allocation172_spill] sm:$0xff] }
 0x2e1   : > { %6796 = vrot.lane.b32.xlu1 %v8823_v31, %s6854_s18  ;;  %v1820_v8 = vsel %vm1403_vm9, %v1818_v58, %v13904_v32  ;;  %v1825_v31 = vsel %vm1445_vm11, %v1823_v10, %v13905_v41 }
 0x2e2   : > { %v8998_v28 = vpop.permute.xlu2 %2107  ;;  %v1822_v53 = vsel %vm1424_vm10, %v1820_v8, %v13907_v62  ;;  %v1827_v19 = vsel %vm1466_vm12, %v1825_v31, %v8353_v37  ;;  %v13910_v37 = vld [vmem:[#allocation170_spill] sm:$0xff] }
 0x2e3   : > { %13901 = vst [vmem:[#allocation30_spill] sm:$0xff] %v8998_v28  ;;  %v9002_v43 = vpop.permute.xlu1 %2052  ;;  %v1824_v12 = vsel %vm1445_vm11, %v1822_v53, %v8283_v11 }
 0x2e4   : > { %13903 = vst [vmem:[#allocation31_spill] sm:$0xff] %v9002_v43  ;;  %v1826_v58 = vsel %vm1466_vm12, %v1824_v12, %v8380_v44 }
 0x2e5   : > { %6791 = vrot.lane.b32.xlu0 %v8670_v42, %s6854_s18  ;;  %v1829_v42 = vsel %vm1487_vm13, %v1827_v19, %v8444_v14 }
 0x2e6   : > { %v9034_v59 = vsel %vm1508_vm14, %v1829_v42, %v13910_v37 }
 0x2e7   : > { %v9012_v47 = vpop.permute.xlu0 %2043 }
 0x2e8   : > { %13906 = vst [vmem:[#allocation33_spill] sm:$0xff] %v9012_v47  ;;  %6816 = vrot.lane.b32.xlu2 %v8855_v33, %s6854_s18  ;;  %v13911_v33 = vld [vmem:[#allocation169_spill] sm:$0xff]  ;;  %v13925_v47 = vld [vmem:[#allocation19_spill] sm:$0xff] }
 0x2e9   : > { %6811 = vrot.lane.b32.xlu1 %v8879_v46, %s6854_s18  ;;  %v1828_v11 = vsel %vm1487_vm13, %v1826_v58, %v13911_v33  ;;  %v2932_v58 = vld [vmem:[%s13289_s1 + $0x78] sm:$0xff] }
 0x2ea   : > { %v9028_v23 = vpop.permute.xlu2 %2115  ;;  %v9042_v14 = vsel %vm1508_vm14, %v1828_v11, %v8409_v9  ;;  %3028 = vmatpush.msra.mxu0 %v2932_v58  ;;  %v2931_v11 = vld [vmem:[%s13289_s1 + $0x70] sm:$0xff] }
 0x2eb   : > { %13908 = vst [vmem:[#allocation34_spill] sm:$0xff] %v9028_v23  ;;  %v9030_v8 = vpop.permute.xlu1 %2065  ;;  %v6825_v44 = vpack.i.bf16 %v9034_v59, %v9042_v14 }
 0x2ec   : > { %13909 = vst [vmem:[#allocation35_spill] sm:$0xff] %v9030_v8  ;;  %3029 = vmatpush.msra.mxu0 %v2931_v11  ;;  %v2920_v8 = vld [vmem:[%s13289_s1 + $0x18] sm:$0xff] }
 0x2ed   : > { %6806 = vrot.lane.b32.xlu0 %v8766_v34, %s6854_s18 }
 0x2ef   : > { %v9044_v46 = vpop.permute.xlu0 %2063 }
 0x2f0   : > { %13912 = vst [vmem:[#allocation45_spill] sm:$0xff] %v9044_v46  ;;  %2373 = vrot.lane.b32.xlu2 %v8561_v48, %s6855_s19 }
 0x2f1   : > { %6826 = vrot.lane.b32.xlu1 %v6825_v44, %s6854_s18  ;;  %v2930_v44 = vld [vmem:[%s13289_s1 + $0x68] sm:$0xff] }
 0x2f2   : > { %v6667_v10 = vpop.permute.xlu2 %6666  ;;  %3030 = vmatpush.msra.mxu0 %v2930_v44 }
 0x2f3   : > { %v9051_v32 = vpop.permute.xlu1 %2085  ;;  %v6669_v37 = vunpack.i.h.bf16 %v6667_v10  ;;  %v6668_v33 = vunpack.i.l.bf16 %v6667_v10 }
 0x2f4   : > { %13913 = vst [vmem:[#allocation36_spill] sm:$0xff] %v9051_v32  ;;  %v2929_v32 = vld [vmem:[%s13289_s1 + $0x60] sm:$0xff] }
 0x2f5   : > { %6821 = vrot.lane.b32.xlu0 %v6765_v50, %s6854_s18  ;;  %v2724_v58 = vsel %vm2719_vm15, %v8547_v38, %v6668_v33  ;;  %3031 = vmatpush.msra.mxu0 %v2929_v32  ;;  %v2928_v38 = vld [vmem:[%s13289_s1 + $0x58] sm:$0xff]  ;;  %v2926_v32 = vld [vmem:[%s13289_s1 + $0x48] sm:$0xff]  ;;  %s278_s18 = scalar_lea.vmem %s13295_s7, %s6460_s15 }
 0x2f7   : > { %v9054_v34 = vpop.permute.xlu0 %2076  ;;  %3032 = vmatpush.msra.mxu0 %v2928_v38 }
 0x2f8   : > { %13914 = vst [vmem:[#allocation37_spill] sm:$0xff] %v9054_v34  ;;  %2379 = vrot.lane.b32.xlu2 %v8712_v54, %s6855_s19 }
 0x2f9   : > { %2377 = vrot.lane.b32.xlu1 %v8693_v49, %s6855_s19 }
 0x2fa   : > { %v6682_v9 = vpop.permute.xlu2 %6681 }
 0x2fb   : > { %v9060_v41 = vpop.permute.xlu1 %2098 }
 0x2fc   : > { %13915 = vst [vmem:[#allocation46_spill] sm:$0xff] %v9060_v41 }
 0x2fd   : > { %2375 = vrot.lane.b32.xlu0 %v8542_v16, %s6855_s19 }
 0x2ff   : > { %v9064_v31 = vpop.permute.xlu0 %2096 }
 0x300   : > { %13916 = vst [vmem:[#allocation38_spill] sm:$0xff] %v9064_v31  ;;  %2385 = vrot.lane.b32.xlu2 %v8656_v3, %s6855_s19  ;;  %v2725_v31 = vsel %vm2719_vm15, %v8550_v24, %v6669_v37  ;;  %v6684_v24 = vunpack.i.h.bf16 %v6682_v9  ;;  %v6683_v37 = vunpack.i.l.bf16 %v6682_v9 }
 0x301   : > { %2383 = vrot.lane.b32.xlu1 %v8666_v25, %s6855_s19 }
 0x302   : > { %v9070_v50 = vpop.permute.xlu2 %6696  ;;  %v2731_v38 = vsel %vm2719_vm15, %v8666_v25, %v6684_v24  ;;  %v2924_v24 = vld [vmem:[%s13289_s1 + $0x38] sm:$0xff] }
 0x303   : > { %v9072_v62 = vpop.permute.xlu1 %2113 }
 0x304   : > { %13917 = vst [vmem:[#allocation39_spill] sm:$0xff] %v9072_v62 }
 0x305   : > { %2381 = vrot.lane.b32.xlu0 %v8644_v55, %s6855_s19 }
 0x307   : > { %v9076_v53 = vpop.permute.xlu0 %2109 }
 0x308   : > { %13918 = vst [vmem:[#allocation40_spill] sm:$0xff] %v9076_v53  ;;  %2391 = vrot.lane.b32.xlu2 %v8805_v60, %s6855_s19  ;;  %v2925_v53 = vld [vmem:[%s13289_s1 + $0x40] sm:$0xff] }
 0x309   : > { %2389 = vrot.lane.b32.xlu1 %v8785_v17, %s6855_s19 }
 0x30a   : > { %v9082_v19 = vpop.permute.xlu2 %6711 }
 0x30b   : > { %v9084_v12 = vpop.permute.xlu1 %6661 }
 0x30d   : > { %2387 = vrot.lane.b32.xlu0 %v8627_v20, %s6855_s19 }
 0x30f   : > { %v9088_v42 = vpop.permute.xlu0 %6656 }
 0x310   : > { %2397 = vrot.lane.b32.xlu2 %v8748_v21, %s6855_s19 }
 0x311   : > { %2395 = vrot.lane.b32.xlu1 %v8758_v57, %s6855_s19 }
 0x312   : > { %v6727_v62 = vpop.permute.xlu2 %6726 }
 0x313   : > { %v9103_v28 = vpop.permute.xlu1 %6676  ;;  %v6729_v10 = vunpack.i.h.bf16 %v6727_v62  ;;  %v6728_v23 = vunpack.i.l.bf16 %v6727_v62 }
 0x315   : > { %2393 = vrot.lane.b32.xlu0 %v8740_v7, %s6855_s19  ;;  %v9115_v11 = vsel %vm2742_vm6, %v2724_v58, %v6728_v23  ;;  %v9118_v62 = vsel %vm2742_vm6, %v2725_v31, %v6729_v10  ;;  %v2927_v23 = vld [vmem:[%s13289_s1 + $0x50] sm:$0xff]  ;;  %v2730_v58 = vsel %vm2719_vm15, %v8644_v55, %v6683_v37  ;;  %v6699_v37 = vunpack.i.h.bf16 %v9070_v50 }
 0x316   : > { %3033 = vmatpush.msra.mxu0 %v2927_v23 }
 0x317   : > { %v9120_v44 = vpop.permute.xlu0 %6671  ;;  %v2737_v43 = vsel %vm2719_vm15, %v8758_v57, %v6699_v37 }
 0x318   : > { %2403 = vrot.lane.b32.xlu2 %v8871_v26, %s6855_s19  ;;  %3034 = vmatpush.msra.mxu0 %v2926_v32 }
 0x319   : > { %2401 = vrot.lane.b32.xlu1 %v8861_v63, %s6855_s19 }
 0x31a   : > { %v6742_v31 = vpop.permute.xlu2 %6741  ;;  %3035 = vmatpush.msra.mxu0 %v2925_v53  ;;  %v2922_v53 = vld [vmem:[%s13289_s1 + $0x28] sm:$0xff] }
 0x31b   : > { %v9135_v33 = vpop.permute.xlu1 %6691  ;;  %v6744_v9 = vunpack.i.h.bf16 %v6742_v31  ;;  %v6743_v10 = vunpack.i.l.bf16 %v6742_v31  ;;  %v6698_v31 = vunpack.i.l.bf16 %v9070_v50 }
 0x31c   : > { %3036 = vmatpush.msra.mxu0 %v2924_v24 }
 0x31d   : > { %2399 = vrot.lane.b32.xlu0 %v8726_v56, %s6855_s19  ;;  %v9147_v23 = vsel %vm2742_vm6, %v2730_v58, %v6743_v10  ;;  %v9150_v41 = vsel %vm2742_vm6, %v2731_v38, %v6744_v9  ;;  %v2923_v9 = vld [vmem:[%s13289_s1 + $0x30] sm:$0xff]  ;;  %v13919_v58 = vld [vmem:[#allocation133_spill] sm:$0xff]  ;;  %v2736_v34 = vsel %vm2719_vm15, %v8740_v7, %v6698_v31 }
 0x31e   : > { %3037 = vmatpush.msra.mxu0 %v2923_v9  ;;  %v1918_v50 = vsel %vm1361_vm7, %v13919_v58, %v8489_v5  ;;  %v2921_v9 = vld [vmem:[%s13289_s1 + $0x20] sm:$0xff] }
 0x31f   : > { %v9152_v32 = vpop.permute.xlu0 %6686  ;;  %v1920_v37 = vsel %vm1382_vm8, %v1918_v50, %v8578_v39 }
 0x320   : > { %2409 = vrot.lane.b32.xlu2 %v8947_v2, %s6855_s19  ;;  %3038 = vmatpush.msra.mxu0 %v2922_v53  ;;  %v13920_v53 = vld [vmem:[#allocation134_spill] sm:$0xff]  ;;  %v1922_v39 = vsel %vm1403_vm9, %v1920_v37, %v8342_v35 }
 0x321   : > { %2407 = vrot.lane.b32.xlu1 %v8831_v13, %s6855_s19  ;;  %v1917_v31 = vsel %vm1361_vm7, %v13920_v53, %v8513_v61  ;;  %v1924_v50 = vsel %vm1424_vm10, %v1922_v39, %v8629_v6  ;;  %v13923_v39 = vld [vmem:[#allocation15_spill] sm:$0xff] }
 0x322   : > { %v6757_v10 = vpop.permute.xlu2 %6756  ;;  %3039 = vmatpush.msra.mxu0 %v2921_v9  ;;  %v1919_v61 = vsel %vm1382_vm8, %v1917_v31, %v8269_v0  ;;  %v1926_v35 = vsel %vm1445_vm11, %v1924_v50, %v8775_v30  ;;  %v13921_v31 = vld [vmem:[#allocation6_spill] sm:$0xff]  ;;  %v13924_v50 = vld [vmem:[#allocation16_spill] sm:$0xff] }
 0x323   : > { %v9172_v38 = vpop.permute.xlu1 %6706  ;;  %v6759_v24 = vunpack.i.h.bf16 %v6757_v10  ;;  %v6758_v46 = vunpack.i.l.bf16 %v6757_v10  ;;  %v1928_v30 = vsel %vm1466_vm12, %v1926_v35, %v13921_v31  ;;  %v6678_v35 = vunpack.i.l.bf16 %v9103_v28 }
 0x324   : > { %3040 = vmatpush.msra.mxu0 %v2920_v8  ;;  %v1921_v8 = vsel %vm1403_vm9, %v1919_v61, %v8544_v27  ;;  %v2917_v27 = vld [vmem:[%s13289_s1] sm:$0xff] }
 0x325   : > { %2405 = vrot.lane.b32.xlu0 %v8845_v22, %s6855_s19  ;;  %v9184_v5 = vsel %vm2742_vm6, %v2736_v34, %v6758_v46  ;;  %v9187_v58 = vsel %vm2742_vm6, %v2737_v43, %v6759_v24  ;;  %v2919_v43 = vld [vmem:[%s13289_s1 + $0x10] sm:$0xff]  ;;  %v6664_v46 = vunpack.i.h.bf16 %v9084_v12  ;;  %v2918_v34 = vld [vmem:[%s13289_s1 + $0x8] sm:$0xff]  ;;  %v1923_v0 = vsel %vm1424_vm10, %v1921_v8, %v8679_v18 }
 0x326   : > { %3041 = vmatpush.msra.mxu0 %v2919_v43  ;;  %v1925_v18 = vsel %vm1445_vm11, %v1923_v0, %v8397_v15  ;;  %v13922_v43 = vld [vmem:[#allocation12_spill] sm:$0xff]  ;;  %v6679_v0 = vunpack.i.h.bf16 %v9103_v28  ;;  %v2728_v28 = vsel %vm2719_vm15, %v8693_v49, %v6678_v35 }
 0x327   : > { %v9194_v10 = vpop.permute.xlu0 %6701  ;;  %v2723_v6 = vsel %vm2719_vm15, %v8593_v52, %v6664_v46  ;;  %v1927_v61 = vsel %vm1466_vm12, %v1925_v18, %v13922_v43 }
 0x328   : > { %2415 = vrot.lane.b32.xlu2 %v9034_v59, %s6855_s19  ;;  %3042 = vmatpush.msra.mxu0 %v2918_v34  ;;  %v1930_v34 = vsel %vm1487_vm13, %v1928_v30, %v13923_v39  ;;  %v1929_v46 = vsel %vm1487_vm13, %v1927_v61, %v13924_v50  ;;  %v2729_v61 = vsel %vm2719_vm15, %v8712_v54, %v6679_v0  ;;  %v6674_v39 = vunpack.i.h.bf16 %v9120_v44 }
 0x329   : > { %2413 = vrot.lane.b32.xlu1 %v9042_v14, %s6855_s19  ;;  %v9251_v15 = vsel %vm1508_vm14, %v1930_v34, %v13925_v47  ;;  %v6673_v34 = vunpack.i.l.bf16 %v9120_v44  ;;  %v6694_v44 = vunpack.i.h.bf16 %v9135_v33 }
 0x32a   : > { %v9218_v24 = vpop.permute.xlu2 %6771  ;;  %3043 = vmatpush.msra.mxu0 %v2917_v27  ;;  %v13926_v27 = vld [vmem:[#allocation7_spill] sm:$0xff] }
 0x32b   : > { %v9224_v9 = vpop.permute.xlu1 %6721 }
 0x32c   : > { %v6724_v53 = vunpack.i.h.bf16 %v9224_v9 }
 0x32d   : > { %2411 = vrot.lane.b32.xlu0 %v8955_v51, %s6855_s19 }
 0x32e   : > { %v9239_v37 = vsel %vm2742_vm6, %v2723_v6, %v6724_v53  ;;  %v9261_v6 = vsel %vm1508_vm14, %v1929_v46, %v13926_v27 }
 0x32f   : > { %v9245_v8 = vpop.permute.xlu0 %6716 }
 0x330   : > { %2447 = vrot.lane.b32.xlu2 %v8693_v49, %s6856_s11 }
 0x331   : > { %2419 = vrot.lane.b32.xlu1 %v9251_v15, %s6855_s19 }
 0x332   : > { %v6787_v53 = vpop.permute.xlu2 %6786 }
 0x333   : > { %v6737_v18 = vpop.permute.xlu1 %6736  ;;  %v6789_v31 = vunpack.i.h.bf16 %v6787_v53  ;;  %v6788_v47 = vunpack.i.l.bf16 %v6787_v53  ;;  %v6693_v53 = vunpack.i.l.bf16 %v9135_v33 }
 0x334   : > { %v6739_v30 = vunpack.i.h.bf16 %v6737_v18  ;;  %v6738_v43 = vunpack.i.l.bf16 %v6737_v18 }
 0x335   : > { %2417 = vrot.lane.b32.xlu0 %v9261_v6, %s6855_s19  ;;  %v9273_v50 = vsel %vm2767_vm0, %v9115_v11, %v6788_v47  ;;  %v9277_v46 = vsel %vm2767_vm0, %v9118_v62, %v6789_v31  ;;  %v2726_v11 = vsel %vm2719_vm15, %v8561_v48, %v6673_v34  ;;  %v2727_v62 = vsel %vm2719_vm15, %v8542_v16, %v6674_v39  ;;  %s6857_s19 = smov 34  }
 0x336   : > { %13927 = vst [vmem:[#allocation41_spill] sm:$0xff] %v9277_v46  ;;  %v9280_v49 = vsel %vm2742_vm6, %v2728_v28, %v6738_v43  ;;  %v9283_v0 = vsel %vm2742_vm6, %v2729_v61, %v6739_v30  ;;  %v2734_v46 = vsel %vm2719_vm15, %v8785_v17, %v6693_v53  ;;  %v2735_v48 = vsel %vm2719_vm15, %v8805_v60, %v6694_v44 }
 0x337   : > { %v6732_v35 = vpop.permute.xlu0 %6731  ;;  %v6689_v16 = vunpack.i.h.bf16 %v9152_v32  ;;  %v6688_v39 = vunpack.i.l.bf16 %v9152_v32  ;;  %v6709_v32 = vunpack.i.h.bf16 %v9172_v38 }
 0x338   : > { %v6734_v27 = vunpack.i.h.bf16 %v6732_v35  ;;  %v6733_v18 = vunpack.i.l.bf16 %v6732_v35  ;;  %2453 = vrot.lane.b32.xlu2 %v8666_v25, %s6856_s11 }
 0x339   : > { %2451 = vrot.lane.b32.xlu1 %v8644_v55, %s6856_s11 }
 0x33a   : > { %v6802_v31 = vpop.permute.xlu2 %6801  ;;  %v9296_v47 = vsel %vm2742_vm6, %v2726_v11, %v6733_v18  ;;  %v9299_v33 = vsel %vm2742_vm6, %v2727_v62, %v6734_v27  ;;  %v6708_v11 = vunpack.i.l.bf16 %v9172_v38 }
 0x33b   : > { %v6752_v30 = vpop.permute.xlu1 %6751  ;;  %v6804_v43 = vunpack.i.h.bf16 %v6802_v31  ;;  %v6803_v28 = vunpack.i.l.bf16 %v6802_v31 }
 0x33c   : > { %v6754_v61 = vunpack.i.h.bf16 %v6752_v30  ;;  %v6753_v35 = vunpack.i.l.bf16 %v6752_v30 }
 0x33d   : > { %2449 = vrot.lane.b32.xlu0 %v8712_v54, %s6856_s11  ;;  %v9311_v34 = vsel %vm2767_vm0, %v9147_v23, %v6803_v28  ;;  %v9315_v27 = vsel %vm2767_vm0, %v9150_v41, %v6804_v43  ;;  %v2732_v41 = vsel %vm2719_vm15, %v8656_v3, %v6688_v39  ;;  %v2733_v23 = vsel %vm2719_vm15, %v8627_v20, %v6689_v16 }
 0x33e   : > { %13928 = vst [vmem:[#allocation43_spill] sm:$0xff] %v9311_v34  ;;  %v9318_v53 = vsel %vm2742_vm6, %v2734_v46, %v6753_v35  ;;  %v9321_v44 = vsel %vm2742_vm6, %v2735_v48, %v6754_v61  ;;  %v6658_v46 = vunpack.i.l.bf16 %v9088_v42  ;;  %v2740_v39 = vsel %vm2719_vm15, %v8861_v63, %v6708_v11 }
 0x33f   : > { %13929 = vst [vmem:[#allocation44_spill] sm:$0xff] %v9315_v27  ;;  %v6747_v18 = vpop.permute.xlu0 %6746  ;;  %v2741_v16 = vsel %vm2719_vm15, %v8871_v26, %v6709_v32  ;;  %v6703_v27 = vunpack.i.l.bf16 %v9194_v10  ;;  %v6773_v11 = vunpack.i.l.bf16 %v9218_v24 }
 0x340   : > { %v6749_v54 = vunpack.i.h.bf16 %v6747_v18  ;;  %v6748_v62 = vunpack.i.l.bf16 %v6747_v18  ;;  %2459 = vrot.lane.b32.xlu2 %v8785_v17, %s6856_s11  ;;  %v6704_v18 = vunpack.i.h.bf16 %v9194_v10 }
 0x341   : > { %2457 = vrot.lane.b32.xlu1 %v8627_v20, %s6856_s11 }
 0x342   : > { %v6817_v31 = vpop.permute.xlu2 %6816  ;;  %v9335_v30 = vsel %vm2742_vm6, %v2732_v41, %v6748_v62  ;;  %v9338_v38 = vsel %vm2742_vm6, %v2733_v23, %v6749_v54  ;;  %v13932_v41 = vld [vmem:[#allocation9_spill] sm:$0xff] }
 0x343   : > { %v6767_v43 = vpop.permute.xlu1 %6766  ;;  %v6819_v28 = vunpack.i.h.bf16 %v6817_v31  ;;  %v6818_v61 = vunpack.i.l.bf16 %v6817_v31  ;;  %v9359_v32 = vsel %vm2719_vm15, %v13932_v41, %v6658_v46  ;;  %v6713_v31 = vunpack.i.l.bf16 %v9082_v19 }
 0x344   : > { %v6769_v35 = vunpack.i.h.bf16 %v6767_v43  ;;  %v6768_v48 = vunpack.i.l.bf16 %v6767_v43  ;;  %v2738_v46 = vsel %vm2719_vm15, %v8748_v21, %v6703_v27 }
 0x345   : > { %2455 = vrot.lane.b32.xlu0 %v8656_v3, %s6856_s11  ;;  %v9350_v54 = vsel %vm2767_vm0, %v9184_v5, %v6818_v61  ;;  %v9354_v62 = vsel %vm2767_vm0, %v9187_v58, %v6819_v28  ;;  %v2743_v58 = vsel %vm2742_vm6, %v9359_v32, %v6713_v31  ;;  %v2739_v28 = vsel %vm2719_vm15, %v8726_v56, %v6704_v18 }
 0x346   : > { %13930 = vst [vmem:[#allocation47_spill] sm:$0xff] %v9350_v54  ;;  %v2765_v23 = vsel %vm2742_vm6, %v2740_v39, %v6768_v48  ;;  %v2766_v10 = vsel %vm2742_vm6, %v2741_v16, %v6769_v35  ;;  %v2768_v35 = vsel %vm2767_vm0, %v2743_v58, %v6773_v11 }
 0x347   : > { %13931 = vst [vmem:[#allocation48_spill] sm:$0xff] %v9354_v62  ;;  %v6762_v43 = vpop.permute.xlu0 %6761 }
 0x348   : > { %v6764_v34 = vunpack.i.h.bf16 %v6762_v43  ;;  %v6763_v5 = vunpack.i.l.bf16 %v6762_v43  ;;  %2465 = vrot.lane.b32.xlu2 %v8758_v57, %s6856_s11 }
 0x349   : > { %2463 = vrot.lane.b32.xlu1 %v8740_v7, %s6856_s11 }
 0x34a   : > { %v9374_v61 = vpop.permute.xlu2 %2373  ;;  %v2763_v48 = vsel %vm2742_vm6, %v2738_v46, %v6763_v5  ;;  %v2764_v39 = vsel %vm2742_vm6, %v2739_v28, %v6764_v34 }
 0x34b   : > { %13933 = vst [vmem:[#allocation49_spill] sm:$0xff] %v9374_v61  ;;  %v9379_v16 = vpop.permute.xlu1 %6781  ;;  %v2793_v43 = vsel %vm2792_vm3, %v2768_v35, %v9374_v61 }
 0x34c   : > { %v6784_v31 = vunpack.i.h.bf16 %v9379_v16  ;;  %3044 = vmatmul.f32.vlgmr.msra.gmra.mxu0 %v2793_v43 }
 0x34d   : > { %2461 = vrot.lane.b32.xlu0 %v8805_v60, %s6856_s11 }
 0x34e   : > { %v9388_v27 = vsel %vm2767_vm0, %v9239_v37, %v6784_v31 }
 0x34f   : > { %v9390_v18 = vpop.permute.xlu0 %6776 }
 0x350   : > { %2471 = vrot.lane.b32.xlu2 %v8861_v63, %s6856_s11 }
 0x351   : > { %2469 = vrot.lane.b32.xlu1 %v8726_v56, %s6856_s11 }
 0x352   : > { %v9396_v34 = vpop.permute.xlu2 %2379 }
 0x353   : > { %v6797_v11 = vpop.permute.xlu1 %6796 }
 0x354   : > { %v6799_v5 = vunpack.i.h.bf16 %v6797_v11  ;;  %v6798_v58 = vunpack.i.l.bf16 %v6797_v11 }
 0x355   : > { %2467 = vrot.lane.b32.xlu0 %v8748_v21, %s6856_s11 }
 0x356   : > { %v9402_v37 = vsel %vm2767_vm0, %v9280_v49, %v6798_v58  ;;  %v9406_v46 = vsel %vm2767_vm0, %v9283_v0, %v6799_v5 }
 0x357   : > { %v6792_v28 = vpop.permute.xlu0 %6791 }
 0x358   : > { %v6794_v35 = vunpack.i.h.bf16 %v6792_v28  ;;  %v6793_v43 = vunpack.i.l.bf16 %v6792_v28  ;;  %2477 = vrot.lane.b32.xlu2 %v8831_v13, %s6856_s11 }
 0x359   : > { %2475 = vrot.lane.b32.xlu1 %v8845_v22, %s6856_s11 }
 0x35a   : > { %v9412_v31 = vpop.permute.xlu2 %2385  ;;  %v9416_v11 = vsel %vm2767_vm0, %v9296_v47, %v6793_v43  ;;  %v9420_v49 = vsel %vm2767_vm0, %v9299_v33, %v6794_v35  ;;  %v13937_v33 = vld [vmem:[#allocation10_spill] sm:$0xff] }
 0x35b   : > { %13934 = vst [vmem:[#allocation51_spill] sm:$0xff] %v9412_v31  ;;  %v6812_v0 = vpop.permute.xlu1 %6811  ;;  %v13938_v35 = vld [vmem:[#allocation150_spill] sm:$0xff] }
 0x35c   : > { %v6814_v5 = vunpack.i.h.bf16 %v6812_v0  ;;  %v6813_v58 = vunpack.i.l.bf16 %v6812_v0  ;;  %v2019_v0 = vsel %vm1361_vm7, %v13938_v35, %v13937_v33 }
 0x35d   : > { %2473 = vrot.lane.b32.xlu0 %v8871_v26, %s6856_s11 }
 0x35e   : > { %v9426_v28 = vsel %vm2767_vm0, %v9318_v53, %v6813_v58  ;;  %v9430_v61 = vsel %vm2767_vm0, %v9321_v44, %v6814_v5  ;;  %v13940_v58 = vld [vmem:[#allocation28_spill] sm:$0xff] }
 0x35f   : > { %13935 = vst [vmem:[#allocation53_spill] sm:$0xff] %v9426_v28  ;;  %v6807_v47 = vpop.permute.xlu0 %6806 }
 0x360   : > { %13936 = vst [vmem:[#allocation84_spill] sm:$0xff] %v9430_v61  ;;  %v6809_v43 = vunpack.i.h.bf16 %v6807_v47  ;;  %v6808_v62 = vunpack.i.l.bf16 %v6807_v47  ;;  %2483 = vrot.lane.b32.xlu2 %v9042_v14, %s6856_s11  ;;  %v2021_v47 = vsel %vm1382_vm8, %v2019_v0, %v13940_v58  ;;  %v6659_v0 = vunpack.i.h.bf16 %v9088_v42 }
 0x361   : > { %2481 = vrot.lane.b32.xlu1 %v8955_v51, %s6856_s11 }
 0x362   : > { %v9439_v54 = vpop.permute.xlu2 %2391  ;;  %v9443_v53 = vsel %vm2767_vm0, %v9335_v30, %v6808_v62  ;;  %v9447_v44 = vsel %vm2767_vm0, %v9338_v38, %v6809_v43  ;;  %v13941_v30 = vld [vmem:[#allocation18_spill] sm:$0xff]  ;;  %v13942_v62 = vld [vmem:[#allocation152_spill] sm:$0xff]  ;;  %v2023_v43 = vsel %vm1403_vm9, %v2021_v47, %v8925_v1 }
 0x363   : > { %13939 = vst [vmem:[#allocation98_spill] sm:$0xff] %v9447_v44  ;;  %v6827_v5 = vpop.permute.xlu1 %6826  ;;  %v2018_v38 = vsel %vm1361_vm7, %v13942_v62, %v13941_v30  ;;  %v6774_v62 = vunpack.i.h.bf16 %v9218_v24 }
 0x364   : > { %v6829_v61 = vunpack.i.h.bf16 %v6827_v5  ;;  %v6828_v28 = vunpack.i.l.bf16 %v6827_v5 }
 0x365   : > { %2479 = vrot.lane.b32.xlu0 %v8947_v2, %s6856_s11 }
 0x366   : > { %v9454_v33 = vsel %vm2767_vm0, %v2765_v23, %v6828_v28  ;;  %v9457_v35 = vsel %vm2767_vm0, %v2766_v10, %v6829_v61  ;;  %v13943_v23 = vld [vmem:[#allocation20_spill] sm:$0xff]  ;;  %v13944_v61 = vld [vmem:[#allocation13_spill] sm:$0xff] }
 0x367   : > { %v6822_v58 = vpop.permute.xlu0 %6821  ;;  %v2020_v10 = vsel %vm1382_vm8, %v2018_v38, %v13943_v23  ;;  %v2025_v28 = vsel %vm1424_vm10, %v2023_v43, %v13944_v61  ;;  %v2721_v38 = vsel %vm2719_vm15, %v8593_v52, %v6659_v0  ;;  %v6714_v23 = vunpack.i.h.bf16 %v9082_v19  ;;  %v13947_v52 = vld [vmem:[#allocation27_spill] sm:$0xff] }
 0x368   : > { %v6824_v5 = vunpack.i.h.bf16 %v6822_v58  ;;  %v6823_v44 = vunpack.i.l.bf16 %v6822_v58  ;;  %2489 = vrot.lane.b32.xlu2 %v9251_v15, %s6856_s11  ;;  %v2027_v47 = vsel %vm1445_vm11, %v2025_v28, %v8943_v40 }
 0x369   : > { %2487 = vrot.lane.b32.xlu1 %v9261_v6, %s6856_s11  ;;  %v2029_v43 = vsel %vm1466_vm12, %v2027_v47, %v8970_v29  ;;  %v2744_v24 = vsel %vm2742_vm6, %v2721_v38, %v6714_v23  ;;  %v6718_v47 = vunpack.i.l.bf16 %v9245_v8 }
 0x36a   : > { %v9473_v30 = vpop.permute.xlu2 %2397  ;;  %v9476_v1 = vsel %vm2767_vm0, %v2763_v48, %v6823_v44  ;;  %v9479_v42 = vsel %vm2767_vm0, %v2764_v39, %v6824_v5  ;;  %v13945_v48 = vld [vmem:[#allocation11_spill] sm:$0xff]  ;;  %v13946_v39 = vld [vmem:[#allocation22_spill] sm:$0xff]  ;;  %v2031_v0 = vsel %vm1487_vm13, %v2029_v43, %v13947_v52  ;;  %v2769_v19 = vsel %vm2767_vm0, %v2744_v24, %v6774_v62 }
 0x36b   : > { %v9484_v58 = vpop.permute.xlu1 %2377  ;;  %v2022_v44 = vsel %vm1403_vm9, %v2020_v10, %v13945_v48  ;;  %v9507_v10 = vsel %vm1508_vm14, %v2031_v0, %v8978_v45  ;;  %v6778_v43 = vunpack.i.l.bf16 %v9390_v18  ;;  %v13951_v48 = vld [vmem:[#allocation29_spill] sm:$0xff]  ;;  %v6719_v24 = vunpack.i.h.bf16 %v9245_v8 }
 0x36c   : > { %v2024_v40 = vsel %vm1424_vm10, %v2022_v44, %v13946_v39  ;;  %v2745_v44 = vsel %vm2742_vm6, %v9359_v32, %v6718_v47  ;;  %v6779_v32 = vunpack.i.h.bf16 %v9390_v18  ;;  %v6663_v8 = vunpack.i.l.bf16 %v9084_v12 }
 0x36d   : > { %2485 = vrot.lane.b32.xlu0 %v9034_v59, %s6856_s11  ;;  %v2026_v5 = vsel %vm1445_vm11, %v2024_v40, %v8957_v36  ;;  %v13948_v36 = vld [vmem:[#allocation17_spill] sm:$0xff]  ;;  %v2770_v40 = vsel %vm2767_vm0, %v2745_v44, %v6778_v43  ;;  %v2746_v0 = vsel %vm2742_vm6, %v2721_v38, %v6719_v24  ;;  %v6783_v38 = vunpack.i.l.bf16 %v9379_v16 }
 0x36e   : > { %v2028_v28 = vsel %vm1466_vm12, %v2026_v5, %v13948_v36  ;;  %v2722_v47 = vsel %vm2719_vm15, %v13932_v41, %v6663_v8  ;;  %v13963_v8 = vld [vmem:[#allocation33_spill] sm:$0xff] }
 0x36f   : > { %v9502_v29 = vpop.permute.xlu0 %2375  ;;  %v2030_v45 = vsel %vm1487_vm13, %v2028_v28, %v8966_v4  ;;  %v2795_v4 = vsel %vm2792_vm3, %v2770_v40, %v9484_v58 }
 0x370   : > { %v2794_v61 = vsel %vm2792_vm3, %v2769_v19, %v9502_v29  ;;  %2521 = vrot.lane.b32.xlu2 %v8644_v55, %s6857_s19  ;;  %v9527_v55 = vsel %vm1508_vm14, %v2030_v45, %v13951_v48 }
 0x371   : > { %3047 = vmatmul.f32.gmra.mxu0 %v2794_v61  ;;  %2493 = vrot.lane.b32.xlu1 %v9507_v10, %s6856_s11  ;;  %v2771_v61 = vsel %vm2767_vm0, %v2746_v0, %v6779_v32 }
 0x372   : > { %v9518_v62 = vpop.permute.xlu2 %2403  ;;  %v2796_v36 = vsel %vm2792_vm3, %v2771_v61, %v9396_v34 }
 0x373   : > { %13949 = vst [vmem:[#allocation94_spill] sm:$0xff] %v9518_v62  ;;  %v9523_v23 = vpop.permute.xlu1 %2383 }
 0x374   : > { %13950 = vst [vmem:[#allocation118_spill] sm:$0xff] %v9523_v23  ;;  %v2798_v44 = vsel %vm2792_vm3, %v9388_v27, %v9523_v23  ;;  %v2799_v27 = vsel %vm2792_vm3, %v9273_v50, %v9412_v31 }
 0x375   : > { %2491 = vrot.lane.b32.xlu0 %v9527_v55, %s6856_s11 }
 0x377   : > { %v9533_v39 = vpop.permute.xlu0 %2381 }
 0x378   : > { %2527 = vrot.lane.b32.xlu2 %v8627_v20, %s6857_s19 }
 0x379   : > { %3050 = vmatmul.f32.gmra.mxu0 %v2795_v4  ;;  %2525 = vrot.lane.b32.xlu1 %v8656_v3, %s6857_s19 }
 0x37a   : > { %v9543_v5 = vpop.permute.xlu2 %2409 }
 0x37b   : > { %13952 = vst [vmem:[#allocation115_spill] sm:$0xff] %v9543_v5  ;;  %v9546_v52 = vpop.permute.xlu1 %2389 }
 0x37c   : > { %13953 = vst [vmem:[#allocation52_spill] sm:$0xff] %v9546_v52 }
 0x37d   : > { %2523 = vrot.lane.b32.xlu0 %v8666_v25, %s6857_s19  ;;  %v6723_v25 = vunpack.i.l.bf16 %v9224_v9 }
 0x37f   : > { %v9551_v19 = vpop.permute.xlu0 %2387  ;;  %v2747_v12 = vsel %vm2742_vm6, %v2722_v47, %v6723_v25  ;;  %v13964_v25 = vld [vmem:[#allocation167_spill] sm:$0xff] }
 0x380   : > { %13954 = vst [vmem:[#allocation103_spill] sm:$0xff] %v9551_v19  ;;  %2533 = vrot.lane.b32.xlu2 %v8740_v7, %s6857_s19  ;;  %v2772_v43 = vsel %vm2767_vm0, %v2747_v12, %v6783_v38  ;;  %v2120_v38 = vsel %vm1361_vm7, %v13964_v25, %v13963_v8  ;;  %v13972_v8 = vld [vmem:[#allocation31_spill] sm:$0xff]  ;;  %vm2817_vm0 = vcmask 56320  }
 0x381   : > { %3053 = vmatmul.f32.gmra.mxu0 %v2796_v36  ;;  %2531 = vrot.lane.b32.xlu1 %v8805_v60, %s6857_s19  ;;  %v2797_v9 = vsel %vm2792_vm3, %v2772_v43, %v9533_v39  ;;  %v13962_v36 = vld [vmem:[#allocation41_spill] sm:$0xff] }
 0x382   : > { %v9562_v18 = vpop.permute.xlu2 %2415  ;;  %v2800_v50 = vsel %vm2792_vm3, %v13962_v36, %v9551_v19  ;;  %v13967_v43 = vld [vmem:[#allocation21_spill] sm:$0xff] }
 0x383   : > { %13955 = vst [vmem:[#allocation54_spill] sm:$0xff] %v9562_v18  ;;  %v9565_v28 = vpop.permute.xlu1 %2395 }
 0x385   : > { %2529 = vrot.lane.b32.xlu0 %v8785_v17, %s6857_s19 }
 0x387   : > { %v9572_v45 = vpop.permute.xlu0 %2393 }
 0x388   : > { %2539 = vrot.lane.b32.xlu2 %v8726_v56, %s6857_s19 }
 0x389   : > { %3056 = vmatmul.f32.gmra.mxu0 %v2797_v9  ;;  %2537 = vrot.lane.b32.xlu1 %v8748_v21, %s6857_s19  ;;  %v13968_v9 = vld [vmem:[#allocation168_spill] sm:$0xff] }
 0x38a   : > { %v9581_v16 = vpop.permute.xlu2 %2447 }
 0x38b   : > { %v9583_v48 = vpop.permute.xlu1 %2401 }
 0x38c   : > { %13956 = vst [vmem:[#allocation55_spill] sm:$0xff] %v9583_v48 }
 0x38d   : > { %2535 = vrot.lane.b32.xlu0 %v8758_v57, %s6857_s19 }
 0x38f   : > { %v9587_v41 = vpop.permute.xlu0 %2399 }
 0x390   : > { %2545 = vrot.lane.b32.xlu2 %v8845_v22, %s6857_s19 }
 0x391   : > { %3059 = vmatmul.f32.gmra.mxu0 %v2798_v44  ;;  %2543 = vrot.lane.b32.xlu1 %v8871_v26, %s6857_s19  ;;  %v2119_v44 = vsel %vm1361_vm7, %v13968_v9, %v13967_v43  ;;  %v2801_v43 = vsel %vm2792_vm3, %v9416_v11, %v9546_v52  ;;  %vm2867_vm7 = vcmask 498688  }
 0x392   : > { %v9596_v40 = vpop.permute.xlu2 %2453  ;;  %v2121_v25 = vsel %vm1382_vm8, %v2119_v44, %v13972_v8 }
 0x393   : > { %v9598_v4 = vpop.permute.xlu1 %2407 }
 0x394   : > { %13957 = vst [vmem:[#allocation56_spill] sm:$0xff] %v9598_v4 }
 0x395   : > { %2541 = vrot.lane.b32.xlu0 %v8861_v63, %s6857_s19 }
 0x397   : > { %v9602_v24 = vpop.permute.xlu0 %2405 }
 0x398   : > { %13958 = vst [vmem:[#allocation69_spill] sm:$0xff] %v9602_v24  ;;  %2551 = vrot.lane.b32.xlu2 %v8955_v51, %s6857_s19 }
 0x399   : > { %3062 = vmatmul.f32.gmra.mxu0 %v2799_v27  ;;  %2549 = vrot.lane.b32.xlu1 %v8947_v2, %s6857_s19  ;;  %v13969_v27 = vld [vmem:[#allocation23_spill] sm:$0xff] }
 0x39a   : > { %v9611_v32 = vpop.permute.xlu2 %2459  ;;  %v2122_v36 = vsel %vm1382_vm8, %v2120_v38, %v13969_v27  ;;  %v13974_v38 = vld [vmem:[#allocation45_spill] sm:$0xff]  ;;  %v13975_v27 = vld [vmem:[#allocation26_spill] sm:$0xff]  ;;  %vm2952_vm8 = vcmask 941056  }
 0x39b   : > { %13959 = vst [vmem:[#allocation57_spill] sm:$0xff] %v9611_v32  ;;  %v9613_v0 = vpop.permute.xlu1 %2413  ;;  %v13973_v32 = vld [vmem:[#allocation37_spill] sm:$0xff]  ;;  %v2123_v9 = vsel %vm1403_vm9, %v2121_v25, %v13974_v38  ;;  %v13979_v25 = vld [vmem:[#allocation36_spill] sm:$0xff] }
 0x39c   : > { %13960 = vst [vmem:[#allocation58_spill] sm:$0xff] %v9613_v0 }
 0x39d   : > { %2547 = vrot.lane.b32.xlu0 %v8831_v13, %s6857_s19 }
 0x39f   : > { %v9617_v61 = vpop.permute.xlu0 %2411 }
 0x3a0   : > { %13961 = vst [vmem:[#allocation67_spill] sm:$0xff] %v9617_v61  ;;  %2557 = vrot.lane.b32.xlu2 %v9261_v6, %s6857_s19 }
 0x3a1   : > { %3065 = vmatmul.f32.gmra.mxu0 %v2800_v50  ;;  %2555 = vrot.lane.b32.xlu1 %v9034_v59, %s6857_s19  ;;  %v13970_v50 = vld [vmem:[#allocation35_spill] sm:$0xff] }
 0x3a2   : > { %v9631_v12 = vpop.permute.xlu2 %2465  ;;  %v2124_v19 = vsel %vm1403_vm9, %v2122_v36, %v13970_v50  ;;  %v13977_v50 = vld [vmem:[#allocation40_spill] sm:$0xff]  ;;  %vm2892_vm9 = vcmask 719872  }
 0x3a3   : > { %v9629_v47 = vpop.permute.xlu1 %2419  ;;  %13966 = vst [vmem:[#allocation59_spill] sm:$0xff] %v9631_v12  ;;  %v2126_v12 = vsel %vm1424_vm10, %v2124_v19, %v13973_v32  ;;  %v13976_v19 = vld [vmem:[#allocation46_spill] sm:$0xff] }
 0x3a4   : > { %13965 = vst [vmem:[#allocation86_spill] sm:$0xff] %v9629_v47  ;;  %v2128_v44 = vsel %vm1445_vm11, %v2126_v12, %v13975_v27  ;;  %v13980_v27 = vld [vmem:[#allocation38_spill] sm:$0xff] }
 0x3a5   : > { %2553 = vrot.lane.b32.xlu0 %v9042_v14, %s6857_s19  ;;  %v2130_v32 = vsel %vm1466_vm12, %v2128_v44, %v13976_v19  ;;  %v2802_v44 = vsel %vm2792_vm3, %v9420_v49, %v9439_v54  ;;  %v13981_v19 = vld [vmem:[#allocation34_spill] sm:$0xff] }
 0x3a6   : > { %v2132_v11 = vsel %vm1487_vm13, %v2130_v32, %v13977_v50 }
 0x3a7   : > { %v9642_v31 = vpop.permute.xlu0 %2417  ;;  %v9682_v32 = vsel %vm1508_vm14, %v2132_v11, %v13981_v19  ;;  %v13986_v19 = vld [vmem:[#allocation43_spill] sm:$0xff] }
 0x3a8   : > { %13971 = vst [vmem:[#allocation66_spill] sm:$0xff] %v9642_v31  ;;  %2563 = vrot.lane.b32.xlu2 %v9507_v10, %s6857_s19 }
 0x3a9   : > { %3068 = vmatmul.f32.gmra.mxu0 %v2801_v43  ;;  %2561 = vrot.lane.b32.xlu1 %v9527_v55, %s6857_s19  ;;  %v13978_v43 = vld [vmem:[#allocation25_spill] sm:$0xff] }
 0x3aa   : > { %v9665_v8 = vpop.permute.xlu2 %2471  ;;  %v2125_v52 = vsel %vm1424_vm10, %v2123_v9, %v13978_v43  ;;  %v13983_v43 = vld [vmem:[#allocation39_spill] sm:$0xff]  ;;  %vm3242_vm10 = vcmask 523264  }
 0x3ab   : > { %v9659_v36 = vpop.permute.xlu1 %2451  ;;  %v2127_v38 = vsel %vm1445_vm11, %v2125_v52, %v13979_v25  ;;  %v13982_v52 = vld [vmem:[#allocation30_spill] sm:$0xff]  ;;  %vm3968_vm11 = vcmask 261120  }
 0x3ac   : > { %v2129_v23 = vsel %vm1466_vm12, %v2127_v38, %v13980_v27  ;;  %v2804_v27 = vsel %vm2792_vm3, %v9406_v46, %v9565_v28  ;;  %v2805_v46 = vsel %vm2792_vm3, %v13986_v19, %v9473_v30  ;;  %vm14089_vm12 = vcmask 1044480  }
 0x3ad   : > { %2559 = vrot.lane.b32.xlu0 %v9251_v15, %s6857_s19  ;;  %v2131_v9 = vsel %vm1487_vm13, %v2129_v23, %v13982_v52  ;;  %vm14092_vm13 = vmmov %vm14089_vm12 }
 0x3ae   : > { %v9694_v49 = vsel %vm1508_vm14, %v2131_v9, %v13983_v43  ;;  %vm14094_vm14 = vmmov %vm14089_vm12 }
 0x3af   : > { %v9673_v12 = vpop.permute.xlu0 %2449  ;;  %vm14095_vm15 = vmmov %vm14089_vm12 }
 0x3b0   : > { %2593 = vrot.lane.b32.xlu2 %v8656_v3, %s6858_s12  ;;  %v2803_v3 = vsel %vm2792_vm3, %v9402_v37, %v9572_v45  ;;  %vm14096_vm6 = vmmov %vm14089_vm12 }
 0x3b1   : > { %3071 = vmatmul.f32.gmra.mxu0 %v2802_v44  ;;  %2567 = vrot.lane.b32.xlu1 %v9682_v32, %s6857_s19 }
 0x3b2   : > { %v9698_v11 = vpop.permute.xlu2 %2477 }
 0x3b3   : > { %v9690_v50 = vpop.permute.xlu1 %2457  ;;  %13984 = vst [vmem:[#allocation83_spill] sm:$0xff] %v9698_v11 }
 0x3b5   : > { %2565 = vrot.lane.b32.xlu0 %v9694_v49, %s6857_s19 }
 0x3b7   : > { %v9700_v25 = vpop.permute.xlu0 %2455 }
 0x3b8   : > { %2599 = vrot.lane.b32.xlu2 %v8805_v60, %s6858_s12 }
 0x3b9   : > { %3074 = vmatmul.f32.gmra.mxu0 %v2803_v3  ;;  %2597 = vrot.lane.b32.xlu1 %v8785_v17, %s6858_s12  ;;  %v13988_v3 = vld [vmem:[#allocation44_spill] sm:$0xff] }
 0x3ba   : > { %v9720_v37 = vpop.permute.xlu2 %2483 }
 0x3bb   : > { %v9709_v23 = vpop.permute.xlu1 %2463  ;;  %13985 = vst [vmem:[#allocation105_spill] sm:$0xff] %v9720_v37 }
 0x3bd   : > { %2595 = vrot.lane.b32.xlu0 %v8627_v20, %s6858_s12 }
 0x3bf   : > { %v9713_v38 = vpop.permute.xlu0 %2461 }
 0x3c0   : > { %2605 = vrot.lane.b32.xlu2 %v8748_v21, %s6858_s12 }
 0x3c1   : > { %3077 = vmatmul.f32.gmra.mxu0 %v2804_v27  ;;  %2603 = vrot.lane.b32.xlu1 %v8758_v57, %s6858_s12  ;;  %v2806_v27 = vsel %vm2792_vm3, %v13988_v3, %v9587_v41  ;;  %v2807_v3 = vsel %vm2792_vm3, %v9443_v53, %v9583_v48  ;;  %v13998_v48 = vld [vmem:[#allocation47_spill] sm:$0xff] }
 0x3c2   : > { %v9737_v52 = vpop.permute.xlu2 %2489 }
 0x3c3   : > { %v9724_v44 = vpop.permute.xlu1 %2469  ;;  %13987 = vst [vmem:[#allocation73_spill] sm:$0xff] %v9737_v52 }
 0x3c5   : > { %2601 = vrot.lane.b32.xlu0 %v8740_v7, %s6858_s12 }
 0x3c7   : > { %v9728_v20 = vpop.permute.xlu0 %2467 }
 0x3c8   : > { %2611 = vrot.lane.b32.xlu2 %v8871_v26, %s6858_s12 }
 0x3c9   : > { %3080 = vmatmul.f32.gmra.mxu0 %v2805_v46  ;;  %2609 = vrot.lane.b32.xlu1 %v8861_v63, %s6858_s12 }
 0x3ca   : > { %v9754_v46 = vpop.permute.xlu2 %2521 }
 0x3cb   : > { %v9739_v9 = vpop.permute.xlu1 %2475 }
 0x3cd   : > { %2607 = vrot.lane.b32.xlu0 %v8726_v56, %s6858_s12 }
 0x3cf   : > { %v9743_v43 = vpop.permute.xlu0 %2473 }
 0x3d0   : > { %2617 = vrot.lane.b32.xlu2 %v8947_v2, %s6858_s12 }
 0x3d1   : > { %3083 = vmatmul.f32.gmra.mxu0 %v2806_v27  ;;  %2615 = vrot.lane.b32.xlu1 %v8831_v13, %s6858_s12 }
 0x3d2   : > { %v9771_v37 = vpop.permute.xlu2 %2527 }
 0x3d3   : > { %v9752_v19 = vpop.permute.xlu1 %2481 }
 0x3d4   : > { %13989 = vst [vmem:[#allocation102_spill] sm:$0xff] %v9752_v19 }
 0x3d5   : > { %2613 = vrot.lane.b32.xlu0 %v8845_v22, %s6858_s12 }
 0x3d7   : > { %v9758_v52 = vpop.permute.xlu0 %2479 }
 0x3d8   : > { %13990 = vst [vmem:[#allocation124_spill] sm:$0xff] %v9758_v52  ;;  %2623 = vrot.lane.b32.xlu2 %v9034_v59, %s6858_s12  ;;  %v13993_v52 = vld [vmem:[#allocation98_spill] sm:$0xff] }
 0x3d9   : > { %3086 = vmatmul.f32.gmra.mxu0 %v2807_v3  ;;  %2621 = vrot.lane.b32.xlu1 %v9042_v14, %s6858_s12  ;;  %v2808_v53 = vsel %vm2792_vm3, %v13993_v52, %v9518_v62 }
 0x3da   : > { %v9793_v52 = vpop.permute.xlu2 %2533 }
 0x3db   : > { %v9767_v27 = vpop.permute.xlu1 %2487 }
 0x3dc   : > { %13991 = vst [vmem:[#allocation61_spill] sm:$0xff] %v9767_v27 }
 0x3dd   : > { %2619 = vrot.lane.b32.xlu0 %v8955_v51, %s6858_s12 }
 0x3df   : > { %v9773_v19 = vpop.permute.xlu0 %2485 }
 0x3e0   : > { %13992 = vst [vmem:[#allocation80_spill] sm:$0xff] %v9773_v19  ;;  %2629 = vrot.lane.b32.xlu2 %v9527_v55, %s6858_s12  ;;  %v13996_v19 = vld [vmem:[#allocation53_spill] sm:$0xff] }
 0x3e1   : > { %3089 = vmatmul.f32.gmra.mxu0 %v2808_v53  ;;  %2627 = vrot.lane.b32.xlu1 %v9251_v15, %s6858_s12  ;;  %v2809_v11 = vsel %vm2792_vm3, %v13996_v19, %v9602_v24 }
 0x3e3   : > { %v9782_v3 = vpop.permute.xlu1 %2493 }
 0x3e4   : > { %13994 = vst [vmem:[#allocation90_spill] sm:$0xff] %v9782_v3 }
 0x3e5   : > { %2625 = vrot.lane.b32.xlu0 %v9261_v6, %s6858_s12 }
 0x3e7   : > { %v9786_v27 = vpop.permute.xlu0 %2491 }
 0x3e8   : > { %13995 = vst [vmem:[#allocation121_spill] sm:$0xff] %v9786_v27  ;;  %2635 = vrot.lane.b32.xlu2 %v9682_v32, %s6858_s12  ;;  %v13997_v27 = vld [vmem:[#allocation84_spill] sm:$0xff] }
 0x3e9   : > { %3092 = vmatmul.f32.gmra.mxu0 %v2809_v11  ;;  %2633 = vrot.lane.b32.xlu1 %v9694_v49, %s6858_s12  ;;  %v2810_v19 = vsel %vm2792_vm3, %v13997_v27, %v9598_v4  ;;  %v9810_v11 = vpop.permute.xlu2 %2539  ;;  %v2811_v27 = vsel %vm2792_vm3, %v13998_v48, %v9543_v5 }
 0x3eb   : > { %v9797_v53 = vpop.permute.xlu1 %2525 }
 0x3ed   : > { %2631 = vrot.lane.b32.xlu0 %v9507_v10, %s6858_s12 }
 0x3ef   : > { %v9801_v3 = vpop.permute.xlu0 %2523 }
 0x3f0   : > { %2663 = vrot.lane.b32.xlu2 %v8740_v7, %s6859_s13 }
 0x3f1   : > { %3095 = vmatmul.f32.gmra.mxu0 %v2810_v19  ;;  %2661 = vrot.lane.b32.xlu1 %v8805_v60, %s6859_s13  ;;  %v9827_v7 = vpop.permute.xlu2 %2545  ;;  %v13999_v19 = vld [vmem:[#allocation48_spill] sm:$0xff] }
 0x3f2   : > { %v2812_v48 = vsel %vm2792_vm3, %v13999_v19, %v9617_v61 }
 0x3f3   : > { %v9812_v24 = vpop.permute.xlu1 %2531 }
 0x3f5   : > { %2659 = vrot.lane.b32.xlu0 %v8785_v17, %s6859_s13 }
 0x3f7   : > { %v9816_v62 = vpop.permute.xlu0 %2529 }
 0x3f8   : > { %2669 = vrot.lane.b32.xlu2 %v8726_v56, %s6859_s13 }
 0x3f9   : > { %3098 = vmatmul.f32.gmra.mxu0 %v2811_v27  ;;  %2667 = vrot.lane.b32.xlu1 %v8748_v21, %s6859_s13  ;;  %v9844_v21 = vpop.permute.xlu2 %2551  ;;  %v2813_v27 = vsel %vm2792_vm3, %v9476_v1, %v9613_v0 }
 0x3fb   : > { %v9825_v60 = vpop.permute.xlu1 %2537 }
 0x3fd   : > { %2665 = vrot.lane.b32.xlu0 %v8758_v57, %s6859_s13 }
 0x3ff   : > { %v9831_v17 = vpop.permute.xlu0 %2535 }
 0x400   : > { %2675 = vrot.lane.b32.xlu2 %v8845_v22, %s6859_s13 }
 0x401   : > { %3101 = vmatmul.f32.gmra.mxu0 %v2812_v48  ;;  %2673 = vrot.lane.b32.xlu1 %v8871_v26, %s6859_s13  ;;  %v2814_v26 = vsel %vm2792_vm3, %v9479_v42, %v9562_v18  ;;  %v9866_v1 = vpop.permute.xlu2 %2557 }
 0x402   : > { %14000 = vst [vmem:[#allocation63_spill] sm:$0xff] %v9866_v1 }
 0x403   : > { %v9840_v56 = vpop.permute.xlu1 %2543 }
 0x405   : > { %2671 = vrot.lane.b32.xlu0 %v8861_v63, %s6859_s13 }
 0x407   : > { %v9846_v57 = vpop.permute.xlu0 %2541 }
 0x408   : > { %2681 = vrot.lane.b32.xlu2 %v8955_v51, %s6859_s13  ;;  %v2815_v51 = vsel %vm2792_vm3, %v9454_v33, %v9642_v31  ;;  %v2816_v33 = vsel %vm2792_vm3, %v9457_v35, %v9629_v47  ;;  %v2946_v35 = vld [vmem:[%s13289_s1 + $0xe8] sm:$0xff]  ;;  %v2937_v47 = vld [vmem:[%s13289_s1 + $0xa0] sm:$0xff]  ;;  %vm2842_vm3 = vcmask 277504  }
 0x409   : > { %3104 = vmatmul.f32.gmra.mxu0 %v2813_v27  ;;  %2679 = vrot.lane.b32.xlu1 %v8947_v2, %s6859_s13  ;;  %v2944_v27 = vld [vmem:[%s13289_s1 + $0xd8] sm:$0xff]  ;;  %v2934_v31 = vld [vmem:[%s13289_s1 + $0x88] sm:$0xff] }
 0x40b   : > { %v9855_v22 = vpop.permute.xlu1 %2549 }
 0x40d   : > { %2677 = vrot.lane.b32.xlu0 %v8831_v13, %s6859_s13 }
 0x40f   : > { %v9859_v63 = vpop.permute.xlu0 %2547 }
 0x410   : > { %2687 = vrot.lane.b32.xlu2 %v9261_v6, %s6859_s13  ;;  %v9883_v6 = vpop.permute.xlu2 %2563 }
 0x411   : > { %3107 = vmatmul.f32.gmra.mxu0 %v2814_v26  ;;  %2685 = vrot.lane.b32.xlu1 %v9034_v59, %s6859_s13  ;;  %14002 = vst [vmem:[#allocation101_spill] sm:$0xff] %v9883_v6  ;;  %v2943_v26 = vld [vmem:[%s13289_s1 + $0xd0] sm:$0xff]  ;;  %v2933_v6 = vld [vmem:[%s13289_s1 + $0x80] sm:$0xff] }
 0x413   : > { %v9870_v2 = vpop.permute.xlu1 %2555 }
 0x414   : > { %14001 = vst [vmem:[#allocation64_spill] sm:$0xff] %v9870_v2 }
 0x415   : > { %2683 = vrot.lane.b32.xlu0 %v9042_v14, %s6859_s13 }
 0x417   : > { %v9874_v13 = vpop.permute.xlu0 %2553 }
 0x418   : > { %2693 = vrot.lane.b32.xlu2 %v9507_v10, %s6859_s13  ;;  %v2594_v10 = vpop.permute.xlu2 %2593 }
 0x419   : > { %3110 = vmatmul.f32.gmra.mxu0 %v2815_v51  ;;  %2691 = vrot.lane.b32.xlu1 %v9527_v55, %s6859_s13 }
 0x41b   : > { %v9885_v59 = vpop.permute.xlu1 %2561 }
 0x41c   : > { %14003 = vst [vmem:[#allocation109_spill] sm:$0xff] %v9885_v59 }
 0x41d   : > { %2689 = vrot.lane.b32.xlu0 %v9251_v15, %s6859_s13  ;;  %v2947_v15 = vld [vmem:[%s13289_s1 + $0xf0] sm:$0x7] }
 0x41e   : > { %6461 = vmatpush.msk.msra.mxu1 %vm969_vm5, %v2947_v15 }
 0x41f   : > { %v9889_v14 = vpop.permute.xlu0 %2559 }
 0x420   : > { %14004 = vst [vmem:[#allocation68_spill] sm:$0xff] %v9889_v14  ;;  %3119 = vmatpush.msra.mxu1 %v2946_v35  ;;  %v2941_v35 = vld [vmem:[%s13289_s1 + $0xc0] sm:$0xff] }
 0x421   : > { %3113 = vmatmul.f32.gmra.mxu0 %v2816_v33  ;;  %2697 = vrot.lane.b32.xlu1 %v9682_v32, %s6859_s13  ;;  %v9911_v32 = vpop.permute.xlu2 %2599  ;;  %v2942_v33 = vld [vmem:[%s13289_s1 + $0xc8] sm:$0xff] }
 0x423   : > { %v9896_v42 = vpop.permute.xlu1 %2567 }
 0x424   : > { %14005 = vst [vmem:[#allocation78_spill] sm:$0xff] %v9896_v42 }
 0x425   : > { %2695 = vrot.lane.b32.xlu0 %v9694_v49, %s6859_s13  ;;  %v2945_v49 = vld [vmem:[%s13289_s1 + $0xe0] sm:$0xff] }
 0x426   : > { %3120 = vmatpush.msra.mxu1 %v2945_v49  ;;  %v2940_v49 = vld [vmem:[%s13289_s1 + $0xb8] sm:$0xff] }
 0x427   : > { %v9900_v55 = vpop.permute.xlu0 %2565 }
 0x428   : > { %14006 = vst [vmem:[#allocation120_spill] sm:$0xff] %v9900_v55  ;;  %3121 = vmatpush.msra.mxu1 %v2944_v27  ;;  %v2936_v55 = vld [vmem:[%s13289_s1 + $0x98] sm:$0xff] }
 0x429   : > { %v9935_v27 = vpop.permute.xlu2 %2605 }
 0x42a   : > { %3122 = vmatpush.msra.mxu1 %v2943_v26  ;;  %v2939_v26 = vld [vmem:[%s13289_s1 + $0xb0] sm:$0xff] }
 0x42b   : > { %v9906_v19 = vpop.permute.xlu1 %2597 }
 0x42c   : > { %3123 = vmatpush.msra.mxu1 %v2942_v33  ;;  %v2938_v33 = vld [vmem:[%s13289_s1 + $0xa8] sm:$0xff] }
 0x42e   : > { %3124 = vmatpush.msra.mxu1 %v2941_v35 }
 0x42f   : > { %v2596_v48 = vpop.permute.xlu0 %2595 }
 0x430   : > { %3125 = vmatpush.msra.mxu1 %v2940_v49  ;;  %v2935_v49 = vld [vmem:[%s13289_s1 + $0x90] sm:$0xff] }
 0x432   : > { %3126 = vmatpush.msra.mxu1 %v2939_v26  ;;  %v9956_v26 = vpop.permute.xlu2 %2611 }
 0x433   : > { %v9922_v51 = vpop.permute.xlu1 %2603 }
 0x434   : > { %3127 = vmatpush.msra.mxu1 %v2938_v33 }
 0x436   : > { %3128 = vmatpush.msra.mxu1 %v2937_v47 }
 0x437   : > { %v9927_v15 = vpop.permute.xlu0 %2601 }
 0x438   : > { %3129 = vmatpush.msra.mxu1 %v2936_v55 }
 0x43a   : > { %3130 = vmatpush.msra.mxu1 %v2935_v49  ;;  %v9968_v18 = vpop.permute.xlu2 %2617 }
 0x43b   : > { %v9940_v42 = vpop.permute.xlu1 %2609 }
 0x43c   : > { %3131 = vmatpush.msra.mxu1 %v2934_v31 }
 0x43e   : > { %3132 = vmatpush.msra.mxu1 %v2933_v6  ;;  %v14012_v6 = vld [vmem:[#allocation49_spill] sm:$0xff] }
 0x43f   : > { %v9945_v35 = vpop.permute.xlu0 %2607  ;;  %v2818_v5 = vsel %vm2817_vm0, %v14012_v6, %v9581_v16 }
 0x440   : > { %v2843_v2 = vsel %vm2842_vm3, %v2818_v5, %v9754_v46 }
 0x441   : > { %v2868_v4 = vsel %vm2867_vm7, %v2843_v2, %v2594_v10 }
 0x442   : > { %v9974_v49 = vpop.permute.xlu2 %2623 }
 0x443   : > { %v9958_v33 = vpop.permute.xlu1 %2615 }
 0x447   : > { %v9963_v47 = vpop.permute.xlu0 %2613 }
 0x44a   : > { %v9982_v61 = vpop.permute.xlu2 %2629 }
 0x44b   : > { %v9970_v55 = vpop.permute.xlu1 %2621  ;;  %14010 = vst [vmem:[#allocation81_spill] sm:$0xff] %v9982_v61 }
 0x44f   : > { %v9972_v59 = vpop.permute.xlu0 %2619 }
 0x452   : > { %v9994_v61 = vpop.permute.xlu2 %2635 }
 0x453   : > { %v9978_v14 = vpop.permute.xlu1 %2627 }
 0x454   : > { %14008 = vst [vmem:[#allocation96_spill] sm:$0xff] %v9978_v14 }
 0x457   : > { %v9976_v0 = vpop.permute.xlu0 %2625 }
 0x458   : > { %14007 = vst [vmem:[#allocation70_spill] sm:$0xff] %v9976_v0 }
 0x45a   : > { %v2664_v2 = vpop.permute.xlu2 %2663 }
 0x45b   : > { %v9984_v1 = vpop.permute.xlu1 %2633 }
 0x45c   : > { %14011 = vst [vmem:[#allocation71_spill] sm:$0xff] %v9984_v1  ;;  %v2819_v1 = vsel %vm2817_vm0, %v9502_v29, %v9673_v12 }
 0x45d   : > { %v2844_v16 = vsel %vm2842_vm3, %v2819_v1, %v9801_v3 }
 0x45e   : > { %v2869_v5 = vsel %vm2867_vm7, %v2844_v16, %v2596_v48 }
 0x45f   : > { %v9980_v31 = vpop.permute.xlu0 %2631 }
 0x460   : > { %14009 = vst [vmem:[#allocation132_spill] sm:$0xff] %v9980_v31 }
 0x462   : > { %v2670_v48 = vpop.permute.xlu2 %2669 }
 0x463   : > { %v2662_v0 = vpop.permute.xlu1 %2661 }
 0x464   : > { %v2894_v46 = vsel %vm2892_vm9, %v2869_v5, %v2662_v0  ;;  %v2821_v0 = vsel %vm2817_vm0, %v9396_v34, %v9596_v40 }
 0x465   : > { %v2846_v1 = vsel %vm2842_vm3, %v2821_v0, %v9771_v37  ;;  %v14013_v37 = vld [vmem:[#allocation118_spill] sm:$0xff] }
 0x467   : > { %v2660_v14 = vpop.permute.xlu0 %2659 }
 0x468   : > { %v2893_v31 = vsel %vm2892_vm9, %v2868_v4, %v2660_v14  ;;  %v2820_v4 = vsel %vm2817_vm0, %v9484_v58, %v9659_v36  ;;  %v2871_v58 = vsel %vm2867_vm7, %v2846_v1, %v9911_v32  ;;  %v2823_v32 = vsel %vm2817_vm0, %v14013_v37, %v9690_v50 }
 0x469   : > { %6462 = vmatmul.msk.f32.vlgmr.msra.gmra.mxu1 %vm2952_vm8, %v2893_v31  ;;  %v2845_v14 = vsel %vm2842_vm3, %v2820_v4, %v9797_v53  ;;  %v2822_v53 = vsel %vm2817_vm0, %v9533_v39, %v9700_v25  ;;  %v2848_v31 = vsel %vm2842_vm3, %v2823_v32, %v9812_v24  ;;  %v14014_v25 = vld [vmem:[#allocation57_spill] sm:$0xff]  ;;  %v3234_v32 = vld [vmem:[%s13291_s3 + $0x20] sm:$0xff] }
 0x46a   : > { %v2870_v29 = vsel %vm2867_vm7, %v2845_v14, %v9906_v19  ;;  %v2847_v19 = vsel %vm2842_vm3, %v2822_v53, %v9816_v62  ;;  %v2873_v39 = vsel %vm2867_vm7, %v2848_v31, %v9922_v51  ;;  %v14016_v51 = vld [vmem:[#allocation103_spill] sm:$0xff] }
 0x46b   : > { %v2895_v12 = vsel %vm2892_vm9, %v2870_v29, %v2664_v2  ;;  %v2668_v10 = vpop.permute.xlu1 %2667  ;;  %v2872_v34 = vsel %vm2867_vm7, %v2847_v19, %v9927_v15  ;;  %v2898_v62 = vsel %vm2892_vm9, %v2873_v39, %v2670_v48  ;;  %v14015_v15 = vld [vmem:[#allocation51_spill] sm:$0xff] }
 0x46c   : > { %v2897_v40 = vsel %vm2892_vm9, %v2872_v34, %v2668_v10  ;;  %v2824_v6 = vsel %vm2817_vm0, %v14015_v15, %v14014_v25 }
 0x46d   : > { %v2849_v5 = vsel %vm2842_vm3, %v2824_v6, %v9793_v52 }
 0x46e   : > { %v2874_v50 = vsel %vm2867_vm7, %v2849_v5, %v9935_v27  ;;  %v14017_v27 = vld [vmem:[#allocation52_spill] sm:$0xff]  ;;  %v14019_v5 = vld [vmem:[#allocation55_spill] sm:$0xff] }
 0x46f   : > { %v2666_v3 = vpop.permute.xlu0 %2665  ;;  %v2826_v29 = vsel %vm2817_vm0, %v14017_v27, %v9709_v23  ;;  %v14022_v27 = vld [vmem:[#allocation124_spill] sm:$0xff] }
 0x470   : > { %v2896_v36 = vsel %vm2892_vm9, %v2871_v58, %v2666_v3  ;;  %v2851_v0 = vsel %vm2842_vm3, %v2826_v29, %v9825_v60  ;;  %v14023_v29 = vld [vmem:[#allocation69_spill] sm:$0xff] }
 0x471   : > { %6463 = vmatmul.msk.f32.gmra.mxu1 %vm2952_vm8, %v2894_v46  ;;  %v2825_v46 = vsel %vm2817_vm0, %v14016_v51, %v9713_v38  ;;  %v2876_v38 = vsel %vm2867_vm7, %v2851_v0, %v9940_v42  ;;  %v2828_v42 = vsel %vm2817_vm0, %v9572_v45, %v9728_v20  ;;  %v3236_v45 = vld [vmem:[%s13291_s3 + $0x30] sm:$0xff]  ;;  %v3235_v20 = vld [vmem:[%s13291_s3 + $0x28] sm:$0xff] }
 0x472   : > { %v2850_v2 = vsel %vm2842_vm3, %v2825_v46, %v9831_v17  ;;  %v14020_v51 = vld [vmem:[#allocation83_spill] sm:$0xff]  ;;  %v14021_v46 = vld [vmem:[#allocation94_spill] sm:$0xff] }
 0x473   : > { %v2674_v4 = vpop.permute.xlu1 %2673  ;;  %v2875_v14 = vsel %vm2867_vm7, %v2850_v2, %v9945_v35  ;;  %v14018_v35 = vld [vmem:[#allocation59_spill] sm:$0xff] }
 0x474   : > { %v2900_v52 = vsel %vm2892_vm9, %v2875_v14, %v2674_v4  ;;  %v2827_v3 = vsel %vm2817_vm0, %v9439_v54, %v14018_v35  ;;  %v2853_v54 = vsel %vm2842_vm3, %v2828_v42, %v9846_v57  ;;  %v2829_v57 = vsel %vm2817_vm0, %v9565_v28, %v9724_v44  ;;  %v3233_v28 = vld [vmem:[%s13291_s3 + $0x18] sm:$0xff] }
 0x475   : > { %v2852_v58 = vsel %vm2842_vm3, %v2827_v3, %v9810_v11  ;;  %v2878_v10 = vsel %vm2867_vm7, %v2853_v54, %v9963_v47  ;;  %v2854_v34 = vsel %vm2842_vm3, %v2829_v57, %v9840_v56  ;;  %v2830_v44 = vsel %vm2817_vm0, %v9473_v30, %v9665_v8  ;;  %v3230_v30 = vld [vmem:[%s13291_s3] sm:$0xff] }
 0x476   : > { %v2877_v23 = vsel %vm2867_vm7, %v2852_v58, %v9956_v26  ;;  %v3237_v26 = vld [vmem:[%s13291_s3 + $0x38] sm:$0xff]  ;;  %v2855_v48 = vsel %vm2842_vm3, %v2830_v44, %v9827_v7  ;;  %v2831_v8 = vsel %vm2817_vm0, %v9587_v41, %v9743_v43  ;;  %v2833_v4 = vsel %vm2817_vm0, %v14021_v46, %v14020_v51 }
 0x477   : > { %v2672_v16 = vpop.permute.xlu0 %2671  ;;  %3323 = vmatpush.msra.mxu2 %v3237_v26  ;;  %v2880_v39 = vsel %vm2867_vm7, %v2855_v48, %v9968_v18  ;;  %v2856_v18 = vsel %vm2842_vm3, %v2831_v8, %v9859_v63  ;;  %v14028_v26 = vld [vmem:[#allocation96_spill] sm:$0xff] }
 0x478   : > { %v2899_v24 = vsel %vm2892_vm9, %v2874_v50, %v2672_v16  ;;  %v2881_v15 = vsel %vm2867_vm7, %v2856_v18, %v9972_v59  ;;  %v2832_v50 = vsel %vm2817_vm0, %v14019_v5, %v9739_v9  ;;  %v2858_v9 = vsel %vm2842_vm3, %v2833_v4, %v9844_v21  ;;  %v14033_v8 = vld [vmem:[#allocation80_spill] sm:$0xff]  ;;  %v14037_v4 = vld [vmem:[#allocation61_spill] sm:$0xff] }
 0x479   : > { %6464 = vmatmul.msk.f32.gmra.mxu1 %vm2952_vm8, %v2895_v12  ;;  %v2676_v12 = vpop.permute.xlu2 %2675  ;;  %3324 = vmatpush.msra.mxu2 %v3236_v45  ;;  %v2857_v41 = vsel %vm2842_vm3, %v2832_v50, %v9855_v22  ;;  %v2883_v14 = vsel %vm2867_vm7, %v2858_v9, %v9974_v49 }
 0x47a   : > { %v2901_v17 = vsel %vm2892_vm9, %v2876_v38, %v2676_v12  ;;  %v2882_v43 = vsel %vm2867_vm7, %v2857_v41, %v9970_v55  ;;  %v10156_v55 = vld [vmem:[%s13290_s2] ss:$0 sm:$0xff]  ;;  %v2834_v12 = vsel %vm2817_vm0, %v14023_v29, %v14022_v27  ;;  %v14040_v27 = vld [vmem:[#allocation71_spill] sm:$0xff] }
 0x47b   : > { %v2680_v53 = vpop.permute.xlu1 %2679  ;;  %3325 = vmatpush.msra.mxu2 %v3235_v20  ;;  %v2859_v49 = vsel %vm2842_vm3, %v2834_v12, %v9874_v13 }
 0x47c   : > { %v2903_v11 = vsel %vm2892_vm9, %v2878_v10, %v2680_v53  ;;  %v14027_v53 = vld [vmem:[#allocation64_spill] sm:$0xff] }
 0x47d   : > { %3326 = vmatpush.msra.mxu2 %v3234_v32 }
 0x47f   : > { %v2678_v1 = vpop.permute.xlu0 %2677  ;;  %3327 = vmatpush.msra.mxu2 %v3233_v28  ;;  %v14031_v28 = vld [vmem:[#allocation63_spill] sm:$0xff] }
 0x480   : > { %v2902_v60 = vsel %vm2892_vm9, %v2877_v23, %v2678_v1  ;;  %v14025_v23 = vld [vmem:[#allocation102_spill] sm:$0xff] }
 0x481   : > { %6465 = vmatmul.msk.f32.gmra.mxu1 %vm2952_vm8, %v2896_v36  ;;  %v3045_v36 = vpop.f32.mrf.mxu0  ;;  %v2682_v19 = vpop.permute.xlu2 %2681 }
 0x483   : > { %v2686_v7 = vpop.permute.xlu1 %2685 }
 0x484   : > { %v2906_v6 = vsel %vm2892_vm9, %v2881_v15, %v2686_v7  ;;  %v14034_v7 = vld [vmem:[#allocation67_spill] sm:$0xff] }
 0x487   : > { %v2684_v56 = vpop.permute.xlu0 %2683 }
 0x488   : > { %v2905_v25 = vsel %vm2892_vm9, %v2880_v39, %v2684_v56 }
 0x489   : > { %6466 = vmatmul.msk.f32.gmra.mxu1 %vm2952_vm8, %v2897_v40  ;;  %v3048_v47 = vpop.f32.mrf.mxu0  ;;  %v2879_v40 = vsel %vm2867_vm7, %v2854_v34, %v9958_v33  ;;  %v3232_v33 = vld [vmem:[%s13291_s3 + $0x10] sm:$0xff]  ;;  %v14029_v34 = vld [vmem:[#allocation105_spill] sm:$0xff] }
 0x48a   : > { %v2904_v37 = vsel %vm2892_vm9, %v2879_v40, %v2682_v19  ;;  %3328 = vmatpush.msra.mxu2 %v3232_v33  ;;  %v14030_v40 = vld [vmem:[#allocation115_spill] sm:$0xff]  ;;  %v14032_v33 = vld [vmem:[#allocation81_spill] sm:$0xff] }
 0x48b   : > { %v2692_v21 = vpop.permute.xlu1 %2691 }
 0x48f   : > { %v2690_v2 = vpop.permute.xlu0 %2689 }
 0x490   : > { %v2908_v22 = vsel %vm2892_vm9, %v2883_v14, %v2690_v2  ;;  %v14038_v2 = vld [vmem:[#allocation58_spill] sm:$0xff]  ;;  %v14039_v14 = vld [vmem:[#allocation109_spill] sm:$0xff] }
 0x491   : > { %6467 = vmatmul.msk.f32.gmra.mxu1 %vm2952_vm8, %v2898_v62  ;;  %v3051_v31 = vpop.f32.mrf.mxu0  ;;  %v3231_v62 = vld [vmem:[%s13291_s3 + $0x8] sm:$0xff] }
 0x492   : > { %3329 = vmatpush.msra.mxu2 %v3231_v62 }
 0x493   : > { %v2698_v15 = vpop.permute.xlu1 %2697 }
 0x494   : > { %3330 = vmatpush.msra.mxu2 %v3230_v30 }
 0x497   : > { %v2696_v32 = vpop.permute.xlu0 %2695 }
 0x499   : > { %6468 = vmatmul.msk.f32.gmra.mxu1 %vm2952_vm8, %v2899_v24  ;;  %v3054_v16 = vpop.f32.mrf.mxu0  ;;  %v2688_v24 = vpop.permute.xlu2 %2687 }
 0x49a   : > { %v2907_v63 = vsel %vm2892_vm9, %v2882_v43, %v2688_v24  ;;  %v3055_v18 = vadd.f32 %v10156_v55, %v3054_v16  ;;  %v14036_v24 = vld [vmem:[#allocation132_spill] sm:$0xff]  ;;  %v2838_v16 = vsel %vm2817_vm0, %v14038_v2, %v14037_v4 }
 0x4a1   : > { %6469 = vmatmul.msk.f32.gmra.mxu1 %vm2952_vm8, %v2900_v52  ;;  %v3057_v59 = vpop.f32.mrf.mxu0  ;;  %v3046_v52 = vadd.f32 %v10156_v55, %v3045_v36  ;;  %v3049_v36 = vadd.f32 %v10156_v55, %v3048_v47  ;;  %v2694_v13 = vpop.permute.xlu2 %2693  ;;  %v2836_v47 = vsel %vm2817_vm0, %v14030_v40, %v14029_v34 }
 0x4a2   : > { %v2861_v44 = vsel %vm2842_vm3, %v2836_v47, %v14031_v28  ;;  %v3058_v9 = vadd.f32 %v10156_v55, %v3057_v59  ;;  %v14048_v28 = vld [vmem:[#allocation86_spill] sm:$0xff] }
 0x4a3   : > { %v2886_v48 = vsel %vm2867_vm7, %v2861_v44, %v14032_v33 }
 0x4a4   : > { %v2911_v62 = vsel %vm2892_vm9, %v2886_v48, %v2696_v32 }
 0x4a9   : > { %6470 = vmatmul.msk.f32.gmra.mxu1 %vm2952_vm8, %v2901_v17  ;;  %v3060_v0 = vpop.f32.mrf.mxu0  ;;  %v14024_v17 = vld [vmem:[#allocation70_spill] sm:$0xff] }
 0x4aa   : > { %v2884_v35 = vsel %vm2867_vm7, %v2859_v49, %v14024_v17  ;;  %v14042_v17 = vld [vmem:[#allocation54_spill] sm:$0xff]  ;;  %v3061_v59 = vadd.f32 %v10156_v55, %v3060_v0 }
 0x4ab   : > { %v2909_v1 = vsel %vm2892_vm9, %v2884_v35, %v2692_v21 }
 0x4b1   : > { %6471 = vmatmul.msk.f32.gmra.mxu1 %vm2952_vm8, %v2902_v60  ;;  %v14026_v60 = vld [vmem:[#allocation56_spill] sm:$0xff] }
 0x4b2   : > { %v2835_v42 = vsel %vm2817_vm0, %v14026_v60, %v14025_v23 }
 0x4b3   : > { %v2860_v54 = vsel %vm2842_vm3, %v2835_v42, %v14027_v53  ;;  %v14044_v53 = vld [vmem:[#allocation121_spill] sm:$0xff] }
 0x4b4   : > { %v2885_v45 = vsel %vm2867_vm7, %v2860_v54, %v14028_v26  ;;  %v14045_v54 = vld [vmem:[#allocation66_spill] sm:$0xff]  ;;  %v14046_v26 = vld [vmem:[#allocation120_spill] sm:$0xff] }
 0x4b5   : > { %v2910_v57 = vsel %vm2892_vm9, %v2885_v45, %v2694_v13  ;;  %v2840_v0 = vsel %vm2817_vm0, %v14045_v54, %v14044_v53 }
 0x4b6   : > { %v2865_v45 = vsel %vm2842_vm3, %v2840_v0, %v14046_v26  ;;  %v10268_v26 = vld [vmem:[%s13292_s4] ss:$0 sm:$0xff] }
 0x4b9   : > { %6472 = vmatmul.msk.f32.gmra.mxu1 %vm2952_vm8, %v2903_v11  ;;  %v3063_v11 = vpop.f32.mrf.mxu0 }
 0x4c1   : > { %6473 = vmatmul.msk.f32.gmra.mxu1 %vm2952_vm8, %v2904_v37  ;;  %v3052_v37 = vadd.f32 %v10156_v55, %v3051_v31  ;;  %v2837_v31 = vsel %vm2817_vm0, %v14034_v7, %v14033_v8 }
 0x4c9   : > { %6474 = vmatmul.msk.f32.gmra.mxu1 %vm2952_vm8, %v2905_v25  ;;  %v3066_v25 = vpop.f32.mrf.mxu0 }
 0x4ca   : > { %v3067_v44 = vadd.f32 %v10156_v55, %v3066_v25 }
 0x4d1   : > { %6475 = vmatmul.msk.f32.gmra.mxu1 %vm2952_vm8, %v2906_v6  ;;  %v14035_v6 = vld [vmem:[#allocation68_spill] sm:$0xff]  ;;  %v3069_v46 = vpop.f32.mrf.mxu0 }
 0x4d2   : > { %v2862_v5 = vsel %vm2842_vm3, %v2837_v31, %v14035_v6  ;;  %v3070_v7 = vadd.f32 %v10156_v55, %v3069_v46 }
 0x4d3   : > { %v2887_v41 = vsel %vm2867_vm7, %v2862_v5, %v14036_v24 }
 0x4d9   : > { %6476 = vmatmul.msk.f32.gmra.mxu1 %vm2952_vm8, %v2907_v63  ;;  %v2912_v63 = vsel %vm2892_vm9, %v2887_v41, %v2698_v15 }
 0x4e1   : > { %6477 = vmatmul.msk.f32.gmra.mxu1 %vm2952_vm8, %v2908_v22  ;;  %v2863_v22 = vsel %vm2842_vm3, %v2838_v16, %v14039_v14 }
 0x4e2   : > { %v2888_v29 = vsel %vm2867_vm7, %v2863_v22, %v14040_v27 }
 0x4e3   : > { %v2913_v21 = vsel %vm2892_vm9, %v2888_v29, %v2696_v32 }
 0x4e6   : > { %v3134_v38 = vpop.f32.mrf.mxu1 }
 0x4e7   : > { %v3135_v3 = vadd.f32 %v3134_v38, %v3046_v52  ;;  %v14041_v38 = vld [vmem:[#allocation73_spill] sm:$0xff] }
 0x4e8   : > { %v2839_v35 = vsel %vm2817_vm0, %v14042_v17, %v14041_v38 }
 0x4e9   : > { %v3206_v58 = vmax.f32 %v3135_v3, 0.0  ;;  %6478 = vmatmul.msk.f32.gmra.mxu1 %vm2952_vm8, %v2909_v1  ;;  %v3072_v3 = vpop.f32.mrf.mxu0  ;;  %v14043_v1 = vld [vmem:[#allocation101_spill] sm:$0xff] }
 0x4ea   : > { %v3073_v5 = vadd.f32 %v10156_v55, %v3072_v3 }
 0x4eb   : > { %6486 = vmatmul.msk.f32.vlgmr.msra.gmra.mxu2 %vm3242_vm10, %v3206_v58  ;;  %v2864_v58 = vsel %vm2842_vm3, %v2839_v35, %v14043_v1 }
 0x4ec   : > { %v2889_v60 = vsel %vm2867_vm7, %v2864_v58, %v9994_v61 }
 0x4ee   : > { %v3137_v10 = vpop.f32.mrf.mxu1 }
 0x4ef   : > { %v3138_v20 = vadd.f32 %v3137_v10, %v3049_v36  ;;  %v2914_v36 = vsel %vm2892_vm9, %v2889_v60, %v2698_v15  ;;  %v3064_v10 = vadd.f32 %v10156_v55, %v3063_v11 }
 0x4f1   : > { %v3207_v19 = vmax.f32 %v3138_v20, 0.0  ;;  %6479 = vmatmul.msk.f32.gmra.mxu1 %vm2952_vm8, %v2910_v57  ;;  %v3075_v57 = vpop.f32.mrf.mxu0 }
 0x4f3   : > { %6487 = vmatmul.msk.f32.gmra.mxu2 %vm3242_vm10, %v3207_v19  ;;  %v2890_v19 = vsel %vm2867_vm7, %v2865_v45, %v14040_v27 }
 0x4f4   : > { %v2915_v40 = vsel %vm2892_vm9, %v2890_v19, %v2696_v32 }
 0x4f6   : > { %v3140_v56 = vpop.f32.mrf.mxu1 }
 0x4f7   : > { %v3141_v39 = vadd.f32 %v3140_v56, %v3052_v37  ;;  %v14047_v37 = vld [vmem:[#allocation90_spill] sm:$0xff] }
 0x4f8   : > { %v2841_v11 = vsel %vm2817_vm0, %v14048_v28, %v14047_v37  ;;  %v14049_v56 = vld [vmem:[#allocation78_spill] sm:$0xff]  ;;  %vm14099_vm0 = vmmov %vm14096_vm6 }
 0x4f9   : > { %v3208_v30 = vmax.f32 %v3141_v39, 0.0  ;;  %6480 = vmatmul.msk.f32.gmra.mxu1 %vm2952_vm8, %v2911_v62  ;;  %v2866_v33 = vsel %vm2842_vm3, %v2841_v11, %v14049_v56  ;;  %vm14100_vm3 = vmmov %vm14099_vm0 }
 0x4fa   : > { %v2891_v39 = vsel %vm2867_vm7, %v2866_v33, %v9994_v61  ;;  %vm14101_vm7 = vmmov %vm14099_vm0 }
 0x4fb   : > { %6488 = vmatmul.msk.f32.gmra.mxu2 %vm3242_vm10, %v3208_v30  ;;  %v2916_v32 = vsel %vm2892_vm9, %v2891_v39, %v2698_v15  ;;  %v3078_v30 = vpop.f32.mrf.mxu0  ;;  %v3076_v15 = vadd.f32 %v10156_v55, %v3075_v57  ;;  %vm14103_vm9 = vmmov %vm14099_vm0 }
 0x4fc   : > { %v3079_v46 = vadd.f32 %v10156_v55, %v3078_v30 }
 0x4fe   : > { %v3143_v50 = vpop.f32.mrf.mxu1 }
 0x4ff   : > { %v3144_v43 = vadd.f32 %v3143_v50, %v3055_v18 }
 0x501   : > { %v3209_v51 = vmax.f32 %v3144_v43, 0.0  ;;  %6481 = vmatmul.msk.f32.gmra.mxu1 %vm2952_vm8, %v2912_v63 }
 0x503   : > { %6489 = vmatmul.msk.f32.gmra.mxu2 %vm3242_vm10, %v3209_v51  ;;  %v3081_v6 = vpop.f32.mrf.mxu0 }
 0x504   : > { %v3082_v14 = vadd.f32 %v10156_v55, %v3081_v6 }
 0x506   : > { %v3146_v52 = vpop.f32.mrf.mxu1 }
 0x507   : > { %v3147_v12 = vadd.f32 %v3146_v52, %v3058_v9 }
 0x509   : > { %v3210_v49 = vmax.f32 %v3147_v12, 0.0  ;;  %6482 = vmatmul.msk.f32.gmra.mxu1 %vm2952_vm8, %v2913_v21 }
 0x50b   : > { %6490 = vmatmul.msk.f32.gmra.mxu2 %vm3242_vm10, %v3210_v49  ;;  %v3084_v41 = vpop.f32.mrf.mxu0 }
 0x50c   : > { %v3085_v12 = vadd.f32 %v10156_v55, %v3084_v41 }
 0x50e   : > { %v3149_v23 = vpop.f32.mrf.mxu1 }
 0x50f   : > { %v3150_v42 = vadd.f32 %v3149_v23, %v3061_v59 }
 0x511   : > { %v3211_v13 = vmax.f32 %v3150_v42, 0.0  ;;  %6483 = vmatmul.msk.f32.gmra.mxu1 %vm2952_vm8, %v2914_v36 }
 0x513   : > { %6491 = vmatmul.msk.f32.gmra.mxu2 %vm3242_vm10, %v3211_v13  ;;  %v3087_v2 = vpop.f32.mrf.mxu0 }
 0x514   : > { %v3088_v35 = vadd.f32 %v10156_v55, %v3087_v2 }
 0x516   : > { %v3152_v20 = vpop.f32.mrf.mxu1 }
 0x517   : > { %v3153_v34 = vadd.f32 %v3152_v20, %v3064_v10 }
 0x519   : > { %v3212_v47 = vmax.f32 %v3153_v34, 0.0  ;;  %6484 = vmatmul.msk.f32.gmra.mxu1 %vm2952_vm8, %v2915_v40 }
 0x51b   : > { %6492 = vmatmul.msk.f32.gmra.mxu2 %vm3242_vm10, %v3212_v47  ;;  %v3090_v27 = vpop.f32.mrf.mxu0 }
 0x51c   : > { %v3091_v58 = vadd.f32 %v10156_v55, %v3090_v27 }
 0x51e   : > { %v3155_v48 = vpop.f32.mrf.mxu1 }
 0x51f   : > { %v3156_v62 = vadd.f32 %v3155_v48, %v3067_v44 }
 0x521   : > { %v3213_v8 = vmax.f32 %v3156_v62, 0.0  ;;  %6485 = vmatmul.msk.f32.gmra.mxu1 %vm2952_vm8, %v2916_v32  ;;  %vm14102_vm8 = vmmov %vm14099_vm0 }
 0x523   : > { %6493 = vmatmul.msk.f32.gmra.mxu2 %vm3242_vm10, %v3213_v8  ;;  %v3093_v17 = vpop.f32.mrf.mxu0 }
 0x524   : > { %v3094_v13 = vadd.f32 %v10156_v55, %v3093_v17 }
 0x526   : > { %v3158_v31 = vpop.f32.mrf.mxu1 }
 0x527   : > { %v3159_v25 = vadd.f32 %v3158_v31, %v3070_v7 }
 0x529   : > { %v3214_v18 = vmax.f32 %v3159_v25, 0.0 }
 0x52b   : > { %6494 = vmatmul.msk.f32.gmra.mxu2 %vm3242_vm10, %v3214_v18  ;;  %v3096_v23 = vpop.f32.mrf.mxu0 }
 0x52c   : > { %v3097_v45 = vadd.f32 %v10156_v55, %v3096_v23 }
 0x52e   : > { %v3161_v61 = vpop.f32.mrf.mxu1 }
 0x52f   : > { %v3162_v50 = vadd.f32 %v3161_v61, %v3073_v5 }
 0x531   : > { %v3215_v24 = vmax.f32 %v3162_v50, 0.0 }
 0x533   : > { %6495 = vmatmul.msk.f32.gmra.mxu2 %vm3242_vm10, %v3215_v24  ;;  %v3099_v54 = vpop.f32.mrf.mxu0 }
 0x534   : > { %v3100_v28 = vadd.f32 %v10156_v55, %v3099_v54 }
 0x536   : > { %v3164_v43 = vpop.f32.mrf.mxu1 }
 0x537   : > { %v3165_v63 = vadd.f32 %v3164_v43, %v3076_v15 }
 0x539   : > { %v3216_v51 = vmax.f32 %v3165_v63, 0.0 }
 0x53b   : > { %6496 = vmatmul.msk.f32.gmra.mxu2 %vm3242_vm10, %v3216_v51  ;;  %v3102_v40 = vpop.f32.mrf.mxu0 }
 0x53c   : > { %v3103_v25 = vadd.f32 %v10156_v55, %v3102_v40 }
 0x53e   : > { %v3167_v4 = vpop.f32.mrf.mxu1 }
 0x53f   : > { %v3168_v16 = vadd.f32 %v3167_v4, %v3079_v46 }
 0x541   : > { %v3217_v9 = vmax.f32 %v3168_v16, 0.0 }
 0x543   : > { %6497 = vmatmul.msk.f32.gmra.mxu2 %vm3242_vm10, %v3217_v9  ;;  %v3105_v30 = vpop.f32.mrf.mxu0 }
 0x546   : > { %v3170_v22 = vpop.f32.mrf.mxu1 }
 0x547   : > { %v3171_v52 = vadd.f32 %v3170_v22, %v3082_v14  ;;  %v3106_v22 = vadd.f32 %v10156_v55, %v3105_v30 }
 0x549   : > { %v3218_v29 = vmax.f32 %v3171_v52, 0.0 }
 0x54b   : > { %6498 = vmatmul.msk.f32.gmra.mxu2 %vm3242_vm10, %v3218_v29  ;;  %v3108_v52 = vpop.f32.mrf.mxu0 }
 0x54e   : > { %v3173_v21 = vpop.f32.mrf.mxu1 }
 0x54f   : > { %v3174_v49 = vadd.f32 %v3173_v21, %v3085_v12 }
 0x551   : > { %v3219_v38 = vmax.f32 %v3174_v49, 0.0 }
 0x553   : > { %6499 = vmatmul.msk.f32.gmra.mxu2 %vm3242_vm10, %v3219_v38 }
 0x556   : > { %v3176_v59 = vpop.f32.mrf.mxu1 }
 0x557   : > { %v3177_v3 = vadd.f32 %v3176_v59, %v3088_v35 }
 0x559   : > { %v3220_v1 = vmax.f32 %v3177_v3, 0.0 }
 0x55b   : > { %6500 = vmatmul.msk.f32.gmra.mxu2 %vm3242_vm10, %v3220_v1 }
 0x55e   : > { %v3179_v60 = vpop.f32.mrf.mxu1 }
 0x55f   : > { %v3180_v42 = vadd.f32 %v3179_v60, %v3091_v58  ;;  %v3109_v58 = vadd.f32 %v10156_v55, %v3108_v52 }
 0x561   : > { %v3221_v36 = vmax.f32 %v3180_v42, 0.0 }
 0x563   : > { %6501 = vmatmul.msk.f32.gmra.mxu2 %vm3242_vm10, %v3221_v36 }
 0x566   : > { %v3182_v53 = vpop.f32.mrf.mxu1 }
 0x567   : > { %v3183_v0 = vadd.f32 %v3182_v53, %v3094_v13 }
 0x569   : > { %v3222_v10 = vmax.f32 %v3183_v0, 0.0 }
 0x56b   : > { %6502 = vmatmul.msk.f32.gmra.mxu2 %vm3242_vm10, %v3222_v10 }
 0x56e   : > { %v3185_v20 = vpop.f32.mrf.mxu1  ;;  %v3332_v57 = vpop.f32.mrf.mxu2 }
 0x56f   : > { %v3186_v19 = vadd.f32 %v3185_v20, %v3097_v45  ;;  %v3333_v34 = vadd.f32 %v10268_v26, %v3332_v57  ;;  %v3111_v20 = vpop.f32.mrf.mxu0 }
 0x571   : > { %v3223_v47 = vmax.f32 %v3186_v19, 0.0  ;;  %v3404_v37 = vmax.f32 %v3333_v34, 0.0 }
 0x573   : > { %6503 = vmatmul.msk.f32.gmra.mxu2 %vm3242_vm10, %v3223_v47  ;;  %v3428_v56 = vperm.slane %v3404_v37, 0  ;;  %v3476_v33 = vrot.slane %v3404_v37, 4 }
 0x575   : > { %v10276_v8 = vsel %vm858_vm4, %v3428_v56, %v3476_v33 }
 0x576   : > { %v3188_v11 = vpop.f32.mrf.mxu1  ;;  %v3335_v44 = vpop.f32.mrf.mxu2  ;;  %14050 = vst [vmem:[#allocation72_spill] sm:$0xff] %v10276_v8  ;;  %v3572_v24 = vrot.slane %v10276_v8, 1  ;;  %v13355_v4 = vrot.slane %v10276_v8, 4 }
 0x577   : > { %v3189_v48 = vadd.f32 %v3188_v11, %v3100_v28  ;;  %v3336_v39 = vadd.f32 %v10268_v26, %v3335_v44  ;;  %v3112_v11 = vadd.f32 %v10156_v55, %v3111_v20 }
 0x579   : > { %v3224_v62 = vmax.f32 %v3189_v48, 0.0  ;;  %v3405_v32 = vmax.f32 %v3336_v39, 0.0 }
 0x57b   : > { %v10278_v7 = vperm.slane %v3405_v32, 3  ;;  %v3477_v31 = vrot.slane %v3405_v32, 4  ;;  %6504 = vmatmul.msk.f32.gmra.mxu2 %vm3242_vm10, %v3224_v62 }
 0x57d   : > { %14051 = vst [vmem:[#allocation75_spill] sm:$0xff] %v10278_v7  ;;  %v10283_v18 = vsel %vm858_vm4, %v3476_v33, %v3477_v31  ;;  %v13337_v6 = vrot.slane %v10278_v7, 1  ;;  %v5674_v63 = vrot.slane %v10278_v7, 4  ;;  %v3114_v31 = vpop.f32.mrf.mxu0 }
 0x57e   : > { %14052 = vst [vmem:[#allocation117_spill] sm:$0xff] %v10283_v18  ;;  %v3191_v5 = vpop.f32.mrf.mxu1  ;;  %v3338_v61 = vpop.f32.mrf.mxu2  ;;  %v3573_v50 = vrot.slane %v10283_v18, 1  ;;  %v10289_v15 = vrot.slane %v10283_v18, 4 }
 0x57f   : > { %v3192_v41 = vadd.f32 %v3191_v5, %v3103_v25  ;;  %v3339_v43 = vadd.f32 %v10268_v26, %v3338_v61 }
 0x580   : > { %v3576_v51 = vsel %vm525_vm1, %v3573_v50, %v13337_v6  ;;  %v3574_v46 = vsel %vm525_vm1, %v3572_v24, %v3573_v50  ;;  %v5675_v16 = vsel %vm858_vm4, %v10289_v15, %v5674_v63  ;;  %v10306_v9 = vsel %vm858_vm4, %v13355_v4, %v10289_v15 }
 0x581   : > { %v3225_v2 = vmax.f32 %v3192_v41, 0.0  ;;  %3634 = vrot.lane.b32.xlu0 %v3576_v51, %s6860_s23  ;;  %3632 = vrot.lane.b32.xlu2 %v3574_v46, %s6860_s23  ;;  %v3406_v14 = vmax.f32 %v3339_v43, 0.0  ;;  %5723 = vst.msk [vmem:[#allocation2 + $0x68] sm:$0xff] %vm3968_vm11, %v5675_v16  ;;  %v3115_v50 = vadd.f32 %v10156_v55, %v3114_v31 }
 0x582   : > { %5722 = vst.msk [vmem:[#allocation2 + $0x30] sm:$0xff] %vm3968_vm11, %v10306_v9 }
 0x583   : > { %6505 = vmatmul.msk.f32.gmra.mxu2 %vm3242_vm10, %v3225_v2  ;;  %v3429_v12 = vperm.slane %v3406_v14, 0  ;;  %v3479_v21 = vrot.slane %v3406_v14, 4 }
 0x585   : > { %v10315_v59 = vsel %vm858_vm4, %v3429_v12, %v3479_v21 }
 0x586   : > { %v3194_v27 = vpop.f32.mrf.mxu1  ;;  %v3341_v29 = vpop.f32.mrf.mxu2  ;;  %14053 = vst [vmem:[#allocation77_spill] sm:$0xff] %v10315_v59  ;;  %v3577_v13 = vrot.slane %v10315_v59, 1  ;;  %v13353_v34 = vrot.slane %v10315_v59, 4 }
 0x587   : > { %v3195_v49 = vadd.f32 %v3194_v27, %v3106_v22  ;;  %v3342_v38 = vadd.f32 %v10268_v26, %v3341_v29 }
 0x589   : > { %v3226_v17 = vmax.f32 %v3195_v49, 0.0  ;;  %v3407_v35 = vmax.f32 %v3342_v38, 0.0 }
 0x58b   : > { %v10317_v3 = vperm.slane %v3407_v35, 3  ;;  %v3480_v1 = vrot.slane %v3407_v35, 4  ;;  %6506 = vmatmul.msk.f32.gmra.mxu2 %vm3242_vm10, %v3226_v17 }
 0x58d   : > { %14054 = vst [vmem:[#allocation87_spill] sm:$0xff] %v10317_v3  ;;  %v10322_v23 = vsel %vm858_vm4, %v3479_v21, %v3480_v1  ;;  %v13338_v60 = vrot.slane %v10317_v3, 1  ;;  %v5676_v45 = vrot.slane %v10317_v3, 4 }
 0x58e   : > { %14055 = vst [vmem:[#allocation92_spill] sm:$0xff] %v10322_v23  ;;  %v3197_v42 = vpop.f32.mrf.mxu1  ;;  %v3344_v36 = vpop.f32.mrf.mxu2  ;;  %v3578_v53 = vrot.slane %v10322_v23, 1  ;;  %v10328_v54 = vrot.slane %v10322_v23, 4 }
 0x58f   : > { %v3198_v0 = vadd.f32 %v3197_v42, %v3109_v58  ;;  %v3345_v10 = vadd.f32 %v10268_v26, %v3344_v36 }
 0x590   : > { %v3579_v57 = vsel %vm525_vm1, %v3577_v13, %v3578_v53  ;;  %v3581_v19 = vsel %vm525_vm1, %v3578_v53, %v13338_v60  ;;  %v5677_v47 = vsel %vm858_vm4, %v10328_v54, %v5676_v45  ;;  %v10345_v37 = vsel %vm858_vm4, %v13353_v34, %v10328_v54 }
 0x591   : > { %v3227_v40 = vmax.f32 %v3198_v0, 0.0  ;;  %3636 = vrot.lane.b32.xlu1 %v3579_v57, %s6860_s23  ;;  %3638 = vrot.lane.b32.xlu2 %v3581_v19, %s6860_s23  ;;  %v3408_v28 = vmax.f32 %v3345_v10, 0.0  ;;  %5725 = vst.msk [vmem:[#allocation2 + $0xd8] sm:$0xff] %vm3968_vm11, %v5677_v47 }
 0x592   : > { %5724 = vst.msk [vmem:[#allocation2 + $0xa0] sm:$0xff] %vm3968_vm11, %v10345_v37 }
 0x593   : > { %6507 = vmatmul.msk.f32.gmra.mxu2 %vm3242_vm10, %v3227_v40  ;;  %v3430_v33 = vperm.slane %v3408_v28, 0  ;;  %v3482_v48 = vrot.slane %v3408_v28, 4 }
 0x595   : > { %v10354_v25 = vsel %vm858_vm4, %v3430_v33, %v3482_v48 }
 0x596   : > { %v3200_v44 = vpop.f32.mrf.mxu1  ;;  %v3347_v56 = vpop.f32.mrf.mxu2  ;;  %v3582_v46 = vrot.slane %v10354_v25, 1  ;;  %v13352_v27 = vrot.slane %v10354_v25, 4 }
 0x597   : > { %v3201_v39 = vadd.f32 %v3200_v44, %v3112_v11  ;;  %v3348_v62 = vadd.f32 %v10268_v26, %v3347_v56 }
 0x599   : > { %v3228_v32 = vmax.f32 %v3201_v39, 0.0  ;;  %v3409_v30 = vmax.f32 %v3348_v62, 0.0 }
 0x59b   : > { %v10356_v5 = vperm.slane %v3409_v30, 3  ;;  %v3483_v61 = vrot.slane %v3409_v30, 4  ;;  %6508 = vmatmul.msk.f32.gmra.mxu2 %vm3242_vm10, %v3228_v32 }
 0x59d   : > { %14056 = vst [vmem:[#allocation135_spill] sm:$0xff] %v10356_v5  ;;  %v10361_v24 = vsel %vm858_vm4, %v3482_v48, %v3483_v61  ;;  %v13339_v41 = vrot.slane %v10356_v5, 1  ;;  %v5678_v22 = vrot.slane %v10356_v5, 4 }
 0x59e   : > { %v3203_v43 = vpop.f32.mrf.mxu1  ;;  %v3350_v63 = vpop.f32.mrf.mxu2  ;;  %v3583_v51 = vrot.slane %v10361_v24, 1  ;;  %v10367_v2 = vrot.slane %v10361_v24, 4 }
 0x59f   : > { %v3204_v16 = vadd.f32 %v3203_v43, %v3115_v50  ;;  %v3351_v14 = vadd.f32 %v10268_v26, %v3350_v63 }
 0x5a0   : > { %v3586_v55 = vsel %vm525_vm1, %v3583_v51, %v13339_v41  ;;  %v3584_v52 = vsel %vm525_vm1, %v3582_v46, %v3583_v51  ;;  %v5679_v12 = vsel %vm858_vm4, %v10367_v2, %v5678_v22  ;;  %v10384_v21 = vsel %vm858_vm4, %v13352_v27, %v10367_v2 }
 0x5a1   : > { %v3229_v29 = vmax.f32 %v3204_v16, 0.0  ;;  %3642 = vrot.lane.b32.xlu1 %v3586_v55, %s6860_s23  ;;  %3640 = vrot.lane.b32.xlu0 %v3584_v52, %s6860_s23  ;;  %v3410_v49 = vmax.f32 %v3351_v14, 0.0  ;;  %5727 = vst.msk [vmem:[#allocation2 + $0x148] sm:$0xff] %vm3968_vm11, %v5679_v12 }
 0x5a2   : > { %5726 = vst.msk [vmem:[#allocation2 + $0x110] sm:$0xff] %vm3968_vm11, %v10384_v21 }
 0x5a3   : > { %6509 = vmatmul.msk.f32.gmra.mxu2 %vm3242_vm10, %v3229_v29  ;;  %v3431_v17 = vperm.slane %v3410_v49, 0  ;;  %v3485_v35 = vrot.slane %v3410_v49, 4 }
 0x5a5   : > { %v10392_v42 = vsel %vm858_vm4, %v3431_v17, %v3485_v35 }
 0x5a6   : > { %v3353_v38 = vpop.f32.mrf.mxu2  ;;  %v3587_v45 = vrot.slane %v10392_v42, 1  ;;  %v13351_v11 = vrot.slane %v10392_v42, 4 }
 0x5a7   : > { %v3354_v1 = vadd.f32 %v10268_v26, %v3353_v38 }
 0x5a9   : > { %v3411_v58 = vmax.f32 %v3354_v1, 0.0 }
 0x5ab   : > { %v10394_v36 = vperm.slane %v3411_v58, 3  ;;  %v3486_v13 = vrot.slane %v3411_v58, 4 }
 0x5ad   : > { %14057 = vst [vmem:[#allocation82_spill] sm:$0xff] %v10394_v36  ;;  %v10397_v53 = vsel %vm858_vm4, %v3485_v35, %v3486_v13  ;;  %v13341_v0 = vrot.slane %v10394_v36, 1  ;;  %v5680_v40 = vrot.slane %v10394_v36, 4 }
 0x5ae   : > { %14058 = vst [vmem:[#allocation89_spill] sm:$0xff] %v10397_v53  ;;  %v3356_v10 = vpop.f32.mrf.mxu2  ;;  %v3588_v20 = vrot.slane %v10397_v53, 1  ;;  %v10403_v57 = vrot.slane %v10397_v53, 4 }
 0x5af   : > { %v3357_v19 = vadd.f32 %v10268_v26, %v3356_v10 }
 0x5b0   : > { %v3589_v47 = vsel %vm525_vm1, %v3587_v45, %v3588_v20  ;;  %v3591_v28 = vsel %vm525_vm1, %v3588_v20, %v13341_v0  ;;  %v5681_v44 = vsel %vm858_vm4, %v10403_v57, %v5680_v40  ;;  %v10421_v56 = vsel %vm858_vm4, %v13351_v11, %v10403_v57 }
 0x5b1   : > { %3644 = vrot.lane.b32.xlu2 %v3589_v47, %s6860_s23  ;;  %3646 = vrot.lane.b32.xlu0 %v3591_v28, %s6860_s23  ;;  %5729 = vst.msk [vmem:[#allocation2 + $0x1b8] sm:$0xff] %vm3968_vm11, %v5681_v44  ;;  %v3412_v33 = vmax.f32 %v3357_v19, 0.0 }
 0x5b2   : > { %5728 = vst.msk [vmem:[#allocation2 + $0x180] sm:$0xff] %vm3968_vm11, %v10421_v56 }
 0x5b3   : > { %v3432_v39 = vperm.slane %v3412_v33, 0  ;;  %v3488_v62 = vrot.slane %v3412_v33, 4 }
 0x5b5   : > { %v10427_v31 = vsel %vm858_vm4, %v3432_v39, %v3488_v62 }
 0x5b6   : > { %v3359_v48 = vpop.f32.mrf.mxu2  ;;  %v3592_v16 = vrot.slane %v10427_v31, 1  ;;  %v13349_v12 = vrot.slane %v10427_v31, 4 }
 0x5b7   : > { %v3360_v32 = vadd.f32 %v10268_v26, %v3359_v48 }
 0x5b9   : > { %v3413_v30 = vmax.f32 %v3360_v32, 0.0 }
 0x5bb   : > { %v10429_v61 = vperm.slane %v3413_v30, 3  ;;  %v3489_v50 = vrot.slane %v3413_v30, 4 }
 0x5bd   : > { %14059 = vst [vmem:[#allocation106_spill] sm:$0xff] %v10429_v61  ;;  %v10432_v43 = vsel %vm858_vm4, %v3488_v62, %v3489_v50  ;;  %v13344_v63 = vrot.slane %v10429_v61, 1  ;;  %v5682_v55 = vrot.slane %v10429_v61, 4 }
 0x5be   : > { %v3362_v51 = vpop.f32.mrf.mxu2  ;;  %v3593_v46 = vrot.slane %v10432_v43, 1  ;;  %v10438_v14 = vrot.slane %v10432_v43, 4 }
 0x5bf   : > { %v3363_v22 = vadd.f32 %v10268_v26, %v3362_v51 }
 0x5c0   : > { %v3596_v52 = vsel %vm525_vm1, %v3593_v46, %v13344_v63  ;;  %v3594_v29 = vsel %vm525_vm1, %v3592_v16, %v3593_v46  ;;  %v5683_v49 = vsel %vm858_vm4, %v10438_v14, %v5682_v55  ;;  %v10456_v38 = vsel %vm858_vm4, %v13349_v12, %v10438_v14 }
 0x5c1   : > { %3650 = vrot.lane.b32.xlu2 %v3596_v52, %s6860_s23  ;;  %3648 = vrot.lane.b32.xlu1 %v3594_v29, %s6860_s23  ;;  %5731 = vst.msk [vmem:[#allocation2 + $0x228] sm:$0xff] %vm3968_vm11, %v5683_v49  ;;  %v3414_v17 = vmax.f32 %v3363_v22, 0.0 }
 0x5c2   : > { %5730 = vst.msk [vmem:[#allocation2 + $0x1f0] sm:$0xff] %vm3968_vm11, %v10456_v38 }
 0x5c3   : > { %v3433_v1 = vperm.slane %v3414_v17, 0  ;;  %v3491_v58 = vrot.slane %v3414_v17, 4 }
 0x5c5   : > { %v10462_v45 = vsel %vm858_vm4, %v3433_v1, %v3491_v58 }
 0x5c6   : > { %v3365_v35 = vpop.f32.mrf.mxu2  ;;  %v3597_v33 = vrot.slane %v10462_v45, 1  ;;  %v13348_v50 = vrot.slane %v10462_v45, 4 }
 0x5c7   : > { %v3366_v13 = vadd.f32 %v10268_v26, %v3365_v35 }
 0x5c9   : > { %v3415_v10 = vmax.f32 %v3366_v13, 0.0 }
 0x5cb   : > { %v10464_v20 = vperm.slane %v3415_v10, 3  ;;  %v3492_v19 = vrot.slane %v3415_v10, 4 }
 0x5cd   : > { %14060 = vst [vmem:[#allocation111_spill] sm:$0xff] %v10464_v20  ;;  %v10467_v40 = vsel %vm858_vm4, %v3491_v58, %v3492_v19  ;;  %v13342_v47 = vrot.slane %v10464_v20, 1  ;;  %v5684_v62 = vrot.slane %v10464_v20, 4 }
 0x5ce   : > { %v3368_v28 = vpop.f32.mrf.mxu2  ;;  %v3598_v44 = vrot.slane %v10467_v40, 1  ;;  %v10473_v48 = vrot.slane %v10467_v40, 4 }
 0x5cf   : > { %v3369_v39 = vadd.f32 %v10268_v26, %v3368_v28 }
 0x5d0   : > { %v3601_v32 = vsel %vm525_vm1, %v3598_v44, %v13342_v47  ;;  %v3599_v30 = vsel %vm525_vm1, %v3597_v33, %v3598_v44  ;;  %v5685_v51 = vsel %vm858_vm4, %v10473_v48, %v5684_v62  ;;  %v10491_v46 = vsel %vm858_vm4, %v13348_v50, %v10473_v48 }
 0x5d1   : > { %3654 = vrot.lane.b32.xlu1 %v3601_v32, %s6860_s23  ;;  %3652 = vrot.lane.b32.xlu0 %v3599_v30, %s6860_s23  ;;  %5733 = vst.msk [vmem:[#allocation2 + $0x298] sm:$0xff] %vm3968_vm11, %v5685_v51  ;;  %v3416_v16 = vmax.f32 %v3369_v39, 0.0 }
 0x5d2   : > { %14061 = vst [vmem:[#allocation138_spill] sm:$0xff] %v10491_v46 }
 0x5d3   : > { %5732 = vst.msk [vmem:[#allocation2 + $0x260] sm:$0xff] %vm3968_vm11, %v10491_v46  ;;  %v3434_v55 = vperm.slane %v3416_v16, 0  ;;  %v3494_v52 = vrot.slane %v3416_v16, 4 }
 0x5d5   : > { %v10497_v17 = vsel %vm858_vm4, %v3434_v55, %v3494_v52 }
 0x5d6   : > { %v3371_v22 = vpop.f32.mrf.mxu2  ;;  %14062 = vst [vmem:[#allocation85_spill] sm:$0xff] %v10497_v17  ;;  %v3602_v19 = vrot.slane %v10497_v17, 1  ;;  %v13346_v30 = vrot.slane %v10497_v17, 4 }
 0x5d7   : > { %v3372_v29 = vadd.f32 %v10268_v26, %v3371_v22 }
 0x5d9   : > { %v3417_v49 = vmax.f32 %v3372_v29, 0.0 }
 0x5db   : > { %v10499_v35 = vperm.slane %v3417_v49, 3  ;;  %v3495_v1 = vrot.slane %v3417_v49, 4 }
 0x5dd   : > { %14063 = vst [vmem:[#allocation108_spill] sm:$0xff] %v10499_v35  ;;  %v10502_v58 = vsel %vm858_vm4, %v3494_v52, %v3495_v1  ;;  %v13340_v13 = vrot.slane %v10499_v35, 1  ;;  %v5686_v39 = vrot.slane %v10499_v35, 4 }
 0x5de   : > { %14064 = vst [vmem:[#allocation130_spill] sm:$0xff] %v10502_v58  ;;  %v3374_v10 = vpop.f32.mrf.mxu2  ;;  %v3603_v28 = vrot.slane %v10502_v58, 1  ;;  %v10508_v44 = vrot.slane %v10502_v58, 4 }
 0x5df   : > { %v3375_v33 = vadd.f32 %v10268_v26, %v3374_v10 }
 0x5e0   : > { %14065 = vst [vmem:[#allocation88_spill] sm:$0xff] %v10508_v44  ;;  %v3604_v62 = vsel %vm525_vm1, %v3602_v19, %v3603_v28  ;;  %v3606_v32 = vsel %vm525_vm1, %v3603_v28, %v13340_v13  ;;  %v5687_v51 = vsel %vm858_vm4, %v10508_v44, %v5686_v39  ;;  %v10526_v16 = vsel %vm858_vm4, %v13346_v30, %v10508_v44 }
 0x5e1   : > { %3656 = vrot.lane.b32.xlu2 %v3604_v62, %s6860_s23  ;;  %3658 = vrot.lane.b32.xlu0 %v3606_v32, %s6860_s23  ;;  %5735 = vst.msk [vmem:[#allocation2 + $0x308] sm:$0xff] %vm3968_vm11, %v5687_v51  ;;  %v3418_v22 = vmax.f32 %v3375_v33, 0.0 }
 0x5e2   : > { %14066 = vst [vmem:[#allocation95_spill] sm:$0xff] %v10526_v16 }
 0x5e3   : > { %5734 = vst.msk [vmem:[#allocation2 + $0x2d0] sm:$0xff] %vm3968_vm11, %v10526_v16  ;;  %v3435_v52 = vperm.slane %v3418_v22, 0  ;;  %v3497_v29 = vrot.slane %v3418_v22, 4 }
 0x5e5   : > { %v10532_v10 = vsel %vm858_vm4, %v3435_v52, %v3497_v29 }
 0x5e6   : > { %v3377_v55 = vpop.f32.mrf.mxu2  ;;  %14067 = vst [vmem:[#allocation127_spill] sm:$0xff] %v10532_v10  ;;  %v3607_v51 = vrot.slane %v10532_v10, 1  ;;  %v3739_v16 = vrot.slane %v10532_v10, 2 }
 0x5e7   : > { %v3378_v49 = vadd.f32 %v10268_v26, %v3377_v55 }
 0x5e9   : > { %v3419_v1 = vmax.f32 %v3378_v49, 0.0 }
 0x5eb   : > { %v10534_v19 = vperm.slane %v3419_v1, 3  ;;  %v3498_v28 = vrot.slane %v3419_v1, 4  ;;  %v13345_v1 = vrot.slane %v10532_v10, 4 }
 0x5ed   : > { %14068 = vst [vmem:[#allocation122_spill] sm:$0xff] %v10534_v19  ;;  %v10537_v39 = vsel %vm858_vm4, %v3497_v29, %v3498_v28  ;;  %v13336_v33 = vrot.slane %v10534_v19, 1  ;;  %v5688_v52 = vrot.slane %v10534_v19, 4 }
 0x5ee   : > { %14069 = vst [vmem:[#allocation107_spill] sm:$0xff] %v10537_v39  ;;  %v3380_v62 = vpop.f32.mrf.mxu2  ;;  %v3608_v32 = vrot.slane %v10537_v39, 1  ;;  %v10543_v22 = vrot.slane %v10537_v39, 4 }
 0x5ef   : > { %v3381_v55 = vadd.f32 %v10268_v26, %v3380_v62 }
 0x5f0   : > { %14070 = vst [vmem:[#allocation116_spill] sm:$0xff] %v10543_v22  ;;  %v3611_v49 = vsel %vm525_vm1, %v3608_v32, %v13336_v33  ;;  %v3609_v29 = vsel %vm525_vm1, %v3607_v51, %v3608_v32  ;;  %v5689_v28 = vsel %vm858_vm4, %v10543_v22, %v5688_v52  ;;  %v10561_v62 = vsel %vm858_vm4, %v13345_v1, %v10543_v22 }
 0x5f1   : > { %3662 = vrot.lane.b32.xlu2 %v3611_v49, %s6860_s23  ;;  %3660 = vrot.lane.b32.xlu1 %v3609_v29, %s6860_s23  ;;  %5737 = vst.msk [vmem:[#allocation2 + $0x378] sm:$0xff] %vm3968_vm11, %v5689_v28  ;;  %v3420_v33 = vmax.f32 %v3381_v55, 0.0  ;;  %v13378_v22 = vrot.slane %v10499_v35, 2 }
 0x5f2   : > { %14071 = vst [vmem:[#allocation137_spill] sm:$0xff] %v10561_v62 }
 0x5f3   : > { %5736 = vst.msk [vmem:[#allocation2 + $0x340] sm:$0xff] %vm3968_vm11, %v10561_v62  ;;  %v3436_v51 = vperm.slane %v3420_v33, 0  ;;  %v3500_v49 = vrot.slane %v3420_v33, 4 }
 0x5f5   : > { %v10567_v52 = vsel %vm858_vm4, %v3436_v51, %v3500_v49 }
 0x5f6   : > { %v3383_v32 = vpop.f32.mrf.mxu2  ;;  %14072 = vst [vmem:[#allocation125_spill] sm:$0xff] %v10567_v52  ;;  %v3612_v47 = vrot.slane %v10567_v52, 1 }
 0x5f7   : > { %v3384_v29 = vadd.f32 %v10268_v26, %v3383_v32 }
 0x5f9   : > { %v3421_v6 = vmax.f32 %v3384_v29, 0.0 }
 0x5fb   : > { %v10569_v28 = vperm.slane %v3421_v6, 3  ;;  %v3501_v60 = vrot.slane %v3421_v6, 4 }
 0x5fd   : > { %14073 = vst [vmem:[#allocation126_spill] sm:$0xff] %v10569_v28  ;;  %v10572_v41 = vsel %vm858_vm4, %v3500_v49, %v3501_v60  ;;  %v13343_v55 = vrot.slane %v10569_v28, 1  ;;  %v5690_v51 = vrot.slane %v10569_v28, 4  ;;  %v13347_v49 = vrot.slane %v10567_v52, 4 }
 0x5fe   : > { %14074 = vst [vmem:[#allocation140_spill] sm:$0xff] %v10572_v41  ;;  %v3386_v13 = vpop.f32.mrf.mxu2  ;;  %v3613_v0 = vrot.slane %v10572_v41, 1  ;;  %v10578_v33 = vrot.slane %v10572_v41, 4 }
 0x5ff   : > { %v3387_v32 = vadd.f32 %v10268_v26, %v3386_v13 }
 0x600   : > { %14075 = vst [vmem:[#allocation141_spill] sm:$0xff] %v10578_v33  ;;  %v3616_v6 = vsel %vm525_vm1, %v3613_v0, %v13343_v55  ;;  %v3614_v60 = vsel %vm525_vm1, %v3612_v47, %v3613_v0  ;;  %v5691_v29 = vsel %vm858_vm4, %v10578_v33, %v5690_v51  ;;  %v10596_v13 = vsel %vm858_vm4, %v13347_v49, %v10578_v33 }
 0x601   : > { %3666 = vrot.lane.b32.xlu1 %v3616_v6, %s6860_s23  ;;  %3664 = vrot.lane.b32.xlu0 %v3614_v60, %s6860_s23  ;;  %5739 = vst.msk [vmem:[#allocation2 + $0x3e8] sm:$0xff] %vm3968_vm11, %v5691_v29  ;;  %v3422_v55 = vmax.f32 %v3387_v32, 0.0  ;;  %v13365_v33 = vrot.slane %v10317_v3, 2 }
 0x602   : > { %14076 = vst [vmem:[#allocation62_spill] sm:$0xff] %v10596_v13 }
 0x603   : > { %5738 = vst.msk [vmem:[#allocation2 + $0x3b0] sm:$0xff] %vm3968_vm11, %v10596_v13  ;;  %v3437_v47 = vperm.slane %v3422_v55, 0  ;;  %v3503_v6 = vrot.slane %v3422_v55, 4 }
 0x605   : > { %v10602_v51 = vsel %vm858_vm4, %v3437_v47, %v3503_v6 }
 0x606   : > { %v3389_v0 = vpop.f32.mrf.mxu2  ;;  %14077 = vst [vmem:[#allocation104_spill] sm:$0xff] %v10602_v51  ;;  %v3617_v50 = vrot.slane %v10602_v51, 1 }
 0x607   : > { %v3390_v60 = vadd.f32 %v10268_v26, %v3389_v0 }
 0x609   : > { %v3423_v63 = vmax.f32 %v3390_v60, 0.0 }
 0x60b   : > { %v10604_v29 = vperm.slane %v3423_v63, 3  ;;  %v3504_v1 = vrot.slane %v3423_v63, 4 }
 0x60d   : > { %14078 = vst [vmem:[#allocation144_spill] sm:$0xff] %v10604_v29  ;;  %v10607_v30 = vsel %vm858_vm4, %v3503_v6, %v3504_v1  ;;  %v13350_v32 = vrot.slane %v10604_v29, 1  ;;  %v5692_v47 = vrot.slane %v10604_v29, 4  ;;  %v13354_v1 = vrot.slane %v10602_v51, 4 }
 0x60e   : > { %14079 = vst [vmem:[#allocation76_spill] sm:$0xff] %v10607_v30  ;;  %v3392_v49 = vpop.f32.mrf.mxu2  ;;  %v3618_v12 = vrot.slane %v10607_v30, 1  ;;  %v10613_v55 = vrot.slane %v10607_v30, 4  ;;  %v13383_v44 = vrot.slane %v10604_v29, 2 }
 0x60f   : > { %v3393_v0 = vadd.f32 %v10268_v26, %v3392_v49 }
 0x610   : > { %14080 = vst [vmem:[#allocation123_spill] sm:$0xff] %v10613_v55  ;;  %v3619_v60 = vsel %vm525_vm1, %v3617_v50, %v3618_v12  ;;  %v3621_v63 = vsel %vm525_vm1, %v3618_v12, %v13350_v32  ;;  %v5693_v6 = vsel %vm858_vm4, %v10613_v55, %v5692_v47  ;;  %v10631_v50 = vsel %vm858_vm4, %v13354_v1, %v10613_v55 }
 0x611   : > { %3668 = vrot.lane.b32.xlu2 %v3619_v60, %s6860_s23  ;;  %3670 = vrot.lane.b32.xlu0 %v3621_v63, %s6860_s23  ;;  %5741 = vst.msk [vmem:[#allocation2 + $0x458] sm:$0xff] %vm3968_vm11, %v5693_v6  ;;  %v3424_v49 = vmax.f32 %v3393_v0, 0.0 }
 0x612   : > { %14081 = vst [vmem:[#allocation5_spill] sm:$0xff] %v10631_v50 }
 0x613   : > { %5740 = vst.msk [vmem:[#allocation2 + $0x420] sm:$0xff] %vm3968_vm11, %v10631_v50  ;;  %v3438_v32 = vperm.slane %v3424_v49, 0  ;;  %v3506_v60 = vrot.slane %v3424_v49, 4 }
 0x615   : > { %v10637_v47 = vsel %vm858_vm4, %v3438_v32, %v3506_v60 }
 0x616   : > { %v3395_v12 = vpop.f32.mrf.mxu2  ;;  %v3622_v50 = vrot.slane %v10637_v47, 1  ;;  %v3754_v46 = vrot.slane %v10637_v47, 2 }
 0x617   : > { %v3396_v63 = vadd.f32 %v10268_v26, %v3395_v12 }
 0x619   : > { %v3425_v11 = vmax.f32 %v3396_v63, 0.0 }
 0x61b   : > { %v10639_v6 = vperm.slane %v3425_v11, 3  ;;  %v3507_v27 = vrot.slane %v3425_v11, 4 }
 0x61d   : > { %14082 = vst [vmem:[#allocation3_spill] sm:$0xff] %v10639_v6  ;;  %v10642_v34 = vsel %vm858_vm4, %v3506_v60, %v3507_v27  ;;  %v13357_v0 = vrot.slane %v10639_v6, 1  ;;  %v5694_v32 = vrot.slane %v10639_v6, 4  ;;  %v13360_v60 = vrot.slane %v10637_v47, 4 }
 0x61e   : > { %14083 = vst [vmem:[#allocation8_spill] sm:$0xff] %v10642_v34  ;;  %v3398_v1 = vpop.f32.mrf.mxu2  ;;  %v3623_v4 = vrot.slane %v10642_v34, 1  ;;  %v10648_v49 = vrot.slane %v10642_v34, 4 }
 0x61f   : > { %v3399_v12 = vadd.f32 %v10268_v26, %v3398_v1 }
 0x620   : > { %14084 = vst [vmem:[#allocation4_spill] sm:$0xff] %v10648_v49  ;;  %v3626_v11 = vsel %vm525_vm1, %v3623_v4, %v13357_v0  ;;  %v3624_v27 = vsel %vm525_vm1, %v3622_v50, %v3623_v4  ;;  %v5695_v63 = vsel %vm858_vm4, %v10648_v49, %v5694_v32  ;;  %v10666_v1 = vsel %vm858_vm4, %v13360_v60, %v10648_v49 }
 0x621   : > { %3674 = vrot.lane.b32.xlu2 %v3626_v11, %s6860_s23  ;;  %3672 = vrot.lane.b32.xlu1 %v3624_v27, %s6860_s23  ;;  %5743 = vst.msk [vmem:[#allocation2 + $0x4c8] sm:$0xff] %vm3968_vm11, %v5695_v63  ;;  %v3426_v0 = vmax.f32 %v3399_v12, 0.0  ;;  %v3705_v4 = vrot.slane %v10283_v18, 2  ;;  %v3704_v11 = vrot.slane %v10276_v8, 2  ;;  %v3710_v49 = vrot.slane %v10322_v23, 2 }
 0x622   : > { %14085 = vst [vmem:[#allocation93_spill] sm:$0xff] %v10666_v1 }
 0x623   : > { %5742 = vst.msk [vmem:[#allocation2 + $0x490] sm:$0xff] %vm3968_vm11, %v10666_v1  ;;  %v3439_v27 = vperm.slane %v3426_v0, 0  ;;  %v3509_v55 = vrot.slane %v3426_v0, 4  ;;  %v3706_v63 = vsel %vm636_vm2, %v3704_v11, %v3705_v4 }
 0x625   : > { %v10676_v12 = vsel %vm858_vm4, %v3439_v27, %v3509_v55 }
 0x626   : > { %v3401_v50 = vpop.f32.mrf.mxu2  ;;  %v3627_v11 = vrot.slane %v10676_v12, 1  ;;  %v13368_v62 = vrot.slane %v10676_v12, 4 }
 0x627   : > { %v3402_v32 = vadd.f32 %v10268_v26, %v3401_v50 }
 0x629   : > { %v3427_v13 = vmax.f32 %v3402_v32, 0.0  ;;  %3764 = vrot.lane.b32.xlu2 %v3706_v63, %s6861_s26 }
 0x62b   : > { %v10678_v60 = vperm.slane %v3427_v13, 3  ;;  %v3510_v1 = vrot.slane %v3427_v13, 4  ;;  %v3713_v13 = vsel %vm636_vm2, %v3710_v49, %v13365_v33  ;;  %v3720_v33 = vrot.slane %v10397_v53, 2 }
 0x62d   : > { %14086 = vst [vmem:[#allocation128_spill] sm:$0xff] %v10678_v60  ;;  %v10683_v0 = vsel %vm858_vm4, %v3509_v55, %v3510_v1  ;;  %v13366_v26 = vrot.slane %v10678_v60, 1  ;;  %v5696_v27 = vrot.slane %v10678_v60, 4 }
 0x62e   : > { %v3628_v50 = vrot.slane %v10683_v0, 1  ;;  %v10689_v32 = vrot.slane %v10683_v0, 4 }
 0x630   : > { %14087 = vst [vmem:[#allocation24_spill] sm:$0xff] %v10689_v32  ;;  %v3631_v55 = vsel %vm525_vm1, %v3628_v50, %v13366_v26  ;;  %v3629_v1 = vsel %vm525_vm1, %v3627_v11, %v3628_v50  ;;  %v5697_v63 = vsel %vm858_vm4, %v10689_v32, %v5696_v27  ;;  %v10713_v50 = vsel %vm858_vm4, %v13368_v62, %v10689_v32 }
 0x631   : > { %3770 = vrot.lane.b32.xlu2 %v3713_v13, %s6861_s26  ;;  %3678 = vrot.lane.b32.xlu1 %v3631_v55, %s6860_s23  ;;  %5745 = vst.msk [vmem:[#allocation2 + $0x538] sm:$0xff] %vm3968_vm11, %v5697_v63  ;;  %v13367_v11 = vrot.slane %v10278_v7, 2  ;;  %v3719_v27 = vrot.slane %v10392_v42, 2  ;;  %v3709_v13 = vrot.slane %v10315_v59, 2  ;;  %v3735_v62 = vrot.slane %v10502_v58, 2 }
 0x632   : > { %3676 = vrot.lane.b32.xlu0 %v3629_v1, %s6860_s23  ;;  %5747 = vst.msk [vmem:[#allocation2 + $0x5a8] sm:$0xff] %vm3968_vm11, %v5697_v63  ;;  %v3724_v32 = vrot.slane %v10427_v31, 2 }
 0x633   : > { %5749 = vst.msk [vmem:[#allocation2 + $0x618] sm:$0xff] %vm3968_vm11, %v5697_v63  ;;  %v3721_v55 = vsel %vm636_vm2, %v3719_v27, %v3720_v33  ;;  %v3711_v1 = vsel %vm636_vm2, %v3709_v13, %v3710_v49  ;;  %v3708_v26 = vsel %vm636_vm2, %v3705_v4, %v13367_v11  ;;  %v3725_v49 = vrot.slane %v10432_v43, 2  ;;  %v10753_v11 = vpop.permute.xlu2 %3632 }
 0x634   : > { %14088 = vst [vmem:[#allocation112_spill] sm:$0xff] %v10713_v50  ;;  %v3715_v27 = vrot.slane %v10361_v24, 2  ;;  %v13372_v13 = vrot.slane %v10356_v5, 2  ;;  %v3714_v4 = vrot.slane %v10354_v25, 2 }
 0x635   : > { %5751 = vst.msk [vmem:[#allocation2 + $0x688] sm:$0xff] %vm3968_vm11, %v5697_v63 }
 0x636   : > { %5753 = vst.msk [vmem:[#allocation2 + $0x6f8] sm:$0xff] %vm3968_vm11, %v5697_v63  ;;  %v13370_v63 = vrot.slane %v10429_v61, 2 }
 0x637   : > { %5744 = vst.msk [vmem:[#allocation2 + $0x500] sm:$0xff] %vm3968_vm11, %v10713_v50 }
 0x638   : > { %5746 = vst.msk [vmem:[#allocation2 + $0x570] sm:$0xff] %vm3968_vm11, %v10713_v50 }
 0x639   : > { %3776 = vrot.lane.b32.xlu2 %v3721_v55, %s6861_s26  ;;  %3768 = vrot.lane.b32.xlu1 %v3711_v1, %s6861_s26  ;;  %5748 = vst.msk [vmem:[#allocation2 + $0x5e0] sm:$0xff] %vm3968_vm11, %v10713_v50  ;;  %v3718_v55 = vsel %vm636_vm2, %v3715_v27, %v13372_v13  ;;  %v3716_v1 = vsel %vm636_vm2, %v3714_v4, %v3715_v27 }
 0x63a   : > { %3766 = vrot.lane.b32.xlu0 %v3708_v26, %s6861_s26  ;;  %5750 = vst.msk [vmem:[#allocation2 + $0x650] sm:$0xff] %vm3968_vm11, %v10713_v50  ;;  %v3728_v26 = vsel %vm636_vm2, %v3725_v49, %v13370_v63  ;;  %v3734_v63 = vrot.slane %v10497_v17, 2 }
 0x63b   : > { %5752 = vst.msk [vmem:[#allocation2 + $0x6c0] sm:$0xff] %vm3968_vm11, %v10713_v50  ;;  %v13373_v50 = vrot.slane %v10394_v36, 2  ;;  %v10767_v4 = vpop.permute.xlu2 %3638 }
 0x63c   : > { %v3736_v13 = vsel %vm636_vm2, %v3734_v63, %v3735_v62  ;;  %v3730_v63 = vrot.slane %v10467_v40, 2 }
 0x63d   : > { %v3723_v27 = vsel %vm636_vm2, %v3720_v33, %v13373_v50  ;;  %v3750_v50 = vrot.slane %v10607_v30, 2 }
 0x641   : > { %3782 = vrot.lane.b32.xlu2 %v3728_v26, %s6861_s26  ;;  %3774 = vrot.lane.b32.xlu1 %v3718_v55, %s6861_s26  ;;  %v3726_v26 = vsel %vm636_vm2, %v3724_v32, %v3725_v49  ;;  %v3740_v55 = vrot.slane %v10537_v39, 2  ;;  %v13377_v32 = vrot.slane %v10464_v20, 2  ;;  %v3729_v49 = vrot.slane %v10462_v45, 2 }
 0x642   : > { %3772 = vrot.lane.b32.xlu0 %v3716_v1, %s6861_s26  ;;  %v13375_v1 = vrot.slane %v10534_v19, 2 }
 0x643   : > { %v3733_v33 = vsel %vm636_vm2, %v3730_v63, %v13377_v32 }
 0x649   : > { %3788 = vrot.lane.b32.xlu2 %v3736_v13, %s6861_s26  ;;  %3780 = vrot.lane.b32.xlu1 %v3726_v26, %s6861_s26  ;;  %v3743_v13 = vsel %vm636_vm2, %v3740_v55, %v13375_v1  ;;  %v3731_v26 = vsel %vm636_vm2, %v3729_v49, %v3730_v63  ;;  %v3749_v1 = vrot.slane %v10602_v51, 2  ;;  %v3738_v63 = vsel %vm636_vm2, %v3735_v62, %v13378_v22 }
 0x64a   : > { %3778 = vrot.lane.b32.xlu0 %v3723_v27, %s6861_s26  ;;  %v10784_v27 = vpop.permute.xlu2 %3644  ;;  %v3837_v22 = vrot.slane %v10283_v18, 3 }
 0x64b   : > { %v3751_v32 = vsel %vm636_vm2, %v3749_v1, %v3750_v50  ;;  %v3745_v1 = vrot.slane %v10572_v41, 2 }
 0x651   : > { %3794 = vrot.lane.b32.xlu2 %v3743_v13, %s6861_s26  ;;  %3786 = vrot.lane.b32.xlu1 %v3733_v33, %s6861_s26  ;;  %v3741_v13 = vsel %vm636_vm2, %v3739_v16, %v3740_v55  ;;  %v3755_v33 = vrot.slane %v10642_v34, 2  ;;  %v13382_v16 = vrot.slane %v10569_v28, 2  ;;  %v3744_v55 = vrot.slane %v10567_v52, 2 }
 0x652   : > { %3784 = vrot.lane.b32.xlu0 %v3731_v26, %s6861_s26  ;;  %v10798_v49 = vpop.permute.xlu2 %3650  ;;  %v13380_v26 = vrot.slane %v10639_v6, 2 }
 0x653   : > { %v3748_v62 = vsel %vm636_vm2, %v3745_v1, %v13382_v16 }
 0x659   : > { %3800 = vrot.lane.b32.xlu2 %v3751_v32, %s6861_s26  ;;  %3792 = vrot.lane.b32.xlu1 %v3741_v13, %s6861_s26  ;;  %v3758_v32 = vsel %vm636_vm2, %v3755_v33, %v13380_v26  ;;  %v3746_v13 = vsel %vm636_vm2, %v3744_v55, %v3745_v1  ;;  %v3836_v26 = vrot.slane %v10276_v8, 3  ;;  %v3753_v1 = vsel %vm636_vm2, %v3750_v50, %v13383_v44  ;;  %v10829_v55 = vpop.permute.xlu1 %3636 }
 0x65a   : > { %3790 = vrot.lane.b32.xlu0 %v3738_v63, %s6861_s26  ;;  %v10815_v63 = vpop.permute.xlu2 %3656 }
 0x65b   : > { %v3838_v16 = vsel %vm14089_vm12, %v3836_v26, %v3837_v22  ;;  %v3842_v26 = vrot.slane %v10322_v23, 3  ;;  %vm14104_vm12 = vmmov %vm14099_vm0 }
 0x661   : > { %3806 = vrot.lane.b32.xlu2 %v3758_v32, %s6861_s26  ;;  %3798 = vrot.lane.b32.xlu1 %v3748_v62, %s6861_s26  ;;  %v3756_v32 = vsel %vm636_vm2, %v3754_v46, %v3755_v33  ;;  %v13386_v46 = vrot.slane %v10317_v3, 3  ;;  %v3760_v33 = vrot.slane %v10683_v0, 2  ;;  %v10850_v18 = vpop.permute.xlu1 %3642  ;;  %v13392_v3 = vrot.slane %v10278_v7, 3 }
 0x662   : > { %3796 = vrot.lane.b32.xlu0 %v3746_v13, %s6861_s26  ;;  %v10831_v62 = vpop.permute.xlu2 %3662  ;;  %v10833_v13 = vpop.permute.xlu0 %3634 }
 0x663   : > { %14090 = vst [vmem:[#allocation143_spill] sm:$0xff] %v10831_v62  ;;  %v3845_v50 = vsel %vm14092_vm13, %v3842_v26, %v13386_v46  ;;  %v3852_v46 = vrot.slane %v10397_v53, 3  ;;  %vm14107_vm13 = vmmov %vm14099_vm0 }
 0x664   : > { %14091 = vst [vmem:[#allocation131_spill] sm:$0xff] %v10833_v13 }
 0x669   : > { %3896 = vrot.lane.b32.xlu2 %v3838_v16, %s6862_s27  ;;  %3804 = vrot.lane.b32.xlu1 %v3756_v32, %s6861_s26  ;;  %v13389_v16 = vrot.slane %v10678_v60, 2  ;;  %v3759_v32 = vrot.slane %v10676_v12, 2 }
 0x66a   : > { %3802 = vrot.lane.b32.xlu0 %v3753_v1, %s6861_s26  ;;  %v10854_v62 = vpop.permute.xlu0 %3640 }
 0x66b   : > { %v3763_v1 = vsel %vm636_vm2, %v3760_v33, %v13389_v16  ;;  %v3761_v44 = vsel %vm636_vm2, %v3759_v32, %v3760_v33  ;;  %v10852_v13 = vpop.permute.xlu2 %3668  ;;  %v3851_v16 = vrot.slane %v10392_v42, 3  ;;  %v10868_v32 = vpop.permute.xlu1 %3648 }
 0x66c   : > { %14093 = vst [vmem:[#allocation42_spill] sm:$0xff] %v10852_v13 }
 0x671   : > { %3902 = vrot.lane.b32.xlu2 %v3845_v50, %s6862_s27  ;;  %3810 = vrot.lane.b32.xlu1 %v3763_v1, %s6861_s26  ;;  %v3841_v50 = vrot.slane %v10315_v59, 3  ;;  %v3853_v1 = vsel %vm14094_vm14, %v3851_v16, %v3852_v46  ;;  %v3857_v16 = vrot.slane %v10432_v43, 3  ;;  %vm14108_vm14 = vmmov %vm14099_vm0 }
 0x672   : > { %3808 = vrot.lane.b32.xlu0 %v3761_v44, %s6861_s26  ;;  %v3840_v44 = vsel %vm14096_vm6, %v3837_v22, %v13392_v3  ;;  %v10872_v13 = vpop.permute.xlu0 %3646  ;;  %vm14110_vm6 = vmmov %vm14099_vm0 }
 0x673   : > { %v3843_v33 = vsel %vm14095_vm15, %v3841_v50, %v3842_v26  ;;  %14098 = vst [vmem:[#allocation147_spill] sm:$0xff] %v10872_v13  ;;  %v13395_v26 = vrot.slane %v10429_v61, 3  ;;  %v3847_v50 = vrot.slane %v10361_v24, 3  ;;  %v10889_v7 = vpop.permute.xlu1 %3654  ;;  %v13403_v61 = vrot.slane %v10394_v36, 3  ;;  %vm14109_vm15 = vmmov %vm14099_vm0 }
 0x675   : > { %v3860_v22 = vsel %vm14099_vm0, %v3857_v16, %v13395_v26  ;;  %v3867_v26 = vrot.slane %v10502_v58, 3 }
 0x679   : > { %3908 = vrot.lane.b32.xlu2 %v3853_v1, %s6862_s27  ;;  %3900 = vrot.lane.b32.xlu1 %v3843_v33, %s6862_s27  ;;  %v13398_v1 = vrot.slane %v10356_v5, 3  ;;  %v3846_v33 = vrot.slane %v10354_v25, 3 }
 0x67a   : > { %3898 = vrot.lane.b32.xlu0 %v3840_v44, %s6862_s27 }
 0x67b   : > { %v10870_v53 = vpop.permute.xlu2 %3674  ;;  %v3850_v44 = vsel %vm14100_vm3, %v3847_v50, %v13398_v1  ;;  %v3848_v3 = vsel %vm14101_vm7, %v3846_v33, %v3847_v50  ;;  %v3866_v1 = vrot.slane %v10497_v17, 3  ;;  %v10907_v33 = vpop.permute.xlu1 %3660  ;;  %vm14111_vm3 = vmmov %vm14099_vm0 }
 0x67c   : > { %14097 = vst [vmem:[#allocation146_spill] sm:$0xff] %v10870_v53  ;;  %v10893_v53 = vpop.permute.xlu0 %3652  ;;  %vm14114_vm7 = vmmov %vm14099_vm0 }
 0x67d   : > { %14105 = vst [vmem:[#allocation14_spill] sm:$0xff] %v10907_v33 }
 0x681   : > { %3914 = vrot.lane.b32.xlu2 %v3860_v22, %s6862_s27  ;;  %3906 = vrot.lane.b32.xlu1 %v3850_v44, %s6862_s27  ;;  %v3856_v22 = vrot.slane %v10427_v31, 3  ;;  %v3868_v44 = vsel %vm14102_vm8, %v3866_v1, %v3867_v26  ;;  %v3872_v1 = vrot.slane %v10537_v39, 3  ;;  %vm14115_vm8 = vmmov %vm14099_vm0 }
 0x682   : > { %3904 = vrot.lane.b32.xlu0 %v3848_v3, %s6862_s27  ;;  %v3855_v3 = vsel %vm14104_vm12, %v3852_v46, %v13403_v61  ;;  %vm14117_vm12 = vmmov %vm14099_vm0 }
 0x683   : > { %v10891_v13 = vpop.permute.xlu2 %3764  ;;  %v3858_v50 = vsel %vm14103_vm9, %v3856_v22, %v3857_v16  ;;  %v13406_v16 = vrot.slane %v10534_v19, 3  ;;  %v3862_v22 = vrot.slane %v10467_v40, 3  ;;  %v10928_v36 = vpop.permute.xlu1 %3666  ;;  %v13414_v19 = vrot.slane %v10499_v35, 3  ;;  %vm14116_vm9 = vmmov %vm14099_vm0 }
 0x684   : > { %v10911_v58 = vpop.permute.xlu0 %3658 }
 0x685   : > { %14106 = vst [vmem:[#allocation60_spill] sm:$0xff] %v10911_v58  ;;  %v3875_v46 = vsel %vm14107_vm13, %v3872_v1, %v13406_v16  ;;  %v3882_v16 = vrot.slane %v10607_v30, 3  ;;  %vm14119_vm13 = vmmov %vm14099_vm0 }
 0x689   : > { %3920 = vrot.lane.b32.xlu2 %v3868_v44, %s6862_s27  ;;  %3912 = vrot.lane.b32.xlu1 %v3858_v50, %s6862_s27  ;;  %v13409_v44 = vrot.slane %v10464_v20, 3  ;;  %v3861_v50 = vrot.slane %v10462_v45, 3 }
 0x68a   : > { %3910 = vrot.lane.b32.xlu0 %v3855_v3, %s6862_s27 }
 0x68b   : > { %v10909_v5 = vpop.permute.xlu2 %3770  ;;  %v3865_v3 = vsel %vm14108_vm14, %v3862_v22, %v13409_v44  ;;  %v3863_v61 = vsel %vm14109_vm15, %v3861_v50, %v3862_v22  ;;  %v3881_v44 = vrot.slane %v10602_v51, 3  ;;  %vm14120_vm14 = vmmov %vm14099_vm0 }
 0x68c   : > { %v10932_v33 = vpop.permute.xlu0 %3664  ;;  %vm14122_vm15 = vmmov %vm14099_vm0 }
 0x691   : > { %3926 = vrot.lane.b32.xlu2 %v3875_v46, %s6862_s27  ;;  %3918 = vrot.lane.b32.xlu1 %v3865_v3, %s6862_s27  ;;  %v3871_v46 = vrot.slane %v10532_v10, 3  ;;  %v3883_v3 = vsel %vm14110_vm6, %v3881_v44, %v3882_v16  ;;  %v3887_v44 = vrot.slane %v10642_v34, 3  ;;  %vm4017_vm6 = vcmask 785408  }
 0x692   : > { %3916 = vrot.lane.b32.xlu0 %v3863_v61, %s6862_s27  ;;  %v3870_v61 = vsel %vm14111_vm3, %v3867_v26, %v13414_v19 }
 0x693   : > { %v10930_v58 = vpop.permute.xlu2 %3776  ;;  %v3873_v22 = vsel %vm14099_vm0, %v3871_v46, %v3872_v1  ;;  %v10946_v50 = vpop.permute.xlu1 %3672  ;;  %v13417_v1 = vrot.slane %v10639_v6, 3  ;;  %v3877_v46 = vrot.slane %v10572_v41, 3  ;;  %vm14241_vm0 = vcmask 1041408  }
 0x694   : > { %14112 = vst [vmem:[#allocation151_spill] sm:$0xff] %v10946_v50  ;;  %v10950_v30 = vpop.permute.xlu0 %3670  ;;  %vm14242_vm3 = vmmov %vm14241_vm0 }
 0x695   : > { %14113 = vst [vmem:[#allocation32_spill] sm:$0xff] %v10950_v30  ;;  %v3890_v26 = vsel %vm14114_vm7, %v3887_v44, %v13417_v1  ;;  %v13421_v1 = vrot.slane %v10604_v29, 3  ;;  %vm14243_vm7 = vmmov %vm14241_vm0 }
 0x699   : > { %3932 = vrot.lane.b32.xlu2 %v3883_v3, %s6862_s27  ;;  %3924 = vrot.lane.b32.xlu1 %v3873_v22, %s6862_s27  ;;  %v13420_v3 = vrot.slane %v10569_v28, 3  ;;  %v3876_v22 = vrot.slane %v10567_v52, 3  ;;  %v3886_v28 = vrot.slane %v10637_v47, 3 }
 0x69a   : > { %3922 = vrot.lane.b32.xlu0 %v3870_v61, %s6862_s27 }
 0x69b   : > { %v10948_v20 = vpop.permute.xlu2 %3782  ;;  %v3880_v61 = vsel %vm14115_vm8, %v3877_v46, %v13420_v3  ;;  %v3878_v19 = vsel %vm14116_vm9, %v3876_v22, %v3877_v46  ;;  %v3888_v3 = vsel %vm14117_vm12, %v3886_v28, %v3887_v44  ;;  %v3892_v28 = vrot.slane %v10683_v0, 3  ;;  %vm14246_vm8 = vmmov %vm14241_vm0 }
 0x69c   : > { %v13426_v44 = vrot.slane %v10678_v60, 3  ;;  %vm14250_vm9 = vmmov %vm14241_vm0 }
 0x69d   : > { %vm14251_vm12 = vmmov %vm14241_vm0 }
 0x6a1   : > { %3938 = vrot.lane.b32.xlu2 %v3890_v26, %s6862_s27  ;;  %3930 = vrot.lane.b32.xlu1 %v3880_v61, %s6862_s27  ;;  %v14118_v26 = vrot.slane %v10276_v8, 4 }
 0x6a2   : > { %3928 = vrot.lane.b32.xlu0 %v3878_v19, %s6862_s27  ;;  %v3885_v19 = vsel %vm14119_vm13, %v3882_v16, %v13421_v1  ;;  %v14121_v16 = vrot.slane %v10315_v59, 4  ;;  %vm14252_vm13 = vmmov %vm14241_vm0 }
 0x6a3   : > { %v10967_v35 = vpop.permute.xlu2 %3788  ;;  %v10969_v30 = vpop.permute.xlu1 %3678 }
 0x6a4   : > { %v10971_v50 = vpop.permute.xlu0 %3676 }
 0x6a9   : > { %4110 = vrot.lane.b32.xlu2 %v14118_v26, %s6860_s23  ;;  %3936 = vrot.lane.b32.xlu1 %v3888_v3, %s6862_s27  ;;  %v3891_v26 = vrot.slane %v10676_v12, 3  ;;  %v3895_v3 = vsel %vm14120_vm14, %v3892_v28, %v13426_v44  ;;  %v14123_v44 = vrot.slane %v10354_v25, 4  ;;  %vm14267_vm14 = vmmov %vm14241_vm0 }
 0x6aa   : > { %3934 = vrot.lane.b32.xlu0 %v3885_v19, %s6862_s27 }
 0x6ab   : > { %v10984_v46 = vpop.permute.xlu2 %3794  ;;  %v10986_v22 = vpop.permute.xlu1 %3768  ;;  %v3893_v19 = vsel %vm14122_vm15, %v3891_v26, %v3892_v28  ;;  %vm14268_vm15 = vmmov %vm14241_vm0 }
 0x6ac   : > { %v10988_v61 = vpop.permute.xlu0 %3766 }
 0x6b1   : > { %4116 = vrot.lane.b32.xlu2 %v14121_v16, %s6860_s23  ;;  %3942 = vrot.lane.b32.xlu1 %v3895_v3, %s6862_s27  ;;  %v14124_v16 = vrot.slane %v10392_v42, 4 }
 0x6b2   : > { %3940 = vrot.lane.b32.xlu0 %v3893_v19, %s6862_s27 }
 0x6b3   : > { %v11002_v1 = vpop.permute.xlu2 %3800  ;;  %v11004_v29 = vpop.permute.xlu1 %3774 }
 0x6b4   : > { %v11006_v6 = vpop.permute.xlu0 %3772 }
 0x6b9   : > { %4114 = vrot.lane.b32.xlu1 %v10289_v15, %s6860_s23  ;;  %4122 = vrot.lane.b32.xlu2 %v14123_v44, %s6860_s23  ;;  %v11029_v15 = vsel %vm3968_vm11, %v10276_v8, %v10753_v11  ;;  %v11054_v11 = vsel %vm3968_vm11, %v10322_v23, %v10767_v4 }
 0x6ba   : > { %4112 = vrot.lane.b32.xlu0 %v10306_v9, %s6860_s23  ;;  %14125 = vst [vmem:[#allocation74_spill] sm:$0xff] %v11029_v15  ;;  %v11036_v9 = vsel %vm3242_vm10, %v11029_v15, %v10891_v13  ;;  %v11061_v13 = vsel %vm3242_vm10, %v11054_v11, %v10909_v5  ;;  %v11079_v5 = vsel %vm3968_vm11, %v10392_v42, %v10784_v27 }
 0x6bb   : > { %v11015_v3 = vpop.permute.xlu2 %3806  ;;  %v11017_v28 = vpop.permute.xlu1 %3780  ;;  %14126 = vst [vmem:[#allocation50_spill] sm:$0xff] %v11036_v9  ;;  %v11086_v4 = vsel %vm3242_vm10, %v11079_v5, %v10930_v58  ;;  %v11104_v58 = vsel %vm3968_vm11, %v10432_v43, %v10798_v49  ;;  %v14140_v49 = vld [vmem:[#allocation138_spill] sm:$0xff] }
 0x6bc   : > { %v11019_v26 = vpop.permute.xlu0 %3778  ;;  %14128 = vst [vmem:[#allocation91_spill] sm:$0xff] %v11054_v11  ;;  %v11111_v27 = vsel %vm3242_vm10, %v11104_v58, %v10948_v20  ;;  %v11130_v20 = vsel %vm3968_vm11, %v10497_v17, %v10815_v63  ;;  %v14142_v63 = vld [vmem:[#allocation88_spill] sm:$0xff] }
 0x6bd   : > { %14129 = vst [vmem:[#allocation136_spill] sm:$0xff] %v11061_v13 }
 0x6be   : > { %14132 = vst [vmem:[#allocation110_spill] sm:$0xff] %v11079_v5  ;;  %v14152_v5 = vld [vmem:[#allocation117_spill] sm:$0xff] }
 0x6bf   : > { %14133 = vst [vmem:[#allocation79_spill] sm:$0xff] %v11086_v4 }
 0x6c0   : > { %14135 = vst [vmem:[#allocation129_spill] sm:$0xff] %v11104_v58 }
 0x6c1   : > { %4120 = vrot.lane.b32.xlu1 %v10328_v54, %s6860_s23  ;;  %4128 = vrot.lane.b32.xlu2 %v14124_v16, %s6860_s23  ;;  %14136 = vst [vmem:[#allocation100_spill] sm:$0xff] %v11111_v27 }
 0x6c2   : > { %4118 = vrot.lane.b32.xlu0 %v10345_v37, %s6860_s23  ;;  %v14127_v37 = vrot.slane %v10427_v31, 4  ;;  %14139 = vst [vmem:[#allocation139_spill] sm:$0xff] %v11130_v20 }
 0x6c3   : > { %v3897_v44 = vpop.permute.xlu2 %3896  ;;  %v11038_v54 = vpop.permute.xlu1 %3786 }
 0x6c4   : > { %v11042_v19 = vsel %vm4017_vm6, %v11036_v9, %v3897_v44  ;;  %v11044_v16 = vpop.permute.xlu0 %3784 }
 0x6c9   : > { %4126 = vrot.lane.b32.xlu1 %v10367_v2, %s6860_s23  ;;  %4134 = vrot.lane.b32.xlu2 %v14127_v37, %s6860_s23 }
 0x6ca   : > { %4124 = vrot.lane.b32.xlu0 %v10384_v21, %s6860_s23  ;;  %v14131_v21 = vrot.slane %v10462_v45, 4 }
 0x6cb   : > { %v3903_v44 = vpop.permute.xlu2 %3902  ;;  %v11063_v9 = vpop.permute.xlu1 %3792 }
 0x6cc   : > { %v11067_v2 = vsel %vm4017_vm6, %v11061_v13, %v3903_v44  ;;  %v11069_v37 = vpop.permute.xlu0 %3790 }
 0x6cd   : > { %14130 = vst [vmem:[#allocation65_spill] sm:$0xff] %v11067_v2 }
 0x6d1   : > { %4132 = vrot.lane.b32.xlu1 %v10403_v57, %s6860_s23  ;;  %4140 = vrot.lane.b32.xlu2 %v14131_v21, %s6860_s23 }
 0x6d2   : > { %4130 = vrot.lane.b32.xlu0 %v10421_v56, %s6860_s23  ;;  %v14134_v56 = vrot.slane %v10497_v17, 4 }
 0x6d3   : > { %v3909_v44 = vpop.permute.xlu2 %3908  ;;  %v11088_v15 = vpop.permute.xlu1 %3798 }
 0x6d4   : > { %v11092_v57 = vsel %vm4017_vm6, %v11086_v4, %v3909_v44  ;;  %v11094_v21 = vpop.permute.xlu0 %3796  ;;  %v14151_v4 = vld [vmem:[#allocation131_spill] sm:$0xff] }
 0x6d9   : > { %4138 = vrot.lane.b32.xlu1 %v10438_v14, %s6860_s23  ;;  %4146 = vrot.lane.b32.xlu2 %v14134_v56, %s6860_s23 }
 0x6da   : > { %4136 = vrot.lane.b32.xlu0 %v10456_v38, %s6860_s23  ;;  %v14138_v38 = vrot.slane %v10532_v10, 4 }
 0x6db   : > { %v3915_v44 = vpop.permute.xlu2 %3914  ;;  %v11113_v13 = vpop.permute.xlu1 %3804 }
 0x6dc   : > { %v11117_v14 = vsel %vm4017_vm6, %v11111_v27, %v3915_v44  ;;  %v11119_v56 = vpop.permute.xlu0 %3802  ;;  %v11137_v44 = vsel %vm3242_vm10, %v11130_v20, %v10967_v35  ;;  %v11156_v35 = vsel %vm3968_vm11, %v10315_v59, %v10829_v55  ;;  %v14145_v20 = vld [vmem:[#allocation143_spill] sm:$0xff] }
 0x6dd   : > { %14137 = vst [vmem:[#allocation119_spill] sm:$0xff] %v11117_v14 }
 0x6de   : > { %4059 = vst [vmem:[#allocation2 + $0x3b8] sm:$0xff] %v11117_v14 }
 0x6df   : > { %14141 = vst [vmem:[#allocation97_spill] sm:$0xff] %v11137_v44 }
 0x6e0   : > { %14144 = vst [vmem:[#allocation149_spill] sm:$0xff] %v11156_v35 }
 0x6e1   : > { %4144 = vrot.lane.b32.xlu1 %v10473_v48, %s6860_s23  ;;  %4152 = vrot.lane.b32.xlu2 %v14138_v38, %s6860_s23 }
 0x6e2   : > { %4142 = vrot.lane.b32.xlu0 %v14140_v49, %s6860_s23  ;;  %v14143_v49 = vrot.slane %v10567_v52, 4 }
 0x6e3   : > { %v3921_v11 = vpop.permute.xlu2 %3920  ;;  %v11139_v60 = vpop.permute.xlu1 %3810 }
 0x6e4   : > { %v11143_v48 = vsel %vm4017_vm6, %v11137_v44, %v3921_v11  ;;  %v11145_v38 = vpop.permute.xlu0 %3808  ;;  %v11161_v11 = vsel %vm3968_vm11, %v10537_v39, %v14145_v20  ;;  %v14147_v44 = vld [vmem:[#allocation95_spill] sm:$0xff] }
 0x6e5   : > { %4062 = vst [vmem:[#allocation2 + $0x460] sm:$0xff] %v11143_v48 }
 0x6e6   : > { %14146 = vst [vmem:[#allocation99_spill] sm:$0xff] %v11161_v11 }
 0x6e9   : > { %4150 = vrot.lane.b32.xlu1 %v14142_v63, %s6860_s23  ;;  %4158 = vrot.lane.b32.xlu2 %v14143_v49, %s6860_s23  ;;  %v11168_v63 = vsel %vm3242_vm10, %v11161_v11, %v10984_v46  ;;  %v11173_v49 = vsel %vm3242_vm10, %v11156_v35, %v10986_v22  ;;  %v11186_v46 = vsel %vm3968_vm11, %v14152_v5, %v14151_v4  ;;  %v13446_v11 = vrot.slane %v11067_v2, 1  ;;  %v14173_v35 = vld [vmem:[#allocation147_spill] sm:$0xff] }
 0x6ea   : > { %4148 = vrot.lane.b32.xlu0 %v14147_v44, %s6860_s23  ;;  %14148 = vst [vmem:[#allocation154_spill] sm:$0xff] %v11168_v63 }
 0x6eb   : > { %14149 = vst [vmem:[#allocation155_spill] sm:$0xff] %v11173_v49  ;;  %v3927_v55 = vpop.permute.xlu2 %3926  ;;  %v3901_v27 = vpop.permute.xlu1 %3900 }
 0x6ec   : > { %v11177_v58 = vsel %vm4017_vm6, %v11168_v63, %v3927_v55  ;;  %v11181_v20 = vsel %vm4017_vm6, %v11173_v49, %v3901_v27  ;;  %v3899_v44 = vpop.permute.xlu0 %3898  ;;  %14153 = vst [vmem:[#allocation158_spill] sm:$0xff] %v11186_v46  ;;  %v11195_v55 = vsel %vm3242_vm10, %v11186_v46, %v10988_v61  ;;  %v14156_v63 = vld [vmem:[#allocation116_spill] sm:$0xff]  ;;  %v14157_v49 = vrot.slane %v10602_v51, 4  ;;  %v14159_v46 = vld [vmem:[#allocation137_spill] sm:$0xff] }
 0x6ed   : > { %14150 = vst [vmem:[#allocation142_spill] sm:$0xff] %v11177_v58  ;;  %v5531_v22 = vrot.slane %v11181_v20, 1  ;;  %6210 = vmatpush.xpose.msrb.mxu0 %v11177_v58  ;;  %v11202_v4 = vsel %vm4017_vm6, %v11195_v55, %v3899_v44  ;;  %v11212_v61 = vsel %vm3968_vm11, %v10361_v24, %v10850_v18  ;;  %v11219_v44 = vsel %vm3968_vm11, %v10354_v25, %v10854_v62 }
 0x6ee   : > { %4065 = vst [vmem:[#allocation2 + $0x508] sm:$0xff] %v11177_v58  ;;  %v11239_v62 = vsel %vm3242_vm10, %v11219_v44, %v11006_v6  ;;  %v14167_v6 = vld [vmem:[#allocation141_spill] sm:$0xff] }
 0x6ef   : > { %14154 = vst [vmem:[#allocation157_spill] sm:$0xff] %v11195_v55  ;;  %v5533_v27 = vsel %vm525_vm1, %v5531_v22, %v13446_v11  ;;  %v14161_v22 = vld [vmem:[#allocation42_spill] sm:$0xff] }
 0x6f0   : > { %14155 = vst [vmem:[#allocation161_spill] sm:$0xff] %v11202_v4 }
 0x6f1   : > { %5614 = vst [vmem:[#allocation2 + $0x100] sm:$0xff] %v5533_v27  ;;  %4156 = vrot.lane.b32.xlu1 %v14156_v63, %s6860_s23  ;;  %4164 = vrot.lane.b32.xlu2 %v14157_v49, %s6860_s23  ;;  %v11224_v63 = vsel %vm3968_vm11, %v10602_v51, %v14161_v22  ;;  %v11229_v49 = vsel %vm3242_vm10, %v11212_v61, %v11004_v29 }
 0x6f2   : > { %14158 = vst [vmem:[#allocation145_spill] sm:$0xff] %v11212_v61  ;;  %4154 = vrot.lane.b32.xlu0 %v14159_v46, %s6860_s23  ;;  %v11234_v46 = vsel %vm3242_vm10, %v11224_v63, %v11002_v1 }
 0x6f3   : > { %14160 = vst [vmem:[#allocation160_spill] sm:$0xff] %v11219_v44  ;;  %v3933_v18 = vpop.permute.xlu2 %3932  ;;  %v3907_v27 = vpop.permute.xlu1 %3906 }
 0x6f4   : > { %14162 = vst [vmem:[#allocation148_spill] sm:$0xff] %v11224_v63  ;;  %v11243_v22 = vsel %vm4017_vm6, %v11229_v49, %v3907_v27  ;;  %v3905_v11 = vpop.permute.xlu0 %3904  ;;  %v11247_v29 = vsel %vm4017_vm6, %v11234_v46, %v3933_v18  ;;  %v14168_v27 = vrot.slane %v10637_v47, 4  ;;  %v14169_v18 = vld [vmem:[#allocation146_spill] sm:$0xff] }
 0x6f5   : > { %14163 = vst [vmem:[#allocation164_spill] sm:$0xff] %v11229_v49  ;;  %v11251_v55 = vsel %vm4017_vm6, %v11239_v62, %v3905_v11  ;;  %v11265_v11 = vsel %vm3968_vm11, %v10427_v31, %v10868_v32  ;;  %v11270_v1 = vsel %vm3968_vm11, %v10642_v34, %v14169_v18 }
 0x6f6   : > { %14164 = vst [vmem:[#allocation163_spill] sm:$0xff] %v11234_v46  ;;  %v5536_v63 = vrot.slane %v11251_v55, 1  ;;  %v14171_v46 = vrot.slane %v11243_v22, 1  ;;  %v11285_v32 = vsel %vm3242_vm10, %v11270_v1, %v11015_v3  ;;  %v11290_v18 = vsel %vm3242_vm10, %v11265_v11, %v11017_v28 }
 0x6f7   : > { %14165 = vst [vmem:[#allocation153_spill] sm:$0xff] %v11239_v62  ;;  %v14174_v62 = vld [vmem:[#allocation89_spill] sm:$0xff] }
 0x6f8   : > { %14166 = vst [vmem:[#allocation166_spill] sm:$0xff] %v11243_v22  ;;  %v5538_v51 = vsel %vm525_vm1, %v5536_v63, %v14171_v46 }
 0x6f9   : > { %4068 = vst [vmem:[#allocation2 + $0x5b0] sm:$0xff] %v11247_v29  ;;  %4162 = vrot.lane.b32.xlu1 %v14167_v6, %s6860_s23  ;;  %4170 = vrot.lane.b32.xlu2 %v14168_v27, %s6860_s23  ;;  %v14172_v6 = vld [vmem:[#allocation62_spill] sm:$0xff]  ;;  %v11280_v27 = vsel %vm3968_vm11, %v14174_v62, %v14173_v35 }
 0x6fa   : > { %5660 = vst [vmem:[#allocation2 + $0x418] sm:$0xff] %v11247_v29  ;;  %4160 = vrot.lane.b32.xlu0 %v14172_v6, %s6860_s23  ;;  %v11295_v46 = vsel %vm3242_vm10, %v11280_v27, %v11019_v26  ;;  %v11328_v26 = vsel %vm3968_vm11, %v10467_v40, %v10889_v7 }
 0x6fb   : > { %14170 = vst [vmem:[#allocation156_spill] sm:$0xff] %v11270_v1  ;;  %v3939_v34 = vpop.permute.xlu2 %3938  ;;  %v3913_v63 = vpop.permute.xlu1 %3912  ;;  %v13459_v1 = vrot.slane %v11117_v14, 1  ;;  %v11344_v7 = vsel %vm3242_vm10, %v11328_v26, %v11038_v54 }
 0x6fc   : > { %14175 = vst [vmem:[#allocation114_spill] sm:$0xff] %v11285_v32  ;;  %v11299_v35 = vsel %vm4017_vm6, %v11285_v32, %v3939_v34  ;;  %v11303_v3 = vsel %vm4017_vm6, %v11290_v18, %v3913_v63  ;;  %v3911_v6 = vpop.permute.xlu0 %3910  ;;  %v5541_v63 = vrot.slane %v11092_v57, 1  ;;  %v14182_v32 = vld [vmem:[#allocation5_spill] sm:$0xff] }
 0x6fd   : > { %14176 = vst [vmem:[#allocation113_spill] sm:$0xff] %v11299_v35  ;;  %v5546_v28 = vrot.slane %v11303_v3, 1  ;;  %v11309_v44 = vsel %vm4017_vm6, %v11295_v46, %v3911_v6  ;;  %v14179_v6 = vrot.slane %v10676_v12, 4 }
 0x6fe   : > { %5616 = vst [vmem:[#allocation2 + $0x170] sm:$0xff] %v5538_v51  ;;  %6110 = vmatpush.xpose.msra.mxu3 %v11309_v44  ;;  %v14178_v51 = vld [vmem:[#allocation123_spill] sm:$0xff] }
 0x6ff   : > { %14177 = vst [vmem:[#allocation159_spill] sm:$0xff] %v11309_v44  ;;  %v5548_v34 = vsel %vm525_vm1, %v5546_v28, %v13459_v1  ;;  %v14181_v28 = vrot.slane %v11309_v44, 1 }
 0x700   : > { %4071 = vst [vmem:[#allocation2 + $0x658] sm:$0xff] %v11299_v35 }
 0x701   : > { %5663 = vst [vmem:[#allocation2 + $0x4c0] sm:$0xff] %v11299_v35  ;;  %4168 = vrot.lane.b32.xlu1 %v14178_v51, %s6860_s23  ;;  %4176 = vrot.lane.b32.xlu2 %v14179_v6, %s6860_s23  ;;  %v5543_v1 = vsel %vm525_vm1, %v5541_v63, %v14181_v28  ;;  %v11339_v51 = vsel %vm3968_vm11, %v10462_v45, %v10893_v53 }
 0x702   : > { %4058 = vst [vmem:[#allocation2 + $0x380] sm:$0xff] %v11303_v3  ;;  %4166 = vrot.lane.b32.xlu0 %v14182_v32, %s6860_s23  ;;  %6111 = vmatpush.xpose.msra.mxu3 %v11092_v57  ;;  %v11351_v63 = vsel %vm3242_vm10, %v11339_v51, %v11044_v16  ;;  %v5526_v16 = vrot.slane %v11042_v19, 1 }
 0x703   : > { %14180 = vst [vmem:[#allocation171_spill] sm:$0xff] %v11328_v26  ;;  %v3919_v6 = vpop.permute.xlu1 %3918 }
 0x704   : > { %5620 = vst [vmem:[#allocation2 + $0x250] sm:$0xff] %v5548_v34  ;;  %v11346_v34 = vpop.permute.xlu2 %4110  ;;  %v11355_v32 = vsel %vm4017_vm6, %v11344_v7, %v3919_v6  ;;  %v3917_v28 = vpop.permute.xlu0 %3916  ;;  %v13468_v6 = vrot.slane %v10276_v8, 5 }
 0x705   : > { %14183 = vst [vmem:[#allocation172_spill] sm:$0xff] %v11339_v51  ;;  %v13465_v53 = vrot.slane %v11355_v32, 1  ;;  %v11360_v54 = vsel %vm4017_vm6, %v11351_v63, %v3917_v28  ;;  %v14188_v28 = vld [vmem:[#allocation4_spill] sm:$0xff]  ;;  %v14189_v51 = vld [vmem:[#allocation14_spill] sm:$0xff] }
 0x706   : > { %14184 = vst [vmem:[#allocation165_spill] sm:$0xff] %v11344_v7  ;;  %v5551_v26 = vrot.slane %v11360_v54, 1  ;;  %6112 = vmatpush.xpose.msra.mxu3 %v11243_v22  ;;  %v11383_v7 = vsel %vm3968_vm11, %v10532_v10, %v14189_v51 }
 0x707   : > { %14185 = vst [vmem:[#allocation162_spill] sm:$0xff] %v11346_v34  ;;  %v13467_v34 = vrot.slane %v11202_v4, 1 }
 0x708   : > { %14186 = vst [vmem:[#allocation170_spill] sm:$0xff] %v11351_v63 }
 0x709   : > { %14187 = vst [vmem:[#allocation169_spill] sm:$0xff] %v11355_v32  ;;  %4174 = vrot.lane.b32.xlu1 %v14188_v28, %s6860_s23  ;;  %4278 = vrot.lane.b32.xlu2 %v13468_v6, %s6861_s26  ;;  %v5528_v63 = vsel %vm525_vm1, %v5526_v16, %v13467_v34  ;;  %v14192_v28 = vld [vmem:[#allocation60_spill] sm:$0xff]  ;;  %v11396_v16 = vsel %vm3242_vm10, %v11383_v7, %v11063_v9 }
 0x70a   : > { %5618 = vst [vmem:[#allocation2 + $0x1e0] sm:$0xff] %v5543_v1  ;;  %v5553_v1 = vsel %vm525_vm1, %v5551_v26, %v13465_v53  ;;  %v14191_v26 = vld [vmem:[#allocation93_spill] sm:$0xff]  ;;  %6113 = vmatpush.xpose.msra.mxu3 %v11251_v55  ;;  %v14193_v53 = vld [vmem:[#allocation130_spill] sm:$0xff] }
 0x70b   : > { %4061 = vst [vmem:[#allocation2 + $0x428] sm:$0xff] %v11355_v32  ;;  %4172 = vrot.lane.b32.xlu0 %v14191_v26, %s6860_s23  ;;  %v11391_v49 = vsel %vm3968_vm11, %v14193_v53, %v14192_v28  ;;  %v3925_v51 = vpop.permute.xlu1 %3924  ;;  %v13471_v28 = vrot.slane %v11177_v58, 1 }
 0x70c   : > { %4060 = vst [vmem:[#allocation2 + $0x3f0] sm:$0xff] %v11360_v54  ;;  %v11398_v34 = vpop.permute.xlu2 %4116  ;;  %v4032_v26 = vsel %vm4017_vm6, %v11396_v16, %v3925_v51  ;;  %v3923_v6 = vpop.permute.xlu0 %3922  ;;  %v14199_v51 = vld [vmem:[#allocation24_spill] sm:$0xff] }
 0x70d   : > { %14190 = vst [vmem:[#allocation133_spill] sm:$0xff] %v11383_v7  ;;  %v5561_v61 = vrot.slane %v4032_v26, 1  ;;  %6211 = vmatpush.xpose.msrb.mxu0 %v4032_v26  ;;  %v5556_v7 = vrot.slane %v11143_v48, 1 }
 0x70e   : > { %5622 = vst [vmem:[#allocation2 + $0x2c0] sm:$0xff] %v5553_v1  ;;  %v11403_v1 = vsel %vm3242_vm10, %v11391_v49, %v11069_v37  ;;  %6114 = vmatpush.xpose.msra.mxu3 %v11067_v2 }
 0x70f   : > { %14194 = vst [vmem:[#allocation134_spill] sm:$0xff] %v11391_v49  ;;  %v11410_v9 = vsel %vm4017_vm6, %v11403_v1, %v3923_v6  ;;  %v5563_v37 = vsel %vm525_vm1, %v5561_v61, %v13471_v28  ;;  %v11431_v61 = vsel %vm3968_vm11, %v10572_v41, %v10928_v36  ;;  %v11459_v28 = vrot.slane %v14152_v5, 5 }
 0x710   : > { %14195 = vst [vmem:[#allocation6_spill] sm:$0xff] %v11396_v16  ;;  %v14209_v16 = vld [vmem:[#allocation151_spill] sm:$0xff]  ;;  %v4406_v41 = vrot.slane %v10427_v31, 6 }
 0x711   : > { %14196 = vst [vmem:[#allocation12_spill] sm:$0xff] %v11398_v34  ;;  %v13472_v34 = vrot.slane %v11410_v9, 1  ;;  %4180 = vrot.lane.b32.xlu1 %v14199_v51, %s6860_s23  ;;  %6212 = vmatpush.xpose.msrb.mxu0 %v11410_v9 }
 0x712   : > { %14197 = vst [vmem:[#allocation15_spill] sm:$0xff] %v11403_v1  ;;  %6115 = vmatpush.xpose.msra.mxu3 %v11181_v20 }
 0x713   : > { %5610 = vst [vmem:[#allocation2 + $0x20] sm:$0xff] %v5528_v63  ;;  %v13473_v63 = vrot.slane %v10315_v59, 5  ;;  %v5558_v6 = vsel %vm525_vm1, %v5556_v7, %v13472_v34  ;;  %v11439_v7 = vsel %vm3968_vm11, %v10567_v52, %v10932_v33 }
 0x714   : > { %4064 = vst [vmem:[#allocation2 + $0x4d0] sm:$0xff] %v4032_v26  ;;  %v14201_v26 = vld [vmem:[#allocation112_spill] sm:$0xff]  ;;  %v11446_v51 = vpop.permute.xlu2 %4122  ;;  %v11452_v36 = vsel %vm3242_vm10, %v11439_v7, %v11094_v21  ;;  %v3929_v33 = vpop.permute.xlu0 %3928 }
 0x715   : > { %14198 = vst [vmem:[#allocation16_spill] sm:$0xff] %v11410_v9  ;;  %4284 = vrot.lane.b32.xlu2 %v13473_v63, %s6861_s26  ;;  %4178 = vrot.lane.b32.xlu0 %v14201_v26, %s6860_s23  ;;  %v4034_v58 = vsel %vm4017_vm6, %v11452_v36, %v3929_v33  ;;  %v14208_v33 = vrot.slane %v10276_v8, 5 }
 0x716   : > { %4063 = vst [vmem:[#allocation2 + $0x498] sm:$0xff] %v11410_v9  ;;  %v5566_v21 = vrot.slane %v4034_v58, 1  ;;  %6116 = vmatpush.xpose.msra.mxu3 %v11202_v4  ;;  %6213 = vmatpush.xpose.msrb.mxu0 %v11143_v48 }
 0x717   : > { %5626 = vst [vmem:[#allocation2 + $0x3a0] sm:$0xff] %v5563_v37  ;;  %v11444_v37 = vsel %vm3242_vm10, %v11431_v61, %v11088_v15  ;;  %v14207_v15 = vld [vmem:[#allocation75_spill] sm:$0xff]  ;;  %v4220_v48 = vsel %vm969_vm5, %v14208_v33, %v11459_v28 }
 0x718   : > { %5624 = vst [vmem:[#allocation2 + $0x330] sm:$0xff] %v5558_v6  ;;  %v3931_v6 = vpop.permute.xlu1 %3930  ;;  %v4221_v34 = vrot.slane %v14207_v15, 5 }
 0x719   : > { %14200 = vst [vmem:[#allocation19_spill] sm:$0xff] %v11431_v61  ;;  %v11456_v26 = vsel %vm4017_vm6, %v11444_v37, %v3931_v6  ;;  %v13479_v6 = vrot.slane %v10354_v25, 5 }
 0x71a   : > { %14202 = vst [vmem:[#allocation7_spill] sm:$0xff] %v11439_v7  ;;  %v13478_v63 = vrot.slane %v11456_v26, 1  ;;  %v4222_v49 = vsel %vm969_vm5, %v11459_v28, %v4221_v34  ;;  %6117 = vmatpush.xpose.msra.mxu3 %v11042_v19  ;;  %6214 = vmatpush.xpose.msrb.mxu0 %v11355_v32  ;;  %v13487_v7 = vrot.slane %v11299_v35, 1 }
 0x71b   : > { %14203 = vst [vmem:[#allocation9_spill] sm:$0xff] %v11444_v37  ;;  %4282 = vrot.lane.b32.xlu1 %v4222_v49, %s6861_s26  ;;  %v14212_v49 = vld [vmem:[#allocation76_spill] sm:$0xff] }
 0x71c   : > { %14204 = vst [vmem:[#allocation10_spill] sm:$0xff] %v11446_v51  ;;  %v5568_v1 = vsel %vm525_vm1, %v5566_v21, %v13478_v63  ;;  %v11486_v21 = vsel %vm3968_vm11, %v10637_v47, %v14209_v16  ;;  %v11500_v63 = vpop.permute.xlu2 %4128 }
 0x71d   : > { %14205 = vst [vmem:[#allocation150_spill] sm:$0xff] %v11452_v36  ;;  %4290 = vrot.lane.b32.xlu2 %v13479_v6, %s6861_s26  ;;  %4280 = vrot.lane.b32.xlu0 %v4220_v48, %s6861_s26  ;;  %v11511_v6 = vrot.slane %v10322_v23, 5 }
 0x71e   : > { %14206 = vst [vmem:[#allocation28_spill] sm:$0xff] %v11456_v26  ;;  %6118 = vmatpush.xpose.msra.mxu3 %v11202_v4  ;;  %6215 = vmatpush.xpose.msrb.mxu0 %v11360_v54  ;;  %v11542_v54 = vsel %vm3968_vm11, %v10683_v0, %v10969_v30 }
 0x71f   : > { %4067 = vst [vmem:[#allocation2 + $0x578] sm:$0xff] %v11456_v26 }
 0x720   : > { %5659 = vst [vmem:[#allocation2 + $0x3e0] sm:$0xff] %v11456_v26  ;;  %v3937_v33 = vpop.permute.xlu1 %3936  ;;  %v14216_v26 = vld [vmem:[#allocation87_spill] sm:$0xff] }
 0x721   : > { %4066 = vst [vmem:[#allocation2 + $0x540] sm:$0xff] %v4034_v58 }
 0x722   : > { %5658 = vst [vmem:[#allocation2 + $0x3a8] sm:$0xff] %v4034_v58  ;;  %v14211_v58 = vld [vmem:[#allocation32_spill] sm:$0xff]  ;;  %6119 = vmatpush.xpose.msra.mxu3 %v11042_v19  ;;  %6216 = vmatpush.xpose.msrb.mxu0 %v11117_v14 }
 0x723   : > { %5628 = vst [vmem:[#allocation2 + $0x410] sm:$0xff] %v5568_v1  ;;  %v11493_v34 = vsel %vm3968_vm11, %v14212_v49, %v14211_v58  ;;  %v11498_v1 = vsel %vm3242_vm10, %v11486_v21, %v11113_v13  ;;  %v3935_v58 = vpop.permute.xlu0 %3934  ;;  %v4226_v13 = vrot.slane %v14216_v26, 5 }
 0x724   : > { %14210 = vst [vmem:[#allocation18_spill] sm:$0xff] %v11486_v21  ;;  %v11506_v16 = vsel %vm3242_vm10, %v11493_v34, %v11119_v56  ;;  %v4038_v48 = vsel %vm4017_vm6, %v11498_v1, %v3937_v33  ;;  %v5571_v56 = vrot.slane %v11247_v29, 1 }
 0x725   : > { %14213 = vst [vmem:[#allocation152_spill] sm:$0xff] %v11493_v34  ;;  %v5576_v61 = vrot.slane %v4038_v48, 1  ;;  %v11517_v37 = vsel %vm4017_vm6, %v11506_v16, %v3935_v58  ;;  %v4233_v34 = vrot.slane %v10392_v42, 5 }
 0x726   : > { %14214 = vst [vmem:[#allocation20_spill] sm:$0xff] %v11498_v1  ;;  %v13486_v36 = vrot.slane %v11517_v37, 1  ;;  %6120 = vmatpush.xpose.msra.mxu3 %v11202_v4  ;;  %6217 = vmatpush.xpose.msrb.mxu0 %v11303_v3  ;;  %v4243_v1 = vrot.slane %v10462_v45, 5 }
 0x727   : > { %14215 = vst [vmem:[#allocation13_spill] sm:$0xff] %v11506_v16  ;;  %v5578_v33 = vsel %vm525_vm1, %v5576_v61, %v13487_v7  ;;  %4296 = vrot.lane.b32.xlu2 %v4233_v34, %s6861_s26  ;;  %v14218_v61 = vrot.slane %v10315_v59, 5  ;;  %v4238_v7 = vrot.slane %v10427_v31, 5  ;;  %v14228_v16 = vld [vmem:[#allocation82_spill] sm:$0xff] }
 0x728   : > { %4070 = vst [vmem:[#allocation2 + $0x620] sm:$0xff] %v4038_v48  ;;  %v5573_v29 = vsel %vm525_vm1, %v5571_v56, %v13486_v36  ;;  %v3943_v56 = vpop.permute.xlu1 %3942 }
 0x729   : > { %14217 = vst [vmem:[#allocation11_spill] sm:$0xff] %v11517_v37  ;;  %v4225_v58 = vsel %vm969_vm5, %v14218_v61, %v11511_v6  ;;  %v14222_v61 = vld [vmem:[#allocation135_spill] sm:$0xff] }
 0x72a   : > { %5662 = vst [vmem:[#allocation2 + $0x488] sm:$0xff] %v4038_v48  ;;  %v4227_v48 = vsel %vm969_vm5, %v11511_v6, %v4226_v13  ;;  %4286 = vrot.lane.b32.xlu0 %v4225_v58, %s6861_s26  ;;  %v11550_v13 = vsel %vm3242_vm10, %v11542_v54, %v11139_v60  ;;  %v4231_v58 = vrot.slane %v14222_v61, 5  ;;  %v11566_v60 = vsel %vm3968_vm11, %v10676_v12, %v10971_v50 }
 0x72b   : > { %4069 = vst [vmem:[#allocation2 + $0x5e8] sm:$0xff] %v11517_v37  ;;  %4288 = vrot.lane.b32.xlu1 %v4227_v48, %s6861_s26  ;;  %v11557_v30 = vsel %vm4017_vm6, %v11550_v13, %v3943_v56  ;;  %v11560_v48 = vrot.slane %v10361_v24, 5  ;;  %v11572_v36 = vsel %vm3242_vm10, %v11566_v60, %v11145_v38  ;;  %v14225_v38 = vrot.slane %v10354_v25, 5  ;;  %6121 = vmatpush.xpose.msra.mxu3 %v11042_v19 }
 0x72c   : > { %5632 = vst [vmem:[#allocation2 + $0x4f0] sm:$0xff] %v5578_v33  ;;  %v11552_v33 = vpop.permute.xlu2 %4134  ;;  %v13495_v3 = vrot.slane %v11557_v30, 1  ;;  %6218 = vmatpush.xpose.msrb.mxu0 %v11309_v44  ;;  %v4253_v44 = vrot.slane %v10532_v10, 5 }
 0x72d   : > { %5630 = vst [vmem:[#allocation2 + $0x480] sm:$0xff] %v5573_v29  ;;  %v3941_v29 = vpop.permute.xlu0 %3940  ;;  %v4232_v50 = vsel %vm969_vm5, %v11560_v48, %v4231_v58 }
 0x72e   : > { %14219 = vst [vmem:[#allocation22_spill] sm:$0xff] %v11542_v54  ;;  %v4040_v56 = vsel %vm4017_vm6, %v11572_v36, %v3941_v29  ;;  %v4230_v29 = vsel %vm969_vm5, %v14225_v38, %v11560_v48  ;;  %v11603_v38 = vrot.slane %v14174_v62, 5 }
 0x72f   : > { %5661 = vst [vmem:[#allocation2 + $0x450] sm:$0xff] %v11517_v37  ;;  %4302 = vrot.lane.b32.xlu2 %v4238_v7, %s6861_s26  ;;  %v5581_v37 = vrot.slane %v4040_v56, 1  ;;  %6122 = vmatpush.xpose.msra.mxu3 %v11202_v4 }
 0x730   : > { %14220 = vst [vmem:[#allocation27_spill] sm:$0xff] %v11550_v13  ;;  %v11595_v58 = vpop.permute.xlu1 %4114  ;;  %6219 = vmatpush.xpose.msrb.mxu0 %v11092_v57  ;;  %v4235_v21 = vsel %vm969_vm5, %v4233_v34, %v11603_v38  ;;  %v4248_v34 = vrot.slane %v10497_v17, 5 }
 0x731   : > { %14221 = vst [vmem:[#allocation17_spill] sm:$0xff] %v11557_v30 }
 0x732   : > { %14223 = vst [vmem:[#allocation29_spill] sm:$0xff] %v11566_v60  ;;  %4292 = vrot.lane.b32.xlu0 %v4230_v29, %s6861_s26  ;;  %v5583_v29 = vsel %vm525_vm1, %v5581_v37, %v13495_v3 }
 0x733   : > { %4073 = vst [vmem:[#allocation2 + $0x6c8] sm:$0xff] %v11557_v30  ;;  %4294 = vrot.lane.b32.xlu1 %v4232_v50, %s6861_s26  ;;  %6123 = vmatpush.xpose.msra.mxu3 %v11042_v19 }
 0x734   : > { %14224 = vst [vmem:[#allocation41_spill] sm:$0xff] %v11572_v36  ;;  %v11597_v50 = vpop.permute.xlu2 %4140  ;;  %v4236_v36 = vrot.slane %v14228_v16, 5  ;;  %6220 = vmatpush.xpose.msrb.mxu0 %v11243_v22 }
 0x735   : > { %5665 = vst [vmem:[#allocation2 + $0x530] sm:$0xff] %v11557_v30  ;;  %v11600_v35 = vpop.permute.xlu0 %4112 }
 0x736   : > { %5667 = vst [vmem:[#allocation2 + $0x5a0] sm:$0xff] %v11557_v30  ;;  %v4237_v60 = vsel %vm969_vm5, %v11603_v38, %v4236_v36  ;;  %v11628_v36 = vrot.slane %v10432_v43, 5 }
 0x737   : > { %5669 = vst [vmem:[#allocation2 + $0x610] sm:$0xff] %v11557_v30  ;;  %4308 = vrot.lane.b32.xlu2 %v4243_v1, %s6861_s26  ;;  %6124 = vmatpush.xpose.msra.mxu3 %v11202_v4 }
 0x738   : > { %5671 = vst [vmem:[#allocation2 + $0x680] sm:$0xff] %v11557_v30  ;;  %v11620_v37 = vpop.permute.xlu1 %4120  ;;  %6221 = vmatpush.xpose.msrb.mxu0 %v11251_v55 }
 0x739   : > { %5673 = vst [vmem:[#allocation2 + $0x6f0] sm:$0xff] %v11557_v30 }
 0x73a   : > { %4072 = vst [vmem:[#allocation2 + $0x690] sm:$0xff] %v4040_v56  ;;  %4298 = vrot.lane.b32.xlu0 %v4235_v21, %s6861_s26 }
 0x73b   : > { %14226 = vst [vmem:[#allocation33_spill] sm:$0xff] %v11595_v58  ;;  %4300 = vrot.lane.b32.xlu1 %v4237_v60, %s6861_s26  ;;  %v14231_v60 = vld [vmem:[#allocation106_spill] sm:$0xff]  ;;  %6125 = vmatpush.xpose.msra.mxu3 %v11042_v19 }
 0x73c   : > { %5664 = vst [vmem:[#allocation2 + $0x4f8] sm:$0xff] %v4040_v56  ;;  %v11622_v3 = vpop.permute.xlu2 %4146  ;;  %6222 = vmatpush.xpose.msrb.mxu0 %v11067_v2 }
 0x73d   : > { %14227 = vst [vmem:[#allocation167_spill] sm:$0xff] %v11600_v35  ;;  %v11625_v57 = vpop.permute.xlu0 %4118 }
 0x73e   : > { %5666 = vst [vmem:[#allocation2 + $0x568] sm:$0xff] %v4040_v56 }
 0x73f   : > { %5668 = vst [vmem:[#allocation2 + $0x5d8] sm:$0xff] %v4040_v56  ;;  %4314 = vrot.lane.b32.xlu2 %v4248_v34, %s6861_s26 }
 0x740   : > { %5670 = vst [vmem:[#allocation2 + $0x648] sm:$0xff] %v4040_v56  ;;  %v11642_v30 = vpop.permute.xlu1 %4126  ;;  %6223 = vmatpush.xpose.msrb.mxu0 %v11181_v20  ;;  %v11666_v20 = vrot.slane %v14193_v53, 5 }
 0x741   : > { %5672 = vst [vmem:[#allocation2 + $0x6b8] sm:$0xff] %v4040_v56  ;;  %v4241_v56 = vrot.slane %v14231_v60, 5 }
 0x742   : > { %5634 = vst [vmem:[#allocation2 + $0x560] sm:$0xff] %v5583_v29  ;;  %v4240_v29 = vsel %vm969_vm5, %v4238_v7, %v11628_v36 }
 0x743   : > { %14229 = vst [vmem:[#allocation21_spill] sm:$0xff] %v11620_v37  ;;  %v4242_v21 = vsel %vm969_vm5, %v11628_v36, %v4241_v56  ;;  %4304 = vrot.lane.b32.xlu0 %v4240_v29, %s6861_s26  ;;  %v4244_v56 = vrot.slane %v10467_v40, 5 }
 0x744   : > { %14230 = vst [vmem:[#allocation168_spill] sm:$0xff] %v11625_v57  ;;  %4306 = vrot.lane.b32.xlu1 %v4242_v21, %s6861_s26  ;;  %v11644_v54 = vpop.permute.xlu2 %4152  ;;  %v14234_v21 = vld [vmem:[#allocation111_spill] sm:$0xff]  ;;  %6224 = vmatpush.xpose.msrb.mxu0 %v11202_v4 }
 0x745   : > { %14232 = vst [vmem:[#allocation23_spill] sm:$0xff] %v11644_v54  ;;  %v11647_v55 = vpop.permute.xlu0 %4124  ;;  %v4246_v13 = vrot.slane %v14234_v21, 5  ;;  %v4245_v29 = vsel %vm969_vm5, %v4243_v1, %v4244_v56  ;;  %v4414_v9 = vrot.slane %v14234_v21, 6 }
 0x746   : > { %14233 = vst [vmem:[#allocation35_spill] sm:$0xff] %v11647_v55 }
 0x747   : > { %v4247_v7 = vsel %vm969_vm5, %v4244_v56, %v4246_v13  ;;  %4320 = vrot.lane.b32.xlu2 %v4253_v44, %s6861_s26  ;;  %14235 = vst [vmem:[#allocation31_spill] sm:$0xff] %v11666_v20  ;;  %v14236_v13 = vld [vmem:[#allocation108_spill] sm:$0xff] }
 0x748   : > { %v11658_v54 = vpop.permute.xlu1 %4132  ;;  %v4251_v22 = vrot.slane %v14236_v13, 5  ;;  %6225 = vmatpush.xpose.msrb.mxu0 %v11042_v19  ;;  %v11687_v19 = vrot.slane %v10537_v39, 5  ;;  %v11705_v39 = vrot.slane %v10432_v43, 6 }
 0x74a   : > { %v4252_v1 = vsel %vm969_vm5, %v11666_v20, %v4251_v22  ;;  %14238 = vst [vmem:[#allocation45_spill] sm:$0xff] %v11687_v19  ;;  %v14239_v22 = vld [vmem:[#allocation122_spill] sm:$0xff] }
 0x74b   : > { %4310 = vrot.lane.b32.xlu0 %v4245_v29, %s6861_s26  ;;  %v4250_v29 = vsel %vm969_vm5, %v4248_v34, %v11666_v20  ;;  %v4255_v34 = vsel %vm969_vm5, %v4253_v44, %v11687_v19 }
 0x74c   : > { %4312 = vrot.lane.b32.xlu1 %v4247_v7, %s6861_s26  ;;  %v11660_v2 = vpop.permute.xlu2 %4158  ;;  %v13506_v7 = vrot.slane %v10567_v52, 5 }
 0x74d   : > { %v11663_v14 = vpop.permute.xlu0 %4130 }
 0x74f   : > { %4326 = vrot.lane.b32.xlu2 %v13506_v7, %s6861_s26 }
 0x750   : > { %v11680_v4 = vpop.permute.xlu1 %4138 }
 0x753   : > { %4316 = vrot.lane.b32.xlu0 %v4250_v29, %s6861_s26 }
 0x754   : > { %4318 = vrot.lane.b32.xlu1 %v4252_v1, %s6861_s26  ;;  %v11682_v35 = vpop.permute.xlu2 %4164  ;;  %v4256_v1 = vrot.slane %v14239_v22, 5  ;;  %v4401_v22 = vrot.slane %v10392_v42, 6 }
 0x755   : > { %14237 = vst [vmem:[#allocation37_spill] sm:$0xff] %v11682_v35  ;;  %v11684_v58 = vpop.permute.xlu0 %4136 }
 0x756   : > { %v4257_v7 = vsel %vm969_vm5, %v11687_v19, %v4256_v1  ;;  %v4409_v1 = vrot.slane %v14231_v60, 6 }
 0x757   : > { %4470 = vrot.lane.b32.xlu2 %v4406_v41, %s6862_s27 }
 0x758   : > { %v11698_v29 = vpop.permute.xlu1 %4144  ;;  %v4410_v44 = vsel %vm14241_vm0, %v11705_v39, %v4409_v1  ;;  %v4412_v1 = vrot.slane %v10467_v40, 6 }
 0x75a   : > { %v4415_v37 = vsel %vm14246_vm8, %v4412_v1, %v4414_v9  ;;  %v4411_v9 = vrot.slane %v10462_v45, 6  ;;  %vm14288_vm8 = vmmov %vm14241_vm0 }
 0x75b   : > { %4322 = vrot.lane.b32.xlu0 %v4255_v34, %s6861_s26 }
 0x75c   : > { %4324 = vrot.lane.b32.xlu1 %v4257_v7, %s6861_s26  ;;  %v11700_v35 = vpop.permute.xlu2 %4170  ;;  %v11709_v7 = vrot.slane %v14174_v62, 6 }
 0x75d   : > { %14240 = vst [vmem:[#allocation26_spill] sm:$0xff] %v11700_v35  ;;  %v11702_v20 = vpop.permute.xlu0 %4142  ;;  %v4408_v35 = vsel %vm14243_vm7, %v4406_v41, %v11705_v39  ;;  %v14247_v41 = vrot.slane %v14231_v60, 1  ;;  %vm14287_vm7 = vmmov %vm14241_vm0 }
 0x75e   : > { %v4403_v34 = vsel %vm14242_vm3, %v4401_v22, %v11709_v7  ;;  %vm14280_vm3 = vmmov %vm14241_vm0 }
 0x75f   : > { %4466 = vrot.lane.b32.xlu2 %v4403_v34, %s6862_s27 }
 0x760   : > { %v11721_v19 = vpop.permute.xlu1 %4150 }
 0x761   : > { %14244 = vst [vmem:[#allocation46_spill] sm:$0xff] %v11721_v19  ;;  %v11742_v19 = vrot.slane %v14193_v53, 6 }
 0x763   : > { %4472 = vrot.lane.b32.xlu0 %v4408_v35, %s6862_s27  ;;  %14249 = vst [vmem:[#allocation36_spill] sm:$0xff] %v11742_v19 }
 0x764   : > { %4474 = vrot.lane.b32.xlu1 %v4410_v44, %s6862_s27  ;;  %v11723_v52 = vpop.permute.xlu2 %4176 }
 0x765   : > { %14245 = vst [vmem:[#allocation40_spill] sm:$0xff] %v11723_v52  ;;  %v11725_v57 = vpop.permute.xlu0 %4148  ;;  %v4404_v52 = vrot.slane %v14228_v16, 6 }
 0x767   : > { %4480 = vrot.lane.b32.xlu2 %v4415_v37, %s6862_s27  ;;  %v4413_v37 = vsel %vm14250_vm9, %v4411_v9, %v4412_v1  ;;  %vm14298_vm9 = vcmask 1044480  }
 0x768   : > { %v11735_v35 = vpop.permute.xlu1 %4156 }
 0x76b   : > { %4841 = vrot.lane.b32.xlu0 %v14247_v41, %s6860_s23 }
 0x76c   : > { %4879 = vrot.lane.b32.xlu1 %v4244_v56, %s6861_s26  ;;  %v11737_v44 = vpop.permute.xlu2 %4278  ;;  %v4416_v56 = vrot.slane %v10497_v17, 6  ;;  %v14256_v17 = vrot.slane %v14234_v21, 2 }
 0x76d   : > { %14248 = vst [vmem:[#allocation25_spill] sm:$0xff] %v11737_v44  ;;  %v11739_v34 = vpop.permute.xlu0 %4154  ;;  %v4405_v44 = vsel %vm14252_vm13, %v11709_v7, %v4404_v52  ;;  %vm14306_vm13 = vmmov %vm14298_vm9 }
 0x76e   : > { %v4418_v41 = vsel %vm14251_vm12, %v4416_v56, %v11742_v19  ;;  %vm14305_vm12 = vmmov %vm14298_vm9 }
 0x76f   : > { %4484 = vrot.lane.b32.xlu2 %v4418_v41, %s6862_s27 }
 0x770   : > { %v11755_v49 = vpop.permute.xlu1 %4162 }
 0x771   : > { %14253 = vst [vmem:[#allocation38_spill] sm:$0xff] %v11755_v49 }
 0x773   : > { %4468 = vrot.lane.b32.xlu0 %v4405_v44, %s6862_s27 }
 0x774   : > { %4478 = vrot.lane.b32.xlu1 %v4413_v37, %s6862_s27  ;;  %v11757_v51 = vpop.permute.xlu2 %4284  ;;  %v14257_v37 = vrot.slane %v14234_v21, 1 }
 0x775   : > { %14254 = vst [vmem:[#allocation34_spill] sm:$0xff] %v11757_v51  ;;  %v11759_v32 = vpop.permute.xlu0 %4160  ;;  %v4394_v51 = vrot.slane %v14216_v26, 6 }
 0x776   : > { %14255 = vst [vmem:[#allocation30_spill] sm:$0xff] %v11759_v32  ;;  %v14264_v32 = vrot.slane %v14236_v13, 1 }
 0x777   : > { %4476 = vrot.lane.b32.xlu2 %v4411_v9, %s6862_s27 }
 0x778   : > { %v11768_v41 = vpop.permute.xlu1 %4168 }
 0x779   : > { %14258 = vst [vmem:[#allocation39_spill] sm:$0xff] %v11768_v41  ;;  %v11799_v41 = vrot.slane %v10361_v24, 6 }
 0x77b   : > { %4843 = vrot.lane.b32.xlu0 %v14257_v37, %s6860_s23  ;;  %v14263_v37 = vrot.slane %v14228_v16, 1 }
 0x77c   : > { %5167 = vrot.lane.b32.xlu1 %v14256_v17, %s6861_s26  ;;  %v11770_v52 = vpop.permute.xlu2 %4290 }
 0x77d   : > { %14259 = vst [vmem:[#allocation43_spill] sm:$0xff] %v11770_v52  ;;  %v11772_v44 = vpop.permute.xlu0 %4166  ;;  %v4391_v52 = vrot.slane %v10315_v59, 6  ;;  %v14285_v59 = vrot.slane %v14216_v26, 1 }
 0x77e   : > { %14260 = vst [vmem:[#allocation44_spill] sm:$0xff] %v11772_v44 }
 0x77f   : > { %4877 = vrot.lane.b32.xlu2 %v11628_v36, %s6861_s26 }
 0x780   : > { %v11779_v17 = vpop.permute.xlu1 %4174 }
 0x781   : > { %14261 = vst [vmem:[#allocation98_spill] sm:$0xff] %v11779_v17  ;;  %v4399_v17 = vrot.slane %v14222_v61, 6 }
 0x783   : > { %5205 = vrot.lane.b32.xlu0 %v11742_v19, %s6862_s27  ;;  %v14271_v19 = vrot.slane %v14236_v13, 2 }
 0x784   : > { %4464 = vrot.lane.b32.xlu1 %v4401_v22, %s6862_s27  ;;  %v11781_v9 = vpop.permute.xlu2 %4296 }
 0x785   : > { %v11783_v49 = vpop.permute.xlu0 %4172 }
 0x786   : > { %14262 = vst [vmem:[#allocation53_spill] sm:$0xff] %v11783_v49  ;;  %v4396_v49 = vrot.slane %v10354_v25, 6 }
 0x787   : > { %4845 = vrot.lane.b32.xlu2 %v14264_v32, %s6860_s23 }
 0x788   : > { %v11792_v36 = vpop.permute.xlu1 %4180  ;;  %v4398_v32 = vsel %vm14268_vm15, %v4396_v49, %v11799_v41  ;;  %vm14318_vm15 = vmmov %vm14298_vm9 }
 0x789   : > { %14265 = vst [vmem:[#allocation84_spill] sm:$0xff] %v11792_v36 }
 0x78b   : > { %4482 = vrot.lane.b32.xlu0 %v4416_v56, %s6862_s27 }
 0x78c   : > { %4839 = vrot.lane.b32.xlu1 %v14263_v37, %s6860_s23  ;;  %v11794_v22 = vpop.permute.xlu2 %4302  ;;  %v4400_v37 = vsel %vm14267_vm14, %v11799_v41, %v4399_v17  ;;  %v14272_v17 = vrot.slane %v14222_v61, 1  ;;  %vm14308_vm14 = vmmov %vm14241_vm0 }
 0x78d   : > { %v11796_v44 = vpop.permute.xlu0 %4178 }
 0x78e   : > { %14266 = vst [vmem:[#allocation47_spill] sm:$0xff] %v11796_v44 }
 0x78f   : > { %5203 = vrot.lane.b32.xlu2 %v4412_v1, %s6862_s27  ;;  %v14273_v1 = vrot.slane %v14231_v60, 2 }
 0x790   : > { %v11810_v56 = vpop.permute.xlu1 %4282 }
 0x791   : > { %14269 = vst [vmem:[#allocation48_spill] sm:$0xff] %v11810_v56 }
 0x793   : > { %4460 = vrot.lane.b32.xlu0 %v4398_v32, %s6862_s27 }
 0x794   : > { %4462 = vrot.lane.b32.xlu1 %v4400_v37, %s6862_s27  ;;  %v11812_v36 = vpop.permute.xlu2 %4308 }
 0x795   : > { %v11814_v44 = vpop.permute.xlu0 %4280 }
 0x796   : > { %14270 = vst [vmem:[#allocation49_spill] sm:$0xff] %v11814_v44  ;;  %v11832_v44 = vrot.slane %v10322_v23, 6 }
 0x797   : > { %4837 = vrot.lane.b32.xlu2 %v14272_v17, %s6860_s23  ;;  %v14276_v17 = vrot.slane %v14236_v13, 3 }
 0x798   : > { %v4393_v23 = vsel %vm14280_vm3, %v4391_v52, %v11832_v44 }
 0x79b   : > { %5165 = vrot.lane.b32.xlu0 %v14273_v1, %s6861_s26 }
 0x79c   : > { %5169 = vrot.lane.b32.xlu1 %v14271_v19, %s6861_s26  ;;  %v11827_v32 = vpop.permute.xlu2 %4314  ;;  %v4395_v19 = vsel %vm14241_vm0, %v11832_v44, %v4394_v51  ;;  %v14281_v51 = vrot.slane %v14234_v21, 3  ;;  %vm14325_vm0 = vmmov %vm14298_vm9 }
 0x79d   : > { %v11825_v37 = vpop.permute.xlu1 %4288  ;;  %v11829_v56 = vpop.permute.xlu0 %4286  ;;  %vm14326_vm3 = vmmov %vm14325_vm0 }
 0x79e   : > { %14274 = vst [vmem:[#allocation118_spill] sm:$0xff] %v11825_v37 }
 0x79f   : > { %14275 = vst [vmem:[#allocation57_spill] sm:$0xff] %v11829_v56  ;;  %4456 = vrot.lane.b32.xlu2 %v4395_v19, %s6862_s27 }
 0x7a3   : > { %5454 = vrot.lane.b32.xlu0 %v14276_v17, %s6862_s27 }
 0x7a4   : > { %4458 = vrot.lane.b32.xlu1 %v4396_v49, %s6862_s27  ;;  %v11844_v37 = vpop.permute.xlu2 %4320  ;;  %v4578_v49 = vsel %vm3968_vm11, %v10532_v10, %v11660_v2 }
 0x7a5   : > { %v11842_v1 = vpop.permute.xlu1 %4294  ;;  %14278 = vst [vmem:[#allocation103_spill] sm:$0xff] %v11844_v37  ;;  %v11846_v56 = vpop.permute.xlu0 %4292 }
 0x7a6   : > { %14277 = vst [vmem:[#allocation51_spill] sm:$0xff] %v11842_v1 }
 0x7a7   : > { %14279 = vst [vmem:[#allocation52_spill] sm:$0xff] %v11846_v56  ;;  %5452 = vrot.lane.b32.xlu2 %v14281_v51, %s6862_s27  ;;  %v4386_v56 = vrot.slane %v10276_v8, 6  ;;  %v14290_v8 = vrot.slane %v14231_v60, 3 }
 0x7ab   : > { %4875 = vrot.lane.b32.xlu0 %v11603_v38, %s6861_s26  ;;  %v14284_v38 = vrot.slane %v14228_v16, 2 }
 0x7ac   : > { %4454 = vrot.lane.b32.xlu1 %v4393_v23, %s6862_s27  ;;  %v11862_v17 = vpop.permute.xlu2 %4326 }
 0x7ad   : > { %v11860_v19 = vpop.permute.xlu1 %4300  ;;  %14282 = vst [vmem:[#allocation59_spill] sm:$0xff] %v11862_v17  ;;  %v11866_v37 = vsel %vm3242_vm10, %v4578_v49, %v11862_v17  ;;  %v11868_v23 = vpop.permute.xlu0 %4298  ;;  %v14286_v49 = vrot.slane %v14222_v61, 2  ;;  %v4389_v17 = vrot.slane %v14207_v15, 6 }
 0x7ae   : > { %14283 = vst [vmem:[#allocation55_spill] sm:$0xff] %v11866_v37 }
 0x7af   : > { %4873 = vrot.lane.b32.xlu2 %v11560_v48, %s6861_s26 }
 0x7b3   : > { %5163 = vrot.lane.b32.xlu0 %v14284_v38, %s6861_s26  ;;  %v11891_v38 = vrot.slane %v14152_v5, 6 }
 0x7b4   : > { %5201 = vrot.lane.b32.xlu1 %v11705_v39, %s6862_s27  ;;  %v4471_v51 = vpop.permute.xlu2 %4470 }
 0x7b5   : > { %v4305_v10 = vpop.permute.xlu0 %4304 }
 0x7b6   : > { %v4307_v2 = vpop.permute.xlu1 %4306 }
 0x7b7   : > { %5161 = vrot.lane.b32.xlu2 %v14286_v49, %s6861_s26 }
 0x7bb   : > { %4452 = vrot.lane.b32.xlu0 %v4391_v52, %s6862_s27  ;;  %v4388_v52 = vsel %vm14288_vm8, %v4386_v56, %v11891_v38  ;;  %vm14335_vm8 = vmmov %vm14287_vm7 }
 0x7bc   : > { %4835 = vrot.lane.b32.xlu1 %v14285_v59, %s6860_s23  ;;  %v11886_v48 = vpop.permute.xlu2 %4466  ;;  %v4390_v59 = vsel %vm14287_vm7, %v11891_v38, %v4389_v17  ;;  %v14291_v17 = vrot.slane %v14216_v26, 2 }
 0x7bd   : > { %v11888_v37 = vpop.permute.xlu0 %4310 }
 0x7be   : > { %v11884_v39 = vpop.permute.xlu1 %4312 }
 0x7bf   : > { %4446 = vrot.lane.b32.xlu2 %v4386_v56, %s6862_s27  ;;  %v4577_v56 = vsel %vm3968_vm11, %v14236_v13, %v11735_v35 }
 0x7c3   : > { %4448 = vrot.lane.b32.xlu0 %v4388_v52, %s6862_s27 }
 0x7c4   : > { %4450 = vrot.lane.b32.xlu1 %v4390_v59, %s6862_s27  ;;  %v11904_v5 = vpop.permute.xlu2 %4480 }
 0x7c5   : > { %v11906_v1 = vpop.permute.xlu0 %4316 }
 0x7c6   : > { %v11902_v49 = vpop.permute.xlu1 %4318 }
 0x7c7   : > { %14289 = vst [vmem:[#allocation83_spill] sm:$0xff] %v11902_v49  ;;  %5159 = vrot.lane.b32.xlu2 %v14291_v17, %s6861_s26  ;;  %v4576_v49 = vsel %vm3968_vm11, %v14193_v53, %v11739_v34  ;;  %v4568_v53 = vsel %vm3968_vm11, %v14228_v16, %v11680_v4  ;;  %v14295_v34 = vrot.slane %v14207_v15, 1  ;;  %v4567_v4 = vsel %vm3968_vm11, %v14174_v62, %v11684_v58 }
 0x7cb   : > { %5199 = vrot.lane.b32.xlu0 %v11709_v7, %s6862_s27  ;;  %v4566_v7 = vsel %vm3968_vm11, %v10392_v42, %v11552_v33 }
 0x7cc   : > { %5450 = vrot.lane.b32.xlu1 %v14290_v8, %s6862_s27  ;;  %v11919_v52 = vpop.permute.xlu2 %4484  ;;  %v4605_v35 = vsel %vm3242_vm10, %v4566_v7, %v11794_v22 }
 0x7cd   : > { %v11927_v55 = vpop.permute.xlu0 %4322  ;;  %v4644_v33 = vsel %vm4017_vm6, %v4605_v35, %v4471_v51 }
 0x7ce   : > { %v4325_v59 = vpop.permute.xlu1 %4324  ;;  %14293 = vst [vmem:[#allocation124_spill] sm:$0xff] %v11927_v55  ;;  %v11931_v17 = vsel %vm3242_vm10, %v4576_v49, %v11927_v55  ;;  %v14296_v49 = vld [vmem:[#allocation110_spill] sm:$0xff] }
 0x7cf   : > { %v11925_v8 = vsel %vm3242_vm10, %v4577_v56, %v4325_v59  ;;  %14294 = vst [vmem:[#allocation69_spill] sm:$0xff] %v11931_v17  ;;  %4869 = vrot.lane.b32.xlu2 %v11459_v28, %s6861_s26  ;;  %v4929_v42 = vsel %vm3242_vm10, %v14296_v49, %v11794_v22  ;;  %v14297_v17 = vld [vmem:[#allocation79_spill] sm:$0xff]  ;;  %v4730_v49 = vrot.slane %v4644_v33, 4 }
 0x7d0   : > { %14292 = vst [vmem:[#allocation94_spill] sm:$0xff] %v11925_v8  ;;  %v4968_v59 = vsel %vm4017_vm6, %v4929_v42, %v4471_v51  ;;  %v5253_v22 = vsel %vm4017_vm6, %v14297_v17, %v4471_v51 }
 0x7d1   : > { %v5054_v42 = vrot.slane %v4968_v59, 3  ;;  %v14300_v59 = vrot.slane %v14222_v61, 3 }
 0x7d3   : > { %4833 = vrot.lane.b32.xlu0 %v14295_v34, %s6860_s23 }
 0x7d4   : > { %4871 = vrot.lane.b32.xlu1 %v11511_v6, %s6861_s26  ;;  %v4607_v6 = vsel %vm3242_vm10, %v4568_v53, %v4307_v2  ;;  %v4477_v56 = vpop.permute.xlu2 %4476  ;;  %v4606_v2 = vsel %vm3242_vm10, %v4567_v4, %v4305_v10  ;;  %v4930_v53 = vsel %vm3242_vm10, %v11280_v27, %v4305_v10  ;;  %v5339_v4 = vrot.slane %v5253_v22, 2 }
 0x7d5   : > { %v4473_v34 = vpop.permute.xlu0 %4472 }
 0x7d6   : > { %v11953_v28 = vpop.permute.xlu1 %4474  ;;  %v4645_v8 = vsel %vm4017_vm6, %v4606_v2, %v4473_v34  ;;  %v11968_v62 = vsel %vm4017_vm6, %v4930_v53, %v4473_v34  ;;  %v11972_v58 = vsel %vm4017_vm6, %v11295_v46, %v4473_v34  ;;  %v14299_v46 = vrot.slane %v14228_v16, 3 }
 0x7d7   : > { %v4646_v7 = vsel %vm4017_vm6, %v4607_v6, %v11953_v28  ;;  %v4731_v6 = vrot.slane %v4645_v8, 4  ;;  %v5055_v51 = vrot.slane %v11968_v62, 3  ;;  %v13537_v17 = vrot.slane %v11972_v58, 2  ;;  %5446 = vrot.lane.b32.xlu2 %v14300_v59, %s6862_s27  ;;  %v14328_v62 = vld [vmem:[#allocation35_spill] sm:$0xff] }
 0x7d8   : > { %v4733_v35 = vrot.slane %v4646_v7, 4  ;;  %v4569_v53 = vsel %vm3968_vm11, %v10427_v31, %v11597_v50  ;;  %v4932_v31 = vsel %vm3242_vm10, %v11265_v11, %v11812_v36 }
 0x7d9   : > { %v4732_v10 = vsel %vm858_vm4, %v4730_v49, %v4731_v6  ;;  %v11981_v33 = vsel %vm14298_vm9, %v5054_v42, %v5055_v51  ;;  %v11989_v8 = vsel %vm636_vm2, %v5339_v4, %v13537_v17  ;;  %v4564_v49 = vsel %vm3968_vm11, %v10361_v24, %v11663_v14  ;;  %vm14338_vm9 = vmmov %vm14287_vm7 }
 0x7da   : > { %v4734_v27 = vsel %vm858_vm4, %v4731_v6, %v4733_v35  ;;  %v4571_v35 = vsel %vm3968_vm11, %v14231_v60, %v11698_v29  ;;  %v4608_v42 = vsel %vm3242_vm10, %v4569_v53, %v11812_v36  ;;  %v4570_v24 = vsel %vm3968_vm11, %v10432_v43, %v11702_v20  ;;  %v14301_v43 = vld [vmem:[#allocation129_spill] sm:$0xff] }
 0x7db   : > { %5197 = vrot.lane.b32.xlu0 %v11799_v41, %s6862_s27  ;;  %6130 = vmatpush.xpose.msrb.mxu3 %v4734_v27  ;;  %v4565_v41 = vsel %vm3968_vm11, %v14222_v61, %v11658_v54  ;;  %v4610_v6 = vsel %vm3242_vm10, %v4571_v35, %v11884_v39  ;;  %v4647_v54 = vsel %vm4017_vm6, %v4608_v42, %v4477_v56  ;;  %v14303_v4 = vrot.slane %v14207_v15, 2 }
 0x7dc   : > { %5448 = vrot.lane.b32.xlu1 %v14299_v46, %s6862_s27  ;;  %v11996_v34 = vpop.permute.xlu2 %4877  ;;  %v4649_v50 = vsel %vm4017_vm6, %v4610_v6, %v11904_v5  ;;  %v4604_v14 = vsel %vm3242_vm10, %v4565_v41, %v11860_v19  ;;  %v4603_v29 = vsel %vm3242_vm10, %v4564_v49, %v11868_v23  ;;  %v4971_v11 = vsel %vm4017_vm6, %v4932_v31, %v4477_v56  ;;  %v14304_v41 = vld [vmem:[#allocation100_spill] sm:$0xff] }
 0x7dd   : > { %v4842_v22 = vpop.permute.xlu0 %4841  ;;  %v12038_v36 = vsel %vm4017_vm6, %v4603_v29, %v11886_v48  ;;  %v4609_v39 = vsel %vm3242_vm10, %v4570_v24, %v11888_v37  ;;  %v4933_v20 = vsel %vm3242_vm10, %v14301_v43, %v11888_v37  ;;  %v14302_v19 = vrot.slane %v14207_v15, 3 }
 0x7de   : > { %v4880_v7 = vpop.permute.xlu1 %4879  ;;  %v12000_v2 = vsel %vm3968_vm11, %v14231_v60, %v4842_v22  ;;  %v4735_v27 = vrot.slane %v4647_v54, 4  ;;  %v5256_v46 = vsel %vm4017_vm6, %v11290_v18, %v4477_v56  ;;  %v5059_v22 = vrot.slane %v4971_v11, 3 }
 0x7df   : > { %6131 = vmatpush.xpose.msrb.mxu3 %v4732_v10  ;;  %v4934_v60 = vsel %vm3242_vm10, %v12000_v2, %v4880_v7  ;;  %5442 = vrot.lane.b32.xlu2 %v14302_v19, %s6862_s27  ;;  %v4738_v10 = vrot.slane %v4649_v50, 4  ;;  %v4726_v56 = vrot.slane %v12038_v36, 4  ;;  %v5344_v24 = vrot.slane %v5256_v46, 2 }
 0x7e0   : > { %v4973_v59 = vsel %vm4017_vm6, %v4934_v60, %v11904_v5  ;;  %v4441_v60 = vrot.slane %v10676_v12, 6  ;;  %v4274_v46 = vrot.slane %v10683_v0, 5 }
 0x7e1   : > { %v5062_v50 = vrot.slane %v4973_v59, 3  ;;  %v14309_v59 = vld [vmem:[#allocation128_spill] sm:$0xff] }
 0x7e3   : > { %5157 = vrot.lane.b32.xlu0 %v14303_v4, %s6861_s26 }
 0x7e4   : > { %5195 = vrot.lane.b32.xlu1 %v11832_v44, %s6862_s27  ;;  %v12052_v44 = vrot.slane %v10683_v0, 6  ;;  %v12058_v7 = vpop.permute.xlu2 %4845 }
 0x7e5   : > { %v12066_v42 = vpop.permute.xlu0 %4468 }
 0x7e6   : > { %v4479_v37 = vpop.permute.xlu1 %4478  ;;  %v4643_v5 = vsel %vm4017_vm6, %v4604_v14, %v12066_v42  ;;  %v4443_v19 = vsel %vm14308_vm14, %v4441_v60, %v12052_v44  ;;  %vm14363_vm14 = vmmov %vm14287_vm7 }
 0x7e7   : > { %v4648_v53 = vsel %vm4017_vm6, %v4609_v39, %v4479_v37  ;;  %v4972_v35 = vsel %vm4017_vm6, %v4933_v20, %v4479_v37  ;;  %v12064_v49 = vsel %vm4017_vm6, %v14304_v41, %v4479_v37  ;;  %v4728_v54 = vrot.slane %v4643_v5, 4  ;;  %4514 = vrot.lane.b32.xlu2 %v4443_v19, %s6862_s27  ;;  %v14311_v41 = vld [vmem:[#allocation164_spill] sm:$0xff] }
 0x7e8   : > { %v4736_v6 = vrot.slane %v4648_v53, 4  ;;  %v5060_v31 = vrot.slane %v4972_v35, 3  ;;  %v5345_v18 = vrot.slane %v12064_v49, 2  ;;  %v14307_v20 = vrot.slane %v14216_v26, 3  ;;  %v14344_v49 = vld [vmem:[#allocation149_spill] sm:$0xff] }
 0x7e9   : > { %v4729_v14 = vsel %vm858_vm4, %v4726_v56, %v4728_v54  ;;  %v4276_v37 = vrot.slane %v14309_v59, 5 }
 0x7ea   : > { %v4737_v29 = vsel %vm858_vm4, %v4735_v27, %v4736_v6  ;;  %v4739_v11 = vsel %vm858_vm4, %v4736_v6, %v4738_v10  ;;  %v12076_v39 = vsel %vm14305_vm12, %v5059_v22, %v5060_v31  ;;  %v12079_v43 = vsel %vm14306_vm13, %v5060_v31, %v5062_v50  ;;  %6132 = vmatpush.xpose.msrb.mxu3 %v4729_v14  ;;  %v14310_v22 = vld [vmem:[#allocation145_spill] sm:$0xff]  ;;  %vm14348_vm12 = vmmov %vm14325_vm0 }
 0x7eb   : > { %4817 = vst [vmem:[#allocation2 + $0x388] sm:$0xff] %v4737_v29  ;;  %v12085_v36 = vsel %vm636_vm2, %v5344_v24, %v5345_v18  ;;  %5193 = vrot.lane.b32.xlu0 %v11891_v38, %s6862_s27  ;;  %v4927_v53 = vsel %vm3242_vm10, %v14310_v22, %v11868_v23  ;;  %v12111_v38 = vsel %vm4017_vm6, %v14311_v41, %v11886_v48  ;;  %v14313_v23 = vrot.slane %v14309_v59, 2  ;;  %v14316_v29 = vld [vmem:[#allocation165_spill] sm:$0xff]  ;;  %vm14359_vm13 = vmmov %vm14325_vm0 }
 0x7ec   : > { %4818 = vst [vmem:[#allocation2 + $0x3c0] sm:$0xff] %v4739_v11  ;;  %5444 = vrot.lane.b32.xlu1 %v14307_v20, %s6862_s27  ;;  %v12097_v10 = vpop.permute.xlu2 %5203  ;;  %v12106_v35 = vsel %vm4017_vm6, %v4927_v53, %v11886_v48  ;;  %v4563_v6 = vsel %vm3968_vm11, %v10354_v25, %v11500_v63  ;;  %v4277_v5 = vsel %vm969_vm5, %v4274_v46, %v4276_v37  ;;  %v14314_v48 = vrot.slane %v14309_v59, 1  ;;  %v14315_v25 = vld [vmem:[#allocation160_spill] sm:$0xff]  ;;  %v14317_v37 = vld [vmem:[#allocation153_spill] sm:$0xff] }
 0x7ed   : > { %v4844_v27 = vpop.permute.xlu0 %4843  ;;  %v4602_v50 = vsel %vm3242_vm10, %v4563_v6, %v11781_v9  ;;  %v4926_v63 = vsel %vm3242_vm10, %v14315_v25, %v11781_v9  ;;  %v13538_v54 = vrot.slane %v12106_v35, 3  ;;  %v13534_v24 = vrot.slane %v12111_v38, 2 }
 0x7ee   : > { %v5168_v4 = vpop.permute.xlu1 %5167  ;;  %v12118_v31 = vsel %vm3968_vm11, %v14234_v21, %v4844_v27  ;;  %v5260_v11 = vsel %vm4017_vm6, %v14316_v29, %v11919_v52 }
 0x7ef   : > { %14312 = vst [vmem:[#allocation70_spill] sm:$0xff] %v12118_v31  ;;  %4348 = vrot.lane.b32.xlu2 %v4277_v5, %s6861_s26  ;;  %v12146_v9 = vsel %vm3242_vm10, %v12118_v31, %v5168_v4  ;;  %v14371_v31 = vld [vmem:[#allocation157_spill] sm:$0xff] }
 0x7f3   : > { %4855 = vrot.lane.b32.xlu0 %v14314_v48, %s6860_s23  ;;  %v5350_v48 = vrot.slane %v5260_v11, 2 }
 0x7f4   : > { %5179 = vrot.lane.b32.xlu1 %v14313_v23, %s6861_s26  ;;  %v12138_v20 = vpop.permute.xlu2 %4837 }
 0x7f5   : > { %v5206_v53 = vpop.permute.xlu0 %5205 }
 0x7f6   : > { %v4465_v14 = vpop.permute.xlu1 %4464  ;;  %v5261_v5 = vsel %vm4017_vm6, %v12146_v9, %v5206_v53 }
 0x7f7   : > { %v4641_v19 = vsel %vm4017_vm6, %v4602_v50, %v4465_v14  ;;  %v4965_v27 = vsel %vm4017_vm6, %v4926_v63, %v4465_v14  ;;  %v5250_v22 = vsel %vm4017_vm6, %v14317_v37, %v4465_v14  ;;  %v5352_v25 = vrot.slane %v5261_v5, 2  ;;  %4891 = vrot.lane.b32.xlu2 %v4274_v46, %s6861_s26  ;;  %v14323_v5 = vld [vmem:[#allocation172_spill] sm:$0xff] }
 0x7f8   : > { %v4725_v41 = vrot.slane %v4641_v19, 4  ;;  %v5049_v6 = vrot.slane %v4965_v27, 3  ;;  %v5334_v23 = vrot.slane %v5250_v22, 2  ;;  %v4273_v50 = vrot.slane %v10676_v12, 5 }
 0x7f9   : > { %v4573_v63 = vsel %vm3968_vm11, %v10467_v40, %v11725_v57  ;;  %v5353_v19 = vsel %vm636_vm2, %v5350_v48, %v5352_v25  ;;  %v14319_v57 = vld [vmem:[#allocation171_spill] sm:$0xff]  ;;  %v4935_v25 = vsel %vm3242_vm10, %v14323_v5, %v11827_v32 }
 0x7fa   : > { %v4727_v29 = vsel %vm858_vm4, %v4725_v41, %v4726_v56  ;;  %v12158_v4 = vsel %vm14318_vm15, %v5049_v6, %v13538_v54  ;;  %v12163_v14 = vsel %vm636_vm2, %v5334_v23, %v13534_v24  ;;  %v4612_v11 = vsel %vm3242_vm10, %v4573_v63, %v11906_v1  ;;  %6170 = vmatpush.xpose.msrb.mxu2 %v5353_v19  ;;  %v14322_v6 = vld [vmem:[#allocation8_spill] sm:$0xff]  ;;  %vm14365_vm15 = vmmov %vm14287_vm7 }
 0x7fb   : > { %v4275_v40 = vsel %vm969_vm5, %v4273_v50, %v4274_v46  ;;  %6133 = vmatpush.xpose.msrb.mxu3 %v4727_v29  ;;  %v4936_v56 = vsel %vm3242_vm10, %v14319_v57, %v11906_v1  ;;  %v12176_v27 = vsel %vm4017_vm6, %v4612_v11, %v11919_v52  ;;  %5215 = vrot.lane.b32.xlu0 %v12052_v44, %s6862_s27  ;;  %v4268_v41 = vrot.slane %v10637_v47, 5 }
 0x7fc   : > { %14320 = vst [vmem:[#allocation102_spill] sm:$0xff] %v12176_v27  ;;  %4346 = vrot.lane.b32.xlu1 %v4275_v40, %s6861_s26  ;;  %v12181_v37 = vsel %vm4017_vm6, %v4936_v56, %v11919_v52  ;;  %v4572_v1 = vsel %vm3968_vm11, %v10462_v45, %v11622_v3  ;;  %v12189_v53 = vpop.permute.xlu2 %4456  ;;  %v12193_v23 = vrot.slane %v14322_v6, 5  ;;  %v4444_v52 = vrot.slane %v14309_v59, 6 }
 0x7fd   : > { %14321 = vst [vmem:[#allocation56_spill] sm:$0xff] %v12181_v37  ;;  %v4611_v46 = vsel %vm3242_vm10, %v4572_v1, %v11827_v32  ;;  %v13536_v63 = vrot.slane %v12176_v27, 4  ;;  %v4483_v3 = vpop.permute.xlu0 %4482  ;;  %v13535_v29 = vrot.slane %v12181_v37, 3  ;;  %v14324_v1 = vld [vmem:[#allocation170_spill] sm:$0xff] }
 0x7fe   : > { %v4840_v22 = vpop.permute.xlu1 %4839  ;;  %v4650_v19 = vsel %vm4017_vm6, %v4611_v46, %v4483_v3  ;;  %v4974_v40 = vsel %vm4017_vm6, %v4935_v25, %v4483_v3 }
 0x7ff   : > { %v12204_v45 = vsel %vm3968_vm11, %v14228_v16, %v4840_v22  ;;  %v4740_v57 = vrot.slane %v4650_v19, 4  ;;  %v5064_v56 = vrot.slane %v4974_v40, 3  ;;  %v5259_v16 = vsel %vm4017_vm6, %v14324_v1, %v4483_v3 }
 0x800   : > { %v4931_v11 = vsel %vm3242_vm10, %v12204_v45, %v11996_v34  ;;  %v5349_v5 = vrot.slane %v5259_v16, 2  ;;  %v14327_v3 = vrot.slane %v14309_v59, 3  ;;  %v4562_v19 = vsel %vm3968_vm11, %v14216_v26, %v11642_v30 }
 0x801   : > { %v4970_v32 = vsel %vm4017_vm6, %v4931_v11, %v11953_v28  ;;  %v4742_v24 = vsel %vm858_vm4, %v4740_v57, %v13536_v63  ;;  %v5066_v34 = vsel %vm14325_vm0, %v5064_v56, %v13535_v29  ;;  %v4270_v28 = vsel %vm969_vm5, %v4268_v41, %v12193_v23 }
 0x802   : > { %v5057_v22 = vrot.slane %v4970_v32, 3  ;;  %4819 = vst [vmem:[#allocation2 + $0x3f8] sm:$0xff] %v4742_v24  ;;  %v5351_v25 = vsel %vm636_vm2, %v5349_v5, %v5350_v48  ;;  %v4445_v11 = vsel %vm14287_vm7, %v12052_v44, %v4444_v52  ;;  %4340 = vrot.lane.b32.xlu2 %v4270_v28, %s6861_s26  ;;  %v14330_v48 = vld [vmem:[#allocation51_spill] sm:$0xff]  ;;  %v14331_v44 = vld [vmem:[#allocation52_spill] sm:$0xff]  ;;  %v12256_v16 = vrot.slane %v14322_v6, 6  ;;  %vm14388_vm7 = vmmov %vm14325_vm0 }
 0x803   : > { %4516 = vrot.lane.b32.xlu0 %v4445_v11, %s6862_s27  ;;  %v4601_v40 = vsel %vm3242_vm10, %v4562_v19, %v14330_v48  ;;  %5141 = vst [vmem:[#allocation2 + $0x390] sm:$0xff] %v5066_v34  ;;  %6171 = vmatpush.xpose.msrb.mxu2 %v5351_v25  ;;  %v14332_v28 = vld [vmem:[#allocation3_spill] sm:$0xff]  ;;  %v14333_v11 = vld [vmem:[#allocation169_spill] sm:$0xff] }
 0x804   : > { %v12229_v46 = vsel %vm14326_vm3, %v5055_v51, %v5057_v22  ;;  %5464 = vrot.lane.b32.xlu1 %v14327_v3, %s6862_s27  ;;  %v14329_v51 = vld [vmem:[#allocation92_spill] sm:$0xff]  ;;  %v5453_v57 = vpop.permute.xlu2 %5452  ;;  %v4439_v3 = vrot.slane %v14332_v28, 6  ;;  %v14334_v19 = vrot.slane %v14333_v11, 1  ;;  %v14339_v11 = vld [vmem:[#allocation10_spill] sm:$0xff]  ;;  %vm14380_vm3 = vmmov %vm14325_vm0 }
 0x805   : > { %v4561_v24 = vsel %vm3968_vm11, %v14329_v51, %v14328_v62  ;;  %v5483_v56 = vsel %vm4017_vm6, %v12146_v9, %v5453_v57  ;;  %v4461_v1 = vpop.permute.xlu0 %4460 }
 0x806   : > { %v12247_v32 = vpop.permute.xlu1 %4462  ;;  %v4600_v52 = vsel %vm3242_vm10, %v4561_v24, %v14331_v44  ;;  %v5554_v5 = vrot.slane %v5483_v56, 1  ;;  %v4440_v9 = vsel %vm14335_vm8, %v12256_v16, %v4439_v3  ;;  %v14336_v56 = vld [vmem:[#allocation91_spill] sm:$0xff] }
 0x807   : > { %v4640_v30 = vsel %vm4017_vm6, %v4601_v40, %v12247_v32  ;;  %v4639_v34 = vsel %vm4017_vm6, %v4600_v52, %v4461_v1 }
 0x808   : > { %v4723_v22 = vrot.slane %v4640_v30, 4  ;;  %v4721_v25 = vrot.slane %v4639_v34, 4  ;;  %v12263_v62 = vsel %vm525_vm1, %v14334_v19, %v5554_v5  ;;  %v4436_v30 = vrot.slane %v10637_v47, 6  ;;  %v14337_v34 = vld [vmem:[#allocation136_spill] sm:$0xff]  ;;  %v14340_v19 = vld [vmem:[#allocation77_spill] sm:$0xff] }
 0x80a   : > { %v4724_v51 = vsel %vm858_vm4, %v4721_v25, %v4723_v22  ;;  %4510 = vrot.lane.b32.xlu2 %v4440_v9, %s6862_s27  ;;  %v4438_v3 = vsel %vm14338_vm9, %v4436_v30, %v12256_v16  ;;  %v14341_v9 = vld [vmem:[#allocation43_spill] sm:$0xff]  ;;  %vm14393_vm9 = vmmov %vm14335_vm8 }
 0x80b   : > { %6134 = vmatpush.xpose.msrb.mxu3 %v4724_v51  ;;  %4512 = vrot.lane.b32.xlu0 %v4441_v60, %s6862_s27  ;;  %v4924_v60 = vsel %vm3242_vm10, %v14336_v56, %v14331_v44  ;;  %v14343_v56 = vld [vmem:[#allocation144_spill] sm:$0xff] }
 0x80c   : > { %4344 = vrot.lane.b32.xlu1 %v4273_v50, %s6861_s26  ;;  %v12275_v48 = vpop.permute.xlu2 %4873  ;;  %v4271_v50 = vrot.slane %v14332_v28, 5  ;;  %v12290_v5 = vsel %vm4017_vm6, %v4924_v60, %v4461_v1  ;;  %v4266_v60 = vrot.slane %v14343_v56, 5 }
 0x80d   : > { %v5166_v40 = vpop.permute.xlu0 %5165 }
 0x80e   : > { %v5170_v24 = vpop.permute.xlu1 %5169  ;;  %v12279_v57 = vsel %vm3242_vm10, %v12000_v2, %v5166_v40  ;;  %v12294_v2 = vsel %vm4017_vm6, %v14337_v34, %v4461_v1  ;;  %v4272_v44 = vsel %vm969_vm5, %v12193_v23, %v4271_v50  ;;  %v14342_v40 = vld [vmem:[#allocation76_spill] sm:$0xff]  ;;  %v12321_v50 = vsel %vm3968_vm11, %v14236_v13, %v12058_v7 }
 0x80f   : > { %v5258_v52 = vsel %vm4017_vm6, %v12279_v57, %v12097_v10  ;;  %v4560_v10 = vsel %vm3968_vm11, %v14340_v19, %v14339_v11  ;;  %14345 = vst [vmem:[#allocation64_spill] sm:$0xff] %v12321_v50  ;;  %v12329_v11 = vsel %vm3242_vm10, %v12321_v50, %v5170_v24 }
 0x810   : > { %v5347_v22 = vrot.slane %v5258_v52, 2  ;;  %v4599_v1 = vsel %vm3242_vm10, %v4560_v10, %v14341_v9  ;;  %v12312_v52 = vrot.slane %v14342_v40, 5  ;;  %14346 = vst [vmem:[#allocation96_spill] sm:$0xff] %v12329_v11 }
 0x812   : > { %v5348_v51 = vsel %vm636_vm2, %v5345_v18, %v5347_v22  ;;  %4506 = vrot.lane.b32.xlu2 %v4436_v30, %s6862_s27  ;;  %v4923_v18 = vsel %vm3242_vm10, %v14344_v49, %v14341_v9  ;;  %v13540_v22 = vrot.slane %v12290_v5, 3  ;;  %v13539_v30 = vrot.slane %v12294_v2, 2 }
 0x813   : > { %4342 = vrot.lane.b32.xlu0 %v4272_v44, %s6861_s26  ;;  %6172 = vmatpush.xpose.msrb.mxu2 %v5348_v51  ;;  %v14347_v44 = vld [vmem:[#allocation155_spill] sm:$0xff] }
 0x814   : > { %4508 = vrot.lane.b32.xlu1 %v4438_v3, %s6862_s27  ;;  %v12325_v3 = vpop.permute.xlu2 %5161 }
 0x815   : > { %v5455_v9 = vpop.permute.xlu0 %5454 }
 0x816   : > { %v4459_v34 = vpop.permute.xlu1 %4458  ;;  %v5484_v17 = vsel %vm4017_vm6, %v12329_v11, %v5455_v9 }
 0x817   : > { %v4638_v19 = vsel %vm4017_vm6, %v4599_v1, %v4459_v34  ;;  %v4962_v10 = vsel %vm4017_vm6, %v4923_v18, %v4459_v34  ;;  %v5247_v7 = vsel %vm4017_vm6, %v14347_v44, %v4459_v34  ;;  %v5559_v54 = vrot.slane %v5484_v17, 1  ;;  %6173 = vmatpush.xpose.msrb.mxu2 %v12085_v36  ;;  %v14349_v18 = vld [vmem:[#allocation21_spill] sm:$0xff]  ;;  %v14353_v36 = vld [vmem:[#allocation168_spill] sm:$0xff] }
 0x818   : > { %v4720_v49 = vrot.slane %v4638_v19, 4  ;;  %v5044_v29 = vrot.slane %v4962_v10, 3  ;;  %v5329_v63 = vrot.slane %v5247_v7, 2  ;;  %v4559_v34 = vsel %vm3968_vm11, %v14207_v15, %v14349_v18  ;;  %v14350_v19 = vld [vmem:[#allocation16_spill] sm:$0xff]  ;;  %v14352_v10 = vld [vmem:[#allocation118_spill] sm:$0xff]  ;;  %v14354_v44 = vld [vmem:[#allocation117_spill] sm:$0xff] }
 0x819   : > { %v14351_v17 = vrot.slane %v14350_v19, 1  ;;  %v4558_v7 = vsel %vm3968_vm11, %v14354_v44, %v14353_v36  ;;  %v5856_v19 = vld [vmem:[#allocation2 + $0x330] sm:$0xff] }
 0x81a   : > { %v4722_v51 = vsel %vm858_vm4, %v4720_v49, %v4721_v25  ;;  %v12341_v24 = vsel %vm14348_vm12, %v5044_v29, %v13540_v22  ;;  %v12346_v1 = vsel %vm636_vm2, %v5329_v63, %v13539_v30  ;;  %v4598_v29 = vsel %vm3242_vm10, %v4559_v34, %v14352_v10  ;;  %v14356_v49 = vld [vmem:[#allocation57_spill] sm:$0xff]  ;;  %vm14398_vm12 = vmmov %vm14325_vm0 }
 0x81b   : > { %v5560_v25 = vsel %vm525_vm1, %v14351_v17, %v5559_v54  ;;  %6135 = vmatpush.xpose.msrb.mxu3 %v4722_v51  ;;  %v4267_v63 = vsel %vm969_vm5, %v12312_v52, %v4266_v60  ;;  %v4637_v9 = vsel %vm4017_vm6, %v4598_v29, %v12189_v53  ;;  %v14355_v54 = vrot.slane %v14332_v28, 1 }
 0x81c   : > { %4338 = vrot.lane.b32.xlu1 %v4268_v41, %s6861_s26  ;;  %6190 = vmatpush.xpose.msrb.mxu1 %v5560_v25  ;;  %v4597_v41 = vsel %vm3242_vm10, %v4558_v7, %v14356_v49  ;;  %v12373_v18 = vpop.permute.xlu2 %4446  ;;  %v12381_v17 = vsel %vm3968_vm11, %v14222_v61, %v12138_v20  ;;  %v4718_v25 = vrot.slane %v4637_v9, 4  ;;  %v14358_v61 = vrot.slane %v12106_v35, 3 }
 0x81d   : > { %4336 = vrot.lane.b32.xlu2 %v4267_v63, %s6861_s26  ;;  %4853 = vrot.lane.b32.xlu0 %v14355_v54, %s6860_s23  ;;  %v4876_v34 = vpop.permute.xlu0 %4875  ;;  %v14357_v63 = vld [vmem:[#allocation104_spill] sm:$0xff]  ;;  %v14360_v9 = vrot.slane %v14343_v56, 1  ;;  %v4434_v35 = vrot.slane %v14343_v56, 6 }
 0x81e   : > { %v4455_v51 = vpop.permute.xlu1 %4454  ;;  %v4928_v29 = vsel %vm3242_vm10, %v12381_v17, %v4876_v34  ;;  %v4263_v36 = vrot.slane %v14357_v63, 5 }
 0x81f   : > { %v12376_v60 = vsel %vm4017_vm6, %v4597_v41, %v4455_v51  ;;  %v4967_v54 = vsel %vm4017_vm6, %v4928_v29, %v12066_v42  ;;  %v14361_v42 = vrot.slane %v14332_v28, 2 }
 0x820   : > { %v4716_v10 = vrot.slane %v12376_v60, 4  ;;  %6191 = vmatpush.xpose.msrb.mxu1 %v5856_v19  ;;  %v5052_v41 = vrot.slane %v4967_v54, 3  ;;  %v4265_v30 = vsel %vm969_vm5, %v4263_v36, %v12312_v52  ;;  %v4431_v54 = vrot.slane %v14357_v63, 6 }
 0x822   : > { %v4719_v7 = vsel %vm858_vm4, %v4716_v10, %v4718_v25  ;;  %v12397_v20 = vsel %vm14359_vm13, %v14358_v61, %v5052_v41  ;;  %v14362_v41 = vld [vmem:[#allocation158_spill] sm:$0xff]  ;;  %vm14407_vm13 = vmmov %vm14335_vm8 }
 0x823   : > { %6136 = vmatpush.xpose.msrb.mxu3 %v4719_v7  ;;  %v4921_v61 = vsel %vm3242_vm10, %v14362_v41, %v14356_v49  ;;  %v14368_v49 = vld [vmem:[#allocation34_spill] sm:$0xff] }
 0x824   : > { %4334 = vrot.lane.b32.xlu1 %v4265_v30, %s6861_s26  ;;  %6192 = vmatpush.xpose.msrb.mxu1 %v12263_v62  ;;  %v12405_v34 = vpop.permute.xlu2 %5159  ;;  %v12408_v30 = vrot.slane %v14342_v40, 6  ;;  %v5842_v62 = vld [vmem:[#allocation2 + $0x2c0] sm:$0xff] }
 0x825   : > { %4851 = vrot.lane.b32.xlu2 %v14360_v9, %s6860_s23  ;;  %5177 = vrot.lane.b32.xlu0 %v14361_v42, %s6861_s26  ;;  %v5164_v19 = vpop.permute.xlu0 %5163  ;;  %v12424_v42 = vsel %vm4017_vm6, %v4921_v61, %v4455_v51 }
 0x826   : > { %v5202_v60 = vpop.permute.xlu1 %5201  ;;  %v12413_v25 = vsel %vm3242_vm10, %v12204_v45, %v5164_v19  ;;  %v4435_v9 = vsel %vm14363_vm14, %v12408_v30, %v4434_v35  ;;  %v14364_v45 = vrot.slane %v11972_v58, 2  ;;  %vm14411_vm14 = vmmov %vm14335_vm8 }
 0x827   : > { %v5255_v29 = vsel %vm4017_vm6, %v12413_v25, %v5202_v60  ;;  %v4433_v60 = vsel %vm14365_vm15, %v4431_v54, %v12408_v30  ;;  %vm14415_vm15 = vmmov %vm14335_vm8 }
 0x828   : > { %6193 = vmatpush.xpose.msrb.mxu1 %v5842_v62  ;;  %v5342_v7 = vrot.slane %v5255_v29, 2  ;;  %v14366_v62 = vld [vmem:[#allocation12_spill] sm:$0xff] }
 0x829   : > { %v14367_v29 = vld [vmem:[#allocation72_spill] sm:$0xff] }
 0x82a   : > { %v5343_v19 = vsel %vm636_vm2, %v14364_v45, %v5342_v7  ;;  %v4557_v22 = vsel %vm3968_vm11, %v14367_v29, %v14366_v62  ;;  %v14369_v7 = vld [vmem:[#allocation140_spill] sm:$0xff] }
 0x82b   : > { %v4596_v35 = vsel %vm3242_vm10, %v4557_v22, %v14368_v49  ;;  %v12442_v45 = vrot.slane %v14369_v7, 5  ;;  %6174 = vmatpush.xpose.msrb.mxu2 %v5343_v19 }
 0x82c   : > { %4504 = vrot.lane.b32.xlu1 %v4435_v9, %s6862_s27  ;;  %v12439_v58 = vpop.permute.xlu2 %4869  ;;  %v14370_v9 = vld [vmem:[#allocation74_spill] sm:$0xff] }
 0x82d   : > { %4500 = vrot.lane.b32.xlu2 %v4431_v54, %s6862_s27  ;;  %4502 = vrot.lane.b32.xlu0 %v4433_v60, %s6862_s27  ;;  %v4920_v37 = vsel %vm3242_vm10, %v14370_v9, %v14368_v49  ;;  %v12450_v54 = vsel %vm4017_vm6, %v14371_v31, %v4455_v51  ;;  %v4453_v60 = vpop.permute.xlu0 %4452  ;;  %v14372_v49 = vld [vmem:[#allocation50_spill] sm:$0xff] }
 0x82e   : > { %v4836_v61 = vpop.permute.xlu1 %4835  ;;  %v4635_v19 = vsel %vm4017_vm6, %v4596_v35, %v4453_v60  ;;  %v4959_v11 = vsel %vm4017_vm6, %v4920_v37, %v4453_v60  ;;  %v5244_v62 = vsel %vm4017_vm6, %v14372_v49, %v4453_v60  ;;  %v13549_v63 = vrot.slane %v12450_v54, 2  ;;  %v14374_v35 = vld [vmem:[#allocation25_spill] sm:$0xff] }
 0x82f   : > { %v12454_v22 = vsel %vm3968_vm11, %v14216_v26, %v4836_v61  ;;  %v4715_v55 = vrot.slane %v4635_v19, 4  ;;  %v5039_v27 = vrot.slane %v4959_v11, 3  ;;  %v5324_v21 = vrot.slane %v5244_v62, 2  ;;  %v14373_v26 = vld [vmem:[#allocation162_spill] sm:$0xff]  ;;  %6175 = vmatpush.xpose.msrb.mxu2 %v11989_v8 }
 0x830   : > { %v4925_v50 = vsel %vm3242_vm10, %v12454_v22, %v12275_v48  ;;  %v4554_v61 = vsel %vm3968_vm11, %v14367_v29, %v14373_v26  ;;  %v12471_v37 = vrot.slane %v14369_v7, 6  ;;  %v14377_v29 = vld [vmem:[#allocation125_spill] sm:$0xff] }
 0x831   : > { %v4964_v51 = vsel %vm4017_vm6, %v4925_v50, %v12247_v32  ;;  %v4593_v60 = vsel %vm3242_vm10, %v4554_v61, %v14374_v35  ;;  %v4717_v32 = vsel %vm858_vm4, %v4715_v55, %v4716_v10  ;;  %v14375_v50 = vrot.slane %v12424_v42, 3  ;;  %v14382_v61 = vld [vmem:[#allocation167_spill] sm:$0xff] }
 0x832   : > { %v5047_v48 = vrot.slane %v4964_v51, 3  ;;  %v14378_v62 = vrot.slane %v14377_v29, 5  ;;  %v4632_v8 = vsel %vm4017_vm6, %v4593_v60, %v12373_v18  ;;  %v14379_v51 = vrot.slane %v12290_v5, 3  ;;  %6137 = vmatpush.xpose.msrb.mxu3 %v4717_v32 }
 0x833   : > { %v12479_v11 = vsel %vm14325_vm0, %v5039_v27, %v14375_v50  ;;  %v12495_v55 = vsel %vm636_vm2, %v5324_v21, %v13549_v63  ;;  %v14381_v27 = vld [vmem:[#allocation33_spill] sm:$0xff]  ;;  %v4555_v60 = vsel %vm3968_vm11, %v14354_v44, %v14382_v61  ;;  %v4917_v5 = vsel %vm3242_vm10, %v14370_v9, %v14374_v35  ;;  %v14383_v21 = vld [vmem:[#allocation48_spill] sm:$0xff]  ;;  %v14385_v44 = vld [vmem:[#allocation126_spill] sm:$0xff] }
 0x834   : > { %14376 = vst [vmem:[#allocation105_spill] sm:$0xff] %v12479_v11  ;;  %v4260_v19 = vsel %vm969_vm5, %v14378_v62, %v12442_v45  ;;  %v12490_v26 = vsel %vm14380_vm3, %v14379_v51, %v5047_v48  ;;  %4332 = vrot.lane.b32.xlu1 %v4263_v36, %s6861_s26  ;;  %v4556_v10 = vsel %vm3968_vm11, %v14207_v15, %v14381_v27  ;;  %v14384_v48 = vld [vmem:[#allocation49_spill] sm:$0xff]  ;;  %v4429_v51 = vrot.slane %v14385_v44, 6  ;;  %v5447_v27 = vpop.permute.xlu2 %5446  ;;  %vm14436_vm3 = vmmov %vm14325_vm0 }
 0x835   : > { %4328 = vrot.lane.b32.xlu2 %v4260_v19, %s6861_s26  ;;  %4889 = vrot.lane.b32.xlu0 %v12193_v23, %s6861_s26  ;;  %v4595_v36 = vsel %vm3242_vm10, %v4556_v10, %v14383_v21  ;;  %v4594_v32 = vsel %vm3242_vm10, %v4555_v60, %v14384_v48  ;;  %v4956_v50 = vsel %vm4017_vm6, %v4917_v5, %v12373_v18  ;;  %v4710_v35 = vrot.slane %v4632_v8, 4  ;;  %v4449_v10 = vpop.permute.xlu0 %4448 }
 0x836   : > { %v4451_v62 = vpop.permute.xlu1 %4450  ;;  %v4918_v9 = vsel %vm3242_vm10, %v14362_v41, %v14384_v48  ;;  %v5231_v23 = vsel %vm3242_vm10, %v12381_v17, %v12325_v3  ;;  %v4633_v5 = vsel %vm4017_vm6, %v4594_v32, %v4449_v10  ;;  %v5034_v63 = vrot.slane %v4956_v50, 3  ;;  %v14386_v48 = vld [vmem:[#allocation166_spill] sm:$0xff] }
 0x837   : > { %v4634_v19 = vsel %vm4017_vm6, %v4595_v36, %v4451_v62  ;;  %v5480_v60 = vsel %vm4017_vm6, %v5231_v23, %v5447_v27  ;;  %v4957_v21 = vsel %vm4017_vm6, %v4918_v9, %v4449_v10  ;;  %v4711_v40 = vrot.slane %v4633_v5, 4 }
 0x838   : > { %v4713_v61 = vrot.slane %v4634_v19, 4  ;;  %v5539_v7 = vrot.slane %v5480_v60, 1  ;;  %v5035_v41 = vrot.slane %v4957_v21, 3  ;;  %v14387_v11 = vrot.slane %v14386_v48, 1 }
 0x839   : > { %v12533_v17 = vsel %vm858_vm4, %v4710_v35, %v4711_v40  ;;  %v4430_v32 = vsel %vm14335_vm8, %v12471_v37, %v4429_v51  ;;  %v5241_v51 = vsel %vm4017_vm6, %v14372_v49, %v12373_v18  ;;  %v4261_v19 = vrot.slane %v14385_v44, 5  ;;  %vm14447_vm8 = vmmov %vm14325_vm0 }
 0x83a   : > { %v12530_v3 = vsel %vm525_vm1, %v14387_v11, %v5539_v7  ;;  %v12536_v8 = vsel %vm858_vm4, %v4711_v40, %v4713_v61  ;;  %v12539_v36 = vsel %vm14388_vm7, %v5034_v63, %v5035_v41  ;;  %v14389_v7 = vrot.slane %v14343_v56, 2  ;;  %vm14437_vm7 = vmmov %vm14325_vm0 }
 0x83b   : > { %6138 = vmatpush.xpose.msrb.mxu3 %v12536_v8  ;;  %v12552_v40 = vsel %vm4017_vm6, %v14371_v31, %v4449_v10  ;;  %v4426_v10 = vrot.slane %v14377_v29, 6  ;;  %v5319_v5 = vrot.slane %v5241_v51, 2  ;;  %v14392_v21 = vrot.slane %v12111_v38, 2 }
 0x83c   : > { %5213 = vrot.lane.b32.xlu1 %v12256_v16, %s6862_s27  ;;  %v12556_v16 = vpop.permute.xlu2 %5442  ;;  %v5320_v31 = vrot.slane %v12552_v40, 2  ;;  %v5786_v40 = vld [vmem:[#allocation2 + $0x100] sm:$0xff] }
 0x83d   : > { %4498 = vrot.lane.b32.xlu2 %v4430_v32, %s6862_s27  ;;  %5175 = vrot.lane.b32.xlu0 %v14389_v7, %s6861_s26  ;;  %v5200_v50 = vpop.permute.xlu0 %5199  ;;  %v4428_v49 = vsel %vm14393_vm9, %v4426_v10, %v12471_v37  ;;  %v5828_v32 = vld [vmem:[#allocation2 + $0x250] sm:$0xff]  ;;  %vm14448_vm9 = vmmov %vm14325_vm0 }
 0x83e   : > { %v5451_v63 = vpop.permute.xlu1 %5450  ;;  %v5252_v35 = vsel %vm4017_vm6, %v5231_v23, %v5200_v50  ;;  %v4262_v23 = vsel %vm969_vm5, %v12442_v45, %v4261_v19  ;;  %v12581_v48 = vsel %vm636_vm2, %v5319_v5, %v5320_v31  ;;  %vm14395_vm5 = vmmov %vm14325_vm0 }
 0x83f   : > { %v5482_v11 = vsel %vm4017_vm6, %v12279_v57, %v5451_v63  ;;  %6139 = vmatpush.xpose.msrb.mxu3 %v12533_v17  ;;  %v5337_v27 = vrot.slane %v5252_v35, 2  ;;  %v14390_v57 = vld [vmem:[#allocation119_spill] sm:$0xff] }
 0x840   : > { %v5549_v9 = vrot.slane %v5482_v11, 1  ;;  %v14391_v61 = vrot.slane %v14390_v57, 1 }
 0x841   : > { %v5338_v18 = vsel %vm636_vm2, %v14392_v21, %v5337_v27  ;;  %v14394_v27 = vrot.slane %v14332_v28, 3 }
 0x842   : > { %v5550_v60 = vsel %vm525_vm1, %v14391_v61, %v5549_v9  ;;  %6176 = vmatpush.xpose.msrb.mxu2 %v5338_v18  ;;  %v14399_v18 = vld [vmem:[#allocation159_spill] sm:$0xff] }
 0x843   : > { %6194 = vmatpush.xpose.msrb.mxu1 %v5550_v60  ;;  %6140 = vmatpush.xpose.msrb.mxu3 %v12536_v8 }
 0x844   : > { %4496 = vrot.lane.b32.xlu1 %v4428_v49, %s6862_s27  ;;  %v12586_v7 = vpop.permute.xlu2 %4514  ;;  %v14400_v49 = vrot.slane %v14399_v18, 1 }
 0x845   : > { %4887 = vrot.lane.b32.xlu2 %v12312_v52, %s6861_s26  ;;  %4330 = vrot.lane.b32.xlu0 %v4262_v23, %s6861_s26  ;;  %v4834_v63 = vpop.permute.xlu0 %4833  ;;  %v5978_v52 = vld [vmem:[%s13293_s5] sm:$0x77] }
 0x846   : > { %v4872_v38 = vpop.permute.xlu1 %4871  ;;  %v4905_v11 = vsel %vm3968_vm11, %v14207_v15, %v4834_v63  ;;  %6177 = vmatpush.xpose.msrb.mxu2 %v12163_v14  ;;  %5992 = vst [vmem:[#allocation1] ss:$2 sm:$0xff] %v5978_v52  ;;  %v14397_v14 = vrot.slane %v12424_v42, 3 }
 0x847   : > { %6195 = vmatpush.xpose.msrb.mxu1 %v5828_v32  ;;  %6141 = vmatpush.xpose.msrb.mxu3 %v12533_v17  ;;  %v4919_v50 = vsel %vm3242_vm10, %v4905_v11, %v12439_v58  ;;  %v4922_v51 = vsel %vm3242_vm10, %v4905_v11, %v4872_v38  ;;  %v14401_v38 = vrot.slane %v12294_v2, 2  ;;  %v5814_v2 = vld [vmem:[#allocation2 + $0x1e0] sm:$0xff] }
 0x848   : > { %v4958_v9 = vsel %vm4017_vm6, %v4919_v50, %v4451_v62  ;;  %v4961_v35 = vsel %vm4017_vm6, %v4922_v51, %v12189_v53  ;;  %v14396_v53 = vrot.slane %v14385_v44, 1 }
 0x849   : > { %v5037_v19 = vrot.slane %v4958_v9, 3  ;;  %v5042_v15 = vrot.slane %v4961_v35, 3  ;;  %v14405_v9 = vld [vmem:[#allocation107_spill] sm:$0xff] }
 0x84a   : > { %v4422_v35 = vrot.slane %v14405_v9, 6 }
 0x84b   : > { %6142 = vmatpush.xpose.msrb.mxu3 %v12536_v8  ;;  %v12606_v58 = vsel %vm14395_vm5, %v5035_v41, %v5037_v19  ;;  %v12616_v62 = vsel %vm14398_vm12, %v14397_v14, %v5042_v15  ;;  %v5230_v41 = vsel %vm3242_vm10, %v12454_v22, %v12405_v34  ;;  %v14402_v34 = vrot.slane %v14385_v44, 2  ;;  %v14403_v22 = vld [vmem:[#allocation122_spill] sm:$0xff]  ;;  %v14406_v14 = vld [vmem:[#allocation127_spill] sm:$0xff]  ;;  %vm14457_vm5 = vmmov %vm14325_vm0 }
 0x84c   : > { %5462 = vrot.lane.b32.xlu1 %v14394_v27, %s6862_s27  ;;  %v12620_v60 = vpop.permute.xlu2 %4348  ;;  %v14404_v63 = vrot.slane %v14403_v22, 1  ;;  %v4424_v19 = vrot.slane %v14403_v22, 6  ;;  %vm14458_vm12 = vmmov %vm14325_vm0 }
 0x84d   : > { %5211 = vrot.lane.b32.xlu2 %v12408_v30, %s6862_s27  ;;  %4849 = vrot.lane.b32.xlu0 %v14396_v53, %s6860_s23  ;;  %v5198_v30 = vpop.permute.xlu0 %5197  ;;  %v12633_v32 = vld.sshfl [vmem:[#allocation1] sm:$0xff pattern:$0x75316420] }
 0x84e   : > { %v5449_v57 = vpop.permute.xlu1 %5448  ;;  %v5249_v21 = vsel %vm4017_vm6, %v5230_v41, %v5198_v30  ;;  %6126 = vmatmul.f32.vlgmr.msra.gmra.mxu3 %v12633_v32  ;;  %v14409_v30 = vld [vmem:[#allocation161_spill] sm:$0xff] }
 0x84f   : > { %v5481_v61 = vsel %vm4017_vm6, %v12413_v25, %v5449_v57  ;;  %6143 = vmatpush.xpose.msrb.mxu3 %v12533_v17  ;;  %v5332_v42 = vrot.slane %v5249_v21, 2  ;;  %v4421_v57 = vrot.slane %v14406_v14, 6 }
 0x850   : > { %v5544_v5 = vrot.slane %v5481_v61, 1  ;;  %v4425_v61 = vsel %vm14407_vm13, %v4422_v35, %v4424_v19  ;;  %vm14469_vm13 = vmmov %vm14325_vm0 }
 0x851   : > { %v5333_v25 = vsel %vm636_vm2, %v14401_v38, %v5332_v42 }
 0x852   : > { %v5545_v23 = vsel %vm525_vm1, %v14400_v49, %v5544_v5  ;;  %6178 = vmatpush.xpose.msrb.mxu2 %v5333_v25  ;;  %v14410_v5 = vrot.slane %v14409_v30, 1  ;;  %v14412_v25 = vld [vmem:[#allocation65_spill] sm:$0xff] }
 0x853   : > { %6196 = vmatpush.xpose.msrb.mxu1 %v5545_v23  ;;  %6144 = vmatpush.xpose.msrb.mxu3 %v12536_v8  ;;  %v4419_v23 = vrot.slane %v14236_v13, 6  ;;  %v14414_v13 = vld [vmem:[#allocation36_spill] sm:$0xff]  ;;  %v14421_v30 = vld [vmem:[#allocation45_spill] sm:$0xff] }
 0x854   : > { %5173 = vrot.lane.b32.xlu1 %v14402_v34, %s6861_s26  ;;  %v12644_v51 = vpop.permute.xlu2 %4891  ;;  %v14413_v34 = vrot.slane %v14412_v25, 1 }
 0x855   : > { %4847 = vrot.lane.b32.xlu2 %v14404_v63, %s6860_s23  ;;  %4494 = vrot.lane.b32.xlu0 %v4426_v10, %s6862_s27  ;;  %v5158_v52 = vpop.permute.xlu0 %5157 }
 0x856   : > { %v5196_v50 = vpop.permute.xlu1 %5195  ;;  %v5229_v8 = vsel %vm3242_vm10, %v4905_v11, %v5158_v52  ;;  %6179 = vmatpush.xpose.msrb.mxu2 %v12346_v1  ;;  %v14408_v11 = vrot.slane %v12450_v54, 2 }
 0x857   : > { %6197 = vmatpush.xpose.msrb.mxu1 %v5814_v2  ;;  %6145 = vmatpush.xpose.msrb.mxu3 %v12533_v17  ;;  %v5246_v15 = vsel %vm4017_vm6, %v5229_v8, %v5196_v50  ;;  %v5478_v10 = vsel %vm4017_vm6, %v5229_v8, %v12556_v16  ;;  %v4420_v50 = vsel %vm14415_vm15, %v14414_v13, %v4419_v23  ;;  %vm14487_vm15 = vmmov %vm14325_vm0 }
 0x858   : > { %v5327_v27 = vrot.slane %v5246_v15, 2  ;;  %v5529_v53 = vrot.slane %v5478_v10, 1  ;;  %v14419_v15 = vld [vmem:[#allocation47_spill] sm:$0xff] }
 0x859   : > { %v4588_v10 = vsel %vm3968_vm11, %v14322_v6, %v14419_v15 }
 0x85a   : > { %v5328_v17 = vsel %vm636_vm2, %v14408_v11, %v5327_v27  ;;  %v5530_v16 = vsel %vm525_vm1, %v14410_v5, %v5529_v53  ;;  %v14422_v5 = vld [vmem:[#allocation84_spill] sm:$0xff] }
 0x85b   : > { %6150 = vmatpush.xpose.msra.mxu3 %v12079_v43  ;;  %6198 = vmatpush.xpose.msrb.mxu1 %v12530_v3  ;;  %v4423_v43 = vsel %vm14411_vm14, %v4421_v57, %v4422_v35  ;;  %v5800_v3 = vld [vmem:[#allocation2 + $0x170] sm:$0xff]  ;;  %vm14478_vm14 = vmmov %vm14325_vm0 }
 0x85c   : > { %4492 = vrot.lane.b32.xlu1 %v4425_v61, %s6862_s27  ;;  %6180 = vmatpush.xpose.msrb.mxu2 %v5328_v17  ;;  %v12670_v21 = vpop.permute.xlu2 %4340  ;;  %v14420_v17 = vld [vmem:[#allocation22_spill] sm:$0xff] }
 0x85d   : > { %4488 = vrot.lane.b32.xlu2 %v4421_v57, %s6862_s27  ;;  %4490 = vrot.lane.b32.xlu0 %v4423_v43, %s6862_s27  ;;  %v5194_v42 = vpop.permute.xlu0 %5193  ;;  %v5971_v57 = vld [vmem:[#allocation2 + $0x6c8] sm:$0xff] }
 0x85e   : > { %v5445_v1 = vpop.permute.xlu1 %5444  ;;  %v5243_v49 = vsel %vm4017_vm6, %v5229_v8, %v5194_v42  ;;  %v6834_v8 = vld [vmem:[#allocation2 + $0x20] sm:$0xff] }
 0x85f   : > { %6151 = vmatpush.xpose.msra.mxu3 %v12076_v39  ;;  %v5479_v54 = vsel %vm4017_vm6, %v5230_v41, %v5445_v1  ;;  %6199 = vmatpush.xpose.msrb.mxu1 %v5800_v3  ;;  %v5322_v38 = vrot.slane %v5243_v49, 2  ;;  %v12679_v39 = vld.sshfl [vmem:[#allocation1 + $0x8] sm:$0xff pattern:$0x75316420]  ;;  %v14423_v1 = vrot.slane %v14385_v44, 3 }
 0x860   : > { %v5534_v18 = vrot.slane %v5479_v54, 1  ;;  %6181 = vmatpush.xpose.msrb.mxu2 %v12495_v55  ;;  %6146 = vmatmul.f32.vlgmr.msrb.gmra.mxu3 %v12679_v39 }
 0x861   : > { %v5323_v41 = vsel %vm636_vm2, %v5320_v31, %v5322_v38 }
 0x862   : > { %v5535_v63 = vsel %vm525_vm1, %v14413_v34, %v5534_v18  ;;  %v5964_v18 = vld [vmem:[#allocation2 + $0x690] sm:$0xff] }
 0x863   : > { %6152 = vmatpush.xpose.msra.mxu3 %v12229_v46  ;;  %6200 = vmatpush.xpose.msrb.mxu1 %v5535_v63  ;;  %v14416_v46 = vrot.slane %v14343_v56, 3 }
 0x864   : > { %4885 = vrot.lane.b32.xlu1 %v12442_v45, %s6861_s26  ;;  %6182 = vmatpush.xpose.msrb.mxu2 %v5323_v41  ;;  %v12694_v31 = vpop.permute.xlu2 %4510  ;;  %v14417_v45 = vrot.slane %v14403_v22, 2 }
 0x865   : > { %4486 = vrot.lane.b32.xlu2 %v4420_v50, %s6862_s27  ;;  %5460 = vrot.lane.b32.xlu0 %v14416_v46, %s6862_s27  ;;  %v4856_v2 = vpop.permute.xlu0 %4855 }
 0x866   : > { %v5180_v55 = vpop.permute.xlu1 %5179 }
 0x867   : > { %6153 = vmatpush.xpose.msra.mxu3 %v11981_v33  ;;  %6201 = vmatpush.xpose.msrb.mxu1 %v5786_v40  ;;  %v4916_v33 = vsel %vm3968_vm11, %v14309_v59, %v4856_v2  ;;  %v14424_v40 = vld [vmem:[#allocation156_spill] sm:$0xff] }
 0x868   : > { %6183 = vmatpush.xpose.msrb.mxu2 %v12581_v48  ;;  %v5240_v27 = vsel %vm3242_vm10, %v4916_v33, %v5180_v55  ;;  %v4955_v49 = vsel %vm3242_vm10, %v4916_v33, %v12644_v51  ;;  %v14425_v33 = vld [vmem:[#allocation17_spill] sm:$0xff] }
 0x86b   : > { %6154 = vmatpush.xpose.msra.mxu3 %v12397_v20  ;;  %6202 = vmatpush.xpose.msrb.mxu1 %v5530_v16 }
 0x86c   : > { %5209 = vrot.lane.b32.xlu1 %v12471_v37, %s6862_s27  ;;  %6184 = vmatpush.xpose.msrb.mxu2 %v5323_v41  ;;  %v12707_v20 = vpop.permute.xlu2 %4506  ;;  %v14418_v37 = vld [vmem:[#allocation27_spill] sm:$0xff] }
 0x86d   : > { %5207 = vrot.lane.b32.xlu2 %v4422_v35, %s6862_s27  ;;  %5171 = vrot.lane.b32.xlu0 %v14417_v45, %s6861_s26  ;;  %v12709_v19 = vpop.permute.xlu0 %5215  ;;  %v12714_v35 = vsel %vm4017_vm6, %v14418_v37, %v12586_v7 }
 0x86e   : > { %v4347_v52 = vpop.permute.xlu1 %4346  ;;  %v5279_v14 = vsel %vm4017_vm6, %v5240_v27, %v12709_v19  ;;  %v5380_v6 = vrot.slane %v12714_v35, 2 }
 0x86f   : > { %6155 = vmatpush.xpose.msra.mxu3 %v12158_v4  ;;  %6203 = vmatpush.xpose.msrb.mxu1 %v6834_v8  ;;  %v4591_v4 = vsel %vm3968_vm11, %v10683_v0, %v14419_v15  ;;  %v4627_v53 = vsel %vm3242_vm10, %v4588_v10, %v4347_v52  ;;  %v5382_v11 = vrot.slane %v5279_v14, 2  ;;  %v4954_v0 = vsel %vm3242_vm10, %v14420_v17, %v4347_v52  ;;  %v5957_v10 = vld [vmem:[#allocation2 + $0x658] sm:$0xff] }
 0x870   : > { %6185 = vmatpush.xpose.msrb.mxu2 %v12581_v48  ;;  %v4630_v61 = vsel %vm3242_vm10, %v4591_v4, %v4347_v52  ;;  %v4592_v48 = vsel %vm3968_vm11, %v14309_v59, %v14422_v5  ;;  %v12742_v43 = vsel %vm4017_vm6, %v4627_v53, %v12586_v7  ;;  %v4993_v23 = vsel %vm4017_vm6, %v4954_v0, %v12586_v7  ;;  %v14430_v17 = vld [vmem:[#allocation114_spill] sm:$0xff] }
 0x871   : > { %v4631_v54 = vsel %vm3242_vm10, %v4592_v48, %v12620_v60  ;;  %v4669_v59 = vsel %vm4017_vm6, %v4630_v61, %v12586_v7  ;;  %v4951_v2 = vsel %vm3242_vm10, %v14424_v40, %v4347_v52  ;;  %v5095_v45 = vrot.slane %v4993_v23, 3  ;;  %v14427_v52 = vld [vmem:[#allocation31_spill] sm:$0xff] }
 0x872   : > { %v4771_v13 = vrot.slane %v4669_v59, 4  ;;  %v12794_v14 = vsel %vm4017_vm6, %v4951_v2, %v12586_v7  ;;  %v12809_v0 = vsel %vm4017_vm6, %v14430_v17, %v12586_v7  ;;  %v5982_v17 = vld [vmem:[%s13294_s6] sm:$0x7] }
 0x873   : > { %6156 = vmatpush.xpose.msra.mxu3 %v12490_v26  ;;  %6204 = vmatpush.xpose.msrb.mxu1 %v5530_v16  ;;  %v4589_v26 = vsel %vm3968_vm11, %v14332_v28, %v14422_v5  ;;  %v12747_v16 = vsel %vm636_vm2, %v5380_v6, %v5382_v11  ;;  %v14431_v5 = vld [vmem:[#allocation105_spill] sm:$0xff]  ;;  %v5090_v59 = vrot.slane %v12794_v14, 3 }
 0x874   : > { %6250 = vmatpush.xpose.msra.mxu2 %v5971_v57  ;;  %4883 = vrot.lane.b32.xlu1 %v14421_v30, %s6861_s26  ;;  %v4628_v3 = vsel %vm3242_vm10, %v4589_v26, %v12620_v60  ;;  %v4766_v60 = vrot.slane %v12742_v43, 4  ;;  %v14429_v57 = vld [vmem:[#allocation40_spill] sm:$0xff]  ;;  %v14432_v43 = vld [vmem:[#allocation18_spill] sm:$0xff] }
 0x875   : > { %5458 = vrot.lane.b32.xlu0 %v14423_v1, %s6862_s27  ;;  %v12766_v34 = vpop.permute.xlu0 %4516  ;;  %v4587_v61 = vsel %vm3968_vm11, %v10637_v47, %v14429_v57  ;;  %v4590_v11 = vsel %vm3968_vm11, %v10676_v12, %v14429_v57  ;;  %v14433_v47 = vld [vmem:[#allocation29_spill] sm:$0xff] }
 0x876   : > { %v5465_v42 = vpop.permute.xlu1 %5464  ;;  %v4670_v41 = vsel %vm4017_vm6, %v4631_v54, %v12766_v34  ;;  %v4994_v55 = vsel %vm4017_vm6, %v4955_v49, %v12766_v34  ;;  %v5950_v49 = vld [vmem:[#allocation2 + $0x620] sm:$0xff]  ;;  %v14438_v57 = vld [vmem:[#allocation53_spill] sm:$0xff] }
 0x877   : > { %6157 = vmatpush.xpose.msra.mxu3 %v12341_v24  ;;  %v5489_v38 = vsel %vm4017_vm6, %v5240_v27, %v5465_v42  ;;  %v12764_v25 = vpop.permute.xlu2 %4336  ;;  %6205 = vmatpush.xpose.msrb.mxu1 %v6834_v8  ;;  %v4667_v24 = vsel %vm4017_vm6, %v4628_v3, %v12766_v34  ;;  %v4773_v46 = vrot.slane %v4670_v41, 4  ;;  %v14426_v8 = vrot.slane %v14425_v33, 1 }
 0x878   : > { %6251 = vmatpush.xpose.msra.mxu2 %v5964_v18  ;;  %v5584_v63 = vrot.slane %v5489_v38, 1  ;;  %v4768_v50 = vrot.slane %v4667_v24, 4  ;;  %v5097_v15 = vrot.slane %v4994_v55, 3  ;;  %v14435_v55 = vld [vmem:[#allocation41_spill] sm:$0xff] }
 0x879   : > { %v4774_v4 = vsel %vm858_vm4, %v4771_v13, %v4773_v46 }
 0x87a   : > { %v12780_v37 = vsel %vm525_vm1, %v14426_v8, %v5584_v63  ;;  %v12784_v27 = vsel %vm858_vm4, %v4766_v60, %v4768_v50  ;;  %v12788_v53 = vsel %vm14325_vm0, %v5095_v45, %v5097_v15  ;;  %v14434_v50 = vld [vmem:[#allocation20_spill] sm:$0xff] }
 0x87b   : > { %6158 = vmatpush.xpose.msra.mxu3 %v12616_v62  ;;  %6270 = vmatpush.xpose.msra.mxu1 %v4774_v4  ;;  %v14428_v62 = vrot.slane %v14403_v22, 3 }
 0x87c   : > { %6252 = vmatpush.xpose.msra.mxu2 %v5957_v10  ;;  %4881 = vrot.lane.b32.xlu1 %v14427_v52, %s6861_s26  ;;  %v5375_v10 = vrot.slane %v12809_v0, 2 }
 0x87d   : > { %5456 = vrot.lane.b32.xlu0 %v14428_v62, %s6862_s27  ;;  %6290 = vmatpush.xpose.msra.mxu0 %v12788_v53  ;;  %v4513_v12 = vpop.permute.xlu0 %4512  ;;  %v5943_v62 = vld [vmem:[#allocation2 + $0x5e8] sm:$0xff] }
 0x87e   : > { %v4345_v30 = vpop.permute.xlu1 %4344  ;;  %v5274_v46 = vsel %vm4017_vm6, %v14434_v50, %v4513_v12  ;;  %v5277_v40 = vsel %vm4017_vm6, %v14435_v55, %v4513_v12  ;;  %v14443_v50 = vld [vmem:[#allocation152_spill] sm:$0xff]  ;;  %v14444_v55 = vld [vmem:[#allocation26_spill] sm:$0xff] }
 0x87f   : > { %6159 = vmatpush.xpose.msra.mxu3 %v14431_v5  ;;  %v4626_v26 = vsel %vm3242_vm10, %v4587_v61, %v4345_v30  ;;  %v4629_v48 = vsel %vm3242_vm10, %v4590_v11, %v4345_v30  ;;  %v4950_v1 = vsel %vm3242_vm10, %v14432_v43, %v4345_v30  ;;  %v4953_v3 = vsel %vm3242_vm10, %v14433_v47, %v4345_v30  ;;  %v12818_v54 = vpop.permute.xlu2 %4851  ;;  %v14439_v61 = vld [vmem:[#allocation76_spill] sm:$0xff] }
 0x880   : > { %v4665_v7 = vsel %vm4017_vm6, %v4626_v26, %v4513_v12  ;;  %v4668_v42 = vsel %vm4017_vm6, %v4629_v48, %v4513_v12  ;;  %v4989_v18 = vsel %vm4017_vm6, %v4950_v1, %v4513_v12  ;;  %v4992_v63 = vsel %vm4017_vm6, %v4953_v3, %v4513_v12  ;;  %6253 = vmatpush.xpose.msra.mxu2 %v5950_v49  ;;  %v14441_v1 = vld [vmem:[#allocation13_spill] sm:$0xff] }
 0x881   : > { %v4765_v23 = vrot.slane %v4665_v7, 4  ;;  %v4770_v38 = vrot.slane %v4668_v42, 4  ;;  %v5089_v24 = vrot.slane %v4989_v18, 3  ;;  %v5094_v41 = vrot.slane %v4992_v63, 3  ;;  %v14442_v7 = vld [vmem:[#allocation98_spill] sm:$0xff] }
 0x882   : > { %v5374_v15 = vrot.slane %v5274_v46, 2  ;;  %v5379_v52 = vrot.slane %v5277_v40, 2  ;;  %v4585_v11 = vsel %vm3968_vm11, %v14439_v61, %v14438_v57  ;;  %v6863_v26 = vmov 0   ;;  %v14445_v40 = vld [vmem:[#allocation104_spill] sm:$0xff] }
 0x883   : > { %6160 = vmatpush.xpose.msra.mxu3 %v12606_v58  ;;  %v4767_v2 = vsel %vm858_vm4, %v4765_v23, %v4766_v60  ;;  %v4772_v33 = vsel %vm858_vm4, %v4770_v38, %v4771_v13  ;;  %v12835_v8 = vsel %vm14436_vm3, %v5089_v24, %v5090_v59  ;;  %v5096_v4 = vsel %vm14437_vm7, %v5094_v41, %v5095_v45  ;;  %v14440_v60 = vld [vmem:[#allocation163_spill] sm:$0xff]  ;;  %v5929_v41 = vld [vmem:[#allocation2 + $0x578] sm:$0xff]  ;;  %vm14497_vm3 = vmmov %vm14325_vm0 }
 0x884   : > { %6271 = vmatpush.xpose.msra.mxu1 %v4772_v33  ;;  %v5271_v13 = vsel %vm4017_vm6, %v14440_v60, %v12707_v20  ;;  %6254 = vmatpush.xpose.msra.mxu2 %v5943_v62  ;;  %v4624_v45 = vsel %vm3242_vm10, %v4585_v11, %v12670_v21  ;;  %v12853_v30 = vsel %vm636_vm2, %v5374_v15, %v5375_v10  ;;  %v14446_v62 = vld [vmem:[#allocation148_spill] sm:$0xff] }
 0x885   : > { %6291 = vmatpush.xpose.msra.mxu0 %v5096_v4  ;;  %6830 = vset.pattern.permute.xlu2 %v6863_v26  ;;  %v12859_v48 = vsel %vm636_vm2, %v5379_v52, %v5380_v6  ;;  %v4343_v12 = vpop.permute.xlu0 %4342  ;;  %v4586_v42 = vsel %vm3968_vm11, %v14343_v56, %v14442_v7  ;;  %v5369_v18 = vrot.slane %v5271_v13, 2  ;;  %v5936_v6 = vld [vmem:[#allocation2 + $0x5b0] sm:$0xff]  ;;  %v4584_v33 = vsel %vm3968_vm11, %v14445_v40, %v14444_v55  ;;  %v5980_v52 = vld [vmem:[%s13293_s5 + $0x10] sm:$0x77]  ;;  %v5922_v13 = vld [vmem:[#allocation2 + $0x540] sm:$0xff] }
 0x886   : > { %v4509_v5 = vpop.permute.xlu1 %4508  ;;  %5985 = vperm.xlu2 %6830, %v5982_v17   ;;  %6831 = vset.pattern.permute.xlu0 %v6863_v26  ;;  %v4625_v23 = vsel %vm3242_vm10, %v4586_v42, %v4343_v12  ;;  %5996 = vst [vmem:[#allocation1 + $0x20] ss:$2 sm:$0xff] %v5980_v52  ;;  %v5915_v42 = vld [vmem:[#allocation2 + $0x508] sm:$0xff] }
 0x887   : > { %6161 = vmatpush.xpose.msra.mxu3 %v12539_v36  ;;  %v4663_v43 = vsel %vm4017_vm6, %v4624_v45, %v4509_v5  ;;  %v12864_v47 = vsel %vm4017_vm6, %v14441_v1, %v4509_v5  ;;  %v12866_v3 = vpop.permute.xlu2 %4500  ;;  %v4664_v63 = vsel %vm4017_vm6, %v4625_v23, %v12694_v31  ;;  %v14451_v55 = vld [vmem:[#allocation140_spill] sm:$0xff] }
 0x888   : > { %v5370_v35 = vrot.slane %v12864_v47, 2  ;;  %6272 = vmatpush.xpose.msra.mxu1 %v12784_v27  ;;  %v4761_v49 = vrot.slane %v4663_v43, 4  ;;  %6255 = vmatpush.xpose.msra.mxu2 %v5936_v6  ;;  %v4763_v24 = vrot.slane %v4664_v63, 4  ;;  %v5979_v27 = vld [vmem:[%s13293_s5 + $0x8] sm:$0x77] }
 0x889   : > { %6292 = vmatpush.xpose.msra.mxu0 %v12788_v53  ;;  %v4948_v53 = vsel %vm3242_vm10, %v14443_v50, %v12670_v21  ;;  %5994 = vst [vmem:[#allocation1 + $0x10] ss:$2 sm:$0xff] %v5979_v27  ;;  %v5901_v50 = vld [vmem:[#allocation2 + $0x498] sm:$0xff] }
 0x88a   : > { %v12878_v38 = vsel %vm636_vm2, %v5369_v18, %v5370_v35  ;;  %v4764_v46 = vsel %vm858_vm4, %v4761_v49, %v4763_v24  ;;  %v12894_v15 = vsel %vm4017_vm6, %v4948_v53, %v4509_v5 }
 0x88b   : > { %6162 = vmatpush.xpose.msra.mxu3 %v12606_v58  ;;  %v5085_v17 = vrot.slane %v12894_v15, 3 }
 0x88c   : > { %6273 = vmatpush.xpose.msra.mxu1 %v4767_v2  ;;  %6256 = vmatpush.xpose.msra.mxu2 %v5929_v41  ;;  %v5858_v41 = vld [vmem:[#allocation2 + $0x340] sm:$0xff] }
 0x88d   : > { %6293 = vmatpush.xpose.msra.mxu0 %v5096_v4  ;;  %v12938_v14 = vld.sshfl [vmem:[#allocation1 + $0x20] sm:$0xff pattern:$0x75316420] }
 0x88e   : > { %v4339_v2 = vpop.permute.xlu1 %4338  ;;  %6206 = vmatmul.f32.vlgmr.msrb.gmra.mxu1 %v12938_v14 }
 0x88f   : > { %6163 = vmatpush.xpose.msra.mxu3 %v12539_v36  ;;  %v4623_v21 = vsel %vm3242_vm10, %v4584_v33, %v4339_v2  ;;  %v4947_v57 = vsel %vm3242_vm10, %v14446_v62, %v4339_v2  ;;  %v12903_v4 = vpop.permute.xlu2 %4328  ;;  %v4854_v61 = vpop.permute.xlu0 %4853 }
 0x890   : > { %v4662_v11 = vsel %vm4017_vm6, %v4623_v21, %v12707_v20  ;;  %v4986_v60 = vsel %vm4017_vm6, %v4947_v57, %v12707_v20  ;;  %6274 = vmatpush.xpose.msra.mxu1 %v4764_v46  ;;  %v4915_v26 = vsel %vm3968_vm11, %v14332_v28, %v4854_v61  ;;  %6257 = vmatpush.xpose.msra.mxu2 %v5922_v13  ;;  %v5865_v28 = vld [vmem:[#allocation2 + $0x378] sm:$0xff]  ;;  %v12927_v18 = vld.sshfl [vmem:[#allocation1 + $0x10] sm:$0xff pattern:$0x75316420]  ;;  %v5894_v13 = vld [vmem:[#allocation2 + $0x460] sm:$0xff] }
 0x891   : > { %v4760_v45 = vrot.slane %v4662_v11, 4  ;;  %v5084_v5 = vrot.slane %v4986_v60, 3  ;;  %v4952_v43 = vsel %vm3242_vm10, %v4915_v26, %v12644_v51  ;;  %v12929_v6 = vld.sshfl [vmem:[#allocation1 + $0x18] sm:$0xff pattern:$0x75316420]  ;;  %v14450_v46 = vld [vmem:[#allocation44_spill] sm:$0xff] }
 0x892   : > { %v4991_v12 = vsel %vm4017_vm6, %v4952_v43, %v12766_v34  ;;  %v5908_v34 = vld [vmem:[#allocation2 + $0x4d0] sm:$0xff]  ;;  %6186 = vmatmul.f32.vlgmr.msrb.gmra.mxu2 %v12929_v6  ;;  %v4582_v40 = vsel %vm3968_vm11, %v14451_v55, %v14450_v46 }
 0x893   : > { %6164 = vmatpush.xpose.msra.mxu3 %v12606_v58  ;;  %v4762_v1 = vsel %vm858_vm4, %v4760_v45, %v4761_v49  ;;  %v12919_v20 = vsel %vm14447_vm8, %v5084_v5, %v5085_v17  ;;  %v5092_v7 = vrot.slane %v4991_v12, 3  ;;  %v14453_v11 = vld [vmem:[#allocation9_spill] sm:$0xff] }
 0x894   : > { %6275 = vmatpush.xpose.msra.mxu1 %v4762_v1  ;;  %6258 = vmatpush.xpose.msra.mxu2 %v5915_v42  ;;  %v5844_v43 = vld [vmem:[#allocation2 + $0x2d0] sm:$0xff]  ;;  %v14454_v42 = vld [vmem:[#allocation19_spill] sm:$0xff] }
 0x895   : > { %v5093_v51 = vsel %vm14448_vm9, %v5090_v59, %v5092_v7  ;;  %v12940_v59 = vld.sshfl [vmem:[#allocation1 + $0x28] sm:$0xff pattern:$0x75316420]  ;;  %v5887_v7 = vld [vmem:[#allocation2 + $0x428] sm:$0xff] }
 0x896   : > { %v4335_v58 = vpop.permute.xlu1 %4334  ;;  %6294 = vmatpush.xpose.msra.mxu0 %v5093_v51  ;;  %v14455_v51 = vld [vmem:[#allocation37_spill] sm:$0xff] }
 0x897   : > { %6165 = vmatpush.xpose.msra.mxu3 %v12539_v36  ;;  %v12931_v49 = vpop.permute.xlu2 %4498  ;;  %v5178_v23 = vpop.permute.xlu0 %5177  ;;  %6226 = vmatmul.f32.vlgmr.msrb.gmra.mxu0 %v12940_v59  ;;  %v4621_v52 = vsel %vm3242_vm10, %v4582_v40, %v4335_v58 }
 0x898   : > { %v12935_v63 = vsel %vm3242_vm10, %v4915_v26, %v5178_v23  ;;  %6259 = vmatpush.xpose.msra.mxu2 %v5908_v34  ;;  %v4581_v23 = vsel %vm3968_vm11, %v14377_v29, %v14455_v51  ;;  %v13044_v51 = vld [vmem:[#allocation2 + $0x560] sm:$0xff] }
 0x899   : > { %v5276_v36 = vsel %vm4017_vm6, %v12935_v63, %v12709_v19  ;;  %v14449_v19 = vld [vmem:[#allocation39_spill] sm:$0xff] }
 0x89a   : > { %6166 = vmatmul.f32.vlgmr.msra.gmra.mxu3 %v12927_v18  ;;  %v5377_v24 = vrot.slane %v5276_v36, 2  ;;  %6295 = vmatpush.xpose.msra.mxu0 %v12835_v8  ;;  %v4583_v53 = vsel %vm3968_vm11, %v14385_v44, %v14449_v19  ;;  %v14452_v8 = vld [vmem:[#allocation150_spill] sm:$0xff]  ;;  %v14456_v19 = vld [vmem:[#allocation7_spill] sm:$0xff] }
 0x89b   : > { %6510 = vmatpush.xpose.msk.msrb.mxu3 %vm3968_vm11, %v5865_v28  ;;  %v4622_v33 = vsel %vm3242_vm10, %v4583_v53, %v12764_v25  ;;  %v5268_v0 = vsel %vm4017_vm6, %v14452_v8, %v12866_v3  ;;  %v4945_v28 = vsel %vm3242_vm10, %v14454_v42, %v4335_v58 }
 0x89c   : > { %v12953_v27 = vsel %vm636_vm2, %v5375_v10, %v5377_v24  ;;  %6260 = vmatpush.xpose.msra.mxu2 %v5901_v50  ;;  %v5851_v10 = vld [vmem:[#allocation2 + $0x308] sm:$0xff]  ;;  %v5364_v45 = vrot.slane %v5268_v0, 2  ;;  %v5837_v24 = vld [vmem:[#allocation2 + $0x298] sm:$0xff] }
 0x89e   : > { %v12966_v2 = vpop.permute.xlu1 %4504 }
 0x89f   : > { %6511 = vmatpush.xpose.msk.msrb.mxu3 %vm3968_vm11, %v5858_v41  ;;  %v4661_v21 = vsel %vm4017_vm6, %v4622_v33, %v12966_v2  ;;  %v12971_v62 = vpop.permute.xlu2 %4887  ;;  %v4503_v57 = vpop.permute.xlu0 %4502  ;;  %v4914_v41 = vsel %vm3968_vm11, %v14343_v56, %v12818_v54  ;;  %v5880_v33 = vld [vmem:[#allocation2 + $0x3f0] sm:$0xff] }
 0x8a0   : > { %v4758_v61 = vrot.slane %v4661_v21, 4  ;;  %v4660_v25 = vsel %vm4017_vm6, %v4621_v52, %v4503_v57  ;;  %v12977_v60 = vsel %vm4017_vm6, %v14453_v11, %v4503_v57  ;;  %6261 = vmatpush.xpose.msra.mxu2 %v5894_v13  ;;  %v12993_v34 = vsel %vm4017_vm6, %v4945_v28, %v4503_v57  ;;  %v5830_v52 = vld [vmem:[#allocation2 + $0x260] sm:$0xff] }
 0x8a1   : > { %v4756_v5 = vrot.slane %v4660_v25, 4  ;;  %v5365_v26 = vrot.slane %v12977_v60, 2  ;;  %v5080_v56 = vrot.slane %v12993_v34, 3  ;;  %v5823_v25 = vld [vmem:[#allocation2 + $0x228] sm:$0xff]  ;;  %v14479_v60 = vld [vmem:[#allocation139_spill] sm:$0xff] }
 0x8a3   : > { %6512 = vmatpush.xpose.msk.msrb.mxu3 %vm3968_vm11, %v5851_v10  ;;  %v4759_v1 = vsel %vm858_vm4, %v4756_v5, %v4758_v61  ;;  %v12984_v12 = vsel %vm636_vm2, %v5364_v45, %v5365_v26  ;;  %v5873_v61 = vld [vmem:[#allocation2 + $0x3b8] sm:$0xff] }
 0x8a4   : > { %6276 = vmatpush.xpose.msra.mxu1 %v4759_v1  ;;  %6262 = vmatpush.xpose.msra.mxu2 %v5887_v7  ;;  %v14459_v7 = vld [vmem:[#allocation30_spill] sm:$0xff] }
 0x8a5   : > { %v4579_v42 = vsel %vm3968_vm11, %v14405_v9, %v14459_v7  ;;  %v5788_v7 = vld [vmem:[#allocation2 + $0x110] sm:$0xff] }
 0x8a6   : > { %v4333_v36 = vpop.permute.xlu1 %4332 }
 0x8a7   : > { %6513 = vmatpush.xpose.msk.msrb.mxu3 %vm3968_vm11, %v5844_v43  ;;  %v4620_v50 = vsel %vm3242_vm10, %v4581_v23, %v4333_v36  ;;  %v4944_v53 = vsel %vm3242_vm10, %v14456_v19, %v4333_v36  ;;  %v13001_v58 = vpop.permute.xlu2 %5211  ;;  %v4890_v46 = vpop.permute.xlu0 %4889  ;;  %v5816_v43 = vld [vmem:[#allocation2 + $0x1f0] sm:$0xff]  ;;  %v5809_v23 = vld [vmem:[#allocation2 + $0x1b8] sm:$0xff]  ;;  %v5802_v19 = vld [vmem:[#allocation2 + $0x180] sm:$0xff] }
 0x8a8   : > { %v4659_v29 = vsel %vm4017_vm6, %v4620_v50, %v12866_v3  ;;  %v4983_v55 = vsel %vm4017_vm6, %v4944_v53, %v12866_v3  ;;  %v4949_v40 = vsel %vm3242_vm10, %v4914_v41, %v4890_v46  ;;  %6263 = vmatpush.xpose.msra.mxu2 %v5880_v33 }
 0x8a9   : > { %v4755_v54 = vrot.slane %v4659_v29, 4  ;;  %v5079_v8 = vrot.slane %v4983_v55, 3  ;;  %v4988_v0 = vsel %vm4017_vm6, %v4949_v40, %v12694_v31  ;;  %v5981_v29 = vld [vmem:[%s13293_s5 + $0x18] sm:$0x7]  ;;  %v14461_v55 = vld [vmem:[#allocation46_spill] sm:$0xff]  ;;  %v14462_v40 = vld [vmem:[#allocation111_spill] sm:$0xff] }
 0x8aa   : > { %v5087_v10 = vrot.slane %v4988_v0, 3  ;;  %v4574_v33 = vsel %vm3968_vm11, %v14462_v40, %v14461_v55  ;;  %v14463_v0 = vld [vmem:[#allocation83_spill] sm:$0xff]  ;;  %5998 = vst [vmem:[#allocation1 + $0x30] ss:$2 sm:$0xff] %v5981_v29  ;;  %v14474_v29 = vld [vmem:[#allocation85_spill] sm:$0xff] }
 0x8ab   : > { %6514 = vmatpush.xpose.msk.msrb.mxu3 %vm3968_vm11, %v5837_v24  ;;  %v4757_v21 = vsel %vm858_vm4, %v4755_v54, %v4756_v5  ;;  %v13016_v57 = vsel %vm14457_vm5, %v5079_v8, %v5080_v56  ;;  %v5866_v5 = vld [vmem:[#allocation2 + $0x380] sm:$0xff]  ;;  %v5795_v8 = vld [vmem:[#allocation2 + $0x148] sm:$0xff] }
 0x8ac   : > { %v5088_v3 = vsel %vm14458_vm12, %v5085_v17, %v5087_v10  ;;  %6277 = vmatpush.xpose.msra.mxu1 %v4757_v21  ;;  %6264 = vmatpush.xpose.msra.mxu2 %v5873_v61  ;;  %v4613_v10 = vsel %vm3242_vm10, %v4574_v33, %v14463_v0  ;;  %v14475_v33 = vld [vmem:[#allocation55_spill] sm:$0xff] }
 0x8ad   : > { %6296 = vmatpush.xpose.msra.mxu0 %v5088_v3 }
 0x8ae   : > { %v5214_v31 = vpop.permute.xlu1 %5213 }
 0x8af   : > { %6515 = vmatpush.xpose.msk.msrb.mxu3 %vm3968_vm11, %v5830_v52  ;;  %v13022_v11 = vpop.permute.xlu2 %4847  ;;  %v5176_v13 = vpop.permute.xlu0 %5175 }
 0x8b0   : > { %v13026_v45 = vsel %vm3242_vm10, %v4914_v41, %v5176_v13  ;;  %6265 = vmatpush.xpose.msra.mxu2 %v5866_v5 }
 0x8b1   : > { %v5273_v15 = vsel %vm4017_vm6, %v13026_v45, %v5214_v31  ;;  %6297 = vmatpush.xpose.msra.mxu0 %v12919_v20  ;;  %v4618_v20 = vsel %vm3242_vm10, %v4579_v42, %v12903_v4  ;;  %v14466_v42 = vld [vmem:[#allocation102_spill] sm:$0xff] }
 0x8b2   : > { %v5372_v17 = vrot.slane %v5273_v15, 2  ;;  %v14464_v15 = vld [vmem:[#allocation113_spill] sm:$0xff] }
 0x8b3   : > { %6516 = vmatpush.xpose.msk.msrb.mxu3 %vm3968_vm11, %v5823_v25  ;;  %6266 = vmatmul.f32.vlgmr.msra.gmra.mxu2 %v12633_v32  ;;  %v14460_v32 = vld [vmem:[#allocation38_spill] sm:$0xff] }
 0x8b4   : > { %6330 = vmatpush.xpose.msrb.mxu2 %v12780_v37  ;;  %v13036_v1 = vsel %vm636_vm2, %v5370_v35, %v5372_v17  ;;  %v4580_v9 = vsel %vm3968_vm11, %v14403_v22, %v14460_v32  ;;  %v14465_v17 = vrot.slane %v14464_v15, 1 }
 0x8b6   : > { %v4497_v28 = vpop.permute.xlu1 %4496 }
 0x8b7   : > { %6517 = vmatpush.xpose.msk.msrb.mxu3 %vm3968_vm11, %v5816_v43  ;;  %v13048_v47 = vsel %vm4017_vm6, %v4618_v20, %v4497_v28  ;;  %v13050_v35 = vpop.permute.xlu2 %4488  ;;  %v4331_v36 = vpop.permute.xlu0 %4330  ;;  %v14467_v20 = vrot.slane %v14466_v42, 4  ;;  %v14481_v42 = vld [vmem:[#allocation134_spill] sm:$0xff] }
 0x8b8   : > { %6331 = vmatpush.xpose.msrb.mxu2 %v13044_v51  ;;  %v4751_v24 = vrot.slane %v13048_v47, 4  ;;  %v4619_v41 = vsel %vm3242_vm10, %v4580_v9, %v4331_v36  ;;  %v5781_v9 = vld [vmem:[#allocation2 + $0xd8] sm:$0xff] }
 0x8b9   : > { %v4658_v50 = vsel %vm4017_vm6, %v4619_v41, %v12931_v49  ;;  %v14470_v41 = vld [vmem:[#allocation59_spill] sm:$0xff] }
 0x8ba   : > { %v4753_v53 = vrot.slane %v4658_v50, 4  ;;  %v14471_v50 = vld [vmem:[#allocation133_spill] sm:$0xff] }
 0x8bb   : > { %6518 = vmatpush.xpose.msk.msrb.mxu3 %vm3968_vm11, %v5809_v23 }
 0x8bc   : > { %6332 = vmatpush.xpose.msrb.mxu2 %v12780_v37  ;;  %v4754_v46 = vsel %vm858_vm4, %v4751_v24, %v4753_v53  ;;  %v14472_v53 = vld [vmem:[#allocation154_spill] sm:$0xff] }
 0x8bd   : > { %6278 = vmatpush.xpose.msra.mxu1 %v4754_v46  ;;  %v13110_v46 = vsel %vm4017_vm6, %v14472_v53, %v4497_v28 }
 0x8be   : > { %v5463_v54 = vpop.permute.xlu1 %5462 }
 0x8bf   : > { %6519 = vmatpush.xpose.msk.msrb.mxu3 %vm3968_vm11, %v5802_v19  ;;  %v5488_v52 = vsel %vm4017_vm6, %v12935_v63, %v5463_v54  ;;  %v13074_v21 = vpop.permute.xlu2 %4486  ;;  %v4850_v3 = vpop.permute.xlu0 %4849  ;;  %v4941_v19 = vsel %vm3242_vm10, %v14471_v50, %v14470_v41  ;;  %v14483_v41 = vld [vmem:[#allocation96_spill] sm:$0xff] }
 0x8c0   : > { %6333 = vmatpush.xpose.msrb.mxu2 %v13044_v51  ;;  %v5579_v61 = vrot.slane %v5488_v52, 1  ;;  %v4652_v31 = vsel %vm4017_vm6, %v4613_v10, %v13074_v21  ;;  %v4913_v25 = vsel %vm3968_vm11, %v14385_v44, %v4850_v3  ;;  %v14476_v3 = vld [vmem:[#allocation103_spill] sm:$0xff] }
 0x8c1   : > { %v4743_v13 = vrot.slane %v4652_v31, 4  ;;  %v4946_v5 = vsel %vm3242_vm10, %v4913_v25, %v12971_v62  ;;  %v14468_v62 = vld [vmem:[#allocation99_spill] sm:$0xff]  ;;  %v5360_v31 = vrot.slane %v13110_v46, 2  ;;  %v5976_v46 = vld [vmem:[#allocation2 + $0x6f0] sm:$0xff] }
 0x8c2   : > { %v5580_v63 = vsel %vm525_vm1, %v14465_v17, %v5579_v61  ;;  %v4985_v43 = vsel %vm4017_vm6, %v4946_v5, %v12966_v2  ;;  %v4942_v47 = vsel %vm3242_vm10, %v14468_v62, %v12903_v4 }
 0x8c3   : > { %6520 = vmatpush.xpose.msk.msrb.mxu3 %vm3968_vm11, %v5795_v8  ;;  %v13092_v23 = vsel %vm858_vm4, %v14467_v20, %v4743_v13  ;;  %v5082_v44 = vrot.slane %v4985_v43, 3  ;;  %v13102_v2 = vsel %vm4017_vm6, %v4942_v47, %v4497_v28  ;;  %v5767_v47 = vld [vmem:[#allocation2 + $0x68] sm:$0xff] }
 0x8c4   : > { %6334 = vmatpush.xpose.msrb.mxu2 %v12780_v37  ;;  %v5075_v8 = vrot.slane %v13102_v2, 3  ;;  %v5898_v2 = vld [vmem:[#allocation2 + $0x480] sm:$0xff] }
 0x8c5   : > { %v5083_v36 = vsel %vm14469_vm13, %v5080_v56, %v5082_v44  ;;  %v14473_v56 = vld [vmem:[#allocation23_spill] sm:$0xff] }
 0x8c6   : > { %v5174_v32 = vpop.permute.xlu1 %5173  ;;  %6298 = vmatpush.xpose.msra.mxu0 %v5083_v36  ;;  %v4575_v55 = vsel %vm3968_vm11, %v14474_v29, %v14473_v56  ;;  %v14485_v29 = vld [vmem:[#allocation69_spill] sm:$0xff] }
 0x8c7   : > { %6521 = vmatpush.xpose.msk.msrb.mxu3 %vm3968_vm11, %v5788_v7  ;;  %v13113_v4 = vsel %vm3242_vm10, %v4913_v25, %v5174_v32  ;;  %v4495_v34 = vpop.permute.xlu0 %4494  ;;  %v4614_v61 = vsel %vm3242_vm10, %v4575_v55, %v14476_v3  ;;  %v14477_v25 = vld [vmem:[#allocation6_spill] sm:$0xff]  ;;  %v5208_v7 = vpop.permute.xlu2 %5207  ;;  %v14482_v32 = vld [vmem:[#allocation97_spill] sm:$0xff] }
 0x8c8   : > { %6335 = vmatpush.xpose.msrb.mxu2 %v13044_v51  ;;  %v5270_v40 = vsel %vm4017_vm6, %v13113_v4, %v13001_v58  ;;  %v4656_v54 = vsel %vm4017_vm6, %v14475_v33, %v4495_v34  ;;  %v4980_v28 = vsel %vm4017_vm6, %v4941_v19, %v4495_v34  ;;  %v5265_v13 = vsel %vm4017_vm6, %v14477_v25, %v4495_v34  ;;  %v5774_v58 = vld [vmem:[#allocation2 + $0xa0] sm:$0xff]  ;;  %v14484_v19 = vld [vmem:[#allocation94_spill] sm:$0xff] }
 0x8c9   : > { %v5367_v0 = vrot.slane %v5270_v40, 2  ;;  %v4750_v10 = vrot.slane %v4656_v54, 4  ;;  %v5074_v52 = vrot.slane %v4980_v28, 3  ;;  %v5359_v43 = vrot.slane %v5265_v13, 2  ;;  %v14486_v40 = vld [vmem:[#allocation15_spill] sm:$0xff] }
 0x8ca   : > { %6299 = vmatpush.xpose.msra.mxu0 %v13016_v57  ;;  %v5264_v50 = vsel %vm4017_vm6, %v14483_v41, %v5208_v7 }
 0x8cb   : > { %6522 = vmatpush.xpose.msk.msrb.mxu3 %vm3968_vm11, %v5781_v9  ;;  %v13136_v5 = vsel %vm636_vm2, %v5365_v26, %v5367_v0  ;;  %v4752_v15 = vsel %vm858_vm4, %v4750_v10, %v4751_v24  ;;  %v13142_v17 = vsel %vm14478_vm14, %v5074_v52, %v5075_v8  ;;  %v4938_v26 = vsel %vm3242_vm10, %v14479_v60, %v14476_v3  ;;  %v14480_v24 = vld [vmem:[#allocation124_spill] sm:$0xff]  ;;  %v5760_v52 = vld [vmem:[#allocation2 + $0x30] sm:$0xff] }
 0x8cc   : > { %6336 = vmatpush.xpose.msrb.mxu2 %v12780_v37  ;;  %v4653_v37 = vsel %vm4017_vm6, %v4614_v61, %v13050_v35  ;;  %6279 = vmatpush.xpose.msra.mxu1 %v4752_v15  ;;  %v13153_v57 = vsel %vm636_vm2, %v5359_v43, %v5360_v31  ;;  %v4939_v20 = vsel %vm3242_vm10, %v14481_v42, %v14480_v24  ;;  %v5357_v3 = vrot.slane %v5264_v50, 2  ;;  %v5912_v43 = vld [vmem:[#allocation2 + $0x4f0] sm:$0xff]  ;;  %v5874_v50 = vld [vmem:[#allocation2 + $0x3c0] sm:$0xff] }
 0x8cd   : > { %v4977_v44 = vsel %vm4017_vm6, %v4938_v26, %v13050_v35  ;;  %v4745_v36 = vrot.slane %v4653_v37, 4  ;;  %v5262_v9 = vsel %vm4017_vm6, %v14482_v32, %v13050_v35  ;;  %v4912_v37 = vsel %vm3968_vm11, %v14403_v22, %v13022_v11  ;;  %v14488_v11 = vld [vmem:[#allocation11_spill] sm:$0xff]  ;;  %v5881_v32 = vld [vmem:[#allocation2 + $0x3f8] sm:$0xff] }
 0x8ce   : > { %v13160_v62 = vpop.permute.xlu1 %4492  ;;  %v5069_v33 = vrot.slane %v4977_v44, 3  ;;  %v5354_v10 = vrot.slane %v5262_v9, 2 }
 0x8cf   : > { %6523 = vmatpush.xpose.msk.msrb.mxu3 %vm3968_vm11, %v5774_v58  ;;  %v4655_v53 = vsel %vm4017_vm6, %v14484_v19, %v13160_v62  ;;  %v4491_v34 = vpop.permute.xlu0 %4490  ;;  %v13186_v58 = vld.sshfl [vmem:[#allocation1 + $0x30] sm:$0xff pattern:$0x75316420] }
 0x8d0   : > { %6337 = vmatpush.xpose.msrb.mxu2 %v13044_v51  ;;  %v4748_v56 = vrot.slane %v4655_v53, 4  ;;  %v4654_v51 = vsel %vm4017_vm6, %v14485_v29, %v4491_v34  ;;  %v13175_v55 = vsel %vm4017_vm6, %v4939_v20, %v4491_v34  ;;  %v5263_v35 = vsel %vm4017_vm6, %v14486_v40, %v4491_v34  ;;  %v14490_v53 = vld [vmem:[#allocation64_spill] sm:$0xff] }
 0x8d1   : > { %v4746_v54 = vrot.slane %v4654_v51, 4  ;;  %v5070_v28 = vrot.slane %v13175_v55, 3  ;;  %v5355_v0 = vrot.slane %v5263_v35, 2  ;;  %v5867_v29 = vld [vmem:[#allocation2 + $0x388] sm:$0xff] }
 0x8d2   : > { %v14492_v40 = vld [vmem:[#allocation28_spill] sm:$0xff] }
 0x8d3   : > { %6524 = vmatpush.xpose.msk.msrb.mxu3 %vm3968_vm11, %v5767_v47  ;;  %v4747_v61 = vsel %vm858_vm4, %v4745_v36, %v4746_v54  ;;  %v4749_v25 = vsel %vm858_vm4, %v4746_v54, %v4748_v56  ;;  %v13183_v13 = vsel %vm14487_vm15, %v5069_v33, %v5070_v28  ;;  %v13189_v15 = vsel %vm636_vm2, %v5354_v10, %v5355_v0  ;;  %v5884_v10 = vld [vmem:[#allocation2 + $0x410] sm:$0xff] }
 0x8d4   : > { %6338 = vmatpush.xpose.msrb.mxu2 %v5580_v63  ;;  %6280 = vmatpush.xpose.msra.mxu1 %v4749_v25  ;;  %v13193_v63 = vsel %vm636_vm2, %v5355_v0, %v5357_v3  ;;  %v14489_v47 = vrot.slane %v14488_v11, 1  ;;  %v14493_v35 = vrot.slane %v14492_v40, 1  ;;  %v5906_v11 = vld [vmem:[#allocation2 + $0x4c0] sm:$0xff] }
 0x8d6   : > { %v4886_v7 = vpop.permute.xlu1 %4885 }
 0x8d7   : > { %6525 = vmatpush.xpose.msk.msrb.mxu3 %vm3968_vm11, %v5760_v52  ;;  %v4943_v60 = vsel %vm3242_vm10, %v4912_v37, %v4886_v7  ;;  %v5461_v26 = vpop.permute.xlu0 %5460 }
 0x8d8   : > { %6339 = vmatpush.xpose.msrb.mxu2 %v5912_v43  ;;  %v4982_v24 = vsel %vm4017_vm6, %v4943_v60, %v12931_v49  ;;  %v5487_v42 = vsel %vm4017_vm6, %v13026_v45, %v5461_v26  ;;  %6281 = vmatpush.xpose.msra.mxu1 %v4747_v61  ;;  %v14495_v61 = vld [vmem:[#allocation56_spill] sm:$0xff]  ;;  %v5948_v26 = vld [vmem:[#allocation2 + $0x610] sm:$0xff] }
 0x8d9   : > { %v5077_v20 = vrot.slane %v4982_v24, 3  ;;  %v5574_v44 = vrot.slane %v5487_v42, 1  ;;  %v14496_v25 = vrot.slane %v14495_v61, 3  ;;  %v5977_v24 = vld [vmem:[#allocation2 + $0x6f8] sm:$0xff]  ;;  %v5970_v42 = vld [vmem:[#allocation2 + $0x6c0] sm:$0xff] }
 0x8da   : > { %6526 = vmatmul.msk.f32.vlgmr.msrb.gmra.mxu3 %vm3968_vm11, %v13186_v58 }
 0x8db   : > { %6310 = vmatpush.xpose.msra.mxu3 %v12747_v16  ;;  %v5078_v22 = vsel %vm14325_vm0, %v5075_v8, %v5077_v20  ;;  %v5575_v36 = vsel %vm525_vm1, %v14489_v47, %v5574_v44  ;;  %v5963_v20 = vld [vmem:[#allocation2 + $0x688] sm:$0xff] }
 0x8dc   : > { %6282 = vmatpush.xpose.msra.mxu1 %v13092_v23  ;;  %6340 = vmatpush.xpose.msrb.mxu2 %v5575_v36  ;;  %v5927_v44 = vld [vmem:[#allocation2 + $0x568] sm:$0xff]  ;;  %v5928_v36 = vld [vmem:[#allocation2 + $0x570] sm:$0xff] }
 0x8dd   : > { %6300 = vmatpush.xpose.msra.mxu0 %v5078_v22  ;;  %v5942_v22 = vld [vmem:[#allocation2 + $0x5e0] sm:$0xff]  ;;  %v5935_v47 = vld [vmem:[#allocation2 + $0x5a8] sm:$0xff] }
 0x8de   : > { %v5210_v49 = vpop.permute.xlu1 %5209 }
 0x8df   : > { %6311 = vmatpush.xpose.msra.mxu3 %v12859_v48  ;;  %v5172_v45 = vpop.permute.xlu0 %5171 }
 0x8e0   : > { %v5236_v9 = vsel %vm3242_vm10, %v4912_v37, %v5172_v45  ;;  %6283 = vmatpush.xpose.msra.mxu1 %v5881_v32  ;;  %6341 = vmatpush.xpose.msrb.mxu2 %v5898_v2  ;;  %v14498_v37 = vld [vmem:[#allocation142_spill] sm:$0xff]  ;;  %v5878_v32 = vld [vmem:[#allocation2 + $0x3e0] sm:$0xff]  ;;  %v5900_v2 = vld [vmem:[#allocation2 + $0x490] sm:$0xff] }
 0x8e1   : > { %v5267_v8 = vsel %vm4017_vm6, %v5236_v9, %v5210_v49  ;;  %6301 = vmatpush.xpose.msra.mxu0 %v13142_v17  ;;  %v14499_v7 = vrot.slane %v14498_v37, 1  ;;  %v5921_v49 = vld [vmem:[#allocation2 + $0x538] sm:$0xff] }
 0x8e2   : > { %v5362_v41 = vrot.slane %v5267_v8, 2  ;;  %v5885_v45 = vld [vmem:[#allocation2 + $0x418] sm:$0xff] }
 0x8e3   : > { %6312 = vmatpush.xpose.msra.mxu3 %v12747_v16  ;;  %v5893_v8 = vld [vmem:[#allocation2 + $0x458] sm:$0xff] }
 0x8e4   : > { %v13221_v23 = vsel %vm636_vm2, %v5360_v31, %v5362_v41  ;;  %6284 = vmatpush.xpose.msra.mxu1 %v5874_v50  ;;  %vm14491_vm2 = vmmov %vm14325_vm0  ;;  %v5886_v41 = vld [vmem:[#allocation2 + $0x420] sm:$0xff]  ;;  %v5879_v50 = vld [vmem:[#allocation2 + $0x3e8] sm:$0xff] }
 0x8e6   : > { %v4884_v19 = vpop.permute.xlu1 %4883 }
 0x8e7   : > { %6313 = vmatpush.xpose.msra.mxu3 %v12859_v48  ;;  %v4940_v34 = vsel %vm3242_vm10, %v14490_v53, %v4884_v19  ;;  %v5459_v56 = vpop.permute.xlu0 %5458  ;;  %v6127_v19 = vpop.f32.mrf.mxu3 }
 0x8e8   : > { %v4979_v51 = vsel %vm4017_vm6, %v4940_v34, %v13160_v62  ;;  %v5486_v17 = vsel %vm4017_vm6, %v13113_v4, %v5459_v56  ;;  %6285 = vmatpush.xpose.msra.mxu1 %v5867_v29  ;;  %v5969_v62 = vld [vmem:[#allocation2 + $0x6b8] sm:$0xff] }
 0x8e9   : > { %v5072_v31 = vrot.slane %v4979_v51, 3  ;;  %v5569_v55 = vrot.slane %v5486_v17, 1  ;;  %v14494_v4 = vld [vmem:[#allocation70_spill] sm:$0xff]  ;;  %v5986_v17 = vpop.permute.xlu2 %5985 }
 0x8eb   : > { %6314 = vmatpush.xpose.msra.mxu3 %v12747_v16  ;;  %v5073_v16 = vsel %vm14491_vm2, %v5070_v28, %v5072_v31  ;;  %v5570_v33 = vsel %vm525_vm1, %v14493_v35, %v5569_v55  ;;  %6286 = vmatmul.f32.vlgmr.msra.gmra.mxu1 %v12679_v39  ;;  %v5962_v39 = vld [vmem:[#allocation2 + $0x680] sm:$0xff]  ;;  %v6128_v35 = vadd.f32 %v6127_v19, %v5986_v17 }
 0x8ec   : > { %6350 = vmatpush.xpose.msrb.mxu1 %v5976_v46  ;;  %6342 = vmatpush.xpose.msrb.mxu2 %v5570_v33 }
 0x8ed   : > { %6302 = vmatpush.xpose.msra.mxu0 %v5073_v16 }
 0x8ef   : > { %6315 = vmatpush.xpose.msra.mxu3 %v12859_v48  ;;  %v4882_v48 = vpop.permute.xlu1 %4881  ;;  %v5457_v0 = vpop.permute.xlu0 %5456 }
 0x8f0   : > { %6351 = vmatpush.xpose.msrb.mxu1 %v5969_v62  ;;  %v4937_v54 = vsel %vm3242_vm10, %v14494_v4, %v4882_v48  ;;  %v5485_v52 = vsel %vm4017_vm6, %v5236_v9, %v5457_v0  ;;  %6343 = vmatpush.xpose.msrb.mxu2 %v5884_v10  ;;  %v5907_v9 = vld [vmem:[#allocation2 + $0x4c8] sm:$0xff]  ;;  %v6147_v53 = vpop.f32.mrf.mxu3 }
 0x8f1   : > { %v4976_v28 = vsel %vm4017_vm6, %v4937_v54, %v13074_v21  ;;  %v5564_v3 = vrot.slane %v5485_v52, 1  ;;  %6303 = vmatpush.xpose.msra.mxu0 %v13183_v13  ;;  %v5955_v21 = vld [vmem:[#allocation2 + $0x648] sm:$0xff]  ;;  %v5868_v13 = vld [vmem:[#allocation2 + $0x390] sm:$0xff]  ;;  %v6148_v48 = vadd.f32 %v6147_v53, %v6128_v35 }
 0x8f3   : > { %6316 = vmatpush.xpose.msra.mxu3 %v12953_v27  ;;  %v5067_v27 = vrot.slane %v4976_v28, 3  ;;  %v5565_v60 = vsel %vm525_vm1, %v14499_v7, %v5564_v3 }
 0x8f4   : > { %6352 = vmatpush.xpose.msrb.mxu1 %v5962_v39  ;;  %6344 = vmatpush.xpose.msrb.mxu2 %v5565_v60 }
 0x8f5   : > { %v5068_v43 = vsel %vm14497_vm3, %v14496_v25, %v5067_v27 }
 0x8f6   : > { %6304 = vmatpush.xpose.msra.mxu0 %v5068_v43 }
 0x8f7   : > { %6317 = vmatpush.xpose.msra.mxu3 %v12853_v30  ;;  %v5870_v30 = vld [vmem:[#allocation2 + $0x3a0] sm:$0xff] }
 0x8f8   : > { %6353 = vmatpush.xpose.msrb.mxu1 %v5955_v21  ;;  %6345 = vmatpush.xpose.msrb.mxu2 %v5870_v30 }
 0x8fa   : > { %6305 = vmatpush.xpose.msra.mxu0 %v5868_v13 }
 0x8fb   : > { %6318 = vmatpush.xpose.msra.mxu3 %v13036_v1  ;;  %6346 = vmatmul.f32.vlgmr.msrb.gmra.mxu2 %v12938_v14  ;;  %v5941_v1 = vld [vmem:[#allocation2 + $0x5d8] sm:$0xff]  ;;  %v5956_v14 = vld [vmem:[#allocation2 + $0x650] sm:$0xff] }
 0x8fc   : > { %6354 = vmatpush.xpose.msrb.mxu1 %v5948_v26 }
 0x8fd   : > { %6306 = vmatmul.f32.vlgmr.msra.gmra.mxu0 %v12927_v18  ;;  %v5920_v18 = vld [vmem:[#allocation2 + $0x530] sm:$0xff] }
 0x8fe   : > { %6527 = vmatpush.xpose.msk.msrb.mxu0 %vm3968_vm11, %v5977_v24 }
 0x8ff   : > { %6319 = vmatpush.xpose.msra.mxu3 %v12878_v38  ;;  %v5934_v38 = vld [vmem:[#allocation2 + $0x5a0] sm:$0xff] }
 0x900   : > { %6355 = vmatpush.xpose.msrb.mxu1 %v5941_v1 }
 0x902   : > { %6528 = vmatpush.xpose.msk.msrb.mxu0 %vm3968_vm11, %v5970_v42 }
 0x903   : > { %6320 = vmatpush.xpose.msra.mxu3 %v13136_v5  ;;  %v5949_v5 = vld [vmem:[#allocation2 + $0x618] sm:$0xff] }
 0x904   : > { %6356 = vmatpush.xpose.msrb.mxu1 %v5934_v38 }
 0x906   : > { %6529 = vmatpush.xpose.msk.msrb.mxu0 %vm3968_vm11, %v5963_v20 }
 0x907   : > { %6321 = vmatpush.xpose.msra.mxu3 %v12984_v12  ;;  %v5913_v12 = vld [vmem:[#allocation2 + $0x4f8] sm:$0xff] }
 0x908   : > { %6357 = vmatpush.xpose.msrb.mxu1 %v5927_v44 }
 0x90a   : > { %6530 = vmatpush.xpose.msk.msrb.mxu0 %vm3968_vm11, %v5956_v14 }
 0x90b   : > { %6322 = vmatpush.xpose.msra.mxu3 %v13221_v23  ;;  %v5872_v23 = vld [vmem:[#allocation2 + $0x3b0] sm:$0xff] }
 0x90c   : > { %6358 = vmatpush.xpose.msrb.mxu1 %v5920_v18 }
 0x90e   : > { %6531 = vmatpush.xpose.msk.msrb.mxu0 %vm3968_vm11, %v5949_v5 }
 0x90f   : > { %6323 = vmatpush.xpose.msra.mxu3 %v13153_v57  ;;  %v5899_v57 = vld [vmem:[#allocation2 + $0x488] sm:$0xff] }
 0x910   : > { %6359 = vmatpush.xpose.msrb.mxu1 %v5913_v12 }
 0x912   : > { %6532 = vmatpush.xpose.msk.msrb.mxu0 %vm3968_vm11, %v5942_v22 }
 0x913   : > { %6324 = vmatpush.xpose.msra.mxu3 %v13193_v63  ;;  %v5892_v63 = vld [vmem:[#allocation2 + $0x450] sm:$0xff] }
 0x914   : > { %6360 = vmatpush.xpose.msrb.mxu1 %v5906_v11  ;;  %v6227_v29 = vpop.f32.mrf.mxu0 }
 0x915   : > { %v6187_v34 = vpop.f32.mrf.mxu2 }
 0x916   : > { %6533 = vmatpush.xpose.msk.msrb.mxu0 %vm3968_vm11, %v5935_v47 }
 0x917   : > { %6325 = vmatpush.xpose.msra.mxu3 %v13189_v15  ;;  %v5914_v15 = vld [vmem:[#allocation2 + $0x500] sm:$0xff] }
 0x918   : > { %6361 = vmatpush.xpose.msrb.mxu1 %v5899_v57 }
 0x91a   : > { %6326 = vmatmul.f32.vlgmr.msra.gmra.mxu3 %v12929_v6  ;;  %6534 = vmatpush.xpose.msk.msrb.mxu0 %vm3968_vm11, %v5928_v36  ;;  %v5871_v6 = vld [vmem:[#allocation2 + $0x3a8] sm:$0xff] }
 0x91c   : > { %6362 = vmatpush.xpose.msrb.mxu1 %v5892_v63 }
 0x91d   : > { %v6167_v56 = vpop.f32.mrf.mxu3 }
 0x91e   : > { %6535 = vmatpush.xpose.msk.msrb.mxu0 %vm3968_vm11, %v5921_v49  ;;  %v6168_v4 = vadd.f32 %v6167_v56, %v6148_v48 }
 0x920   : > { %6363 = vmatpush.xpose.msrb.mxu1 %v5885_v45  ;;  %v6188_v0 = vadd.f32 %v6187_v34, %v6168_v4 }
 0x922   : > { %6536 = vmatpush.xpose.msk.msrb.mxu0 %vm3968_vm11, %v5914_v15 }
 0x924   : > { %6364 = vmatpush.xpose.msrb.mxu1 %v5878_v32 }
 0x926   : > { %6537 = vmatpush.xpose.msk.msrb.mxu0 %vm3968_vm11, %v5907_v9 }
 0x928   : > { %6365 = vmatpush.xpose.msrb.mxu1 %v5871_v6 }
 0x92a   : > { %6538 = vmatpush.xpose.msk.msrb.mxu0 %vm3968_vm11, %v5900_v2 }
 0x92b   : > { %6366 = vmatmul.f32.vlgmr.msrb.gmra.mxu1 %v12940_v59  ;;  %v6207_v59 = vpop.f32.mrf.mxu1 }
 0x92c   : > { %v6208_v52 = vadd.f32 %v6207_v59, %v6188_v0 }
 0x92e   : > { %6539 = vmatpush.xpose.msk.msrb.mxu0 %vm3968_vm11, %v5893_v8  ;;  %v6228_v3 = vadd.f32 %v6227_v29, %v6208_v52 }
 0x932   : > { %6540 = vmatpush.xpose.msk.msrb.mxu0 %vm3968_vm11, %v5886_v41 }
 0x936   : > { %6541 = vmatpush.xpose.msk.msrb.mxu0 %vm3968_vm11, %v5879_v50  ;;  %v6267_v51 = vpop.f32.mrf.mxu2 }
 0x937   : > { %v6268_v46 = vadd.f32 %v6267_v51, %v5986_v17 }
 0x93a   : > { %6542 = vmatpush.xpose.msk.msrb.mxu0 %vm3968_vm11, %v5872_v23 }
 0x93d   : > { %6543 = vmatmul.msk.f32.vlgmr.msrb.gmra.mxu0 %vm3968_vm11, %v13186_v58 }
 0x95d   : > { %v6247_v31 = vpop.f32.mrf.mxu3 }
 0x95e   : > { %v6248_v25 = vadd.f32 %v6247_v31, %v6228_v3 }
 0x968   : > { %v6287_v55 = vpop.f32.mrf.mxu1 }
 0x969   : > { %v6288_v16 = vadd.f32 %v6287_v55, %v6268_v46 }
 0x97a   : > { %v6307_v40 = vpop.f32.mrf.mxu0 }
 0x97b   : > { %v6308_v33 = vadd.f32 %v6307_v40, %v6288_v16 }
 0x97e   : > { %v6347_v54 = vpop.f32.mrf.mxu2 }
 0x99d   : > { %v6327_v62 = vpop.f32.mrf.mxu3 }
 0x99e   : > { %v6328_v58 = vadd.f32 %v6327_v62, %v6308_v33 }
 0x9a0   : > { %v6348_v10 = vadd.f32 %v6347_v54, %v6328_v58 }
 0x9a8   : > { %v6367_v28 = vpop.f32.mrf.mxu1 }
 0x9a9   : > { %v6368_v39 = vadd.f32 %v6367_v28, %v6348_v10 }
 0x9ba   : > { %v6387_v27 = vpop.f32.mrf.mxu0 }
 0x9bb   : > { %v6388_v61 = vadd.f32 %v6387_v27, %v6368_v39 }
 0x9bd   : > { %v6392_v43 = vrot.slane %v6388_v61, 4 }
 0x9bf   : > { %v6393_v37 = vsel %vm858_vm4, %v6248_v25, %v6392_v43 }
 0x9c0   : > { %6395 = vst [vmem:[%s278_s18] sm:$0x77] %v6393_v37 }
 0x9c1 PF: > { %s17_s24 = sadd.s32 1, %s6842_s24  }
 0x9c2   : > { %p14_p5 = scmp.ge.s32.totalorder %s17_s24, 4  }
 0x9c4   :  { %16 = sbr.rel (!%p14_p5) target bundleno = 1 (0x1), region = 81 }

</bundles_post_ra>
